<compile_context>
chip_gen: v6e
topology: v6e:2x2x1
jax: 0.10.0
libtpu: 0.0.40
codegen_flags: <defaults>
</compile_context>

<pallas_src>
import functools

import jax
import jax.numpy as jnp
from jax.experimental import pallas as pl
from jax.experimental.pallas import tpu as pltpu

BN_EPS = 1e-5


def _round_up(n, m):
    return (n + m - 1) // m * m


def _vmem_limit_bytes():
    """Generation-aware scoped-VMEM limit (leave headroom for compiler scratch)."""
    cap = 64 * 1024 * 1024                      # conservative fallback (v7x-sized)
    try:
        info = pltpu.get_tpu_info()
        cap = int(getattr(info, "vmem_capacity_bytes", cap) or cap)
    except Exception:
        pass
    return min(cap * 3 // 4, 112 * 1024 * 1024)  # 48 MiB on v7x, 96 MiB on v5e/v6e


def _choose_tile_h(n, h, w, cin, cout, *, target_rows, budget):
    """Largest divisor of H whose per-step footprint fits `budget` and whose
    output-row count is <= target_rows; keep >= 2 grid steps for v7x megacore."""
    def footprint(th):
        bf, f32 = 2, 4
        return (2 * th * w * cin * bf            # double-buffered input block
                + 2 * th * w * cout * bf         # double-buffered y output block
                + (th + 2) * (w + 2) * cin * bf  # haloed window scratch
                + th * w * cout * f32            # f32 accumulator
                + 2 * th * w * cin * bf          # tap relayout temporaries
                + 2 * 9 * cin * cout * bf)       # weights
    divs = sorted(d for d in range(1, h + 1) if h % d == 0)
    fit = [d for d in divs if footprint(d) <= budget]
    if not fit:
        return 1
    cand = [d for d in fit if d * w <= target_rows] or [fit[0]]
    th = max(cand)
    if n * (h // th) < 2:                        # keep >= 2 grid steps (v7x: 2 TCs)
        smaller = [d for d in cand if d < th]
        if smaller:
            th = max(smaller)
    return th


def _halo_rows(x, tile_h):
    """Tiny auxiliary arrays with the 1-row top/bottom halo of every row tile.
    Boundary tiles get zero rows (the conv's zero padding in H)."""
    n, h, w, c = x.shape
    nrt = h // tile_h
    zero = jnp.zeros((n, 1, w, c), x.dtype)
    if nrt == 1:
        return zero, zero
    top_rows = x[:, tile_h - 1::tile_h][:, :nrt - 1]   # row i*tile_h-1, i=1..nrt-1
    bot_rows = x[:, tile_h::tile_h]                    # row (i+1)*tile_h, i=0..nrt-2
    top = jnp.concatenate([zero, top_rows], axis=1)
    bot = jnp.concatenate([bot_rows, zero], axis=1)
    return top, bot


# ---------------------------------------------------------------------------
# Pass A: (optional input BN-affine + ReLU) -> 3x3 conv -> per-tile channel sums
# ---------------------------------------------------------------------------
def _make_conv_kernel(tile_h, width, cin, cout, apply_affine):
    def kernel(x_ref, top_ref, bot_ref, w_ref, scale_ref, shift_ref,
               y_ref, sum_ref, ssq_ref, xwin_ref):
        i = pl.program_id(1)
        n_row_tiles = pl.num_programs(1)

        def in_act(v, valid):
            # Previous layer's BN affine + ReLU applied on the fly to the loaded
            # pre-BN activation.  `valid` zeroes rows that are conv padding (the
            # padding must be zero AFTER the affine+ReLU, not before).
            if not apply_affine:
                return v
            a = jnp.maximum(v.astype(jnp.float32) * scale_ref[...]
                            + shift_ref[...], 0.0)
            return (a * valid).astype(v.dtype)

        # ---- assemble the zero-padded, haloed input window in VMEM ----------
        zcol = jnp.zeros((tile_h + 2, 1, cin), jnp.bfloat16)
        xwin_ref[:, 0:1, :] = zcol                        # left W-pad column
        xwin_ref[:, width + 1:width + 2, :] = zcol        # right W-pad column
        xwin_ref[1:tile_h + 1, 1:width + 1, :] = in_act(x_ref[0], jnp.float32(1.0))
        xwin_ref[0:1, 1:width + 1, :] = in_act(
            top_ref[0], (i > 0).astype(jnp.float32))
        xwin_ref[tile_h + 1:tile_h + 2, 1:width + 1, :] = in_act(
            bot_ref[0], (i < n_row_tiles - 1).astype(jnp.float32))

        # ---- 3x3 conv as 9 accumulating MXU dots (K = Cin) -------------------
        rows = tile_h * width
        acc = jnp.zeros((rows, cout), jnp.float32)
        for dy in range(3):
            for dx in range(3):
                tap = xwin_ref[dy:dy + tile_h, dx:dx + width, :]
                acc = acc + jnp.dot(tap.reshape(rows, cin),
                                    w_ref[dy * 3 + dx],
                                    preferred_element_type=jnp.float32)
        # NOTE: conv bias intentionally omitted -- training-mode BatchNorm
        # subtracts the batch mean, which removes any per-channel constant.
        y_ref[0] = acc.reshape(tile_h, width, cout).astype(y_ref.dtype)
        sum_ref[0] = jnp.sum(acc, axis=0, keepdims=True)
        ssq_ref[0] = jnp.sum(acc * acc, axis=0, keepdims=True)

    return kernel


def _conv_layer(x, w, in_scale, in_shift, *, tile_h, apply_affine, vmem_limit):
    """3x3 'same' conv over a = relu(x*in_scale+in_shift) (or raw x).
    x: (N,H,W,Cin) bf16.  w: (3,3,Cin,Cout) f32.
    Returns pre-BN conv output y (N,H,W,Cout) bf16 + per-tile channel sum/ssq."""
    n, h, wd, cin = x.shape
    cout = w.shape[-1]
    nrt = h // tile_h

    top, bot = _halo_rows(x, tile_h)
    w3 = w.reshape(9, cin, cout).astype(jnp.bfloat16)
    scale = in_scale.reshape(1, cin).astype(jnp.float32)
    shift = in_shift.reshape(1, cin).astype(jnp.float32)

    kernel = _make_conv_kernel(tile_h, wd, cin, cout, apply_affine)
    flops = 2 * n * h * wd * 9 * cin * cout
    bytes_accessed = ((x.size + top.size + bot.size + w3.size) * 2
                      + n * h * wd * cout * 2 + 2 * n * nrt * cout * 4)

    y, psum, pssq = pl.pallas_call(
        kernel,
        grid=(n, nrt),
        in_specs=[
            pl.BlockSpec((1, tile_h, wd, cin), lambda b, i: (b, i, 0, 0)),
            pl.BlockSpec((1, 1, wd, cin), lambda b, i: (b, i, 0, 0)),
            pl.BlockSpec((1, 1, wd, cin), lambda b, i: (b, i, 0, 0)),
            pl.BlockSpec((9, cin, cout), lambda b, i: (0, 0, 0)),
            pl.BlockSpec((1, cin), lambda b, i: (0, 0)),
            pl.BlockSpec((1, cin), lambda b, i: (0, 0)),
        ],
        out_specs=[
            pl.BlockSpec((1, tile_h, wd, cout), lambda b, i: (b, i, 0, 0)),
            pl.BlockSpec((1, 1, cout), lambda b, i: (b * nrt + i, 0, 0)),
            pl.BlockSpec((1, 1, cout), lambda b, i: (b * nrt + i, 0, 0)),
        ],
        out_shape=[
            jax.ShapeDtypeStruct((n, h, wd, cout), jnp.bfloat16),
            jax.ShapeDtypeStruct((n * nrt, 1, cout), jnp.float32),
            jax.ShapeDtypeStruct((n * nrt, 1, cout), jnp.float32),
        ],
        scratch_shapes=[pltpu.VMEM((tile_h + 2, wd + 2, cin), jnp.bfloat16)],
        compiler_params=pltpu.CompilerParams(
            dimension_semantics=("parallel", "parallel"),
            vmem_limit_bytes=vmem_limit),
        cost_estimate=pl.CostEstimate(flops=flops, transcendentals=0,
                                      bytes_accessed=bytes_accessed),
    )(x, top, bot, w3, scale, shift)
    return y, psum, pssq


def _bn_scale_shift(psum, pssq, count, gamma, beta):
    mean = jnp.sum(psum, axis=0)[0] / count
    var = jnp.maximum(jnp.sum(pssq, axis=0)[0] / count - mean * mean, 0.0)
    scale = gamma.astype(jnp.float32) * jax.lax.rsqrt(var + BN_EPS)
    shift = beta.astype(jnp.float32) - mean * scale
    return scale, shift


# ---------------------------------------------------------------------------
# Pass B (final layer only): BatchNorm affine + ReLU
# ---------------------------------------------------------------------------
def _bn_relu_kernel(y_ref, scale_ref, shift_ref, o_ref):
    o_ref[...] = jnp.maximum(
        y_ref[...].astype(jnp.float32) * scale_ref[...] + shift_ref[...], 0.0)


def _bn_relu_pass(y, scale, shift, *, tile_h, vmem_limit):
    n, h, wd, cout = y.shape
    nrt = h // tile_h
    return pl.pallas_call(
        _bn_relu_kernel,
        grid=(n, nrt),
        in_specs=[
            pl.BlockSpec((1, tile_h, wd, cout), lambda b, i: (b, i, 0, 0)),
            pl.BlockSpec((1, cout), lambda b, i: (0, 0)),
            pl.BlockSpec((1, cout), lambda b, i: (0, 0)),
        ],
        out_specs=pl.BlockSpec((1, tile_h, wd, cout), lambda b, i: (b, i, 0, 0)),
        out_shape=jax.ShapeDtypeStruct((n, h, wd, cout), jnp.float32),
        compiler_params=pltpu.CompilerParams(
            dimension_semantics=("parallel", "parallel"),
            vmem_limit_bytes=vmem_limit),
    )(y, scale.reshape(1, cout), shift.reshape(1, cout))


# ---------------------------------------------------------------------------
# Public forward:  (conv 3x3 -> BN -> ReLU) * 2,  NCHW in / NCHW out
# ---------------------------------------------------------------------------
@functools.partial(jax.jit, static_argnames=("tile_rows",))
def double_conv_forward(x_nchw, params, tile_rows=4096):
    n, cin, h, wd = x_nchw.shape
    cout = params["w1"].shape[-1]
    vmem_limit = _vmem_limit_bytes()
    budget = int(vmem_limit * 0.6)

    # NCHW -> NHWC, pad layer-1 Cin to a multiple of 8 (zeros are inert), bf16.
    cin_pad = _round_up(cin, 8)
    x = jnp.transpose(x_nchw, (0, 2, 3, 1)).astype(jnp.float32)
    x = jnp.pad(x, ((0, 0), (0, 0), (0, 0), (0, cin_pad - cin))).astype(jnp.bfloat16)
    w1 = jnp.pad(params["w1"].astype(jnp.float32),
                 ((0, 0), (0, 0), (0, cin_pad - cin), (0, 0)))

    # ---- layer 1: conv only (its BN+ReLU is fused into layer 2's Pass A) ----
    th1 = _choose_tile_h(n, h, wd, cin_pad, cout, target_rows=tile_rows, budget=budget)
    dummy = jnp.zeros((cin_pad,), jnp.float32)
    y1, s1, q1 = _conv_layer(x, w1, dummy, dummy, tile_h=th1,
                             apply_affine=False, vmem_limit=vmem_limit)
    scale1, shift1 = _bn_scale_shift(s1, q1, float(n * h * wd),
                                     params["g1"], params["beta1"])

    # ---- layer 2: BN1+ReLU applied on the fly, then conv ---------------------
    th2 = _choose_tile_h(n, h, wd, cout, cout, target_rows=tile_rows, budget=budget)
    y2, s2, q2 = _conv_layer(y1, params["w2"].astype(jnp.float32), scale1, shift1,
                             tile_h=th2, apply_affine=True, vmem_limit=vmem_limit)
    scale2, shift2 = _bn_scale_shift(s2, q2, float(n * h * wd),
                                     params["g2"], params["beta2"])

    out = _bn_relu_pass(y2, scale2, shift2, tile_h=th2, vmem_limit=vmem_limit)
    return jnp.transpose(out, (0, 3, 1, 2))           # NHWC -> NCHW


# ---------------------------------------------------------------------------
# Pure-JAX f32 reference (for correctness check)
# ---------------------------------------------------------------------------
def _ref_conv_bn_relu(x_nhwc, w, b, gamma, beta):
    y = jax.lax.conv_general_dilated(
        x_nhwc, w, window_strides=(1, 1), padding="SAME",
        dimension_numbers=("NHWC", "HWIO", "NHWC"),
    ) + b
    mean = jnp.mean(y, axis=(0, 1, 2))
    var = jnp.mean(jnp.square(y - mean), axis=(0, 1, 2))
    y = (y - mean) * jax.lax.rsqrt(var + BN_EPS) * gamma + beta
    return jnp.maximum(y, 0.0)


def _ref_double_conv(x_nchw, params):
    x = jnp.transpose(x_nchw, (0, 2, 3, 1))
    y = _ref_conv_bn_relu(x, params["w1"], params["b1"], params["g1"], params["beta1"])
    y = _ref_conv_bn_relu(y, params["w2"], params["b2"], params["g2"], params["beta2"])
    return jnp.transpose(y, (0, 3, 1, 2))


def init_params(key, in_ch, out_ch):
    k1, k2, k3, k4 = jax.random.split(key, 4)
    bound1 = 1.0 / (in_ch * 9) ** 0.5
    bound2 = 1.0 / (out_ch * 9) ** 0.5
    return {
        "w1": jax.random.uniform(k1, (3, 3, in_ch, out_ch), jnp.float32, -bound1, bound1),
        "b1": jax.random.uniform(k3, (out_ch,), jnp.float32, -bound1, bound1),
        "g1": jnp.ones((out_ch,), jnp.float32),      # BN gamma default = 1
        "beta1": jnp.zeros((out_ch,), jnp.float32),  # BN beta default = 0
        "w2": jax.random.uniform(k2, (3, 3, out_ch, out_ch), jnp.float32, -bound2, bound2),
        "b2": jax.random.uniform(k4, (out_ch,), jnp.float32, -bound2, bound2),
        "g2": jnp.ones((out_ch,), jnp.float32),
        "beta2": jnp.zeros((out_ch,), jnp.float32),
    }


if __name__ == "__main__":
    key = jax.random.PRNGKey(0)
    kx, kp = jax.random.split(key)

    N, in_ch, out_ch, H, W = 2, 4, 8, 16, 16
    x = jax.random.normal(kx, (N, in_ch, H, W), jnp.float32)   # NCHW like PyTorch
    params = init_params(kp, in_ch, out_ch)

    ref = _ref_double_conv(x, params)

    # default tiling (single row tile per image) + forced multi-tile (halo path)
    for tr in (4096, 64):
        out = jax.block_until_ready(double_conv_forward(x, params, tile_rows=tr))
        assert out.shape == (N, out_ch, H, W), out.shape
        err = float(jnp.abs(out - ref).max())
        # bf16 MXU inputs + bf16 intermediate storage -> wider tolerance than f32.
        assert jnp.allclose(out, ref, atol=1e-1, rtol=1e-1), (tr, err)

    print("KERNEL_OK")
</pallas_src>

<mosaic_0001>
module attributes {stable_mosaic.version = 11 : i64} {
  func.func @kernel(%arg0: i32, %arg1: i32, %arg2: memref<1x16x16x8xbf16, #tpu.memory_space<vmem>>, %arg3: memref<1x1x16x8xbf16, #tpu.memory_space<vmem>>, %arg4: memref<1x1x16x8xbf16, #tpu.memory_space<vmem>>, %arg5: memref<9x8x8xbf16, #tpu.memory_space<vmem>>, %arg6: memref<1x8xf32, #tpu.memory_space<vmem>>, %arg7: memref<1x8xf32, #tpu.memory_space<vmem>>, %arg8: memref<1x16x16x8xbf16, #tpu.memory_space<vmem>>, %arg9: memref<1x1x8xf32, #tpu.memory_space<vmem>>, %arg10: memref<1x1x8xf32, #tpu.memory_space<vmem>>, %arg11: memref<18x18x8xbf16, #tpu.memory_space<vmem>>) attributes {dimension_semantics = [#tpu.dimension_semantics<parallel>, #tpu.dimension_semantics<parallel>], iteration_bounds = array<i64: 2, 1>, scalar_prefetch = 0 : i64, scratch_operands = 1 : i64, tpu.core_type = #tpu.core_type<tc>, window_params = [{transform_indices = @transform_0, window_bounds = array<i64: 1, 16, 16, 8>}, {transform_indices = @transform_1, window_bounds = array<i64: 1, 1, 16, 8>}, {transform_indices = @transform_2, window_bounds = array<i64: 1, 1, 16, 8>}, {pipeline_mode = #tpu.pipeline_mode<synchronous>, transform_indices = @transform_3, window_bounds = array<i64: 9, 8, 8>}, {pipeline_mode = #tpu.pipeline_mode<synchronous>, transform_indices = @transform_4, window_bounds = array<i64: 1, 8>}, {pipeline_mode = #tpu.pipeline_mode<synchronous>, transform_indices = @transform_5, window_bounds = array<i64: 1, 8>}, {transform_indices = @transform_6, window_bounds = array<i64: 1, 16, 16, 8>}, {transform_indices = @transform_7, window_bounds = array<i64: 1, 1, 8>}, {transform_indices = @transform_8, window_bounds = array<i64: 1, 1, 8>}]} {
    %cst = arith.constant 0.000000e+00 : bf16
    %0 = vector.broadcast %cst : bf16 to vector<18x1x8xbf16>
    %c0 = arith.constant 0 : index
    %c0_0 = arith.constant 0 : index
    %c0_1 = arith.constant 0 : index
    %1 = vector.load %arg11[%c0, %c0_0, %c0_1] : memref<18x18x8xbf16, #tpu.memory_space<vmem>>, vector<18x1x8xbf16>
    tpu.vector_store %arg11[%c0, %c0_0, %c0_1], %0 {strides = array<i32>} : memref<18x18x8xbf16, #tpu.memory_space<vmem>>, vector<18x1x8xbf16>,
    %c0_2 = arith.constant 0 : index
    %c17 = arith.constant 17 : index
    %c0_3 = arith.constant 0 : index
    %2 = vector.load %arg11[%c0_2, %c17, %c0_3] : memref<18x18x8xbf16, #tpu.memory_space<vmem>>, vector<18x1x8xbf16>
    tpu.vector_store %arg11[%c0_2, %c17, %c0_3], %0 {strides = array<i32>} : memref<18x18x8xbf16, #tpu.memory_space<vmem>>, vector<18x1x8xbf16>,
    %c0_4 = arith.constant 0 : index
    %c0_5 = arith.constant 0 : index
    %c0_6 = arith.constant 0 : index
    %c0_7 = arith.constant 0 : index
    %3 = vector.load %arg2[%c0_4, %c0_5, %c0_6, %c0_7] : memref<1x16x16x8xbf16, #tpu.memory_space<vmem>>, vector<1x16x16x8xbf16>
    %4 = vector.shape_cast %3 : vector<1x16x16x8xbf16> to vector<16x16x8xbf16>
    %c1 = arith.constant 1 : index
    %c1_8 = arith.constant 1 : index
    %c0_9 = arith.constant 0 : index
    %5 = vector.load %arg11[%c1, %c1_8, %c0_9] : memref<18x18x8xbf16, #tpu.memory_space<vmem>>, vector<16x16x8xbf16>
    tpu.vector_store %arg11[%c1, %c1_8, %c0_9], %4 {strides = array<i32>} : memref<18x18x8xbf16, #tpu.memory_space<vmem>>, vector<16x16x8xbf16>,
    %c0_10 = arith.constant 0 : index
    %c0_11 = arith.constant 0 : index
    %c0_12 = arith.constant 0 : index
    %c0_13 = arith.constant 0 : index
    %6 = vector.load %arg3[%c0_10, %c0_11, %c0_12, %c0_13] : memref<1x1x16x8xbf16, #tpu.memory_space<vmem>>, vector<1x1x16x8xbf16>
    %7 = vector.shape_cast %6 : vector<1x1x16x8xbf16> to vector<1x16x8xbf16>
    %c0_14 = arith.constant 0 : index
    %c1_15 = arith.constant 1 : index
    %c0_16 = arith.constant 0 : index
    %8 = vector.load %arg11[%c0_14, %c1_15, %c0_16] : memref<18x18x8xbf16, #tpu.memory_space<vmem>>, vector<1x16x8xbf16>
    tpu.vector_store %arg11[%c0_14, %c1_15, %c0_16], %7 {strides = array<i32>} : memref<18x18x8xbf16, #tpu.memory_space<vmem>>, vector<1x16x8xbf16>,
    %c0_17 = arith.constant 0 : index
    %c0_18 = arith.constant 0 : index
    %c0_19 = arith.constant 0 : index
    %c0_20 = arith.constant 0 : index
    %9 = vector.load %arg4[%c0_17, %c0_18, %c0_19, %c0_20] : memref<1x1x16x8xbf16, #tpu.memory_space<vmem>>, vector<1x1x16x8xbf16>
    %10 = vector.shape_cast %9 : vector<1x1x16x8xbf16> to vector<1x16x8xbf16>
    %c17_21 = arith.constant 17 : index
    %c1_22 = arith.constant 1 : index
    %c0_23 = arith.constant 0 : index
    %11 = vector.load %arg11[%c17_21, %c1_22, %c0_23] : memref<18x18x8xbf16, #tpu.memory_space<vmem>>, vector<1x16x8xbf16>
    tpu.vector_store %arg11[%c17_21, %c1_22, %c0_23], %10 {strides = array<i32>} : memref<18x18x8xbf16, #tpu.memory_space<vmem>>, vector<1x16x8xbf16>,
    %cst_24 = arith.constant 0.000000e+00 : f32
    %12 = vector.broadcast %cst_24 : f32 to vector<256x8xf32>
    %c0_25 = arith.constant 0 : index
    %c0_26 = arith.constant 0 : index
    %c0_27 = arith.constant 0 : index
    %13 = vector.load %arg11[%c0_25, %c0_26, %c0_27] : memref<18x18x8xbf16, #tpu.memory_space<vmem>>, vector<16x16x8xbf16>
    %14 = vector.shape_cast %13 : vector<16x16x8xbf16> to vector<256x8xbf16>
    %c0_28 = arith.constant 0 : index
    %c0_29 = arith.constant 0 : index
    %c0_30 = arith.constant 0 : index
    %15 = vector.load %arg5[%c0_28, %c0_29, %c0_30] : memref<9x8x8xbf16, #tpu.memory_space<vmem>>, vector<1x8x8xbf16>
    %16 = vector.shape_cast %15 : vector<1x8x8xbf16> to vector<8x8xbf16>
    %cst_31 = arith.constant dense<0.000000e+00> : vector<256x8xf32>
    %17 = tpu.matmul %14, %16, %cst_31 {dimension_numbers = #tpu.dot_dimension_numbers<[1], [0], [0], [1], [0, 0, 1, 1], [], []>} : vector<256x8xbf16>, vector<8x8xbf16>, vector<256x8xf32> -> vector<256x8xf32>
    %18 = arith.addf %12, %17 : vector<256x8xf32>
    %c0_32 = arith.constant 0 : index
    %c1_33 = arith.constant 1 : index
    %c0_34 = arith.constant 0 : index
    %19 = vector.load %arg11[%c0_32, %c1_33, %c0_34] : memref<18x18x8xbf16, #tpu.memory_space<vmem>>, vector<16x16x8xbf16>
    %20 = vector.shape_cast %19 : vector<16x16x8xbf16> to vector<256x8xbf16>
    %c1_35 = arith.constant 1 : index
    %c0_36 = arith.constant 0 : index
    %c0_37 = arith.constant 0 : index
    %21 = vector.load %arg5[%c1_35, %c0_36, %c0_37] : memref<9x8x8xbf16, #tpu.memory_space<vmem>>, vector<1x8x8xbf16>
    %22 = vector.shape_cast %21 : vector<1x8x8xbf16> to vector<8x8xbf16>
    %cst_38 = arith.constant dense<0.000000e+00> : vector<256x8xf32>
    %23 = tpu.matmul %20, %22, %cst_38 {dimension_numbers = #tpu.dot_dimension_numbers<[1], [0], [0], [1], [0, 0, 1, 1], [], []>} : vector<256x8xbf16>, vector<8x8xbf16>, vector<256x8xf32> -> vector<256x8xf32>
    %24 = arith.addf %18, %23 : vector<256x8xf32>
    %c0_39 = arith.constant 0 : index
    %c2 = arith.constant 2 : index
    %c0_40 = arith.constant 0 : index
    %25 = vector.load %arg11[%c0_39, %c2, %c0_40] : memref<18x18x8xbf16, #tpu.memory_space<vmem>>, vector<16x16x8xbf16>
    %26 = vector.shape_cast %25 : vector<16x16x8xbf16> to vector<256x8xbf16>
    %c2_41 = arith.constant 2 : index
    %c0_42 = arith.constant 0 : index
    %c0_43 = arith.constant 0 : index
    %27 = vector.load %arg5[%c2_41, %c0_42, %c0_43] : memref<9x8x8xbf16, #tpu.memory_space<vmem>>, vector<1x8x8xbf16>
    %28 = vector.shape_cast %27 : vector<1x8x8xbf16> to vector<8x8xbf16>
    %cst_44 = arith.constant dense<0.000000e+00> : vector<256x8xf32>
    %29 = tpu.matmul %26, %28, %cst_44 {dimension_numbers = #tpu.dot_dimension_numbers<[1], [0], [0], [1], [0, 0, 1, 1], [], []>} : vector<256x8xbf16>, vector<8x8xbf16>, vector<256x8xf32> -> vector<256x8xf32>
    %30 = arith.addf %24, %29 : vector<256x8xf32>
    %c1_45 = arith.constant 1 : index
    %c0_46 = arith.constant 0 : index
    %c0_47 = arith.constant 0 : index
    %31 = vector.load %arg11[%c1_45, %c0_46, %c0_47] : memref<18x18x8xbf16, #tpu.memory_space<vmem>>, vector<16x16x8xbf16>
    %32 = vector.shape_cast %31 : vector<16x16x8xbf16> to vector<256x8xbf16>
    %c3 = arith.constant 3 : index
    %c0_48 = arith.constant 0 : index
    %c0_49 = arith.constant 0 : index
    %33 = vector.load %arg5[%c3, %c0_48, %c0_49] : memref<9x8x8xbf16, #tpu.memory_space<vmem>>, vector<1x8x8xbf16>
    %34 = vector.shape_cast %33 : vector<1x8x8xbf16> to vector<8x8xbf16>
    %cst_50 = arith.constant dense<0.000000e+00> : vector<256x8xf32>
    %35 = tpu.matmul %32, %34, %cst_50 {dimension_numbers = #tpu.dot_dimension_numbers<[1], [0], [0], [1], [0, 0, 1, 1], [], []>} : vector<256x8xbf16>, vector<8x8xbf16>, vector<256x8xf32> -> vector<256x8xf32>
    %36 = arith.addf %30, %35 : vector<256x8xf32>
    %c1_51 = arith.constant 1 : index
    %c1_52 = arith.constant 1 : index
    %c0_53 = arith.constant 0 : index
    %37 = vector.load %arg11[%c1_51, %c1_52, %c0_53] : memref<18x18x8xbf16, #tpu.memory_space<vmem>>, vector<16x16x8xbf16>
    %38 = vector.shape_cast %37 : vector<16x16x8xbf16> to vector<256x8xbf16>
    %c4 = arith.constant 4 : index
    %c0_54 = arith.constant 0 : index
    %c0_55 = arith.constant 0 : index
    %39 = vector.load %arg5[%c4, %c0_54, %c0_55] : memref<9x8x8xbf16, #tpu.memory_space<vmem>>, vector<1x8x8xbf16>
    %40 = vector.shape_cast %39 : vector<1x8x8xbf16> to vector<8x8xbf16>
    %cst_56 = arith.constant dense<0.000000e+00> : vector<256x8xf32>
    %41 = tpu.matmul %38, %40, %cst_56 {dimension_numbers = #tpu.dot_dimension_numbers<[1], [0], [0], [1], [0, 0, 1, 1], [], []>} : vector<256x8xbf16>, vector<8x8xbf16>, vector<256x8xf32> -> vector<256x8xf32>
    %42 = arith.addf %36, %41 : vector<256x8xf32>
    %c1_57 = arith.constant 1 : index
    %c2_58 = arith.constant 2 : index
    %c0_59 = arith.constant 0 : index
    %43 = vector.load %arg11[%c1_57, %c2_58, %c0_59] : memref<18x18x8xbf16, #tpu.memory_space<vmem>>, vector<16x16x8xbf16>
    %44 = vector.shape_cast %43 : vector<16x16x8xbf16> to vector<256x8xbf16>
    %c5 = arith.constant 5 : index
    %c0_60 = arith.constant 0 : index
    %c0_61 = arith.constant 0 : index
    %45 = vector.load %arg5[%c5, %c0_60, %c0_61] : memref<9x8x8xbf16, #tpu.memory_space<vmem>>, vector<1x8x8xbf16>
    %46 = vector.shape_cast %45 : vector<1x8x8xbf16> to vector<8x8xbf16>
    %cst_62 = arith.constant dense<0.000000e+00> : vector<256x8xf32>
    %47 = tpu.matmul %44, %46, %cst_62 {dimension_numbers = #tpu.dot_dimension_numbers<[1], [0], [0], [1], [0, 0, 1, 1], [], []>} : vector<256x8xbf16>, vector<8x8xbf16>, vector<256x8xf32> -> vector<256x8xf32>
    %48 = arith.addf %42, %47 : vector<256x8xf32>
    %c2_63 = arith.constant 2 : index
    %c0_64 = arith.constant 0 : index
    %c0_65 = arith.constant 0 : index
    %49 = vector.load %arg11[%c2_63, %c0_64, %c0_65] : memref<18x18x8xbf16, #tpu.memory_space<vmem>>, vector<16x16x8xbf16>
    %50 = vector.shape_cast %49 : vector<16x16x8xbf16> to vector<256x8xbf16>
    %c6 = arith.constant 6 : index
    %c0_66 = arith.constant 0 : index
    %c0_67 = arith.constant 0 : index
    %51 = vector.load %arg5[%c6, %c0_66, %c0_67] : memref<9x8x8xbf16, #tpu.memory_space<vmem>>, vector<1x8x8xbf16>
    %52 = vector.shape_cast %51 : vector<1x8x8xbf16> to vector<8x8xbf16>
    %cst_68 = arith.constant dense<0.000000e+00> : vector<256x8xf32>
    %53 = tpu.matmul %50, %52, %cst_68 {dimension_numbers = #tpu.dot_dimension_numbers<[1], [0], [0], [1], [0, 0, 1, 1], [], []>} : vector<256x8xbf16>, vector<8x8xbf16>, vector<256x8xf32> -> vector<256x8xf32>
    %54 = arith.addf %48, %53 : vector<256x8xf32>
    %c2_69 = arith.constant 2 : index
    %c1_70 = arith.constant 1 : index
    %c0_71 = arith.constant 0 : index
    %55 = vector.load %arg11[%c2_69, %c1_70, %c0_71] : memref<18x18x8xbf16, #tpu.memory_space<vmem>>, vector<16x16x8xbf16>
    %56 = vector.shape_cast %55 : vector<16x16x8xbf16> to vector<256x8xbf16>
    %c7 = arith.constant 7 : index
    %c0_72 = arith.constant 0 : index
    %c0_73 = arith.constant 0 : index
    %57 = vector.load %arg5[%c7, %c0_72, %c0_73] : memref<9x8x8xbf16, #tpu.memory_space<vmem>>, vector<1x8x8xbf16>
    %58 = vector.shape_cast %57 : vector<1x8x8xbf16> to vector<8x8xbf16>
    %cst_74 = arith.constant dense<0.000000e+00> : vector<256x8xf32>
    %59 = tpu.matmul %56, %58, %cst_74 {dimension_numbers = #tpu.dot_dimension_numbers<[1], [0], [0], [1], [0, 0, 1, 1], [], []>} : vector<256x8xbf16>, vector<8x8xbf16>, vector<256x8xf32> -> vector<256x8xf32>
    %60 = arith.addf %54, %59 : vector<256x8xf32>
    %c2_75 = arith.constant 2 : index
    %c2_76 = arith.constant 2 : index
    %c0_77 = arith.constant 0 : index
    %61 = vector.load %arg11[%c2_75, %c2_76, %c0_77] : memref<18x18x8xbf16, #tpu.memory_space<vmem>>, vector<16x16x8xbf16>
    %62 = vector.shape_cast %61 : vector<16x16x8xbf16> to vector<256x8xbf16>
    %c8 = arith.constant 8 : index
    %c0_78 = arith.constant 0 : index
    %c0_79 = arith.constant 0 : index
    %63 = vector.load %arg5[%c8, %c0_78, %c0_79] : memref<9x8x8xbf16, #tpu.memory_space<vmem>>, vector<1x8x8xbf16>
    %64 = vector.shape_cast %63 : vector<1x8x8xbf16> to vector<8x8xbf16>
    %cst_80 = arith.constant dense<0.000000e+00> : vector<256x8xf32>
    %65 = tpu.matmul %62, %64, %cst_80 {dimension_numbers = #tpu.dot_dimension_numbers<[1], [0], [0], [1], [0, 0, 1, 1], [], []>} : vector<256x8xbf16>, vector<8x8xbf16>, vector<256x8xf32> -> vector<256x8xf32>
    %66 = arith.addf %60, %65 : vector<256x8xf32>
    %67 = vector.shape_cast %66 : vector<256x8xf32> to vector<16x16x8xf32>
    %68 = arith.truncf %67 : vector<16x16x8xf32> to vector<16x16x8xbf16>
    %c0_81 = arith.constant 0 : index
    %c0_82 = arith.constant 0 : index
    %c0_83 = arith.constant 0 : index
    %c0_84 = arith.constant 0 : index
    %69 = vector.load %arg8[%c0_81, %c0_82, %c0_83, %c0_84] : memref<1x16x16x8xbf16, #tpu.memory_space<vmem>>, vector<1x16x16x8xbf16>
    %70 = vector.shape_cast %69 : vector<1x16x16x8xbf16> to vector<16x16x8xbf16>
    %71 = vector.shape_cast %68 : vector<16x16x8xbf16> to vector<1x16x16x8xbf16>
    tpu.vector_store %arg8[%c0_81, %c0_82, %c0_83, %c0_84], %71 {strides = array<i32>} : memref<1x16x16x8xbf16, #tpu.memory_space<vmem>>, vector<1x16x16x8xbf16>,
    %cst_85 = arith.constant dense<0.000000e+00> : vector<8xf32>
    %72 = vector.multi_reduction <add>, %66, %cst_85 [0] : vector<256x8xf32> to vector<8xf32>
    %73 = vector.shape_cast %72 : vector<8xf32> to vector<1x8xf32>
    %c0_86 = arith.constant 0 : index
    %c0_87 = arith.constant 0 : index
    %c0_88 = arith.constant 0 : index
    %74 = vector.load %arg9[%c0_86, %c0_87, %c0_88] : memref<1x1x8xf32, #tpu.memory_space<vmem>>, vector<1x1x8xf32>
    %75 = vector.shape_cast %74 : vector<1x1x8xf32> to vector<1x8xf32>
    %76 = vector.shape_cast %73 : vector<1x8xf32> to vector<1x1x8xf32>
    tpu.vector_store %arg9[%c0_86, %c0_87, %c0_88], %76 {strides = array<i32>} : memref<1x1x8xf32, #tpu.memory_space<vmem>>, vector<1x1x8xf32>,
    %77 = arith.mulf %66, %66 : vector<256x8xf32>
    %cst_89 = arith.constant dense<0.000000e+00> : vector<8xf32>
    %78 = vector.multi_reduction <add>, %77, %cst_89 [0] : vector<256x8xf32> to vector<8xf32>
    %79 = vector.shape_cast %78 : vector<8xf32> to vector<1x8xf32>
    %c0_90 = arith.constant 0 : index
    %c0_91 = arith.constant 0 : index
    %c0_92 = arith.constant 0 : index
    %80 = vector.load %arg10[%c0_90, %c0_91, %c0_92] : memref<1x1x8xf32, #tpu.memory_space<vmem>>, vector<1x1x8xf32>
    %81 = vector.shape_cast %80 : vector<1x1x8xf32> to vector<1x8xf32>
    %82 = vector.shape_cast %79 : vector<1x8xf32> to vector<1x1x8xf32>
    tpu.vector_store %arg10[%c0_90, %c0_91, %c0_92], %82 {strides = array<i32>} : memref<1x1x8xf32, #tpu.memory_space<vmem>>, vector<1x1x8xf32>,
    return
  }
  func.func @transform_0(%arg0: i32, %arg1: i32) -> (i32, i32, i32, i32) {
    %c0_i32 = arith.constant 0 : i32
    %c0_i32_0 = arith.constant 0 : i32
    %c0_i32_1 = arith.constant 0 : i32
    return %arg0, %arg1, %c0_i32, %c0_i32_0 : i32, i32, i32, i32
  }
  func.func @transform_1(%arg0: i32, %arg1: i32) -> (i32, i32, i32, i32) {
    %c0_i32 = arith.constant 0 : i32
    %c0_i32_0 = arith.constant 0 : i32
    %c0_i32_1 = arith.constant 0 : i32
    return %arg0, %arg1, %c0_i32, %c0_i32_0 : i32, i32, i32, i32
  }
  func.func @transform_2(%arg0: i32, %arg1: i32) -> (i32, i32, i32, i32) {
    %c0_i32 = arith.constant 0 : i32
    %c0_i32_0 = arith.constant 0 : i32
    %c0_i32_1 = arith.constant 0 : i32
    return %arg0, %arg1, %c0_i32, %c0_i32_0 : i32, i32, i32, i32
  }
  func.func @transform_3(%arg0: i32, %arg1: i32) -> (i32, i32, i32) {
    %c0_i32 = arith.constant 0 : i32
    %c0_i32_0 = arith.constant 0 : i32
    %c0_i32_1 = arith.constant 0 : i32
    %c0_i32_2 = arith.constant 0 : i32
    return %c0_i32, %c0_i32_0, %c0_i32_1 : i32, i32, i32
  }
  func.func @transform_4(%arg0: i32, %arg1: i32) -> (i32, i32) {
    %c0_i32 = arith.constant 0 : i32
    %c0_i32_0 = arith.constant 0 : i32
    %c0_i32_1 = arith.constant 0 : i32
    return %c0_i32, %c0_i32_0 : i32, i32
  }
  func.func @transform_5(%arg0: i32, %arg1: i32) -> (i32, i32) {
    %c0_i32 = arith.constant 0 : i32
    %c0_i32_0 = arith.constant 0 : i32
    %c0_i32_1 = arith.constant 0 : i32
    return %c0_i32, %c0_i32_0 : i32, i32
  }
  func.func @transform_6(%arg0: i32, %arg1: i32) -> (i32, i32, i32, i32) {
    %c0_i32 = arith.constant 0 : i32
    %c0_i32_0 = arith.constant 0 : i32
    %c0_i32_1 = arith.constant 0 : i32
    return %arg0, %arg1, %c0_i32, %c0_i32_0 : i32, i32, i32, i32
  }
  func.func @transform_7(%arg0: i32, %arg1: i32) -> (i32, i32, i32) {
    %c1_i32 = arith.constant 1 : i32
    %0 = arith.muli %arg0, %c1_i32 : i32
    %1 = arith.addi %0, %arg1 : i32
    %c0_i32 = arith.constant 0 : i32
    %c0_i32_0 = arith.constant 0 : i32
    %c0_i32_1 = arith.constant 0 : i32
    return %1, %c0_i32, %c0_i32_0 : i32, i32, i32
  }
  func.func @transform_8(%arg0: i32, %arg1: i32) -> (i32, i32, i32) {
    %c1_i32 = arith.constant 1 : i32
    %0 = arith.muli %arg0, %c1_i32 : i32
    %1 = arith.addi %0, %arg1 : i32
    %c0_i32 = arith.constant 0 : i32
    %c0_i32_0 = arith.constant 0 : i32
    %c0_i32_1 = arith.constant 0 : i32
    return %1, %c0_i32, %c0_i32_0 : i32, i32, i32
  }
}

module attributes {stable_mosaic.version = 11 : i64} {
  func.func @_bn_relu_kernel(%arg0: i32, %arg1: i32, %arg2: memref<1x16x16x8xbf16, #tpu.memory_space<vmem>>, %arg3: memref<1x8xf32, #tpu.memory_space<vmem>>, %arg4: memref<1x8xf32, #tpu.memory_space<vmem>>, %arg5: memref<1x16x16x8xf32, #tpu.memory_space<vmem>>) attributes {dimension_semantics = [#tpu.dimension_semantics<parallel>, #tpu.dimension_semantics<parallel>], iteration_bounds = array<i64: 2, 1>, scalar_prefetch = 0 : i64, scratch_operands = 0 : i64, tpu.core_type = #tpu.core_type<tc>, window_params = [{transform_indices = @transform_0, window_bounds = array<i64: 1, 16, 16, 8>}, {pipeline_mode = #tpu.pipeline_mode<synchronous>, transform_indices = @transform_1, window_bounds = array<i64: 1, 8>}, {pipeline_mode = #tpu.pipeline_mode<synchronous>, transform_indices = @transform_2, window_bounds = array<i64: 1, 8>}, {transform_indices = @transform_3, window_bounds = array<i64: 1, 16, 16, 8>}]} {
    %c0 = arith.constant 0 : index
    %c0_0 = arith.constant 0 : index
    %c0_1 = arith.constant 0 : index
    %c0_2 = arith.constant 0 : index
    %0 = vector.load %arg2[%c0, %c0_0, %c0_1, %c0_2] : memref<1x16x16x8xbf16, #tpu.memory_space<vmem>>, vector<1x16x16x8xbf16>
    %1 = arith.extf %0 : vector<1x16x16x8xbf16> to vector<1x16x16x8xf32>
    %c0_3 = arith.constant 0 : index
    %c0_4 = arith.constant 0 : index
    %2 = vector.load %arg3[%c0_3, %c0_4] : memref<1x8xf32, #tpu.memory_space<vmem>>, vector<1x8xf32>
    %3 = vector.shape_cast %2 : vector<1x8xf32> to vector<1x1x1x8xf32>
    %4 = vector.broadcast %3 : vector<1x1x1x8xf32> to vector<1x16x16x8xf32>
    %5 = arith.mulf %1, %4 : vector<1x16x16x8xf32>
    %c0_5 = arith.constant 0 : index
    %c0_6 = arith.constant 0 : index
    %6 = vector.load %arg4[%c0_5, %c0_6] : memref<1x8xf32, #tpu.memory_space<vmem>>, vector<1x8xf32>
    %7 = vector.shape_cast %6 : vector<1x8xf32> to vector<1x1x1x8xf32>
    %8 = vector.broadcast %7 : vector<1x1x1x8xf32> to vector<1x16x16x8xf32>
    %9 = arith.addf %5, %8 : vector<1x16x16x8xf32>
    %cst = arith.constant 0.000000e+00 : f32
    %10 = vector.broadcast %cst : f32 to vector<1x16x16x8xf32>
    %11 = arith.maximumf %9, %10 : vector<1x16x16x8xf32>
    %c0_7 = arith.constant 0 : index
    %c0_8 = arith.constant 0 : index
    %c0_9 = arith.constant 0 : index
    %c0_10 = arith.constant 0 : index
    %12 = vector.load %arg5[%c0_7, %c0_8, %c0_9, %c0_10] : memref<1x16x16x8xf32, #tpu.memory_space<vmem>>, vector<1x16x16x8xf32>
    tpu.vector_store %arg5[%c0_7, %c0_8, %c0_9, %c0_10], %11 {strides = array<i32>} : memref<1x16x16x8xf32, #tpu.memory_space<vmem>>, vector<1x16x16x8xf32>,
    return
  }
  func.func @transform_0(%arg0: i32, %arg1: i32) -> (i32, i32, i32, i32) {
    %c0_i32 = arith.constant 0 : i32
    %c0_i32_0 = arith.constant 0 : i32
    %c0_i32_1 = arith.constant 0 : i32
    return %arg0, %arg1, %c0_i32, %c0_i32_0 : i32, i32, i32, i32
  }
  func.func @transform_1(%arg0: i32, %arg1: i32) -> (i32, i32) {
    %c0_i32 = arith.constant 0 : i32
    %c0_i32_0 = arith.constant 0 : i32
    %c0_i32_1 = arith.constant 0 : i32
    return %c0_i32, %c0_i32_0 : i32, i32
  }
  func.func @transform_2(%arg0: i32, %arg1: i32) -> (i32, i32) {
    %c0_i32 = arith.constant 0 : i32
    %c0_i32_0 = arith.constant 0 : i32
    %c0_i32_1 = arith.constant 0 : i32
    return %c0_i32, %c0_i32_0 : i32, i32
  }
  func.func @transform_3(%arg0: i32, %arg1: i32) -> (i32, i32, i32, i32) {
    %c0_i32 = arith.constant 0 : i32
    %c0_i32_0 = arith.constant 0 : i32
    %c0_i32_1 = arith.constant 0 : i32
    return %arg0, %arg1, %c0_i32, %c0_i32_0 : i32, i32, i32, i32
  }
}

module attributes {stable_mosaic.version = 11 : i64} {
  func.func @kernel(%arg0: i32, %arg1: i32, %arg2: memref<1x16x16x8xbf16, #tpu.memory_space<vmem>>, %arg3: memref<1x1x16x8xbf16, #tpu.memory_space<vmem>>, %arg4: memref<1x1x16x8xbf16, #tpu.memory_space<vmem>>, %arg5: memref<9x8x8xbf16, #tpu.memory_space<vmem>>, %arg6: memref<1x8xf32, #tpu.memory_space<vmem>>, %arg7: memref<1x8xf32, #tpu.memory_space<vmem>>, %arg8: memref<1x16x16x8xbf16, #tpu.memory_space<vmem>>, %arg9: memref<1x1x8xf32, #tpu.memory_space<vmem>>, %arg10: memref<1x1x8xf32, #tpu.memory_space<vmem>>, %arg11: memref<18x18x8xbf16, #tpu.memory_space<vmem>>) attributes {dimension_semantics = [#tpu.dimension_semantics<parallel>, #tpu.dimension_semantics<parallel>], iteration_bounds = array<i64: 2, 1>, scalar_prefetch = 0 : i64, scratch_operands = 1 : i64, tpu.core_type = #tpu.core_type<tc>, window_params = [{transform_indices = @transform_0, window_bounds = array<i64: 1, 16, 16, 8>}, {transform_indices = @transform_1, window_bounds = array<i64: 1, 1, 16, 8>}, {transform_indices = @transform_2, window_bounds = array<i64: 1, 1, 16, 8>}, {pipeline_mode = #tpu.pipeline_mode<synchronous>, transform_indices = @transform_3, window_bounds = array<i64: 9, 8, 8>}, {pipeline_mode = #tpu.pipeline_mode<synchronous>, transform_indices = @transform_4, window_bounds = array<i64: 1, 8>}, {pipeline_mode = #tpu.pipeline_mode<synchronous>, transform_indices = @transform_5, window_bounds = array<i64: 1, 8>}, {transform_indices = @transform_6, window_bounds = array<i64: 1, 16, 16, 8>}, {transform_indices = @transform_7, window_bounds = array<i64: 1, 1, 8>}, {transform_indices = @transform_8, window_bounds = array<i64: 1, 1, 8>}]} {
    %cst = arith.constant 0.000000e+00 : bf16
    %0 = vector.broadcast %cst : bf16 to vector<18x1x8xbf16>
    %c0 = arith.constant 0 : index
    %c0_0 = arith.constant 0 : index
    %c0_1 = arith.constant 0 : index
    %1 = vector.load %arg11[%c0, %c0_0, %c0_1] : memref<18x18x8xbf16, #tpu.memory_space<vmem>>, vector<18x1x8xbf16>
    tpu.vector_store %arg11[%c0, %c0_0, %c0_1], %0 {strides = array<i32>} : memref<18x18x8xbf16, #tpu.memory_space<vmem>>, vector<18x1x8xbf16>,
    %c0_2 = arith.constant 0 : index
    %c17 = arith.constant 17 : index
    %c0_3 = arith.constant 0 : index
    %2 = vector.load %arg11[%c0_2, %c17, %c0_3] : memref<18x18x8xbf16, #tpu.memory_space<vmem>>, vector<18x1x8xbf16>
    tpu.vector_store %arg11[%c0_2, %c17, %c0_3], %0 {strides = array<i32>} : memref<18x18x8xbf16, #tpu.memory_space<vmem>>, vector<18x1x8xbf16>,
    %c0_4 = arith.constant 0 : index
    %c0_5 = arith.constant 0 : index
    %c0_6 = arith.constant 0 : index
    %c0_7 = arith.constant 0 : index
    %3 = vector.load %arg2[%c0_4, %c0_5, %c0_6, %c0_7] : memref<1x16x16x8xbf16, #tpu.memory_space<vmem>>, vector<1x16x16x8xbf16>
    %4 = vector.shape_cast %3 : vector<1x16x16x8xbf16> to vector<16x16x8xbf16>
    %5 = arith.extf %4 : vector<16x16x8xbf16> to vector<16x16x8xf32>
    %c0_8 = arith.constant 0 : index
    %c0_9 = arith.constant 0 : index
    %6 = vector.load %arg6[%c0_8, %c0_9] : memref<1x8xf32, #tpu.memory_space<vmem>>, vector<1x8xf32>
    %7 = vector.shape_cast %6 : vector<1x8xf32> to vector<1x1x8xf32>
    %8 = vector.broadcast %7 : vector<1x1x8xf32> to vector<16x16x8xf32>
    %9 = arith.mulf %5, %8 : vector<16x16x8xf32>
    %c0_10 = arith.constant 0 : index
    %c0_11 = arith.constant 0 : index
    %10 = vector.load %arg7[%c0_10, %c0_11] : memref<1x8xf32, #tpu.memory_space<vmem>>, vector<1x8xf32>
    %11 = vector.shape_cast %10 : vector<1x8xf32> to vector<1x1x8xf32>
    %12 = vector.broadcast %11 : vector<1x1x8xf32> to vector<16x16x8xf32>
    %13 = arith.addf %9, %12 : vector<16x16x8xf32>
    %cst_12 = arith.constant 0.000000e+00 : f32
    %14 = vector.broadcast %cst_12 : f32 to vector<16x16x8xf32>
    %15 = arith.maximumf %13, %14 : vector<16x16x8xf32>
    %cst_13 = arith.constant 1.000000e+00 : f32
    %16 = vector.broadcast %cst_13 : f32 to vector<16x16x8xf32>
    %17 = arith.mulf %15, %16 : vector<16x16x8xf32>
    %18 = arith.truncf %17 : vector<16x16x8xf32> to vector<16x16x8xbf16>
    %c1 = arith.constant 1 : index
    %c1_14 = arith.constant 1 : index
    %c0_15 = arith.constant 0 : index
    %19 = vector.load %arg11[%c1, %c1_14, %c0_15] : memref<18x18x8xbf16, #tpu.memory_space<vmem>>, vector<16x16x8xbf16>
    tpu.vector_store %arg11[%c1, %c1_14, %c0_15], %18 {strides = array<i32>} : memref<18x18x8xbf16, #tpu.memory_space<vmem>>, vector<16x16x8xbf16>,
    %c0_16 = arith.constant 0 : index
    %c0_17 = arith.constant 0 : index
    %c0_18 = arith.constant 0 : index
    %c0_19 = arith.constant 0 : index
    %20 = vector.load %arg3[%c0_16, %c0_17, %c0_18, %c0_19] : memref<1x1x16x8xbf16, #tpu.memory_space<vmem>>, vector<1x1x16x8xbf16>
    %21 = vector.shape_cast %20 : vector<1x1x16x8xbf16> to vector<1x16x8xbf16>
    %c0_i32 = arith.constant 0 : i32
    %22 = arith.cmpi sgt, %arg1, %c0_i32 : i32
    %23 = arith.extui %22 : i1 to i32
    %24 = arith.sitofp %23 : i32 to f32
    %25 = arith.extf %21 : vector<1x16x8xbf16> to vector<1x16x8xf32>
    %c0_20 = arith.constant 0 : index
    %c0_21 = arith.constant 0 : index
    %26 = vector.load %arg6[%c0_20, %c0_21] : memref<1x8xf32, #tpu.memory_space<vmem>>, vector<1x8xf32>
    %27 = vector.shape_cast %26 : vector<1x8xf32> to vector<1x1x8xf32>
    %28 = vector.broadcast %27 : vector<1x1x8xf32> to vector<1x16x8xf32>
    %29 = arith.mulf %25, %28 : vector<1x16x8xf32>
    %c0_22 = arith.constant 0 : index
    %c0_23 = arith.constant 0 : index
    %30 = vector.load %arg7[%c0_22, %c0_23] : memref<1x8xf32, #tpu.memory_space<vmem>>, vector<1x8xf32>
    %31 = vector.shape_cast %30 : vector<1x8xf32> to vector<1x1x8xf32>
    %32 = vector.broadcast %31 : vector<1x1x8xf32> to vector<1x16x8xf32>
    %33 = arith.addf %29, %32 : vector<1x16x8xf32>
    %cst_24 = arith.constant 0.000000e+00 : f32
    %34 = vector.broadcast %cst_24 : f32 to vector<1x16x8xf32>
    %35 = arith.maximumf %33, %34 : vector<1x16x8xf32>
    %36 = vector.broadcast %24 : f32 to vector<1x16x8xf32>
    %37 = arith.mulf %35, %36 : vector<1x16x8xf32>
    %38 = arith.truncf %37 : vector<1x16x8xf32> to vector<1x16x8xbf16>
    %c0_25 = arith.constant 0 : index
    %c1_26 = arith.constant 1 : index
    %c0_27 = arith.constant 0 : index
    %39 = vector.load %arg11[%c0_25, %c1_26, %c0_27] : memref<18x18x8xbf16, #tpu.memory_space<vmem>>, vector<1x16x8xbf16>
    tpu.vector_store %arg11[%c0_25, %c1_26, %c0_27], %38 {strides = array<i32>} : memref<18x18x8xbf16, #tpu.memory_space<vmem>>, vector<1x16x8xbf16>,
    %c0_28 = arith.constant 0 : index
    %c0_29 = arith.constant 0 : index
    %c0_30 = arith.constant 0 : index
    %c0_31 = arith.constant 0 : index
    %40 = vector.load %arg4[%c0_28, %c0_29, %c0_30, %c0_31] : memref<1x1x16x8xbf16, #tpu.memory_space<vmem>>, vector<1x1x16x8xbf16>
    %41 = vector.shape_cast %40 : vector<1x1x16x8xbf16> to vector<1x16x8xbf16>
    %c0_i32_32 = arith.constant 0 : i32
    %42 = arith.cmpi slt, %arg1, %c0_i32_32 : i32
    %43 = arith.extui %42 : i1 to i32
    %44 = arith.sitofp %43 : i32 to f32
    %45 = arith.extf %41 : vector<1x16x8xbf16> to vector<1x16x8xf32>
    %c0_33 = arith.constant 0 : index
    %c0_34 = arith.constant 0 : index
    %46 = vector.load %arg6[%c0_33, %c0_34] : memref<1x8xf32, #tpu.memory_space<vmem>>, vector<1x8xf32>
    %47 = vector.shape_cast %46 : vector<1x8xf32> to vector<1x1x8xf32>
    %48 = vector.broadcast %47 : vector<1x1x8xf32> to vector<1x16x8xf32>
    %49 = arith.mulf %45, %48 : vector<1x16x8xf32>
    %c0_35 = arith.constant 0 : index
    %c0_36 = arith.constant 0 : index
    %50 = vector.load %arg7[%c0_35, %c0_36] : memref<1x8xf32, #tpu.memory_space<vmem>>, vector<1x8xf32>
    %51 = vector.shape_cast %50 : vector<1x8xf32> to vector<1x1x8xf32>
    %52 = vector.broadcast %51 : vector<1x1x8xf32> to vector<1x16x8xf32>
    %53 = arith.addf %49, %52 : vector<1x16x8xf32>
    %cst_37 = arith.constant 0.000000e+00 : f32
    %54 = vector.broadcast %cst_37 : f32 to vector<1x16x8xf32>
    %55 = arith.maximumf %53, %54 : vector<1x16x8xf32>
    %56 = vector.broadcast %44 : f32 to vector<1x16x8xf32>
    %57 = arith.mulf %55, %56 : vector<1x16x8xf32>
    %58 = arith.truncf %57 : vector<1x16x8xf32> to vector<1x16x8xbf16>
    %c17_38 = arith.constant 17 : index
    %c1_39 = arith.constant 1 : index
    %c0_40 = arith.constant 0 : index
    %59 = vector.load %arg11[%c17_38, %c1_39, %c0_40] : memref<18x18x8xbf16, #tpu.memory_space<vmem>>, vector<1x16x8xbf16>
    tpu.vector_store %arg11[%c17_38, %c1_39, %c0_40], %58 {strides = array<i32>} : memref<18x18x8xbf16, #tpu.memory_space<vmem>>, vector<1x16x8xbf16>,
    %cst_41 = arith.constant 0.000000e+00 : f32
    %60 = vector.broadcast %cst_41 : f32 to vector<256x8xf32>
    %c0_42 = arith.constant 0 : index
    %c0_43 = arith.constant 0 : index
    %c0_44 = arith.constant 0 : index
    %61 = vector.load %arg11[%c0_42, %c0_43, %c0_44] : memref<18x18x8xbf16, #tpu.memory_space<vmem>>, vector<16x16x8xbf16>
    %62 = vector.shape_cast %61 : vector<16x16x8xbf16> to vector<256x8xbf16>
    %c0_45 = arith.constant 0 : index
    %c0_46 = arith.constant 0 : index
    %c0_47 = arith.constant 0 : index
    %63 = vector.load %arg5[%c0_45, %c0_46, %c0_47] : memref<9x8x8xbf16, #tpu.memory_space<vmem>>, vector<1x8x8xbf16>
    %64 = vector.shape_cast %63 : vector<1x8x8xbf16> to vector<8x8xbf16>
    %cst_48 = arith.constant dense<0.000000e+00> : vector<256x8xf32>
    %65 = tpu.matmul %62, %64, %cst_48 {dimension_numbers = #tpu.dot_dimension_numbers<[1], [0], [0], [1], [0, 0, 1, 1], [], []>} : vector<256x8xbf16>, vector<8x8xbf16>, vector<256x8xf32> -> vector<256x8xf32>
    %66 = arith.addf %60, %65 : vector<256x8xf32>
    %c0_49 = arith.constant 0 : index
    %c1_50 = arith.constant 1 : index
    %c0_51 = arith.constant 0 : index
    %67 = vector.load %arg11[%c0_49, %c1_50, %c0_51] : memref<18x18x8xbf16, #tpu.memory_space<vmem>>, vector<16x16x8xbf16>
    %68 = vector.shape_cast %67 : vector<16x16x8xbf16> to vector<256x8xbf16>
    %c1_52 = arith.constant 1 : index
    %c0_53 = arith.constant 0 : index
    %c0_54 = arith.constant 0 : index
    %69 = vector.load %arg5[%c1_52, %c0_53, %c0_54] : memref<9x8x8xbf16, #tpu.memory_space<vmem>>, vector<1x8x8xbf16>
    %70 = vector.shape_cast %69 : vector<1x8x8xbf16> to vector<8x8xbf16>
    %cst_55 = arith.constant dense<0.000000e+00> : vector<256x8xf32>
    %71 = tpu.matmul %68, %70, %cst_55 {dimension_numbers = #tpu.dot_dimension_numbers<[1], [0], [0], [1], [0, 0, 1, 1], [], []>} : vector<256x8xbf16>, vector<8x8xbf16>, vector<256x8xf32> -> vector<256x8xf32>
    %72 = arith.addf %66, %71 : vector<256x8xf32>
    %c0_56 = arith.constant 0 : index
    %c2 = arith.constant 2 : index
    %c0_57 = arith.constant 0 : index
    %73 = vector.load %arg11[%c0_56, %c2, %c0_57] : memref<18x18x8xbf16, #tpu.memory_space<vmem>>, vector<16x16x8xbf16>
    %74 = vector.shape_cast %73 : vector<16x16x8xbf16> to vector<256x8xbf16>
    %c2_58 = arith.constant 2 : index
    %c0_59 = arith.constant 0 : index
    %c0_60 = arith.constant 0 : index
    %75 = vector.load %arg5[%c2_58, %c0_59, %c0_60] : memref<9x8x8xbf16, #tpu.memory_space<vmem>>, vector<1x8x8xbf16>
    %76 = vector.shape_cast %75 : vector<1x8x8xbf16> to vector<8x8xbf16>
    %cst_61 = arith.constant dense<0.000000e+00> : vector<256x8xf32>
    %77 = tpu.matmul %74, %76, %cst_61 {dimension_numbers = #tpu.dot_dimension_numbers<[1], [0], [0], [1], [0, 0, 1, 1], [], []>} : vector<256x8xbf16>, vector<8x8xbf16>, vector<256x8xf32> -> vector<256x8xf32>
    %78 = arith.addf %72, %77 : vector<256x8xf32>
    %c1_62 = arith.constant 1 : index
    %c0_63 = arith.constant 0 : index
    %c0_64 = arith.constant 0 : index
    %79 = vector.load %arg11[%c1_62, %c0_63, %c0_64] : memref<18x18x8xbf16, #tpu.memory_space<vmem>>, vector<16x16x8xbf16>
    %80 = vector.shape_cast %79 : vector<16x16x8xbf16> to vector<256x8xbf16>
    %c3 = arith.constant 3 : index
    %c0_65 = arith.constant 0 : index
    %c0_66 = arith.constant 0 : index
    %81 = vector.load %arg5[%c3, %c0_65, %c0_66] : memref<9x8x8xbf16, #tpu.memory_space<vmem>>, vector<1x8x8xbf16>
    %82 = vector.shape_cast %81 : vector<1x8x8xbf16> to vector<8x8xbf16>
    %cst_67 = arith.constant dense<0.000000e+00> : vector<256x8xf32>
    %83 = tpu.matmul %80, %82, %cst_67 {dimension_numbers = #tpu.dot_dimension_numbers<[1], [0], [0], [1], [0, 0, 1, 1], [], []>} : vector<256x8xbf16>, vector<8x8xbf16>, vector<256x8xf32> -> vector<256x8xf32>
    %84 = arith.addf %78, %83 : vector<256x8xf32>
    %c1_68 = arith.constant 1 : index
    %c1_69 = arith.constant 1 : index
    %c0_70 = arith.constant 0 : index
    %85 = vector.load %arg11[%c1_68, %c1_69, %c0_70] : memref<18x18x8xbf16, #tpu.memory_space<vmem>>, vector<16x16x8xbf16>
    %86 = vector.shape_cast %85 : vector<16x16x8xbf16> to vector<256x8xbf16>
    %c4 = arith.constant 4 : index
    %c0_71 = arith.constant 0 : index
    %c0_72 = arith.constant 0 : index
    %87 = vector.load %arg5[%c4, %c0_71, %c0_72] : memref<9x8x8xbf16, #tpu.memory_space<vmem>>, vector<1x8x8xbf16>
    %88 = vector.shape_cast %87 : vector<1x8x8xbf16> to vector<8x8xbf16>
    %cst_73 = arith.constant dense<0.000000e+00> : vector<256x8xf32>
    %89 = tpu.matmul %86, %88, %cst_73 {dimension_numbers = #tpu.dot_dimension_numbers<[1], [0], [0], [1], [0, 0, 1, 1], [], []>} : vector<256x8xbf16>, vector<8x8xbf16>, vector<256x8xf32> -> vector<256x8xf32>
    %90 = arith.addf %84, %89 : vector<256x8xf32>
    %c1_74 = arith.constant 1 : index
    %c2_75 = arith.constant 2 : index
    %c0_76 = arith.constant 0 : index
    %91 = vector.load %arg11[%c1_74, %c2_75, %c0_76] : memref<18x18x8xbf16, #tpu.memory_space<vmem>>, vector<16x16x8xbf16>
    %92 = vector.shape_cast %91 : vector<16x16x8xbf16> to vector<256x8xbf16>
    %c5 = arith.constant 5 : index
    %c0_77 = arith.constant 0 : index
    %c0_78 = arith.constant 0 : index
    %93 = vector.load %arg5[%c5, %c0_77, %c0_78] : memref<9x8x8xbf16, #tpu.memory_space<vmem>>, vector<1x8x8xbf16>
    %94 = vector.shape_cast %93 : vector<1x8x8xbf16> to vector<8x8xbf16>
    %cst_79 = arith.constant dense<0.000000e+00> : vector<256x8xf32>
    %95 = tpu.matmul %92, %94, %cst_79 {dimension_numbers = #tpu.dot_dimension_numbers<[1], [0], [0], [1], [0, 0, 1, 1], [], []>} : vector<256x8xbf16>, vector<8x8xbf16>, vector<256x8xf32> -> vector<256x8xf32>
    %96 = arith.addf %90, %95 : vector<256x8xf32>
    %c2_80 = arith.constant 2 : index
    %c0_81 = arith.constant 0 : index
    %c0_82 = arith.constant 0 : index
    %97 = vector.load %arg11[%c2_80, %c0_81, %c0_82] : memref<18x18x8xbf16, #tpu.memory_space<vmem>>, vector<16x16x8xbf16>
    %98 = vector.shape_cast %97 : vector<16x16x8xbf16> to vector<256x8xbf16>
    %c6 = arith.constant 6 : index
    %c0_83 = arith.constant 0 : index
    %c0_84 = arith.constant 0 : index
    %99 = vector.load %arg5[%c6, %c0_83, %c0_84] : memref<9x8x8xbf16, #tpu.memory_space<vmem>>, vector<1x8x8xbf16>
    %100 = vector.shape_cast %99 : vector<1x8x8xbf16> to vector<8x8xbf16>
    %cst_85 = arith.constant dense<0.000000e+00> : vector<256x8xf32>
    %101 = tpu.matmul %98, %100, %cst_85 {dimension_numbers = #tpu.dot_dimension_numbers<[1], [0], [0], [1], [0, 0, 1, 1], [], []>} : vector<256x8xbf16>, vector<8x8xbf16>, vector<256x8xf32> -> vector<256x8xf32>
    %102 = arith.addf %96, %101 : vector<256x8xf32>
    %c2_86 = arith.constant 2 : index
    %c1_87 = arith.constant 1 : index
    %c0_88 = arith.constant 0 : index
    %103 = vector.load %arg11[%c2_86, %c1_87, %c0_88] : memref<18x18x8xbf16, #tpu.memory_space<vmem>>, vector<16x16x8xbf16>
    %104 = vector.shape_cast %103 : vector<16x16x8xbf16> to vector<256x8xbf16>
    %c7 = arith.constant 7 : index
    %c0_89 = arith.constant 0 : index
    %c0_90 = arith.constant 0 : index
    %105 = vector.load %arg5[%c7, %c0_89, %c0_90] : memref<9x8x8xbf16, #tpu.memory_space<vmem>>, vector<1x8x8xbf16>
    %106 = vector.shape_cast %105 : vector<1x8x8xbf16> to vector<8x8xbf16>
    %cst_91 = arith.constant dense<0.000000e+00> : vector<256x8xf32>
    %107 = tpu.matmul %104, %106, %cst_91 {dimension_numbers = #tpu.dot_dimension_numbers<[1], [0], [0], [1], [0, 0, 1, 1], [], []>} : vector<256x8xbf16>, vector<8x8xbf16>, vector<256x8xf32> -> vector<256x8xf32>
    %108 = arith.addf %102, %107 : vector<256x8xf32>
    %c2_92 = arith.constant 2 : index
    %c2_93 = arith.constant 2 : index
    %c0_94 = arith.constant 0 : index
    %109 = vector.load %arg11[%c2_92, %c2_93, %c0_94] : memref<18x18x8xbf16, #tpu.memory_space<vmem>>, vector<16x16x8xbf16>
    %110 = vector.shape_cast %109 : vector<16x16x8xbf16> to vector<256x8xbf16>
    %c8 = arith.constant 8 : index
    %c0_95 = arith.constant 0 : index
    %c0_96 = arith.constant 0 : index
    %111 = vector.load %arg5[%c8, %c0_95, %c0_96] : memref<9x8x8xbf16, #tpu.memory_space<vmem>>, vector<1x8x8xbf16>
    %112 = vector.shape_cast %111 : vector<1x8x8xbf16> to vector<8x8xbf16>
    %cst_97 = arith.constant dense<0.000000e+00> : vector<256x8xf32>
    %113 = tpu.matmul %110, %112, %cst_97 {dimension_numbers = #tpu.dot_dimension_numbers<[1], [0], [0], [1], [0, 0, 1, 1], [], []>} : vector<256x8xbf16>, vector<8x8xbf16>, vector<256x8xf32> -> vector<256x8xf32>
    %114 = arith.addf %108, %113 : vector<256x8xf32>
    %115 = vector.shape_cast %114 : vector<256x8xf32> to vector<16x16x8xf32>
    %116 = arith.truncf %115 : vector<16x16x8xf32> to vector<16x16x8xbf16>
    %c0_98 = arith.constant 0 : index
    %c0_99 = arith.constant 0 : index
    %c0_100 = arith.constant 0 : index
    %c0_101 = arith.constant 0 : index
    %117 = vector.load %arg8[%c0_98, %c0_99, %c0_100, %c0_101] : memref<1x16x16x8xbf16, #tpu.memory_space<vmem>>, vector<1x16x16x8xbf16>
    %118 = vector.shape_cast %117 : vector<1x16x16x8xbf16> to vector<16x16x8xbf16>
    %119 = vector.shape_cast %116 : vector<16x16x8xbf16> to vector<1x16x16x8xbf16>
    tpu.vector_store %arg8[%c0_98, %c0_99, %c0_100, %c0_101], %119 {strides = array<i32>} : memref<1x16x16x8xbf16, #tpu.memory_space<vmem>>, vector<1x16x16x8xbf16>,
    %cst_102 = arith.constant dense<0.000000e+00> : vector<8xf32>
    %120 = vector.multi_reduction <add>, %114, %cst_102 [0] : vector<256x8xf32> to vector<8xf32>
    %121 = vector.shape_cast %120 : vector<8xf32> to vector<1x8xf32>
    %c0_103 = arith.constant 0 : index
    %c0_104 = arith.constant 0 : index
    %c0_105 = arith.constant 0 : index
    %122 = vector.load %arg9[%c0_103, %c0_104, %c0_105] : memref<1x1x8xf32, #tpu.memory_space<vmem>>, vector<1x1x8xf32>
    %123 = vector.shape_cast %122 : vector<1x1x8xf32> to vector<1x8xf32>
    %124 = vector.shape_cast %121 : vector<1x8xf32> to vector<1x1x8xf32>
    tpu.vector_store %arg9[%c0_103, %c0_104, %c0_105], %124 {strides = array<i32>} : memref<1x1x8xf32, #tpu.memory_space<vmem>>, vector<1x1x8xf32>,
    %125 = arith.mulf %114, %114 : vector<256x8xf32>
    %cst_106 = arith.constant dense<0.000000e+00> : vector<8xf32>
    %126 = vector.multi_reduction <add>, %125, %cst_106 [0] : vector<256x8xf32> to vector<8xf32>
    %127 = vector.shape_cast %126 : vector<8xf32> to vector<1x8xf32>
    %c0_107 = arith.constant 0 : index
    %c0_108 = arith.constant 0 : index
    %c0_109 = arith.constant 0 : index
    %128 = vector.load %arg10[%c0_107, %c0_108, %c0_109] : memref<1x1x8xf32, #tpu.memory_space<vmem>>, vector<1x1x8xf32>
    %129 = vector.shape_cast %128 : vector<1x1x8xf32> to vector<1x8xf32>
    %130 = vector.shape_cast %127 : vector<1x8xf32> to vector<1x1x8xf32>
    tpu.vector_store %arg10[%c0_107, %c0_108, %c0_109], %130 {strides = array<i32>} : memref<1x1x8xf32, #tpu.memory_space<vmem>>, vector<1x1x8xf32>,
    return
  }
  func.func @transform_0(%arg0: i32, %arg1: i32) -> (i32, i32, i32, i32) {
    %c0_i32 = arith.constant 0 : i32
    %c0_i32_0 = arith.constant 0 : i32
    %c0_i32_1 = arith.constant 0 : i32
    return %arg0, %arg1, %c0_i32, %c0_i32_0 : i32, i32, i32, i32
  }
  func.func @transform_1(%arg0: i32, %arg1: i32) -> (i32, i32, i32, i32) {
    %c0_i32 = arith.constant 0 : i32
    %c0_i32_0 = arith.constant 0 : i32
    %c0_i32_1 = arith.constant 0 : i32
    return %arg0, %arg1, %c0_i32, %c0_i32_0 : i32, i32, i32, i32
  }
  func.func @transform_2(%arg0: i32, %arg1: i32) -> (i32, i32, i32, i32) {
    %c0_i32 = arith.constant 0 : i32
    %c0_i32_0 = arith.constant 0 : i32
    %c0_i32_1 = arith.constant 0 : i32
    return %arg0, %arg1, %c0_i32, %c0_i32_0 : i32, i32, i32, i32
  }
  func.func @transform_3(%arg0: i32, %arg1: i32) -> (i32, i32, i32) {
    %c0_i32 = arith.constant 0 : i32
    %c0_i32_0 = arith.constant 0 : i32
    %c0_i32_1 = arith.constant 0 : i32
    %c0_i32_2 = arith.constant 0 : i32
    return %c0_i32, %c0_i32_0, %c0_i32_1 : i32, i32, i32
  }
  func.func @transform_4(%arg0: i32, %arg1: i32) -> (i32, i32) {
    %c0_i32 = arith.constant 0 : i32
    %c0_i32_0 = arith.constant 0 : i32
    %c0_i32_1 = arith.constant 0 : i32
    return %c0_i32, %c0_i32_0 : i32, i32
  }
  func.func @transform_5(%arg0: i32, %arg1: i32) -> (i32, i32) {
    %c0_i32 = arith.constant 0 : i32
    %c0_i32_0 = arith.constant 0 : i32
    %c0_i32_1 = arith.constant 0 : i32
    return %c0_i32, %c0_i32_0 : i32, i32
  }
  func.func @transform_6(%arg0: i32, %arg1: i32) -> (i32, i32, i32, i32) {
    %c0_i32 = arith.constant 0 : i32
    %c0_i32_0 = arith.constant 0 : i32
    %c0_i32_1 = arith.constant 0 : i32
    return %arg0, %arg1, %c0_i32, %c0_i32_0 : i32, i32, i32, i32
  }
  func.func @transform_7(%arg0: i32, %arg1: i32) -> (i32, i32, i32) {
    %c1_i32 = arith.constant 1 : i32
    %0 = arith.muli %arg0, %c1_i32 : i32
    %1 = arith.addi %0, %arg1 : i32
    %c0_i32 = arith.constant 0 : i32
    %c0_i32_0 = arith.constant 0 : i32
    %c0_i32_1 = arith.constant 0 : i32
    return %1, %c0_i32, %c0_i32_0 : i32, i32, i32
  }
  func.func @transform_8(%arg0: i32, %arg1: i32) -> (i32, i32, i32) {
    %c1_i32 = arith.constant 1 : i32
    %0 = arith.muli %arg0, %c1_i32 : i32
    %1 = arith.addi %0, %arg1 : i32
    %c0_i32 = arith.constant 0 : i32
    %c0_i32_0 = arith.constant 0 : i32
    %c0_i32_1 = arith.constant 0 : i32
    return %1, %c0_i32, %c0_i32_0 : i32, i32, i32
  }
}

</mosaic_0001>

<bundles_post_ra>
// kernel: double_conv_forward.5
= control target key start
LH: loop header
LB: loop body
LE: loop exit
PB: predicated region body
PF: predicated region fallthrough
CT: control target
= control target key end

     0   :  { %s680_s12 = smov 0   ;;  %s682_s13 = smov 0   ;;  %s875_s0 = inlined_call_operand.vmem [shape: bf16[2,16,16,8], index: 0, kind: input, shape index: {}]   ;;  %s876_s1 = inlined_call_operand.vmem [shape: f32[1,8], index: 1, kind: input, shape index: {}]   ;;  %s877_s2 = inlined_call_operand.vmem [shape: f32[1,8], index: 2, kind: input, shape index: {}]   ;;  %s878_s3 = inlined_call_operand.vmem [shape: f32[2,16,16,8], index: 3, kind: output, shape index: {}]  }
   0x1   :  { %s684_s14 = smov 0  }
   0x2 LB: > { %s25_s15 = sadd.s32 1, %s654_s13  ;;  %p522_p0 = scmp.ge.s32.totalorder %s658_s14, 1  ;;  %s658_s14 = sphi %s684_s14, %s13_s14   ;;  %s654_s13 = sphi %s682_s13, %s880_s13   ;;  %s650_s12 = sphi %s680_s12, %s879_s12  }
   0x3   : > { %p27_p1 = scmp.ge.s32.totalorder %s25_s15, 2  ;;  %p159_p2 = scmp.lt.s32.totalorder %s658_s14, 3 }
   0x5   : > { %s882_s15 = smov (%p27_p1, %s25_s15), 0  ;;  %p160_p3 = pnand %p522_p0, %p159_p2 }
   0x6   : > { %p194_p4 = scmp.lt.s32.totalorder (!%p160_p3), %s650_s12, 1 }
   0x7   : > { %163 = sbr.rel (%p160_p3) target bundleno = 52 (0x34), region = 32 }
   0xc   : > { %s884_s12 = smov (!%p194_p4, %s650_s12), 1  ;;  %v709_v0 = vld [vmem:[%s876_s1] ss:$0 sm:$0xff]  ;;  %vm389_vm0 = vcmask 64512  }
   0xd   : > { %s531_s16 = sshll.u32 %s884_s12, 7  ;;  %v718_v9 = vld [vmem:[%s877_s2] ss:$0 sm:$0xff]  ;;  %s532_s24 = sshll.u32 %s884_s12, 8 }
   0xe   : > { %s704_s19 = scalar_lea.vmem %s875_s0, %s531_s16  ;;  %s736_s27 = scalar_lea.vmem %s878_s3, %s532_s24 }
   0xf   : > { %v534_v1 = vld [vmem:[%s704_s19] sm:$0xff]   ;;  %v597_v2 = vld [vmem:[%s704_s19 + $0x8] sm:$0xff]   ;;  %v598_v3 = vld [vmem:[%s704_s19 + $0x10] sm:$0xff]  }
  0x10   : > { %v535_v4 = vunpack.c.l.bf16 %v534_v1  ;;  %v536_v5 = vunpack.c.h.bf16 %v534_v1  ;;  %v539_v6 = vunpack.c.l.bf16 %v597_v2  ;;  %v540_v7 = vunpack.c.h.bf16 %v597_v2  ;;  %v599_v8 = vld [vmem:[%s704_s19 + $0x18] sm:$0xff]   ;;  %v600_v30 = vld [vmem:[%s704_s19 + $0x20] sm:$0xff]   ;;  %v601_v31 = vld [vmem:[%s704_s19 + $0x28] sm:$0xff]  }
  0x11   : > { %v543_v10 = vunpack.c.l.bf16 %v598_v3  ;;  %v544_v11 = vunpack.c.h.bf16 %v598_v3  ;;  %v547_v12 = vunpack.c.l.bf16 %v599_v8  ;;  %v548_v13 = vunpack.c.h.bf16 %v599_v8  ;;  %v602_v36 = vld [vmem:[%s704_s19 + $0x30] sm:$0xff]   ;;  %v603_v37 = vld [vmem:[%s704_s19 + $0x38] sm:$0xff]   ;;  %v604_v3 = vld [vmem:[%s704_s19 + $0x40] sm:$0xff]  }
  0x12   : > { %v286_v14 = vmul.f32 %v535_v4, %v709_v0  ;;  %v287_v15 = vmul.f32 %v536_v5, %v709_v0  ;;  %v288_v16 = vmul.f32 %v539_v6, %v709_v0  ;;  %v289_v17 = vmul.f32 %v540_v7, %v709_v0  ;;  %v605_v4 = vld [vmem:[%s704_s19 + $0x48] sm:$0xff]  }
  0x13   : > { %v290_v18 = vmul.f32 %v543_v10, %v709_v0  ;;  %v291_v19 = vmul.f32 %v544_v11, %v709_v0  ;;  %v292_v20 = vmul.f32 %v547_v12, %v709_v0  ;;  %v293_v21 = vmul.f32 %v548_v13, %v709_v0  ;;  %v606_v10 = vld [vmem:[%s704_s19 + $0x50] sm:$0xff]   ;;  %v607_v11 = vld [vmem:[%s704_s19 + $0x58] sm:$0xff]  }
  0x14   : > { %v325_v22 = vadd.f32 %v718_v9, %v286_v14  ;;  %v326_v23 = vadd.f32 %v718_v9, %v287_v15  ;;  %v327_v24 = vadd.f32 %v718_v9, %v288_v16  ;;  %v328_v25 = vadd.f32 %v718_v9, %v289_v17 }
  0x15   : > { %v329_v26 = vadd.f32 %v718_v9, %v290_v18  ;;  %v330_v27 = vadd.f32 %v718_v9, %v291_v19  ;;  %v331_v28 = vadd.f32 %v718_v9, %v292_v20  ;;  %v332_v29 = vadd.f32 %v718_v9, %v293_v21 }
  0x16   : > { %v357_v32 = vmax.f32 %v325_v22, 0.0  ;;  %v358_v33 = vmax.f32 %v326_v23, 0.0  ;;  %v359_v34 = vmax.f32 %v327_v24, 0.0  ;;  %v360_v35 = vmax.f32 %v328_v25, 0.0 }
  0x17   : > { %v361_v38 = vmax.f32 %v329_v26, 0.0  ;;  %v362_v39 = vmax.f32 %v330_v27, 0.0  ;;  %v363_v40 = vmax.f32 %v331_v28, 0.0  ;;  %v364_v41 = vmax.f32 %v332_v29, 0.0 }
  0x18   : > { %390 = vst.msk [vmem:[%s736_s27] sm:$0xff] %vm389_vm0, %v357_v32  ;;  %391 = vst.msk [vmem:[%s736_s27 + $0x8] sm:$0xff] %vm389_vm0, %v358_v33  ;;  %v551_v42 = vunpack.c.l.bf16 %v600_v30  ;;  %v552_v43 = vunpack.c.h.bf16 %v600_v30  ;;  %v555_v44 = vunpack.c.l.bf16 %v601_v31  ;;  %v556_v45 = vunpack.c.h.bf16 %v601_v31 }
  0x19   : > { %392 = vst.msk [vmem:[%s736_s27 + $0x10] sm:$0xff] %vm389_vm0, %v359_v34  ;;  %393 = vst.msk [vmem:[%s736_s27 + $0x18] sm:$0xff] %vm389_vm0, %v360_v35  ;;  %v559_v46 = vunpack.c.l.bf16 %v602_v36  ;;  %v560_v47 = vunpack.c.h.bf16 %v602_v36  ;;  %v563_v48 = vunpack.c.l.bf16 %v603_v37  ;;  %v564_v49 = vunpack.c.h.bf16 %v603_v37 }
  0x1a   : > { %394 = vst.msk [vmem:[%s736_s27 + $0x20] sm:$0xff] %vm389_vm0, %v361_v38  ;;  %395 = vst.msk [vmem:[%s736_s27 + $0x28] sm:$0xff] %vm389_vm0, %v362_v39  ;;  %v294_v50 = vmul.f32 %v551_v42, %v709_v0  ;;  %v295_v51 = vmul.f32 %v552_v43, %v709_v0  ;;  %v296_v52 = vmul.f32 %v555_v44, %v709_v0  ;;  %v567_v16 = vunpack.c.l.bf16 %v604_v3 }
  0x1b   : > { %396 = vst.msk [vmem:[%s736_s27 + $0x30] sm:$0xff] %vm389_vm0, %v363_v40  ;;  %397 = vst.msk [vmem:[%s736_s27 + $0x38] sm:$0xff] %vm389_vm0, %v364_v41  ;;  %v297_v53 = vmul.f32 %v556_v45, %v709_v0  ;;  %v298_v54 = vmul.f32 %v559_v46, %v709_v0  ;;  %v299_v55 = vmul.f32 %v560_v47, %v709_v0  ;;  %v568_v17 = vunpack.c.h.bf16 %v604_v3  ;;  %v608_v40 = vld [vmem:[%s704_s19 + $0x60] sm:$0xff]   ;;  %v609_v41 = vld [vmem:[%s704_s19 + $0x68] sm:$0xff]  }
  0x1c   : > { %v300_v56 = vmul.f32 %v563_v48, %v709_v0  ;;  %v301_v57 = vmul.f32 %v564_v49, %v709_v0  ;;  %v333_v58 = vadd.f32 %v718_v9, %v294_v50  ;;  %v334_v59 = vadd.f32 %v718_v9, %v295_v51  ;;  %v610_v46 = vld [vmem:[%s704_s19 + $0x70] sm:$0xff]   ;;  %v611_v47 = vld [vmem:[%s704_s19 + $0x78] sm:$0xff]  }
  0x1d   : > { %v335_v60 = vadd.f32 %v718_v9, %v296_v52  ;;  %v336_v61 = vadd.f32 %v718_v9, %v297_v53  ;;  %v337_v62 = vadd.f32 %v718_v9, %v298_v54  ;;  %v338_v63 = vadd.f32 %v718_v9, %v299_v55 }
  0x1e   : > { %v339_v1 = vadd.f32 %v718_v9, %v300_v56  ;;  %v340_v2 = vadd.f32 %v718_v9, %v301_v57  ;;  %v365_v5 = vmax.f32 %v333_v58, 0.0  ;;  %v366_v6 = vmax.f32 %v334_v59, 0.0 }
  0x1f   : > { %v367_v7 = vmax.f32 %v335_v60, 0.0  ;;  %v368_v8 = vmax.f32 %v336_v61, 0.0  ;;  %v369_v12 = vmax.f32 %v337_v62, 0.0  ;;  %v370_v13 = vmax.f32 %v338_v63, 0.0 }
  0x20   : > { %v371_v14 = vmax.f32 %v339_v1, 0.0  ;;  %v372_v15 = vmax.f32 %v340_v2, 0.0  ;;  %398 = vst.msk [vmem:[%s736_s27 + $0x40] sm:$0xff] %vm389_vm0, %v365_v5  ;;  %399 = vst.msk [vmem:[%s736_s27 + $0x48] sm:$0xff] %vm389_vm0, %v366_v6  ;;  %v571_v18 = vunpack.c.l.bf16 %v605_v4  ;;  %v572_v19 = vunpack.c.h.bf16 %v605_v4 }
  0x21   : > { %400 = vst.msk [vmem:[%s736_s27 + $0x50] sm:$0xff] %vm389_vm0, %v367_v7  ;;  %401 = vst.msk [vmem:[%s736_s27 + $0x58] sm:$0xff] %vm389_vm0, %v368_v8  ;;  %v575_v20 = vunpack.c.l.bf16 %v606_v10  ;;  %v576_v21 = vunpack.c.h.bf16 %v606_v10  ;;  %v579_v22 = vunpack.c.l.bf16 %v607_v11  ;;  %v580_v23 = vunpack.c.h.bf16 %v607_v11 }
  0x22   : > { %402 = vst.msk [vmem:[%s736_s27 + $0x60] sm:$0xff] %vm389_vm0, %v369_v12  ;;  %403 = vst.msk [vmem:[%s736_s27 + $0x68] sm:$0xff] %vm389_vm0, %v370_v13  ;;  %v302_v24 = vmul.f32 %v567_v16, %v709_v0  ;;  %v303_v25 = vmul.f32 %v568_v17, %v709_v0  ;;  %v304_v26 = vmul.f32 %v571_v18, %v709_v0  ;;  %v583_v52 = vunpack.c.l.bf16 %v608_v40 }
  0x23   : > { %404 = vst.msk [vmem:[%s736_s27 + $0x70] sm:$0xff] %vm389_vm0, %v371_v14  ;;  %405 = vst.msk [vmem:[%s736_s27 + $0x78] sm:$0xff] %vm389_vm0, %v372_v15  ;;  %v305_v27 = vmul.f32 %v572_v19, %v709_v0  ;;  %v306_v28 = vmul.f32 %v575_v20, %v709_v0  ;;  %v307_v29 = vmul.f32 %v576_v21, %v709_v0  ;;  %v584_v53 = vunpack.c.h.bf16 %v608_v40 }
  0x24   : > { %v308_v30 = vmul.f32 %v579_v22, %v709_v0  ;;  %v309_v31 = vmul.f32 %v580_v23, %v709_v0  ;;  %v341_v32 = vadd.f32 %v718_v9, %v302_v24  ;;  %v342_v33 = vadd.f32 %v718_v9, %v303_v25 }
  0x25   : > { %v343_v34 = vadd.f32 %v718_v9, %v304_v26  ;;  %v344_v35 = vadd.f32 %v718_v9, %v305_v27  ;;  %v345_v36 = vadd.f32 %v718_v9, %v306_v28  ;;  %v346_v37 = vadd.f32 %v718_v9, %v307_v29 }
  0x26   : > { %v347_v38 = vadd.f32 %v718_v9, %v308_v30  ;;  %v348_v39 = vadd.f32 %v718_v9, %v309_v31  ;;  %v373_v42 = vmax.f32 %v341_v32, 0.0  ;;  %v374_v43 = vmax.f32 %v342_v33, 0.0 }
  0x27   : > { %v375_v44 = vmax.f32 %v343_v34, 0.0  ;;  %v376_v45 = vmax.f32 %v344_v35, 0.0  ;;  %v377_v48 = vmax.f32 %v345_v36, 0.0  ;;  %v378_v49 = vmax.f32 %v346_v37, 0.0 }
  0x28   : > { %v379_v50 = vmax.f32 %v347_v38, 0.0  ;;  %v380_v51 = vmax.f32 %v348_v39, 0.0  ;;  %406 = vst.msk [vmem:[%s736_s27 + $0x80] sm:$0xff] %vm389_vm0, %v373_v42  ;;  %407 = vst.msk [vmem:[%s736_s27 + $0x88] sm:$0xff] %vm389_vm0, %v374_v43  ;;  %v587_v54 = vunpack.c.l.bf16 %v609_v41  ;;  %v588_v55 = vunpack.c.h.bf16 %v609_v41 }
  0x29   : > { %408 = vst.msk [vmem:[%s736_s27 + $0x90] sm:$0xff] %vm389_vm0, %v375_v44  ;;  %409 = vst.msk [vmem:[%s736_s27 + $0x98] sm:$0xff] %vm389_vm0, %v376_v45  ;;  %v591_v56 = vunpack.c.l.bf16 %v610_v46  ;;  %v592_v57 = vunpack.c.h.bf16 %v610_v46  ;;  %v595_v58 = vunpack.c.l.bf16 %v611_v47  ;;  %v596_v59 = vunpack.c.h.bf16 %v611_v47 }
  0x2a   : > { %410 = vst.msk [vmem:[%s736_s27 + $0xa0] sm:$0xff] %vm389_vm0, %v377_v48  ;;  %411 = vst.msk [vmem:[%s736_s27 + $0xa8] sm:$0xff] %vm389_vm0, %v378_v49  ;;  %v310_v60 = vmul.f32 %v583_v52, %v709_v0  ;;  %v311_v61 = vmul.f32 %v584_v53, %v709_v0  ;;  %v312_v62 = vmul.f32 %v587_v54, %v709_v0 }
  0x2b   : > { %412 = vst.msk [vmem:[%s736_s27 + $0xb0] sm:$0xff] %vm389_vm0, %v379_v50  ;;  %413 = vst.msk [vmem:[%s736_s27 + $0xb8] sm:$0xff] %vm389_vm0, %v380_v51  ;;  %v313_v63 = vmul.f32 %v588_v55, %v709_v0  ;;  %v314_v1 = vmul.f32 %v591_v56, %v709_v0  ;;  %v315_v2 = vmul.f32 %v592_v57, %v709_v0 }
  0x2c   : > { %v316_v3 = vmul.f32 %v595_v58, %v709_v0  ;;  %v317_v4 = vmul.f32 %v596_v59, %v709_v0  ;;  %v349_v5 = vadd.f32 %v718_v9, %v310_v60  ;;  %v350_v6 = vadd.f32 %v718_v9, %v311_v61 }
  0x2d   : > { %v351_v7 = vadd.f32 %v718_v9, %v312_v62  ;;  %v352_v8 = vadd.f32 %v718_v9, %v313_v63  ;;  %v353_v10 = vadd.f32 %v718_v9, %v314_v1  ;;  %v354_v11 = vadd.f32 %v718_v9, %v315_v2 }
  0x2e   : > { %v355_v0 = vadd.f32 %v718_v9, %v316_v3  ;;  %v356_v12 = vadd.f32 %v718_v9, %v317_v4  ;;  %v381_v13 = vmax.f32 %v349_v5, 0.0  ;;  %v382_v14 = vmax.f32 %v350_v6, 0.0 }
  0x2f   : > { %v383_v15 = vmax.f32 %v351_v7, 0.0  ;;  %v384_v16 = vmax.f32 %v352_v8, 0.0  ;;  %v385_v17 = vmax.f32 %v353_v10, 0.0  ;;  %v386_v18 = vmax.f32 %v354_v11, 0.0 }
  0x30   : > { %v387_v19 = vmax.f32 %v355_v0, 0.0  ;;  %v388_v20 = vmax.f32 %v356_v12, 0.0  ;;  %414 = vst.msk [vmem:[%s736_s27 + $0xc0] sm:$0xff] %vm389_vm0, %v381_v13  ;;  %415 = vst.msk [vmem:[%s736_s27 + $0xc8] sm:$0xff] %vm389_vm0, %v382_v14 }
  0x31   : > { %416 = vst.msk [vmem:[%s736_s27 + $0xd0] sm:$0xff] %vm389_vm0, %v383_v15  ;;  %417 = vst.msk [vmem:[%s736_s27 + $0xd8] sm:$0xff] %vm389_vm0, %v384_v16 }
  0x32   : > { %418 = vst.msk [vmem:[%s736_s27 + $0xe0] sm:$0xff] %vm389_vm0, %v385_v17  ;;  %419 = vst.msk [vmem:[%s736_s27 + $0xe8] sm:$0xff] %vm389_vm0, %v386_v18 }
  0x33   : > { %420 = vst.msk [vmem:[%s736_s27 + $0xf0] sm:$0xff] %vm389_vm0, %v387_v19  ;;  %421 = vst.msk [vmem:[%s736_s27 + $0xf8] sm:$0xff] %vm389_vm0, %v388_v20 }
  0x34 PF: > { %s13_s14 = sadd.s32 1, %s658_s14   ;;  %s879_s12 = smov %s654_s13 }
  0x35   : > { %p10_p5 = scmp.ge.s32.totalorder %s13_s14, 4   ;;  %s880_s13 = smov %s882_s15 }
  0x37   :  { %12 = sbr.rel (!%p10_p5) target bundleno = 2 (0x2), region = 62 }

// kernel: double_conv_forward.3
= control target key start
LH: loop header
LB: loop body
LE: loop exit
PB: predicated region body
PF: predicated region fallthrough
CT: control target
= control target key end

     0   :  { %s7218_s27 = smov 0   ;;  %s7220_s28 = smov 0   ;;  %s10058_s0 = inlined_call_operand.vmem [shape: bf16[2,16,16,8], index: 0, kind: input, shape index: {}]   ;;  %s10059_s1 = inlined_call_operand.vmem [shape: bf16[2,1,16,8], index: 1, kind: input, shape index: {}, may-alias: {1,2}]   ;;  %s10060_s2 = inlined_call_operand.vmem [shape: bf16[2,1,16,8], index: 2, kind: input, shape index: {}, may-alias: {1,2}]   ;;  %s10061_s3 = inlined_call_operand.vmem [shape: bf16[9,8,8], index: 3, kind: input, shape index: {}]   ;;  %s10062_s4 = inlined_call_operand.vmem [shape: f32[1,8], index: 4, kind: input, shape index: {}, may-alias: {4,5}]   ;;  %s10063_s5 = inlined_call_operand.vmem [shape: f32[1,8], index: 5, kind: input, shape index: {}, may-alias: {4,5}]   ;;  %s10064_s6 = inlined_call_operand.vmem [shape: bf16[2,16,16,8], index: 6, kind: output, shape index: {0}]   ;;  %s10065_s7 = inlined_call_operand.vmem [shape: f32[2,1,8], index: 7, kind: output, shape index: {1}]   ;;  %s10066_s8 = inlined_call_operand.vmem [shape: f32[2,1,8], index: 8, kind: output, shape index: {2}]  }
   0x1   :  { %s7222_s29 = smov 0  }
   0x2 LB: > { %s31_s4 = sadd.s32 1, %s7167_s28  ;;  %p6177_p0 = scmp.ge.s32.totalorder %s7171_s29, 1  ;;  %s7171_s29 = sphi %s7222_s29, %s19_s29   ;;  %s7167_s28 = sphi %s7220_s28, %s10349_s28   ;;  %s7163_s27 = sphi %s7218_s27, %s10348_s27  }
   0x3   : > { %p33_p1 = scmp.ge.s32.totalorder %s31_s4, 2  ;;  %p325_p2 = scmp.lt.s32.totalorder %s7171_s29, 3 }
   0x5   : > { %s10351_s4 = smov (%p33_p1, %s31_s4), 0  ;;  %p326_p3 = pnand %p6177_p0, %p325_p2 }
   0x7   : > { %329 = sbr.rel (%p326_p3) target bundleno = 658 (0x292), region = 44 }
   0xc   : > { %v6186_v0 = vld [vmem:[%s10061_s3 + $0x4] sm:$0xf]  ;;  %vm1623_vm0 = vcmask 1043456   ;;  %p396_p4 = scmp.lt.s32.totalorder %s7163_s27, 1  ;;  %vm446_vm1 = vcmask 57344   ;;  %v10099_v3 = vmov 0 }
   0xd   : > { %7062 = vmatprep.subr.msk.bf16.mxu1 %vm1623_vm0, %v6186_v0  ;;  %7061 = vmatprep.subr.msk.bf16.mxu0 %vm1623_vm0, %v6186_v0  ;;  %v1625_v1 = vsel %vm1623_vm0, %v6186_v0, 0  ;;  %vm447_vm2 = vsmask.f32 256  ;;  %v449_v2 = vld [vmem:[#allocation2] sm:$0x1]  ;;  %v10102_v6 = vmov 0 }
   0xe   : > { %7060 = vmatpush3.bf16.msra.mxu1 %v1625_v1  ;;  %6754 = vmatpush3.bf16.msra.mxu0 %v1625_v1  ;;  %s10353_s27 = smov (!%p396_p4, %s7163_s27), 1  ;;  %vm7246_vm3 = vmand %vm446_vm1, %vm447_vm2  ;;  %vm503_vm4 = vsmask.f32 7938  ;;  %v505_v4 = vld [vmem:[#allocation2 + $0x8] sm:$0x1]  ;;  %vm914_vm6 = vcmask 60416  }
   0xf   : > { %v10100_v3 = vsel %vm7246_vm3, 4294967295, %v10099_v3  ;;  %v450_v5 = vsel %vm7246_vm3, 0, %v449_v2  ;;  %vm7254_vm5 = vmand %vm446_vm1, %vm503_vm4  ;;  %s6564_s9 = sshll.u32 %s10353_s27, 7  ;;  %s6565_s10 = sshll.u32 %s10353_s27, 3  ;;  %vm591_vm7 = vsmask.f32 4368 }
  0x10   : > { %10101 = vst [vmem:[#allocation3_spill] sm:$0xff] %v10100_v3  ;;  %v10103_v6 = vsel %vm7254_vm5, 4294967295, %v10102_v6  ;;  %451 = vst [vmem:[#allocation2] sm:$0x1] %v450_v5  ;;  %v506_v7 = vsel %vm7254_vm5, 0, %v505_v4  ;;  %s7267_s13 = scalar_lea.vmem %s10058_s0, %s6564_s9  ;;  %s414_s16 = scalar_lea.vmem %s10059_s1, %s6565_s10  ;;  %v10105_v23 = vmov 0 }
  0x11   : > { %10104 = vst [vmem:[#allocation4_spill] sm:$0xff] %v10103_v6  ;;  %507 = vst [vmem:[#allocation2 + $0x8] sm:$0x1] %v506_v7  ;;  %v473_v8 = vld [vmem:[#allocation2 + $0x60] sm:$0x1]  ;;  %v10108_v29 = vmov 0  ;;  %s423_s17 = scalar_lea.vmem %s10060_s2, %s6565_s10  ;;  %s9806_s19 = scalar_lea.vmem %s10064_s6, %s6564_s9 }
  0x12   : > { %v529_v9 = vld [vmem:[#allocation2 + $0x68] sm:$0x1]  ;;  %v1029_v10 = vld [vmem:[%s414_s16] sm:$0xf]  ;;  %v1030_v11 = vld [vmem:[%s414_s16 + $0x4] sm:$0xf]  ;;  %s438_s21 = scalar_lea.vmem %s10065_s7, %s10353_s27  ;;  %s443_s24 = scalar_lea.vmem %s10066_s8, %s10353_s27 }
  0x13   : > { %v474_v12 = vsel %vm7246_vm3, 0, %v473_v8  ;;  %v530_v13 = vsel %vm7254_vm5, 0, %v529_v9  ;;  %v1032_v14 = vshrl.u32 %v1029_v10, 16  ;;  %v1035_v15 = vshll.u32 %v1029_v10, 16  ;;  %v573_v18 = vld [vmem:[%s7267_s13 + $0x38] sm:$0xf]  ;;  %vm7287_vm8 = vmor %vm447_vm2, %vm591_vm7 }
  0x14   : > { %v1040_v16 = vshrl.u32 %v1030_v11, 16  ;;  %v1043_v17 = vshll.u32 %v1030_v11, 16  ;;  %475 = vst [vmem:[#allocation2 + $0x60] sm:$0x1] %v474_v12  ;;  %531 = vst [vmem:[#allocation2 + $0x68] sm:$0x1] %v530_v13 }
  0x15   : > { %v574_v19 = vld [vmem:[%s7267_s13 + $0x3c] sm:$0xf]  ;;  %v713_v20 = vshrl.u32 %v573_v18, 16  ;;  %v716_v21 = vshll.u32 %v573_v18, 16  ;;  %v7283_v22 = vld [vmem:[%s10061_s3] sm:$0xf]  ;;  %vm7295_vm9 = vmand %vm914_vm6, %vm503_vm4 }
  0x16   : > { %v10106_v23 = vsel %vm7287_vm8, 4294967295, %v10105_v23  ;;  %v1034_v24 = vrot.slane %v1032_v14, 7  ;;  %v1042_v25 = vrot.slane %v1040_v16, 7  ;;  %v721_v26 = vshrl.u32 %v574_v19, 16  ;;  %7063 = vmatprep.subr.msk.bf16.mxu1 %vm1623_vm0, %v7283_v22  ;;  %v452_v28 = vld [vmem:[#allocation2 + $0xc] sm:$0x1] }
  0x17   : > { %10107 = vst [vmem:[#allocation5_spill] sm:$0xff] %v10106_v23  ;;  %v724_v27 = vshll.u32 %v574_v19, 16  ;;  %v10109_v29 = vsel %vm7295_vm9, 4294967295, %v10108_v29  ;;  %v715_v30 = vrot.slane %v713_v20, 7  ;;  %v453_v31 = vsel %vm7246_vm3, 0, %v452_v28 }
  0x18   : > { %10110 = vst [vmem:[#allocation6_spill] sm:$0xff] %v10109_v29  ;;  %v508_v32 = vld [vmem:[#allocation2 + $0x14] sm:$0x1]  ;;  %v559_v33 = vld [vmem:[%s7267_s13] sm:$0xf]  ;;  %v1037_v34 = vor.u32 %v1035_v15, %v1034_v24  ;;  %v1038_v35 = vrot.slane %v1034_v24, 4  ;;  %v1045_v36 = vor.u32 %v1043_v17, %v1042_v25 }
  0x19   : > { %v1047_v37 = vrot.slane %v1042_v25, 4  ;;  %v1051_v38 = vld [vmem:[#allocation2] sm:$0xf]  ;;  %454 = vst [vmem:[#allocation2 + $0xc] sm:$0x1] %v453_v31  ;;  %v718_v41 = vor.u32 %v716_v21, %v715_v30  ;;  %v719_v42 = vrot.slane %v715_v30, 4 }
  0x1a   : > { %v560_v39 = vld [vmem:[%s7267_s13 + $0x4] sm:$0xf]  ;;  %v1055_v40 = vld [vmem:[#allocation2 + $0x8] sm:$0x1]  ;;  %v723_v43 = vrot.slane %v721_v26, 7  ;;  %v509_v44 = vsel %vm7254_vm5, 0, %v508_v32  ;;  %v1046_v45 = vsel %vm7287_vm8, %v1038_v35, %v1045_v36  ;;  %v1052_v46 = vsel %vm7295_vm9, %v1037_v34, %v1051_v38 }
  0x1b   : > { %v1056_v47 = vsel %vm7246_vm3, %v1047_v37, %v1055_v40  ;;  %510 = vst [vmem:[#allocation2 + $0x14] sm:$0x1] %v509_v44  ;;  %v594_v48 = vshrl.u32 %v559_v33, 16  ;;  %v476_v49 = vld [vmem:[#allocation2 + $0x6c] sm:$0x1]  ;;  %v597_v55 = vshll.u32 %v559_v33, 16 }
  0x1c   : > { %v532_v50 = vld [vmem:[#allocation2 + $0x74] sm:$0x1]  ;;  %1053 = vst [vmem:[#allocation2] sm:$0xf] %v1052_v46  ;;  %1054 = vst.msk [vmem:[#allocation2 + $0x4] sm:$0xf] %vm914_vm6, %v1046_v45  ;;  %v726_v51 = vor.u32 %v724_v27, %v723_v43 }
  0x1d   : > { %1057 = vst [vmem:[#allocation2 + $0x8] sm:$0x1] %v1056_v47  ;;  %v728_v52 = vrot.slane %v723_v43, 4  ;;  %v966_v53 = vld [vmem:[#allocation2 + $0x60] sm:$0xf]  ;;  %v596_v57 = vrot.slane %v594_v48, 7 }
  0x1e   : > { %v970_v54 = vld [vmem:[#allocation2 + $0x68] sm:$0x1]  ;;  %v967_v56 = vsel %vm7295_vm9, %v718_v41, %v966_v53  ;;  %v602_v58 = vshrl.u32 %v560_v39, 16  ;;  %v605_v59 = vshll.u32 %v560_v39, 16  ;;  %v7315_v60 = vld [vmem:[%s7267_s13 + $0x40] sm:$0xf]  ;;  %v727_v61 = vsel %vm7287_vm8, %v719_v42, %v726_v51 }
  0x1f   : > { %vm1137_vm10 = vsmask.f32 3328  ;;  %968 = vst [vmem:[#allocation2 + $0x60] sm:$0xf] %v967_v56  ;;  %v971_v62 = vsel %vm7246_vm3, %v728_v52, %v970_v54  ;;  %v477_v63 = vsel %vm7246_vm3, 0, %v476_v49  ;;  %v533_v0 = vsel %vm7254_vm5, 0, %v532_v50 }
  0x20   : > { %v576_v1 = vld [vmem:[%s7267_s13 + $0x44] sm:$0xf]  ;;  %v7329_v2 = vld [vmem:[%s10061_s3 + $0x8] sm:$0xf]  ;;  %969 = vst.msk [vmem:[#allocation2 + $0x64] sm:$0xf] %vm914_vm6, %v727_v61  ;;  %v599_v4 = vor.u32 %v597_v55, %v596_v57 }
  0x21   : > { %972 = vst [vmem:[#allocation2 + $0x68] sm:$0x1] %v971_v62  ;;  %v600_v5 = vrot.slane %v596_v57, 4  ;;  %v604_v7 = vrot.slane %v602_v58, 7  ;;  %478 = vst [vmem:[#allocation2 + $0x6c] sm:$0x1] %v477_v63  ;;  %7064 = vmatprep.subr.msk.bf16.mxu0 %vm1623_vm0, %v7329_v2 }
  0x22   : > { %534 = vst [vmem:[#allocation2 + $0x74] sm:$0x1] %v533_v0  ;;  %v730_v8 = vshrl.u32 %v7315_v60, 16  ;;  %v455_v9 = vld [vmem:[#allocation2 + $0x18] sm:$0x1]  ;;  %v738_v11 = vshrl.u32 %v576_v1, 16 }
  0x23   : > { %vm1138_vm11 = vsmask.f32 7440  ;;  %v916_v10 = vld [vmem:[#allocation2 + $0xc] sm:$0xf]  ;;  %v741_v12 = vshll.u32 %v576_v1, 16  ;;  %v607_v13 = vor.u32 %v605_v59, %v604_v7  ;;  %v609_v14 = vrot.slane %v604_v7, 4 }
  0x24   : > { %v917_v15 = vsel %vm7295_vm9, %v599_v4, %v916_v10  ;;  %v732_v16 = vrot.slane %v730_v8, 7  ;;  %v511_v17 = vld [vmem:[#allocation2 + $0x20] sm:$0x1]  ;;  %v921_v18 = vld [vmem:[#allocation2 + $0x14] sm:$0x1]  ;;  %v7337_v19 = vrot.slane %v738_v11, 7  ;;  %vm7352_vm13 = vmor %vm1137_vm10, %vm1138_vm11 }
  0x25   : > { %918 = vst [vmem:[#allocation2 + $0xc] sm:$0xf] %v917_v15  ;;  %v456_v20 = vsel %vm7246_vm3, 0, %v455_v9  ;;  %v512_v21 = vsel %vm7254_vm5, 0, %v511_v17  ;;  %v1088_v24 = vld [vmem:[#allocation2] sm:$0xf]  ;;  %v608_v27 = vsel %vm7287_vm8, %v600_v5, %v607_v13  ;;  %v922_v28 = vsel %vm7246_vm3, %v609_v14, %v921_v18 }
  0x26   : > { %v1089_v25 = vld [vmem:[#allocation2 + $0x4] sm:$0xf]  ;;  %v1121_v26 = vld [vmem:[#allocation2 + $0x8] sm:$0x1]  ;;  %457 = vst [vmem:[#allocation2 + $0x18] sm:$0x1] %v456_v20  ;;  %v743_v38 = vor.u32 %v741_v12, %v7337_v19 }
  0x27   : > { %513 = vst [vmem:[#allocation2 + $0x20] sm:$0x1] %v512_v21  ;;  %v1141_v30 = vshrl.u32 %v1088_v24, 16  ;;  %v1144_v31 = vshll.u32 %v1088_v24, 16  ;;  %v1150_v32 = vshll.u32 %v1089_v25, 16  ;;  %v1154_v33 = vshrl.u32 %v1089_v25, 16 }
  0x28   : > { %vm1574_vm12 = vcmask 64512   ;;  %920 = vst.msk [vmem:[#allocation2 + $0x10] sm:$0xf] %vm914_vm6, %v608_v27  ;;  %923 = vst [vmem:[#allocation2 + $0x14] sm:$0x1] %v922_v28  ;;  %v1160_v34 = vshll.u32 %v1121_v26, 16 }
  0x29   : > { %v1104_v35 = vld [vmem:[#allocation2 + $0x60] sm:$0xf]  ;;  %v733_v36 = vshll.u32 %v7315_v60, 16  ;;  %v736_v37 = vrot.slane %v732_v16, 4  ;;  %v1143_v39 = vrot.slane %v1141_v30, 4  ;;  %v1146_v40 = vrot.slane %v1144_v31, 5 }
  0x2a   : > { %v1152_v41 = vrot.slane %v1150_v32, 5  ;;  %v1156_v42 = vrot.slane %v1154_v33, 4  ;;  %v1105_v43 = vld [vmem:[#allocation2 + $0x64] sm:$0xf]  ;;  %v1162_v44 = vrot.slane %v1160_v34, 5  ;;  %v1333_v46 = vshrl.u32 %v1104_v35, 16 }
  0x2b   : > { %v1129_v45 = vld [vmem:[#allocation2 + $0x68] sm:$0x1]  ;;  %v1336_v47 = vshll.u32 %v1104_v35, 16  ;;  %v1342_v48 = vshll.u32 %v1105_v43, 16  ;;  %v1147_v49 = vor.u32 %v1146_v40, %v1143_v39  ;;  %v1346_v51 = vshrl.u32 %v1105_v43, 16 }
  0x2c   : > { %v1157_v50 = vor.u32 %v1156_v42, %v1152_v41  ;;  %v1352_v52 = vshll.u32 %v1129_v45, 16  ;;  %v1335_v54 = vrot.slane %v1333_v46, 4  ;;  %v7356_v57 = vld [vmem:[#allocation2 + $0xc] sm:$0xf]  ;;  %v735_v58 = vor.u32 %v733_v36, %v732_v16  ;;  %v561_v16 = vld [vmem:[%s7267_s13 + $0x8] sm:$0xf] }
  0x2d   : > { %v1338_v55 = vrot.slane %v1336_v47, 5  ;;  %v1344_v56 = vrot.slane %v1342_v48, 5  ;;  %v1148_v59 = vrot.slane %v1147_v49, 4  ;;  %v1348_v61 = vrot.slane %v1346_v51, 4  ;;  %v973_v24 = vld [vmem:[#allocation2 + $0x6c] sm:$0xf] }
  0x2e   : > { %v1158_v60 = vrot.slane %v1157_v50, 4  ;;  %v1354_v62 = vrot.slane %v1352_v52, 5  ;;  %v1165_v4 = vshrl.u32 %v7356_v57, 16  ;;  %v1168_v5 = vshll.u32 %v7356_v57, 16  ;;  %v977_v27 = vld [vmem:[#allocation2 + $0x74] sm:$0x1] }
  0x2f   : > { %v1339_v63 = vor.u32 %v1338_v55, %v1335_v54  ;;  %v7358_v0 = vld [vmem:[#allocation2 + $0x10] sm:$0xf]  ;;  %v1122_v1 = vld [vmem:[#allocation2 + $0x14] sm:$0x1]  ;;  %v744_v7 = vsel %vm7287_vm8, %v736_v37, %v743_v38  ;;  %v1153_v8 = vsel %vm7352_vm13, %v1148_v59, %v1152_v41  ;;  %v1349_v10 = vor.u32 %v1348_v61, %v1344_v56  ;;  %v562_v31 = vld [vmem:[%s7267_s13 + $0xc] sm:$0xf] }
  0x30   : > { %v1163_v9 = vsel %vm7352_vm13, %v1158_v60, %v1162_v44  ;;  %v1174_v11 = vshll.u32 %v7358_v0, 16  ;;  %976 = vst.msk [vmem:[#allocation2 + $0x70] sm:$0xf] %vm914_vm6, %v744_v7  ;;  %v1167_v14 = vrot.slane %v1165_v4, 4  ;;  %v1170_v15 = vrot.slane %v1168_v5, 5 }
  0x31   : > { %v6187_v12 = vcombine.low %v1153_v8, %v1163_v9  ;;  %v1340_v13 = vrot.slane %v1339_v63, 4  ;;  %v1350_v17 = vrot.slane %v1349_v10, 4  ;;  %v1178_v20 = vshrl.u32 %v7358_v0, 16  ;;  %v479_v36 = vld [vmem:[#allocation2 + $0x78] sm:$0x1] }
  0x32   : > { %v1176_v18 = vrot.slane %v1174_v11, 5  ;;  %v1184_v21 = vshll.u32 %v1122_v1, 16  ;;  %v1171_v26 = vor.u32 %v1170_v15, %v1167_v14  ;;  %v7377_v28 = vsel %vm1623_vm0, %v7283_v22, 0  ;;  %v535_v43 = vld [vmem:[#allocation2 + $0x80] sm:$0x1] }
  0x33   : > { %6755 = vmatprep.mubr.msk.bf16.mxu0 %vm1574_vm12, %v6187_v12  ;;  %v1345_v25 = vsel %vm7352_vm13, %v1340_v13, %v1344_v56  ;;  %v7381_v30 = vsel %vm1623_vm0, %v7329_v2, 0  ;;  %v1355_v32 = vsel %vm7352_vm13, %v1350_v17, %v1354_v62  ;;  %v1180_v33 = vrot.slane %v1178_v20, 4  ;;  %v577_v44 = vld [vmem:[%s7267_s13 + $0x48] sm:$0xf]  ;;  %v924_v54 = vld [vmem:[#allocation2 + $0x18] sm:$0xf] }
  0x34   : > { %v1186_v34 = vrot.slane %v1184_v21, 5  ;;  %v745_v35 = vrot.slane %v7337_v19, 4  ;;  %v6195_v37 = vcombine.low %v1345_v25, %v1355_v32  ;;  %v1172_v38 = vrot.slane %v1171_v26, 4  ;;  %v578_v59 = vld [vmem:[%s7267_s13 + $0x4c] sm:$0xf] }
  0x35   : > { %v974_v22 = vsel %vm7295_vm9, %v735_v58, %v973_v24  ;;  %v611_v39 = vshrl.u32 %v561_v16, 16  ;;  %v1181_v40 = vor.u32 %v1180_v33, %v1176_v18  ;;  %v614_v41 = vshll.u32 %v561_v16, 16  ;;  %v928_v4 = vld [vmem:[#allocation2 + $0x20] sm:$0x1]  ;;  %v458_v5 = vld [vmem:[#allocation2 + $0x24] sm:$0x1] }
  0x36   : > { %975 = vst [vmem:[#allocation2 + $0x6c] sm:$0xf] %v974_v22  ;;  %v978_v2 = vsel %vm7246_vm3, %v745_v35, %v977_v27  ;;  %v619_v42 = vshrl.u32 %v562_v31, 16  ;;  %6771 = vmatprep.mubr.msk.bf16.mxu1 %vm1574_vm12, %v6195_v37  ;;  %v1177_v19 = vsel %vm7352_vm13, %v1172_v38, %v1176_v18  ;;  %v622_v47 = vshll.u32 %v562_v31, 16  ;;  %v514_v15 = vld [vmem:[#allocation2 + $0x2c] sm:$0x1] }
  0x37   : > { %979 = vst [vmem:[#allocation2 + $0x74] sm:$0x1] %v978_v2  ;;  %v1107_v45 = vld [vmem:[#allocation2 + $0x70] sm:$0xf]  ;;  %v613_v46 = vrot.slane %v611_v39, 7  ;;  %v480_v48 = vsel %vm7246_vm3, 0, %v479_v36 }
  0x38   : > { %v1182_v49 = vrot.slane %v1181_v40, 4  ;;  %v1366_v50 = vshll.u32 %v1107_v45, 16  ;;  %v1370_v51 = vshrl.u32 %v1107_v45, 16  ;;  %v621_v52 = vrot.slane %v619_v42, 7  ;;  %481 = vst [vmem:[#allocation2 + $0x78] sm:$0x1] %v480_v48 }
  0x39   : > { %v616_v55 = vor.u32 %v614_v41, %v613_v46  ;;  %v617_v56 = vrot.slane %v613_v46, 4  ;;  %v536_v58 = vsel %vm7254_vm5, 0, %v535_v43  ;;  %v747_v60 = vshrl.u32 %v577_v44, 16  ;;  %v563_v16 = vld [vmem:[%s7267_s13 + $0x10] sm:$0xf] }
  0x3a   : > { %v1187_v61 = vsel %vm7352_vm13, %v1182_v49, %v1186_v34  ;;  %v7402_v62 = vrot.slane %v1366_v50, 5  ;;  %v1372_v63 = vrot.slane %v1370_v51, 4  ;;  %v624_v1 = vor.u32 %v622_v47, %v621_v52  ;;  %537 = vst [vmem:[#allocation2 + $0x80] sm:$0x1] %v536_v58  ;;  %v564_v25 = vld [vmem:[%s7267_s13 + $0x14] sm:$0xf] }
  0x3b   : > { %v6188_v7 = vcombine.low %v1177_v19, %v1187_v61  ;;  %v626_v8 = vrot.slane %v621_v52, 4  ;;  %v925_v9 = vsel %vm7295_vm9, %v616_v55, %v924_v54  ;;  %v749_v10 = vrot.slane %v747_v60, 7  ;;  %v482_v26 = vld [vmem:[#allocation2 + $0x84] sm:$0x1]  ;;  %v538_v49 = vld [vmem:[#allocation2 + $0x8c] sm:$0x1] }
  0x3c   : > { %v1373_v11 = vor.u32 %v1372_v63, %v7402_v62  ;;  %v625_v12 = vsel %vm7287_vm8, %v617_v56, %v624_v1  ;;  %926 = vst [vmem:[#allocation2 + $0x18] sm:$0xf] %v925_v9  ;;  %v750_v13 = vshll.u32 %v577_v44, 16  ;;  %v755_v14 = vshrl.u32 %v578_v59, 16 }
  0x3d   : > { %6756 = vmatmul.mubr.msk.bf16.vlgmr.msra.gmra.mxu0 %vm1574_vm12, %v6188_v7  ;;  %v1106_v17 = vld [vmem:[#allocation2 + $0x6c] sm:$0xf]  ;;  %927 = vst.msk [vmem:[#allocation2 + $0x1c] sm:$0xf] %vm914_vm6, %v625_v12  ;;  %v929_v18 = vsel %vm7246_vm3, %v626_v8, %v928_v4  ;;  %v753_v20 = vrot.slane %v749_v10, 4  ;;  %v758_v21 = vshll.u32 %v578_v59, 16 }
  0x3e   : > { %v459_v24 = vsel %vm7246_vm3, 0, %v458_v5  ;;  %v1130_v27 = vld [vmem:[#allocation2 + $0x74] sm:$0x1]  ;;  %v1357_v31 = vshrl.u32 %v1106_v17, 16  ;;  %v1360_v32 = vshll.u32 %v1106_v17, 16  ;;  %v1374_v33 = vrot.slane %v1373_v11, 4  ;;  %6822 = vmatpush3.bf16.msra.mxu0 %v7381_v30 }
  0x3f   : > { %930 = vst [vmem:[#allocation2 + $0x20] sm:$0x1] %v929_v18  ;;  %v752_v34 = vor.u32 %v750_v13, %v749_v10  ;;  %460 = vst [vmem:[#allocation2 + $0x24] sm:$0x1] %v459_v24  ;;  %v1376_v35 = vshll.u32 %v1130_v27, 16  ;;  %v757_v36 = vrot.slane %v755_v14, 7 }
  0x40   : > { %v980_v37 = vld [vmem:[#allocation2 + $0x78] sm:$0xf]  ;;  %v515_v38 = vsel %vm7254_vm5, 0, %v514_v15  ;;  %v628_v22 = vshrl.u32 %v563_v16, 16  ;;  %v1359_v39 = vrot.slane %v1357_v31, 4  ;;  %v1362_v40 = vrot.slane %v1360_v32, 5 }
  0x41   : > { %v981_v2 = vsel %vm7295_vm9, %v752_v34, %v980_v37  ;;  %516 = vst [vmem:[#allocation2 + $0x2c] sm:$0x1] %v515_v38  ;;  %v631_v41 = vshll.u32 %v563_v16, 16  ;;  %v1378_v42 = vrot.slane %v1376_v35, 5  ;;  %v760_v43 = vor.u32 %v758_v21, %v757_v36  ;;  %v984_v44 = vld [vmem:[#allocation2 + $0x80] sm:$0x1] }
  0x42   : > { %v762_v30 = vrot.slane %v757_v36, 4  ;;  %982 = vst [vmem:[#allocation2 + $0x78] sm:$0xf] %v981_v2  ;;  %v630_v19 = vrot.slane %v628_v22, 7  ;;  %v1363_v45 = vor.u32 %v1362_v40, %v1359_v39  ;;  %v636_v46 = vshrl.u32 %v564_v25, 16 }
  0x43   : > { %v639_v47 = vshll.u32 %v564_v25, 16  ;;  %v483_v48 = vsel %vm7246_vm3, 0, %v482_v26  ;;  %v1379_v50 = vsel %vm7352_vm13, %v1374_v33, %v1378_v42  ;;  %v1092_v51 = vld [vmem:[#allocation2 + $0x18] sm:$0xf]  ;;  %v761_v52 = vsel %vm7287_vm8, %v753_v20, %v760_v43  ;;  %v579_v18 = vld [vmem:[%s7267_s13 + $0x50] sm:$0xf] }
  0x44   : > { %v985_v54 = vsel %vm7246_vm3, %v762_v30, %v984_v44  ;;  %v633_v55 = vor.u32 %v631_v41, %v630_v19  ;;  %484 = vst [vmem:[#allocation2 + $0x84] sm:$0x1] %v483_v48  ;;  %v1364_v56 = vrot.slane %v1363_v45, 4  ;;  %v7430_v58 = vld [vmem:[#allocation2 + $0x1c] sm:$0xf]  ;;  %v1189_v59 = vshrl.u32 %v1092_v51, 16 }
  0x45   : > { %v1192_v60 = vshll.u32 %v1092_v51, 16  ;;  %983 = vst.msk [vmem:[#allocation2 + $0x7c] sm:$0xf] %vm914_vm6, %v761_v52  ;;  %986 = vst [vmem:[#allocation2 + $0x80] sm:$0x1] %v985_v54  ;;  %v634_v61 = vrot.slane %v630_v19, 4 }
  0x46   : > { %v1123_v63 = vld [vmem:[#allocation2 + $0x20] sm:$0x1]  ;;  %v1198_v1 = vshll.u32 %v7430_v58, 16  ;;  %v1202_v4 = vshrl.u32 %v7430_v58, 16  ;;  %v638_v5 = vrot.slane %v636_v46, 7  ;;  %v539_v7 = vsel %vm7254_vm5, 0, %v538_v49 }
  0x47   : > { %v1369_v8 = vsel %vm7352_vm13, %v1364_v56, %v7402_v62  ;;  %v1191_v9 = vrot.slane %v1189_v59, 4  ;;  %v1194_v10 = vrot.slane %v1192_v60, 5  ;;  %v1208_v11 = vshll.u32 %v1123_v63, 16  ;;  %v931_v12 = vld [vmem:[#allocation2 + $0x24] sm:$0xf] }
  0x48   : > { %540 = vst [vmem:[#allocation2 + $0x8c] sm:$0x1] %v539_v7  ;;  %v6196_v13 = vcombine.low %v1369_v8, %v1379_v50  ;;  %v1200_v14 = vrot.slane %v1198_v1, 5  ;;  %v1204_v15 = vrot.slane %v1202_v4, 4  ;;  %v641_v16 = vor.u32 %v639_v47, %v638_v5  ;;  %v935_v17 = vld [vmem:[#allocation2 + $0x2c] sm:$0x1] }
  0x49   : > { %v1195_v20 = vor.u32 %v1194_v10, %v1191_v9  ;;  %v1210_v21 = vrot.slane %v1208_v11, 5  ;;  %v1108_v24 = vld [vmem:[#allocation2 + $0x78] sm:$0xf]  ;;  %v643_v25 = vrot.slane %v638_v5, 4  ;;  %v932_v26 = vsel %vm7295_vm9, %v633_v55, %v931_v12  ;;  %v580_v35 = vld [vmem:[%s7267_s13 + $0x54] sm:$0xf] }
  0x4a   : > { %6772 = vmatmul.mubr.msk.bf16.vlgmr.msra.gmra.mxu1 %vm1574_vm12, %v6196_v13  ;;  %v1205_v62 = vor.u32 %v1204_v15, %v1200_v14  ;;  %v1381_v27 = vshrl.u32 %v1108_v24, 16  ;;  %v1384_v31 = vshll.u32 %v1108_v24, 16  ;;  %v642_v32 = vsel %vm7287_vm8, %v634_v61, %v641_v16  ;;  %933 = vst [vmem:[#allocation2 + $0x24] sm:$0xf] %v932_v26  ;;  %v461_v46 = vld [vmem:[#allocation2 + $0x30] sm:$0x1] }
  0x4b   : > { %6788 = vmatpush3.bf16.msra.mxu1 %v7377_v28  ;;  %v1196_v33 = vrot.slane %v1195_v20, 4  ;;  %934 = vst.msk [vmem:[#allocation2 + $0x28] sm:$0xf] %vm914_vm6, %v642_v32  ;;  %v936_v34 = vsel %vm7246_vm3, %v643_v25, %v935_v17  ;;  %v764_v36 = vshrl.u32 %v579_v18, 16  ;;  %v767_v37 = vshll.u32 %v579_v18, 16 }
  0x4c   : > { %v1206_v38 = vrot.slane %v1205_v62, 4  ;;  %v1109_v22 = vld [vmem:[#allocation2 + $0x7c] sm:$0xf]  ;;  %v1131_v39 = vld [vmem:[#allocation2 + $0x80] sm:$0x1]  ;;  %v1383_v40 = vrot.slane %v1381_v27, 4 }
  0x4d   : > { %937 = vst [vmem:[#allocation2 + $0x2c] sm:$0x1] %v936_v34  ;;  %v1201_v28 = vsel %vm7352_vm13, %v1196_v33, %v1200_v14  ;;  %v1386_v41 = vrot.slane %v1384_v31, 5  ;;  %v1390_v42 = vshll.u32 %v1109_v22, 16  ;;  %v1394_v43 = vshrl.u32 %v1109_v22, 16 }
  0x4e   : > { %v1211_v30 = vsel %vm7352_vm13, %v1206_v38, %v1210_v21  ;;  %v1400_v44 = vshll.u32 %v1131_v39, 16  ;;  %v766_v19 = vrot.slane %v764_v36, 7  ;;  %v772_v45 = vshrl.u32 %v580_v35, 16  ;;  %v987_v51 = vld [vmem:[#allocation2 + $0x84] sm:$0xf] }
  0x4f   : > { %v6189_v47 = vcombine.low %v1201_v28, %v1211_v30  ;;  %v1387_v48 = vor.u32 %v1386_v41, %v1383_v40  ;;  %v1392_v49 = vrot.slane %v1390_v42, 5  ;;  %v1396_v50 = vrot.slane %v1394_v43, 4  ;;  %v991_v59 = vld [vmem:[#allocation2 + $0x8c] sm:$0x1]  ;;  %v517_v11 = vld [vmem:[#allocation2 + $0x38] sm:$0x1] }
  0x50   : > { %v1402_v52 = vrot.slane %v1400_v44, 5  ;;  %v769_v54 = vor.u32 %v767_v37, %v766_v19  ;;  %v770_v55 = vrot.slane %v766_v19, 4  ;;  %v774_v56 = vrot.slane %v772_v45, 7  ;;  %v565_v24 = vld [vmem:[%s7267_s13 + $0x18] sm:$0xf] }
  0x51   : > { %6759 = vmatprep.mubr.msk.bf16.mxu0 %vm1574_vm12, %v6189_v47  ;;  %v1388_v60 = vrot.slane %v1387_v48, 4  ;;  %v1397_v61 = vor.u32 %v1396_v50, %v1392_v49  ;;  %v1094_v63 = vld [vmem:[#allocation2 + $0x24] sm:$0xf]  ;;  %v775_v1 = vshll.u32 %v580_v35, 16  ;;  %v462_v4 = vsel %vm7246_vm3, 0, %v461_v46 }
  0x52   : > { %v7460_v5 = vld [vmem:[#allocation2 + $0x28] sm:$0xf]  ;;  %v1213_v7 = vshrl.u32 %v1094_v63, 16  ;;  %v1216_v8 = vshll.u32 %v1094_v63, 16  ;;  %v779_v9 = vrot.slane %v774_v56, 4  ;;  %v988_v10 = vsel %vm7295_vm9, %v769_v54, %v987_v51 }
  0x53   : > { %463 = vst [vmem:[#allocation2 + $0x30] sm:$0x1] %v462_v4  ;;  %v1393_v12 = vsel %vm7352_vm13, %v1388_v60, %v1392_v49  ;;  %v1398_v13 = vrot.slane %v1397_v61, 4  ;;  %v1222_v15 = vshll.u32 %v7460_v5, 16  ;;  %v1226_v16 = vshrl.u32 %v7460_v5, 16 }
  0x54   : > { %v7466_v14 = vld [vmem:[#allocation2 + $0x2c] sm:$0x1]  ;;  %989 = vst [vmem:[#allocation2 + $0x84] sm:$0xf] %v988_v10  ;;  %v1215_v17 = vrot.slane %v1213_v7, 4  ;;  %v1218_v18 = vrot.slane %v1216_v8, 5  ;;  %v777_v21 = vor.u32 %v775_v1, %v774_v56  ;;  %v992_v27 = vsel %vm7246_vm3, %v779_v9, %v991_v59 }
  0x55   : > { %v1232_v20 = vshll.u32 %v7466_v14, 16  ;;  %v1403_v25 = vsel %vm7352_vm13, %v1398_v13, %v1402_v52  ;;  %v1224_v26 = vrot.slane %v1222_v15, 5  ;;  %v1228_v62 = vrot.slane %v1226_v16, 4  ;;  %v566_v31 = vld [vmem:[%s7267_s13 + $0x1c] sm:$0xf] }
  0x56   : > { %v485_v32 = vld [vmem:[#allocation2 + $0x90] sm:$0x1]  ;;  %v6197_v33 = vcombine.low %v1393_v12, %v1403_v25  ;;  %v1219_v34 = vor.u32 %v1218_v18, %v1215_v17  ;;  %v778_v36 = vsel %vm7287_vm8, %v770_v55, %v777_v21  ;;  %993 = vst [vmem:[#allocation2 + $0x8c] sm:$0x1] %v992_v27  ;;  %v541_v37 = vld [vmem:[#allocation2 + $0x98] sm:$0x1] }
  0x57   : > { %v1234_v35 = vrot.slane %v1232_v20, 5  ;;  %v581_v38 = vld [vmem:[%s7267_s13 + $0x58] sm:$0xf]  ;;  %v1229_v22 = vor.u32 %v1228_v62, %v1224_v26  ;;  %990 = vst.msk [vmem:[#allocation2 + $0x88] sm:$0xf] %vm914_vm6, %v778_v36  ;;  %v518_v39 = vsel %vm7254_vm5, 0, %v517_v11 }
  0x58   : > { %v645_v40 = vshrl.u32 %v565_v24, 16  ;;  %v648_v28 = vshll.u32 %v565_v24, 16  ;;  %v582_v41 = vld [vmem:[%s7267_s13 + $0x5c] sm:$0xf]  ;;  %6775 = vmatprep.mubr.msk.bf16.mxu1 %vm1574_vm12, %v6197_v33  ;;  %v1220_v42 = vrot.slane %v1219_v34, 4  ;;  %v653_v43 = vshrl.u32 %v566_v31, 16 }
  0x59   : > { %519 = vst [vmem:[#allocation2 + $0x38] sm:$0x1] %v518_v39  ;;  %v656_v30 = vshll.u32 %v566_v31, 16  ;;  %v486_v44 = vsel %vm7246_vm3, 0, %v485_v32  ;;  %v1230_v19 = vrot.slane %v1229_v22, 4  ;;  %v542_v47 = vsel %vm7254_vm5, 0, %v541_v37 }
  0x5a   : > { %v647_v45 = vrot.slane %v645_v40, 7  ;;  %v938_v46 = vld [vmem:[#allocation2 + $0x30] sm:$0xf]  ;;  %487 = vst [vmem:[#allocation2 + $0x90] sm:$0x1] %v486_v44  ;;  %v781_v48 = vshrl.u32 %v581_v38, 16  ;;  %v1225_v49 = vsel %vm7352_vm13, %v1220_v42, %v1224_v26 }
  0x5b   : > { %v1110_v50 = vld [vmem:[#allocation2 + $0x84] sm:$0xf]  ;;  %v655_v51 = vrot.slane %v653_v43, 7  ;;  %543 = vst [vmem:[#allocation2 + $0x98] sm:$0x1] %v542_v47  ;;  %v784_v52 = vshll.u32 %v581_v38, 16  ;;  %v1235_v55 = vsel %vm7352_vm13, %v1230_v19, %v1234_v35 }
  0x5c   : > { %v789_v54 = vshrl.u32 %v582_v41, 16  ;;  %v1405_v56 = vshrl.u32 %v1110_v50, 16  ;;  %v1408_v59 = vshll.u32 %v1110_v50, 16  ;;  %v650_v60 = vor.u32 %v648_v28, %v647_v45  ;;  %v464_v12 = vld [vmem:[#allocation2 + $0x3c] sm:$0x1] }
  0x5d   : > { %v6190_v61 = vcombine.low %v1225_v49, %v1235_v55  ;;  %v651_v63 = vrot.slane %v647_v45, 4  ;;  %v658_v1 = vor.u32 %v656_v30, %v655_v51  ;;  %v660_v4 = vrot.slane %v655_v51, 4  ;;  %v1132_v7 = vld [vmem:[#allocation2 + $0x8c] sm:$0x1]  ;;  %v520_v13 = vld [vmem:[#allocation2 + $0x44] sm:$0x1] }
  0x5e   : > { %v1407_v8 = vrot.slane %v1405_v56, 4  ;;  %v1410_v9 = vrot.slane %v1408_v59, 5  ;;  %v939_v10 = vsel %vm7295_vm9, %v650_v60, %v938_v46  ;;  %v783_v11 = vrot.slane %v781_v48, 7  ;;  %v7496_v15 = vld [vmem:[#allocation2 + $0x88] sm:$0xf] }
  0x5f   : > { %6760 = vmatmul.mubr.msk.bf16.gmra.mxu0 %vm1574_vm12, %v6190_v61  ;;  %v1424_v16 = vshll.u32 %v1132_v7, 16  ;;  %v659_v17 = vsel %vm7287_vm8, %v651_v63, %v658_v1  ;;  %940 = vst [vmem:[#allocation2 + $0x30] sm:$0xf] %v939_v10  ;;  %v791_v18 = vrot.slane %v789_v54, 7  ;;  %v792_v20 = vshll.u32 %v582_v41, 16 }
  0x60   : > { %v7501_v21 = vld [vmem:[%s7267_s13 + $0x20] sm:$0xf]  ;;  %v1411_v24 = vor.u32 %v1410_v9, %v1407_v8  ;;  %v1414_v25 = vshll.u32 %v7496_v15, 16  ;;  %v1418_v26 = vshrl.u32 %v7496_v15, 16  ;;  %941 = vst.msk [vmem:[#allocation2 + $0x34] sm:$0xf] %vm914_vm6, %v659_v17  ;;  %v786_v27 = vor.u32 %v784_v52, %v783_v11 }
  0x61   : > { %v942_v62 = vld [vmem:[#allocation2 + $0x38] sm:$0x1]  ;;  %v568_v31 = vld [vmem:[%s7267_s13 + $0x24] sm:$0xf]  ;;  %v2140_v32 = vrot.slane %v7358_v0, 5  ;;  %v787_v34 = vrot.slane %v783_v11, 4  ;;  %v794_v35 = vor.u32 %v792_v20, %v791_v18 }
  0x62   : > { %v943_v33 = vsel %vm7246_vm3, %v660_v4, %v942_v62  ;;  %v994_v36 = vld [vmem:[#allocation2 + $0x90] sm:$0xf]  ;;  %v488_v37 = vld [vmem:[#allocation2 + $0x9c] sm:$0x1]  ;;  %v1412_v38 = vrot.slane %v1411_v24, 4  ;;  %v1416_v22 = vrot.slane %v1414_v25, 5 }
  0x63   : > { %v1420_v39 = vrot.slane %v1418_v26, 4  ;;  %944 = vst [vmem:[#allocation2 + $0x38] sm:$0x1] %v943_v33  ;;  %v796_v40 = vrot.slane %v791_v18, 4  ;;  %v998_v28 = vld [vmem:[#allocation2 + $0x98] sm:$0x1]  ;;  %v795_v41 = vsel %vm7287_vm8, %v787_v34, %v794_v35  ;;  %v995_v42 = vsel %vm7295_vm9, %v786_v27, %v994_v36 }
  0x64   : > { %v465_v43 = vsel %vm7246_vm3, 0, %v464_v12  ;;  %v521_v30 = vsel %vm7254_vm5, 0, %v520_v13  ;;  %v544_v44 = vld [vmem:[#allocation2 + $0xa4] sm:$0x1]  ;;  %v1426_v45 = vrot.slane %v1424_v16, 5  ;;  %v662_v47 = vshrl.u32 %v7501_v21, 16 }
  0x65   : > { %v1421_v19 = vor.u32 %v1420_v39, %v1416_v22  ;;  %996 = vst [vmem:[#allocation2 + $0x90] sm:$0xf] %v995_v42  ;;  %997 = vst.msk [vmem:[#allocation2 + $0x94] sm:$0xf] %vm914_vm6, %v795_v41  ;;  %v999_v46 = vsel %vm7246_vm3, %v796_v40, %v998_v28  ;;  %v7523_v48 = vld [vmem:[%s7267_s13 + $0x60] sm:$0xf]  ;;  %v1417_v50 = vsel %vm7352_vm13, %v1412_v38, %v1416_v22 }
  0x66   : > { %466 = vst [vmem:[#allocation2 + $0x3c] sm:$0x1] %v465_v43  ;;  %522 = vst [vmem:[#allocation2 + $0x44] sm:$0x1] %v521_v30  ;;  %v7528_v49 = vld [vmem:[%s10061_s3 + $0xc] sm:$0xf] }
  0x67   : > { %1000 = vst [vmem:[#allocation2 + $0x98] sm:$0x1] %v999_v46  ;;  %v665_v51 = vshll.u32 %v7501_v21, 16  ;;  %v670_v52 = vshrl.u32 %v568_v31, 16  ;;  %v489_v54 = vsel %vm7246_vm3, 0, %v488_v37  ;;  %7065 = vmatprep.subr.msk.bf16.mxu1 %vm1623_vm0, %v7528_v49  ;;  %v1422_v56 = vrot.slane %v1421_v19, 4 }
  0x68   : > { %v7540_v55 = vld [vmem:[%s10061_s3 + $0x10] sm:$0xf]  ;;  %v664_v60 = vrot.slane %v662_v47, 7  ;;  %v673_v61 = vshll.u32 %v568_v31, 16  ;;  %490 = vst [vmem:[#allocation2 + $0x9c] sm:$0x1] %v489_v54 }
  0x69   : > { %v7542_v59 = vld [vmem:[#allocation2 + $0x30] sm:$0xf]  ;;  %v545_v63 = vsel %vm7254_vm5, 0, %v544_v44  ;;  %7066 = vmatprep.subr.msk.bf16.mxu0 %vm1623_vm0, %v7540_v55  ;;  %v7548_v1 = vld [vmem:[#allocation2 + $0x34] sm:$0xf]  ;;  %v672_v8 = vrot.slane %v670_v52, 7  ;;  %v1427_v10 = vsel %vm7352_vm13, %v1422_v56, %v1426_v45 }
  0x6a   : > { %v1237_v4 = vshrl.u32 %v7542_v59, 16  ;;  %v1240_v7 = vshll.u32 %v7542_v59, 16  ;;  %546 = vst [vmem:[#allocation2 + $0xa4] sm:$0x1] %v545_v63  ;;  %v798_v9 = vshrl.u32 %v7523_v48, 16  ;;  %v1246_v11 = vshll.u32 %v7548_v1, 16 }
  0x6b   : > { %v1250_v12 = vshrl.u32 %v7548_v1, 16  ;;  %v801_v13 = vshll.u32 %v7523_v48, 16  ;;  %v6198_v16 = vcombine.low %v1417_v50, %v1427_v10  ;;  %v7558_v17 = vld [vmem:[#allocation2 + $0x38] sm:$0x1]  ;;  %v668_v21 = vrot.slane %v664_v60, 4 }
  0x6c   : > { %v1239_v18 = vrot.slane %v1237_v4, 4  ;;  %v1242_v20 = vrot.slane %v1240_v7, 5  ;;  %v1248_v24 = vrot.slane %v1246_v11, 5  ;;  %v1256_v26 = vshll.u32 %v7558_v17, 16  ;;  %v7562_v31 = vld [vmem:[#allocation2 + $0x90] sm:$0xf] }
  0x6d   : > { %v1252_v25 = vrot.slane %v1250_v12, 4  ;;  %v675_v62 = vor.u32 %v673_v61, %v672_v8  ;;  %6776 = vmatmul.mubr.msk.bf16.gmra.mxu1 %vm1574_vm12, %v6198_v16  ;;  %v7564_v33 = vld [vmem:[#allocation2 + $0x94] sm:$0xf]  ;;  %v667_v34 = vor.u32 %v665_v51, %v664_v60  ;;  %v677_v35 = vrot.slane %v672_v8, 4  ;;  %v945_v30 = vld [vmem:[#allocation2 + $0x3c] sm:$0xf] }
  0x6e   : > { %v1243_v27 = vor.u32 %v1242_v20, %v1239_v18  ;;  %v7566_v36 = vrot.slane %v798_v9, 7  ;;  %v1258_v38 = vrot.slane %v1256_v26, 5  ;;  %v7568_v22 = vld [vmem:[#allocation2 + $0x98] sm:$0x1]  ;;  %v1429_v39 = vshrl.u32 %v7562_v31, 16 }
  0x6f   : > { %v1253_v37 = vor.u32 %v1252_v25, %v1248_v24  ;;  %v1432_v40 = vshll.u32 %v7562_v31, 16  ;;  %v1438_v41 = vshll.u32 %v7564_v33, 16  ;;  %v1442_v42 = vshrl.u32 %v7564_v33, 16  ;;  %v584_v44 = vld [vmem:[%s7267_s13 + $0x64] sm:$0xf] }
  0x70   : > { %v1244_v28 = vrot.slane %v1243_v27, 4  ;;  %v1448_v43 = vshll.u32 %v7568_v22, 16  ;;  %v1431_v45 = vrot.slane %v1429_v39, 4  ;;  %v676_v47 = vsel %vm7287_vm8, %v668_v21, %v675_v62  ;;  %v949_v48 = vld [vmem:[#allocation2 + $0x44] sm:$0x1] }
  0x71   : > { %v1254_v19 = vrot.slane %v1253_v37, 4  ;;  %v1434_v46 = vrot.slane %v1432_v40, 5  ;;  %v1440_v51 = vrot.slane %v1438_v41, 5  ;;  %v1444_v52 = vrot.slane %v1442_v42, 4  ;;  %948 = vst.msk [vmem:[#allocation2 + $0x40] sm:$0xf] %vm914_vm6, %v676_v47 }
  0x72   : > { %v1249_v50 = vsel %vm7352_vm13, %v1244_v28, %v1248_v24  ;;  %v1450_v54 = vrot.slane %v1448_v43, 5  ;;  %v467_v56 = vld [vmem:[#allocation2 + $0x48] sm:$0x1]  ;;  %v946_v63 = vsel %vm7295_vm9, %v667_v34, %v945_v30  ;;  %v950_v4 = vsel %vm7246_vm3, %v677_v35, %v949_v48  ;;  %v1001_v7 = vld [vmem:[#allocation2 + $0x9c] sm:$0xf] }
  0x73   : > { %v1259_v60 = vsel %vm7352_vm13, %v1254_v19, %v1258_v38  ;;  %v1435_v61 = vor.u32 %v1434_v46, %v1431_v45  ;;  %v523_v8 = vld [vmem:[#allocation2 + $0x50] sm:$0x1]  ;;  %v569_v9 = vld [vmem:[%s7267_s13 + $0x28] sm:$0xf]  ;;  %v1445_v11 = vor.u32 %v1444_v52, %v1440_v51  ;;  %947 = vst [vmem:[#allocation2 + $0x3c] sm:$0xf] %v946_v63  ;;  %v803_v12 = vor.u32 %v801_v13, %v7566_v36 }
  0x74   : > { %v6191_v10 = vcombine.low %v1249_v50, %v1259_v60  ;;  %951 = vst [vmem:[#allocation2 + $0x44] sm:$0x1] %v950_v4  ;;  %v804_v16 = vrot.slane %v7566_v36, 4  ;;  %v570_v18 = vld [vmem:[%s7267_s13 + $0x2c] sm:$0xf]  ;;  %v806_v21 = vshrl.u32 %v584_v44, 16 }
  0x75   : > { %v1436_v20 = vrot.slane %v1435_v61, 4  ;;  %v809_v24 = vshll.u32 %v584_v44, 16  ;;  %v468_v25 = vsel %vm7246_vm3, 0, %v467_v56  ;;  %v491_v26 = vld [vmem:[#allocation2 + $0xa8] sm:$0x1]  ;;  %v1446_v62 = vrot.slane %v1445_v11, 4 }
  0x76   : > { %6763 = vmatprep.mubr.msk.bf16.mxu0 %vm1574_vm12, %v6191_v10  ;;  %v1002_v27 = vsel %vm7295_vm9, %v803_v12, %v1001_v7  ;;  %469 = vst [vmem:[#allocation2 + $0x48] sm:$0x1] %v468_v25  ;;  %v524_v13 = vsel %vm7254_vm5, 0, %v523_v8  ;;  %v679_v34 = vshrl.u32 %v569_v9, 16  ;;  %v808_v36 = vrot.slane %v806_v21, 7 }
  0x77   : > { %v1441_v35 = vsel %vm7352_vm13, %v1436_v20, %v1440_v51  ;;  %1003 = vst [vmem:[#allocation2 + $0x9c] sm:$0xf] %v1002_v27  ;;  %525 = vst [vmem:[#allocation2 + $0x50] sm:$0x1] %v524_v13  ;;  %v682_v37 = vshll.u32 %v569_v9, 16  ;;  %v687_v38 = vshrl.u32 %v570_v18, 16  ;;  %v1451_v39 = vsel %vm7352_vm13, %v1446_v62, %v1450_v54 }
  0x78   : > { %v1005_v40 = vld [vmem:[#allocation2 + $0xa4] sm:$0x1]  ;;  %v681_v28 = vrot.slane %v679_v34, 7  ;;  %v690_v41 = vshll.u32 %v570_v18, 16  ;;  %v492_v42 = vsel %vm7246_vm3, 0, %v491_v26  ;;  %v6199_v43 = vcombine.low %v1441_v35, %v1451_v39 }
  0x79   : > { %v7604_v30 = vld [vmem:[#allocation2 + $0x40] sm:$0xf]  ;;  %v811_v44 = vor.u32 %v809_v24, %v808_v36  ;;  %v813_v19 = vrot.slane %v808_v36, 4  ;;  %v689_v45 = vrot.slane %v687_v38, 7  ;;  %493 = vst [vmem:[#allocation2 + $0xa8] sm:$0x1] %v492_v42 }
  0x7a   : > { %v547_v46 = vld [vmem:[#allocation2 + $0xb0] sm:$0x1]  ;;  %v1270_v47 = vshll.u32 %v7604_v30, 16  ;;  %v1274_v48 = vshrl.u32 %v7604_v30, 16  ;;  %v684_v50 = vor.u32 %v682_v37, %v681_v28  ;;  %v685_v51 = vrot.slane %v681_v28, 4  ;;  %6779 = vmatprep.mubr.msk.bf16.mxu1 %vm1574_vm12, %v6199_v43 }
  0x7b   : > { %v585_v52 = vld [vmem:[%s7267_s13 + $0x68] sm:$0xf]  ;;  %v7610_v54 = vld [vmem:[#allocation2 + $0x3c] sm:$0xf]  ;;  %v7612_v56 = vld [vmem:[#allocation2 + $0x44] sm:$0x1]  ;;  %v812_v60 = vsel %vm7287_vm8, %v804_v16, %v811_v44  ;;  %v1006_v61 = vsel %vm7246_vm3, %v813_v19, %v1005_v40  ;;  %v692_v63 = vor.u32 %v690_v41, %v689_v45 }
  0x7c   : > { %v694_v4 = vrot.slane %v689_v45, 4  ;;  %v1261_v7 = vshrl.u32 %v7610_v54, 16  ;;  %v1264_v8 = vshll.u32 %v7610_v54, 16  ;;  %v1272_v9 = vrot.slane %v1270_v47, 5  ;;  %1004 = vst.msk [vmem:[#allocation2 + $0xa0] sm:$0xf] %vm914_vm6, %v812_v60 }
  0x7d   : > { %v1276_v10 = vrot.slane %v1274_v48, 4  ;;  %1007 = vst [vmem:[#allocation2 + $0xa4] sm:$0x1] %v1006_v61  ;;  %v586_v11 = vld [vmem:[%s7267_s13 + $0x6c] sm:$0xf]  ;;  %v1280_v12 = vshll.u32 %v7612_v56, 16  ;;  %v693_v16 = vsel %vm7287_vm8, %v685_v51, %v692_v63 }
  0x7e   : > { %v952_v18 = vld [vmem:[#allocation2 + $0x48] sm:$0xf]  ;;  %v548_v20 = vsel %vm7254_vm5, 0, %v547_v46  ;;  %v815_v21 = vshrl.u32 %v585_v52, 16  ;;  %v1263_v24 = vrot.slane %v1261_v7, 4  ;;  %v1266_v25 = vrot.slane %v1264_v8, 5 }
  0x7f   : > { %v1277_v26 = vor.u32 %v1276_v10, %v1272_v9  ;;  %v7627_v62 = vld [vmem:[#allocation2 + $0x9c] sm:$0xf]  ;;  %v953_v27 = vsel %vm7295_vm9, %v684_v50, %v952_v18  ;;  %955 = vst.msk [vmem:[#allocation2 + $0x4c] sm:$0xf] %vm914_vm6, %v693_v16  ;;  %v956_v13 = vld [vmem:[#allocation2 + $0x50] sm:$0x1] }
  0x80   : > { %549 = vst [vmem:[#allocation2 + $0xb0] sm:$0x1] %v548_v20  ;;  %v1282_v34 = vrot.slane %v1280_v12, 5  ;;  %v1453_v35 = vshrl.u32 %v7627_v62, 16  ;;  %v1456_v36 = vshll.u32 %v7627_v62, 16  ;;  %v957_v37 = vsel %vm7246_vm3, %v694_v4, %v956_v13 }
  0x81   : > { %954 = vst [vmem:[#allocation2 + $0x48] sm:$0xf] %v953_v27  ;;  %v1267_v38 = vor.u32 %v1266_v25, %v1263_v24  ;;  %v1278_v39 = vrot.slane %v1277_v26, 4  ;;  %958 = vst [vmem:[#allocation2 + $0x50] sm:$0x1] %v957_v37  ;;  %v817_v40 = vrot.slane %v815_v21, 7 }
  0x82   : > { %v818_v28 = vshll.u32 %v585_v52, 16  ;;  %v470_v41 = vld [vmem:[#allocation2 + $0x54] sm:$0x1]  ;;  %v1455_v42 = vrot.slane %v1453_v35, 4  ;;  %v1458_v43 = vrot.slane %v1456_v36, 5  ;;  %v823_v44 = vshrl.u32 %v586_v11, 16 }
  0x83   : > { %v826_v19 = vshll.u32 %v586_v11, 16  ;;  %v1268_v45 = vrot.slane %v1267_v38, 4  ;;  %v1283_v46 = vsel %vm7352_vm13, %v1278_v39, %v1282_v34  ;;  %v821_v47 = vrot.slane %v817_v40, 4  ;;  %v7638_v48 = vld [vmem:[#allocation2 + $0xa0] sm:$0xf] }
  0x84   : > { %v7640_v50 = vld [vmem:[#allocation2 + $0xa4] sm:$0x1]  ;;  %v1459_v51 = vor.u32 %v1458_v43, %v1455_v42  ;;  %v820_v60 = vor.u32 %v818_v28, %v817_v40  ;;  %v825_v61 = vrot.slane %v823_v44, 7  ;;  %v471_v52 = vsel %vm7246_vm3, 0, %v470_v41  ;;  %v1008_v10 = vld [vmem:[#allocation2 + $0xa8] sm:$0xf] }
  0x85   : > { %v1273_v63 = vsel %vm7352_vm13, %v1268_v45, %v1272_v9  ;;  %v1462_v4 = vshll.u32 %v7638_v48, 16  ;;  %v1466_v7 = vshrl.u32 %v7638_v48, 16  ;;  %v1472_v8 = vshll.u32 %v7640_v50, 16  ;;  %472 = vst [vmem:[#allocation2 + $0x54] sm:$0x1] %v471_v52 }
  0x86   : > { %v6192_v11 = vcombine.low %v1273_v63, %v1283_v46  ;;  %v1460_v12 = vrot.slane %v1459_v51, 4  ;;  %v7649_v16 = vld [vmem:[#allocation2 + $0x4c] sm:$0xf]  ;;  %v828_v18 = vor.u32 %v826_v19, %v825_v61  ;;  %v830_v20 = vrot.slane %v825_v61, 4  ;;  %v526_v24 = vld [vmem:[#allocation2 + $0x5c] sm:$0x1] }
  0x87   : > { %v1012_v21 = vld [vmem:[#allocation2 + $0xb0] sm:$0x1]  ;;  %v1464_v25 = vrot.slane %v1462_v4, 5  ;;  %v1468_v26 = vrot.slane %v1466_v7, 4  ;;  %v1474_v9 = vrot.slane %v1472_v8, 5  ;;  %v1294_v13 = vshll.u32 %v7649_v16, 16 }
  0x88   : > { %v7651_v27 = vld [vmem:[#allocation2 + $0x48] sm:$0xf]  ;;  %6764 = vmatmul.mubr.msk.bf16.gmra.mxu0 %vm1574_vm12, %v6192_v11  ;;  %v7655_v34 = vld [vmem:[#allocation2 + $0x50] sm:$0x1]  ;;  %v1298_v37 = vshrl.u32 %v7649_v16, 16  ;;  %v829_v38 = vsel %vm7287_vm8, %v821_v47, %v828_v18  ;;  %v1009_v46 = vsel %vm7295_vm9, %v820_v60, %v1008_v10  ;;  %v1013_v52 = vsel %vm7246_vm3, %v830_v20, %v1012_v21 }
  0x89   : > { %v1285_v35 = vshrl.u32 %v7651_v27, 16  ;;  %v1288_v36 = vshll.u32 %v7651_v27, 16  ;;  %v1465_v39 = vsel %vm7352_vm13, %v1460_v12, %v1464_v25  ;;  %v1469_v40 = vor.u32 %v1468_v26, %v1464_v25  ;;  %1011 = vst.msk [vmem:[#allocation2 + $0xac] sm:$0xf] %vm914_vm6, %v829_v38  ;;  %v571_v42 = vld [vmem:[%s7267_s13 + $0x30] sm:$0xf] }
  0x8a   : > { %v1296_v28 = vrot.slane %v1294_v13, 5  ;;  %v1304_v41 = vshll.u32 %v7655_v34, 16  ;;  %v572_v43 = vld [vmem:[%s7267_s13 + $0x34] sm:$0xf]  ;;  %v1300_v45 = vrot.slane %v1298_v37, 4  ;;  %v527_v63 = vsel %vm7254_vm5, 0, %v526_v24 }
  0x8b   : > { %v1287_v44 = vrot.slane %v1285_v35, 4  ;;  %v1290_v19 = vrot.slane %v1288_v36, 5  ;;  %v494_v51 = vld [vmem:[#allocation2 + $0xb4] sm:$0x1]  ;;  %v1470_v47 = vrot.slane %v1469_v40, 4  ;;  %v696_v11 = vshrl.u32 %v571_v42, 16 }
  0x8c   : > { %v1306_v61 = vrot.slane %v1304_v41, 5  ;;  %1010 = vst [vmem:[#allocation2 + $0xa8] sm:$0xf] %v1009_v46  ;;  %v550_v4 = vld [vmem:[#allocation2 + $0xbc] sm:$0x1]  ;;  %v1301_v8 = vor.u32 %v1300_v45, %v1296_v28  ;;  %v699_v12 = vshll.u32 %v571_v42, 16 }
  0x8d   : > { %v1291_v7 = vor.u32 %v1290_v19, %v1287_v44  ;;  %1014 = vst [vmem:[#allocation2 + $0xb0] sm:$0x1] %v1013_v52  ;;  %528 = vst [vmem:[#allocation2 + $0x5c] sm:$0x1] %v527_v63  ;;  %v587_v18 = vld [vmem:[%s7267_s13 + $0x70] sm:$0xf]  ;;  %v1475_v60 = vsel %vm7352_vm13, %v1470_v47, %v1474_v9 }
  0x8e   : > { %v704_v10 = vshrl.u32 %v572_v43, 16  ;;  %v707_v25 = vshll.u32 %v572_v43, 16  ;;  %v495_v20 = vsel %vm7246_vm3, 0, %v494_v51  ;;  %v6200_v21 = vcombine.low %v1465_v39, %v1475_v60  ;;  %v588_v35 = vld [vmem:[%s7267_s13 + $0x74] sm:$0xf] }
  0x8f   : > { %v1292_v26 = vrot.slane %v1291_v7, 4  ;;  %v1302_v24 = vrot.slane %v1301_v8, 4  ;;  %v698_v13 = vrot.slane %v696_v11, 7  ;;  %496 = vst [vmem:[#allocation2 + $0xb4] sm:$0x1] %v495_v20  ;;  %v551_v38 = vsel %vm7254_vm5, 0, %v550_v4 }
  0x90   : > { %v706_v36 = vrot.slane %v704_v10, 7  ;;  %v959_v37 = vld [vmem:[#allocation2 + $0x54] sm:$0xf]  ;;  %v832_v40 = vshrl.u32 %v587_v18, 16  ;;  %v835_v41 = vshll.u32 %v587_v18, 16  ;;  %6780 = vmatmul.mubr.msk.bf16.gmra.mxu1 %vm1574_vm12, %v6200_v21  ;;  %v840_v4 = vshrl.u32 %v588_v35, 16 }
  0x91   : > { %v1297_v9 = vsel %vm7352_vm13, %v1292_v26, %v1296_v28  ;;  %v1307_v39 = vsel %vm7352_vm13, %v1302_v24, %v1306_v61  ;;  %v7687_v42 = vld [vmem:[#allocation2 + $0xac] sm:$0xf]  ;;  %v701_v43 = vor.u32 %v699_v12, %v698_v13  ;;  %v702_v44 = vrot.slane %v698_v13, 4  ;;  %552 = vst [vmem:[#allocation2 + $0xbc] sm:$0x1] %v551_v38 }
  0x92   : > { %10113 = vst [vmem:[#allocation7_spill] sm:$0xff] %v7687_v42  ;;  %v6193_v19 = vcombine.low %v1297_v9, %v1307_v39  ;;  %v1486_v45 = vshll.u32 %v7687_v42, 16  ;;  %v1490_v46 = vshrl.u32 %v7687_v42, 16  ;;  %v709_v51 = vor.u32 %v707_v25, %v706_v36  ;;  %v2081_v39 = vld [vmem:[#allocation2 + $0xc] sm:$0xe] }
  0x93   : > { %v7691_v47 = vld [vmem:[#allocation2 + $0xa8] sm:$0xf]  ;;  %v711_v52 = vrot.slane %v706_v36, 4  ;;  %v960_v28 = vsel %vm7295_vm9, %v701_v43, %v959_v37  ;;  %v834_v63 = vrot.slane %v832_v40, 7  ;;  %v842_v38 = vrot.slane %v840_v4, 7 }
  0x94   : > { %6767 = vmatprep.mubr.msk.bf16.mxu0 %vm1574_vm12, %v6193_v19  ;;  %v7696_v61 = vld [vmem:[#allocation2 + $0xb0] sm:$0x1]  ;;  %v1477_v7 = vshrl.u32 %v7691_v47, 16  ;;  %v1480_v8 = vshll.u32 %v7691_v47, 16  ;;  %v1488_v11 = vrot.slane %v1486_v45, 5  ;;  %v1492_v12 = vrot.slane %v1490_v46, 4 }
  0x95   : > { %961 = vst [vmem:[#allocation2 + $0x54] sm:$0xf] %v960_v28  ;;  %v1496_v18 = vshll.u32 %v7696_v61, 16  ;;  %v710_v60 = vsel %vm7287_vm8, %v702_v44, %v709_v51  ;;  %v963_v10 = vld [vmem:[#allocation2 + $0x5c] sm:$0x1]  ;;  %v837_v25 = vor.u32 %v835_v41, %v834_v63  ;;  %v838_v20 = vrot.slane %v834_v63, 4 }
  0x96   : > { %v1479_v21 = vrot.slane %v1477_v7, 4  ;;  %v1482_v26 = vrot.slane %v1480_v8, 5  ;;  %v1493_v24 = vor.u32 %v1492_v12, %v1488_v11  ;;  %962 = vst.msk [vmem:[#allocation2 + $0x58] sm:$0xf] %vm914_vm6, %v710_v60  ;;  %v964_v13 = vsel %vm7246_vm3, %v711_v52, %v963_v10  ;;  %v1015_v36 = vld [vmem:[#allocation2 + $0xb4] sm:$0xf] }
  0x97   : > { %v1498_v37 = vrot.slane %v1496_v18, 5  ;;  %965 = vst [vmem:[#allocation2 + $0x5c] sm:$0x1] %v964_v13  ;;  %v843_v40 = vshll.u32 %v588_v35, 16  ;;  %v1016_v9 = vsel %vm7295_vm9, %v837_v25, %v1015_v36  ;;  %vm2128_vm14 = vcmask 1042432  }
  0x98   : > { %v1483_v43 = vor.u32 %v1482_v26, %v1479_v21  ;;  %v1494_v41 = vrot.slane %v1493_v24, 4  ;;  %1017 = vst [vmem:[#allocation2 + $0xb4] sm:$0xf] %v1016_v9  ;;  %v1019_v44 = vld [vmem:[#allocation2 + $0xbc] sm:$0x1]  ;;  %vm2129_vm15 = vcmask 1046532  }
  0x99   : > { %v7128_v19 = vld [vmem:[#allocation2 + $0x14] sm:$0x1]  ;;  %v845_v46 = vor.u32 %v843_v40, %v842_v38  ;;  %v847_v51 = vrot.slane %v842_v38, 4  ;;  %v2080_v52 = vld [vmem:[#allocation2] sm:$0xe]  ;;  %vm7708_vm2 = vmor %vm2128_vm14, %vm2129_vm15  ;;  %v10114_v28 = vmov 0 }
  0x9a   : > { %v2143_v45 = vrot.slane %v7128_v19, 5  ;;  %v10115_v28 = vsel %vm7708_vm2, 4294967295, %v10114_v28  ;;  %v1484_v35 = vrot.slane %v1483_v43, 4  ;;  %v1499_v63 = vsel %vm7352_vm13, %v1494_v41, %v1498_v37  ;;  %v7722_v60 = vld [vmem:[#allocation2 + $0x4] sm:$0xf] }
  0x9b   : > { %10116 = vst [vmem:[#allocation8_spill] sm:$0xff] %v10115_v28  ;;  %v6252_v4 = vrot.slane %v2081_v39, 9  ;;  %v2142_v7 = vrot.slane %v2140_v32, 4  ;;  %v846_v12 = vsel %vm7287_vm8, %v838_v20, %v845_v46  ;;  %v1020_v18 = vsel %vm7246_vm3, %v847_v51, %v1019_v44  ;;  %v7130_v43 = vld [vmem:[#allocation2 + $0x8] sm:$0x1] }
  0x9c   : > { %v7716_v8 = vld [vmem:[#allocation2 + $0x54] sm:$0xf]  ;;  %v2133_v10 = vrot.slane %v7722_v60, 5  ;;  %v1489_v25 = vsel %vm7352_vm13, %v1484_v35, %v1488_v11  ;;  %1018 = vst.msk [vmem:[#allocation2 + $0xb8] sm:$0xf] %vm914_vm6, %v846_v12  ;;  %v6251_v36 = vrot.slane %v2080_v52, 9 }
  0x9d   : > { %v1309_v21 = vshrl.u32 %v7716_v8, 16  ;;  %v1312_v26 = vshll.u32 %v7716_v8, 16  ;;  %1021 = vst [vmem:[#allocation2 + $0xbc] sm:$0x1] %v1020_v18  ;;  %v7734_v20 = vsel %vm7708_vm2, %v6252_v4, %v2140_v32  ;;  %v6201_v24 = vcombine.low %v1489_v25, %v1499_v63  ;;  %v7736_v13 = vld [vmem:[#allocation2 + $0x58] sm:$0xf] }
  0x9e   : > { %v7740_v11 = vsel %vm7708_vm2, %v2142_v7, %v2143_v45  ;;  %v7742_v37 = vld [vmem:[#allocation2 + $0x5c] sm:$0x1]  ;;  %v1318_v9 = vshll.u32 %v7736_v13, 16  ;;  %v1322_v39 = vshrl.u32 %v7736_v13, 16  ;;  %v2136_v41 = vrot.slane %v7130_v43, 5 }
  0x9f   : > { %v1311_v38 = vrot.slane %v1309_v21, 4  ;;  %v1314_v40 = vrot.slane %v1312_v26, 5  ;;  %6783 = vmatprep.mubr.msk.bf16.mxu1 %vm1574_vm12, %v6201_v24  ;;  %v1328_v32 = vshll.u32 %v7742_v37, 16  ;;  %v7748_v44 = vld [vmem:[#allocation2 + $0xb4] sm:$0xf]  ;;  %v2135_v19 = vrot.slane %v2133_v10, 4 }
  0xa0   : > { %10117 = vst [vmem:[#allocation9_spill] sm:$0xff] %v7748_v44  ;;  %v1320_v51 = vrot.slane %v1318_v9, 5  ;;  %v1324_v52 = vrot.slane %v1322_v39, 4  ;;  %v1501_v35 = vshrl.u32 %v7748_v44, 16  ;;  %v2082_v63 = vld [vmem:[#allocation2 + $0x18] sm:$0xe]  ;;  %v2134_v7 = vsel %vm7708_vm2, %v6251_v36, %v2133_v10 }
  0xa1   : > { %v1315_v46 = vor.u32 %v1314_v40, %v1311_v38  ;;  %v1504_v4 = vshll.u32 %v7748_v44, 16  ;;  %v2147_v12 = vrot.slane %v7430_v58, 5  ;;  %v1330_v21 = vrot.slane %v1328_v32, 5  ;;  %v7131_v2 = vld [vmem:[#allocation2 + $0x20] sm:$0x1] }
  0xa2   : > { %v1325_v25 = vor.u32 %v1324_v52, %v1320_v51  ;;  %v1503_v26 = vrot.slane %v1501_v35, 4  ;;  %v2137_v40 = vsel %vm7708_vm2, %v2135_v19, %v2136_v41  ;;  %v6253_v9 = vrot.slane %v2082_v63, 9  ;;  %v2084_v41 = vld [vmem:[#allocation2 + $0x30] sm:$0xe] }
  0xa3   : > { %v1316_v18 = vrot.slane %v1315_v46, 4  ;;  %v7757_v24 = vld [vmem:[#allocation2 + $0xb8] sm:$0xf]  ;;  %v1506_v38 = vrot.slane %v1504_v4, 5  ;;  %v2083_v46 = vld [vmem:[#allocation2 + $0x24] sm:$0xe]  ;;  %v6268_v29 = vcombine.low %v2134_v7, %v2137_v40 }
  0xa4   : > { %v7759_v43 = vld [vmem:[#allocation2 + $0xbc] sm:$0x1]  ;;  %v1326_v58 = vrot.slane %v1325_v25, 4  ;;  %v1510_v36 = vshll.u32 %v7757_v24, 16  ;;  %v1514_v32 = vshrl.u32 %v7757_v24, 16  ;;  %v2149_v4 = vrot.slane %v2147_v12, 4 }
  0xa5   : > { %10118 = vst [vmem:[#allocation10_spill] sm:$0xff] %v7759_v43  ;;  %v1321_v10 = vsel %vm7352_vm13, %v1316_v18, %v1320_v51  ;;  %v1507_v52 = vor.u32 %v1506_v38, %v1503_v26  ;;  %v1520_v35 = vshll.u32 %v7759_v43, 16  ;;  %v2150_v45 = vrot.slane %v7131_v2, 5 }
  0xa6   : > { %v1331_v19 = vsel %vm7352_vm13, %v1326_v58, %v1330_v21  ;;  %v1512_v63 = vrot.slane %v1510_v36, 5  ;;  %v1516_v39 = vrot.slane %v1514_v32, 4  ;;  %v6254_v25 = vrot.slane %v2083_v46, 9  ;;  %v7786_v58 = vld [vmem:[#allocation2 + $0x68] sm:$0x1] }
  0xa7   : > { %v6194_v51 = vcombine.low %v1321_v10, %v1331_v19  ;;  %v1508_v18 = vrot.slane %v1507_v52, 4  ;;  %v2154_v23 = vrot.slane %v7460_v5, 5  ;;  %v1522_v3 = vrot.slane %v1520_v35, 5  ;;  %v7133_v32 = vld [vmem:[#allocation2] sm:$0xf] }
  0xa8   : > { %v1517_v6 = vor.u32 %v1516_v39, %v1512_v63  ;;  %v6255_v26 = vrot.slane %v2084_v41, 9  ;;  %v2161_v38 = vrot.slane %v7548_v1, 5  ;;  %v2157_v21 = vrot.slane %v7466_v14, 5  ;;  %v2085_v35 = vld [vmem:[#allocation2 + $0x3c] sm:$0xe] }
  0xa9   : > { %6768 = vmatmul.mubr.msk.bf16.gmra.mxu0 %vm1574_vm12, %v6194_v51  ;;  %v1513_v2 = vsel %vm7352_vm13, %v1508_v18, %v1512_v63  ;;  %v2156_v43 = vrot.slane %v2154_v23, 4  ;;  %v2164_v7 = vrot.slane %v7558_v17, 5  ;;  %v2192_v36 = vrot.slane %v7786_v58, 5  ;;  %v2087_v19 = vld [vmem:[#allocation2 + $0x54] sm:$0xe] }
  0xaa   : > { %v1518_v40 = vrot.slane %v1517_v6, 4  ;;  %6823 = vmatprep.mubr.msk.bf16.mxu0 %vm1574_vm12, %v6268_v29  ;;  %v7782_v5 = vsel %vm7708_vm2, %v6255_v26, %v2161_v38  ;;  %v2163_v39 = vrot.slane %v2161_v38, 4  ;;  %v2148_v14 = vsel %vm7708_vm2, %v6253_v9, %v2147_v12  ;;  %v7803_v9 = vld [vmem:[#allocation2 + $0x18] sm:$0xf]  ;;  %v2088_v63 = vld [vmem:[#allocation2 + $0x60] sm:$0xe] }
  0xab   : > { %v2151_v6 = vsel %vm7708_vm2, %v2149_v4, %v2150_v45  ;;  %v2168_v29 = vrot.slane %v7604_v30, 5  ;;  %v6219_v46 = vcombine.low %v7133_v32, %v7722_v60  ;;  %v3426_v12 = vsel %vm1623_vm0, %v7540_v55, 0  ;;  %v7805_v45 = vld [vmem:[#allocation2 + $0x1c] sm:$0xf]  ;;  %v2086_v60 = vld [vmem:[#allocation2 + $0x48] sm:$0xe] }
  0xac   : > { %v1523_v17 = vsel %vm7352_vm13, %v1518_v40, %v1522_v3  ;;  %v7799_v52 = vsel %vm7708_vm2, %v2163_v39, %v2164_v7  ;;  %v6221_v4 = vcombine.low %v7803_v9, %v7805_v45  ;;  %v6270_v51 = vcombine.low %v2148_v14, %v2151_v6  ;;  %v2089_v38 = vld [vmem:[#allocation2 + $0x6c] sm:$0xe]  ;;  %v7145_v45 = vld [vmem:[#allocation2 + $0x80] sm:$0x1] }
  0xad   : > { %v6202_v41 = vcombine.low %v1513_v2, %v1523_v17  ;;  %v6272_v3 = vcombine.low %v7782_v5, %v7799_v52  ;;  %v7813_v18 = vsel %vm7708_vm2, %v6254_v25, %v2154_v23  ;;  %v7817_v55 = vsel %vm7708_vm2, %v2156_v43, %v2157_v21  ;;  %v7823_v2 = vld [vmem:[%s10061_s3 + $0x18] sm:$0xf]  ;;  %v7829_v43 = vld [vmem:[#allocation2 + $0x24] sm:$0xf]  ;;  %v7831_v25 = vld [vmem:[#allocation2 + $0x28] sm:$0xf] }
  0xae   : > { %v2175_v26 = vrot.slane %v7649_v16, 5  ;;  %v6256_v7 = vrot.slane %v2085_v35, 9  ;;  %v2170_v40 = vrot.slane %v2168_v29, 4  ;;  %v2171_v39 = vrot.slane %v7612_v56, 5 }
  0xaf   : > { %6784 = vmatmul.mubr.msk.bf16.gmra.mxu1 %vm1574_vm12, %v6202_v41  ;;  %v2182_v23 = vrot.slane %v7736_v13, 5  ;;  %v6257_v14 = vrot.slane %v2086_v60, 9  ;;  %v2178_v6 = vrot.slane %v7655_v34, 5  ;;  %v6258_v17 = vrot.slane %v2087_v19, 9  ;;  %v7841_v41 = vld [vmem:[#allocation2 + $0x64] sm:$0xf] }
  0xb0   : > { %6789 = vmatprep.mubr.msk.bf16.mxu1 %vm1574_vm12, %v6219_v46  ;;  %v10119_v32 = vcombine.low %v7734_v20, %v7740_v11  ;;  %v2177_v56 = vrot.slane %v2175_v26, 4  ;;  %v2185_v46 = vrot.slane %v7742_v37, 5  ;;  %v2189_v10 = vrot.slane %v7841_v41, 5  ;;  %v7849_v11 = vld [vmem:[#allocation2 + $0x70] sm:$0xf] }
  0xb1   : > { %v2184_v35 = vrot.slane %v2182_v23, 4  ;;  %v2700_v21 = vsel %vm1623_vm0, %v7528_v49, 0  ;;  %v6271_v34 = vcombine.low %v7813_v18, %v7817_v55  ;;  %v6259_v20 = vrot.slane %v2088_v63, 9  ;;  %v7140_v55 = vld [vmem:[#allocation2 + $0x74] sm:$0x1] }
  0xb2   : > { %6824 = vmatmul.mubr.msk.bf16.vlgmr.msra.gmra.mxu0 %vm1574_vm12, %v10119_v32  ;;  %v2196_v60 = vrot.slane %v7849_v11, 5  ;;  %v7854_v37 = vsel %vm7708_vm2, %v6256_v7, %v2168_v29  ;;  %v7858_v19 = vsel %vm7708_vm2, %v2170_v40, %v2171_v39  ;;  %v2191_v49 = vrot.slane %v2189_v10, 4  ;;  %v2090_v29 = vld [vmem:[#allocation2 + $0x78] sm:$0xe] }
  0xb3   : > { %6890 = vmatpush3.bf16.msra.mxu0 %v3426_v12  ;;  %6827 = vmatprep.mubr.msk.bf16.mxu0 %vm1574_vm12, %v6270_v51  ;;  %v6260_v12 = vrot.slane %v2089_v38, 9  ;;  %v2199_v32 = vrot.slane %v7140_v55, 5  ;;  %v7868_v7 = vsel %vm7708_vm2, %v6257_v14, %v2175_v26  ;;  %v7872_v38 = vsel %vm7708_vm2, %v2177_v56, %v2178_v6  ;;  %v7884_v51 = vld [vmem:[#allocation2 + $0x60] sm:$0xf]  ;;  %v7901_v6 = vld [vmem:[%s10061_s3 + $0x14] sm:$0xf] }
  0xb4   : > { %7068 = vmatprep.subr.msk.bf16.mxu0 %vm1623_vm0, %v7823_v2  ;;  %v2198_v18 = vrot.slane %v2196_v60, 4  ;;  %v7876_v40 = vsel %vm7708_vm2, %v6258_v17, %v2182_v23  ;;  %v7880_v39 = vsel %vm7708_vm2, %v2184_v35, %v2185_v46  ;;  %v6273_v55 = vcombine.low %v7854_v37, %v7858_v19  ;;  %v7915_v56 = vld [vmem:[#allocation2 + $0x7c] sm:$0xf]  ;;  %v2895_v26 = vld [vmem:[#allocation2 + $0xc] sm:$0xf] }
  0xb5   : > { %v7890_v14 = vsel %vm7708_vm2, %v6259_v20, %v2189_v10  ;;  %v7896_v23 = vsel %vm7708_vm2, %v2191_v49, %v2192_v36  ;;  %v10120_v17 = vcombine.low %v7356_v57, %v7358_v0  ;;  %v7909_v10 = vsel %vm7708_vm2, %v6260_v12, %v2196_v60  ;;  %v2093_v46 = vld [vmem:[#allocation2 + $0x9c] sm:$0xe]  ;;  %v7926_v20 = vld [vmem:[#allocation2 + $0x6c] sm:$0xf]  ;;  %v7933_v49 = vld [vmem:[#allocation2 + $0x78] sm:$0xf] }
  0xb6   : > { %v7913_v58 = vsel %vm7708_vm2, %v2198_v18, %v2199_v32  ;;  %v6261_v36 = vrot.slane %v2090_v29, 9  ;;  %v2203_v35 = vrot.slane %v7915_v56, 5  ;;  %v6274_v57 = vcombine.low %v7868_v7, %v7872_v38  ;;  %v2091_v12 = vld [vmem:[#allocation2 + $0x84] sm:$0xe]  ;;  %v2094_v32 = vld [vmem:[#allocation2 + $0xa8] sm:$0xe] }
  0xb7   : > { %6790 = vmatmul.mubr.msk.bf16.vlgmr.msra.gmra.mxu1 %vm1574_vm12, %v10120_v17  ;;  %v7947_v29 = vld [vmem:[#allocation2 + $0x84] sm:$0xf]  ;;  %v2210_v38 = vrot.slane %v7496_v15, 5  ;;  %v7952_v17 = vld [vmem:[#allocation2 + $0x90] sm:$0xe]  ;;  %v2224_v52 = vrot.slane %v7638_v48, 5  ;;  %v10121_v60 = vcombine.low %v7829_v43, %v7831_v25 }
  0xb8   : > { %6856 = vmatpush3.bf16.msra.mxu1 %v2700_v21  ;;  %6793 = vmatprep.mubr.msk.bf16.mxu1 %vm1574_vm12, %v6221_v4  ;;  %v2206_v4 = vrot.slane %v7145_v45, 5  ;;  %v6264_v45 = vrot.slane %v2093_v46, 9  ;;  %v7956_v18 = vsel %vm7708_vm2, %v6261_v36, %v2203_v35  ;;  %v2205_v5 = vrot.slane %v2203_v35, 4  ;;  %v7147_v21 = vld [vmem:[#allocation2 + $0x8c] sm:$0x1] }
  0xb9   : > { %7067 = vmatprep.subr.msk.bf16.mxu1 %vm1623_vm0, %v7901_v6  ;;  %v6262_v9 = vrot.slane %v2091_v12, 9  ;;  %v2231_v7 = vrot.slane %v7687_v42, 5  ;;  %v2213_v0 = vrot.slane %v7147_v21, 5  ;;  %v2217_v46 = vrot.slane %v7564_v33, 5 }
  0xba   : > { %6828 = vmatmul.mubr.msk.bf16.gmra.mxu0 %vm1574_vm12, %v6271_v34  ;;  %v6265_v34 = vrot.slane %v2094_v32, 9  ;;  %v7966_v36 = vsel %vm7708_vm2, %v6264_v45, %v2224_v52  ;;  %v2226_v35 = vrot.slane %v2224_v52, 4  ;;  %v2212_v63 = vrot.slane %v2210_v38, 4 }
  0xbb   : > { %6831 = vmatprep.mubr.msk.bf16.mxu0 %vm1574_vm12, %v6272_v3  ;;  %v2227_v3 = vrot.slane %v7640_v50, 5  ;;  %v2233_v12 = vrot.slane %v2231_v7, 4  ;;  %v2234_v32 = vrot.slane %v7696_v61, 5  ;;  %v7979_v21 = vsel %vm7708_vm2, %v2205_v5, %v2206_v4  ;;  %v2095_v5 = vld [vmem:[#allocation2 + $0xb4] sm:$0xe] }
  0xbc   : > { %v7970_v50 = vsel %vm7708_vm2, %v6265_v34, %v2231_v7  ;;  %v6263_v45 = vrot.slane %v7952_v17, 9  ;;  %v7988_v7 = vld [vmem:[#allocation2 + $0x10] sm:$0xf]  ;;  %v10123_v61 = vcombine.low %v7542_v59, %v7548_v1  ;;  %v2220_v43 = vrot.slane %v7568_v22, 5  ;;  %v2898_v17 = vld [vmem:[#allocation2 + $0x18] sm:$0xf] }
  0xbd   : > { %v7984_v52 = vsel %vm7708_vm2, %v2226_v35, %v2227_v3  ;;  %10122 = vst [vmem:[#allocation11_spill] sm:$0xff] %v7988_v7  ;;  %v2944_v4 = vshrl.u32 %v2895_v26, 16  ;;  %v8007_v59 = vsel %vm7708_vm2, %v6262_v9, %v2210_v38  ;;  %v2219_v1 = vrot.slane %v2217_v46, 4  ;;  %v8011_v3 = vld [vmem:[#allocation2 + $0x14] sm:$0x1] }
  0xbe   : > { %v2947_v35 = vshll.u32 %v2895_v26, 16  ;;  %v2953_v19 = vshll.u32 %v7988_v7, 16  ;;  %v8020_v9 = vld [vmem:[#allocation2 + $0x1c] sm:$0xf]  ;;  %v2238_v38 = vrot.slane %v7757_v24, 5  ;;  %v2971_v34 = vshll.u32 %v2898_v17, 16 }
  0xbf   : > { %6794 = vmatmul.mubr.msk.bf16.gmra.mxu1 %vm1574_vm12, %v10121_v60  ;;  %v7999_v60 = vsel %vm7708_vm2, %v2233_v12, %v2234_v32  ;;  %v8016_v12 = vsel %vm7708_vm2, %v2212_v63, %v2213_v0  ;;  %v2946_v37 = vrot.slane %v2944_v4, 4  ;;  %10124 = vst [vmem:[#allocation12_spill] sm:$0xff] %v8020_v9  ;;  %v6266_v22 = vrot.slane %v2095_v5, 9  ;;  %v2900_v0 = vld [vmem:[#allocation2 + $0x20] sm:$0x1] }
  0xc0   : > { %6797 = vmatprep.mubr.msk.bf16.mxu1 %vm1574_vm12, %v10123_v61  ;;  %v2949_v32 = vrot.slane %v2947_v35, 5  ;;  %v2968_v61 = vshrl.u32 %v2898_v17, 16  ;;  %v8023_v26 = vrot.slane %v2953_v19, 5  ;;  %v2963_v25 = vshll.u32 %v8011_v3, 16  ;;  %v2901_v19 = vld [vmem:[#allocation2 + $0x24] sm:$0xf] }
  0xc1   : > { %v2973_v44 = vrot.slane %v2971_v34, 5  ;;  %v2977_v42 = vshll.u32 %v8020_v9, 16  ;;  %v2981_v5 = vshrl.u32 %v8020_v9, 16  ;;  %v8041_v34 = vsel %vm7708_vm2, %v6263_v45, %v2217_v46 }
  0xc2   : > { %6832 = vmatmul.mubr.msk.bf16.gmra.mxu0 %vm1574_vm12, %v6273_v55  ;;  %v2957_v55 = vshrl.u32 %v7988_v7, 16  ;;  %v2950_v63 = vor.u32 %v2949_v32, %v2946_v37  ;;  %v2970_v4 = vrot.slane %v2968_v61, 4  ;;  %v10125_v37 = vcombine.low %v7610_v54, %v7604_v30  ;;  %v10126_v61 = vld [vmem:[#allocation10_spill] sm:$0xff] }
  0xc3   : > { %6835 = vmatprep.mubr.msk.bf16.mxu0 %vm1574_vm12, %v6274_v57  ;;  %v2240_v32 = vrot.slane %v2238_v38, 4  ;;  %v2241_v7 = vrot.slane %v10126_v61, 5  ;;  %v8044_v35 = vrot.slane %v2977_v42, 5  ;;  %v2983_v54 = vrot.slane %v2981_v5, 4  ;;  %v2904_v61 = vld [vmem:[#allocation2 + $0x30] sm:$0xf] }
  0xc4   : > { %v2959_v57 = vrot.slane %v2957_v55, 4  ;;  %v8033_v55 = vld [vmem:[#allocation2 + $0x28] sm:$0xf]  ;;  %v2951_v30 = vrot.slane %v2950_v63, 4  ;;  %v10128_v46 = vcombine.low %v7876_v40, %v7880_v39  ;;  %v8058_v42 = vsel %vm7708_vm2, %v2219_v1, %v2220_v43  ;;  %v8090_v5 = vld [vmem:[#allocation2 + $0x40] sm:$0xf] }
  0xc5   : > { %v2974_v45 = vor.u32 %v2973_v44, %v2970_v4  ;;  %v10130_v63 = vcombine.low %v7890_v14, %v7896_v23  ;;  %v2984_v39 = vor.u32 %v2983_v54, %v8044_v35  ;;  %v2992_v43 = vshrl.u32 %v2901_v19, 16  ;;  %v2907_v23 = vld [vmem:[#allocation2 + $0x3c] sm:$0xf] }
  0xc6   : > { %v2960_v17 = vor.u32 %v2959_v57, %v8023_v26  ;;  %v10127_v57 = vcombine.low %v7651_v27, %v7649_v16  ;;  %v8062_v16 = vsel %vm7708_vm2, %v6266_v22, %v2238_v38  ;;  %v2965_v27 = vrot.slane %v2963_v25, 5 }
  0xc7   : > { %6798 = vmatmul.mubr.msk.bf16.gmra.mxu1 %vm1574_vm12, %v10125_v37  ;;  %v2987_v37 = vshll.u32 %v2900_v0, 16  ;;  %v8071_v0 = vld [vmem:[#allocation2 + $0x2c] sm:$0x1]  ;;  %v2995_v1 = vshll.u32 %v2901_v19, 16  ;;  %v8075_v22 = vsel %vm7708_vm2, %v2240_v32, %v2241_v7  ;;  %v8079_v44 = vsel %vm1623_vm0, %v7901_v6, 0 }
  0xc8   : > { %6801 = vmatprep.mubr.msk.bf16.mxu1 %vm1574_vm12, %v10127_v57  ;;  %v8064_v57 = vld [vmem:[#allocation2 + $0x34] sm:$0xf]  ;;  %v2961_v40 = vrot.slane %v2960_v17, 4  ;;  %v3001_v25 = vshll.u32 %v8033_v55, 16  ;;  %v3005_v14 = vshrl.u32 %v8033_v55, 16  ;;  %v2956_v38 = vsel %vm7352_vm13, %v2951_v30, %v8023_v26 }
  0xc9   : > { %10129 = vst [vmem:[#allocation10_spill] sm:$0xff] %v8064_v57  ;;  %v2989_v4 = vrot.slane %v2987_v37, 5  ;;  %v8088_v17 = vsel %vm1623_vm0, %v7823_v2, 0  ;;  %v3016_v7 = vshrl.u32 %v2904_v61, 16  ;;  %v2975_v19 = vrot.slane %v2974_v45, 4 }
  0xca   : > { %6836 = vmatmul.mubr.msk.bf16.gmra.mxu0 %vm1574_vm12, %v10128_v46  ;;  %v3019_v6 = vshll.u32 %v2904_v61, 16  ;;  %v3025_v32 = vshll.u32 %v8064_v57, 16  ;;  %v3029_v54 = vshrl.u32 %v8064_v57, 16  ;;  %v2966_v46 = vsel %vm7352_vm13, %v2961_v40, %v2965_v27  ;;  %v8103_v61 = vld [vmem:[#allocation2 + $0x38] sm:$0x1] }
  0xcb   : > { %6839 = vmatprep.mubr.msk.bf16.mxu0 %vm1574_vm12, %v10130_v63  ;;  %v2985_v63 = vrot.slane %v2984_v39, 4  ;;  %v2994_v9 = vrot.slane %v2992_v43, 4  ;;  %v2997_v26 = vrot.slane %v2995_v1, 5  ;;  %v10131_v30 = vcombine.low %v7716_v8, %v7736_v13  ;;  %v2910_v13 = vld [vmem:[#allocation2 + $0x48] sm:$0xf] }
  0xcc   : > { %v8100_v2 = vrot.slane %v3001_v25, 5  ;;  %v3007_v37 = vrot.slane %v3005_v14, 4  ;;  %v3011_v45 = vshll.u32 %v8071_v0, 16  ;;  %v3018_v28 = vrot.slane %v3016_v7, 4 }
  0xcd   : > { %v10132_v57 = vcombine.low %v7884_v51, %v7841_v41  ;;  %v3021_v27 = vrot.slane %v3019_v6, 5  ;;  %v8109_v40 = vrot.slane %v3025_v32, 5  ;;  %v3031_v39 = vrot.slane %v3029_v54, 4  ;;  %v2913_v54 = vld [vmem:[#allocation2 + $0x54] sm:$0xf] }
  0xce   : > { %v3040_v8 = vshrl.u32 %v2907_v23, 16  ;;  %v10133_v43 = vcombine.low %v7909_v10, %v7913_v58  ;;  %v6280_v1 = vcombine.low %v8041_v34, %v8058_v42  ;;  %v6283_v25 = vcombine.low %v8062_v16, %v8075_v22  ;;  %v8131_v34 = vld [vmem:[#allocation2 + $0x44] sm:$0x1]  ;;  %v8273_v16 = vld [vmem:[#allocation2 + $0x80] sm:$0x1] }
  0xcf   : > { %6802 = vmatmul.mubr.msk.bf16.gmra.mxu1 %vm1574_vm12, %v10131_v30  ;;  %v3043_v41 = vshll.u32 %v2907_v23, 16  ;;  %v3049_v51 = vshll.u32 %v8090_v5, 16  ;;  %v8124_v14 = vcombine.low %v2956_v38, %v2966_v46  ;;  %v2980_v10 = vsel %vm7352_vm13, %v2975_v19, %v8044_v35  ;;  %10148 = vst [vmem:[#allocation15_spill] sm:$0xff] %v8273_v16 }
  0xd0   : > { %6805 = vmatprep.mubr.msk.bf16.mxu1 %vm1574_vm12, %v10132_v57  ;;  %v10134_v57 = vcombine.low %v7956_v18, %v7979_v21  ;;  %v2990_v58 = vsel %vm7352_vm13, %v2985_v63, %v2989_v4  ;;  %v3042_v42 = vrot.slane %v3040_v8, 4  ;;  %v2998_v23 = vor.u32 %v2997_v26, %v2994_v9  ;;  %v8136_v21 = vld [vmem:[#allocation2 + $0x4c] sm:$0xf]  ;;  %v8147_v8 = vld [vmem:[#allocation2 + $0x58] sm:$0xf] }
  0xd1   : > { %v3008_v7 = vor.u32 %v3007_v37, %v8100_v2  ;;  %v8134_v6 = vrot.slane %v3011_v45, 5  ;;  %v3045_v18 = vrot.slane %v3043_v41, 5  ;;  %v3035_v38 = vshll.u32 %v8103_v61, 16 }
  0xd2   : > { %6840 = vmatmul.mubr.msk.bf16.gmra.mxu0 %vm1574_vm12, %v10133_v43  ;;  %v8139_v32 = vrot.slane %v3049_v51, 5  ;;  %v3053_v35 = vshrl.u32 %v8090_v5, 16  ;;  %v3064_v19 = vshrl.u32 %v2910_v13, 16  ;;  %v8142_v4 = vcombine.low %v2980_v10, %v2990_v58 }
  0xd3   : > { %6843 = vmatprep.mubr.msk.bf16.mxu0 %vm1574_vm12, %v10134_v57  ;;  %v3022_v46 = vor.u32 %v3021_v27, %v3018_v28  ;;  %v3032_v9 = vor.u32 %v3031_v39, %v8109_v40  ;;  %v3067_v63 = vshll.u32 %v2910_v13, 16  ;;  %v3046_v26 = vor.u32 %v3045_v18, %v3042_v42  ;;  %v2916_v27 = vld [vmem:[#allocation2 + $0x60] sm:$0xf] }
  0xd4   : > { %v3055_v30 = vrot.slane %v3053_v35, 4  ;;  %v3059_v37 = vshll.u32 %v8131_v34, 16  ;;  %v3073_v45 = vshll.u32 %v8136_v21, 16  ;;  %v10135_v43 = vcombine.low %v7926_v20, %v7849_v11 }
  0xd5   : > { %v2999_v41 = vrot.slane %v2998_v23, 4  ;;  %v3009_v51 = vrot.slane %v3008_v7, 4  ;;  %v3066_v57 = vrot.slane %v3064_v19, 4  ;;  %v3069_v28 = vrot.slane %v3067_v63, 5  ;;  %v8163_v7 = vld [vmem:[#allocation2 + $0x50] sm:$0x1] }
  0xd6   : > { %v10136_v39 = vcombine.low %v7933_v49, %v7915_v56  ;;  %v3037_v13 = vrot.slane %v3035_v38, 5  ;;  %v3056_v10 = vor.u32 %v3055_v30, %v8139_v32  ;;  %v3077_v58 = vshrl.u32 %v8136_v21, 16  ;;  %v8169_v63 = vld [vmem:[#allocation2 + $0x5c] sm:$0x1] }
  0xd7   : > { %6806 = vmatmul.mubr.msk.bf16.gmra.mxu1 %vm1574_vm12, %v10135_v43  ;;  %v3088_v42 = vshrl.u32 %v2913_v54, 16  ;;  %v10137_v11 = vcombine.low %v8007_v59, %v8016_v12  ;;  %v3023_v20 = vrot.slane %v3022_v46, 4  ;;  %v3033_v23 = vrot.slane %v3032_v9, 4  ;;  %v8172_v9 = vld [vmem:[#allocation2 + $0x64] sm:$0xf] }
  0xd8   : > { %6809 = vmatprep.mubr.msk.bf16.mxu1 %vm1574_vm12, %v10136_v39  ;;  %v3091_v18 = vshll.u32 %v2913_v54, 16  ;;  %v3097_v56 = vshll.u32 %v8147_v8, 16  ;;  %v3047_v49 = vrot.slane %v3046_v26, 4  ;;  %v3061_v38 = vrot.slane %v3059_v37, 5  ;;  %v2919_v39 = vld [vmem:[#allocation2 + $0x6c] sm:$0xf] }
  0xd9   : > { %v8167_v35 = vrot.slane %v3073_v45, 5  ;;  %v3079_v19 = vrot.slane %v3077_v58, 4  ;;  %v3057_v30 = vrot.slane %v3056_v10, 4  ;;  %v3070_v59 = vor.u32 %v3069_v28, %v3066_v57 }
  0xda   : > { %6844 = vmatmul.mubr.msk.bf16.gmra.mxu0 %vm1574_vm12, %v10137_v11  ;;  %v3090_v12 = vrot.slane %v3088_v42, 4  ;;  %v3101_v46 = vshrl.u32 %v8147_v8, 16  ;;  %v3004_v54 = vsel %vm7352_vm13, %v2999_v41, %v8100_v2  ;;  %v3093_v26 = vrot.slane %v3091_v18, 5  ;;  %v8199_v11 = vld [vmem:[#allocation2 + $0x70] sm:$0xf] }
  0xdb   : > { %6847 = vmatprep.mubr.msk.bf16.mxu0 %vm1574_vm12, %v6280_v1  ;;  %v3014_v1 = vsel %vm7352_vm13, %v3009_v51, %v8134_v6  ;;  %v3112_v37 = vshrl.u32 %v2916_v27, 16  ;;  %v3028_v45 = vsel %vm7352_vm13, %v3023_v20, %v8109_v40  ;;  %v3038_v43 = vsel %vm7352_vm13, %v3033_v23, %v3037_v13 }
  0xdc   : > { %v8185_v57 = vrot.slane %v3097_v56, 5  ;;  %v3103_v28 = vrot.slane %v3101_v46, 4  ;;  %v3080_v10 = vor.u32 %v3079_v19, %v8167_v35  ;;  %v3083_v2 = vshll.u32 %v8163_v7, 16 }
  0xdd   : > { %v3114_v41 = vrot.slane %v3112_v37, 4  ;;  %v3115_v58 = vshll.u32 %v2916_v27, 16  ;;  %v10138_v6 = vcombine.low %v7947_v29, %v7496_v15  ;;  %v3052_v40 = vsel %vm7352_vm13, %v3047_v49, %v8139_v32 }
  0xde   : > { %v3062_v51 = vsel %vm7352_vm13, %v3057_v30, %v3061_v38  ;;  %v3071_v13 = vrot.slane %v3070_v59, 4  ;;  %v3107_v42 = vshll.u32 %v8169_v63, 16  ;;  %v10139_v27 = vcombine.low %v7562_v31, %v7564_v33  ;;  %v8216_v31 = vld [vmem:[#allocation2 + $0x68] sm:$0x1]  ;;  %v2922_v59 = vld [vmem:[#allocation2 + $0x78] sm:$0xf] }
  0xdf   : > { %6810 = vmatmul.mubr.msk.bf16.gmra.mxu1 %vm1574_vm12, %v10138_v6  ;;  %v3094_v15 = vor.u32 %v3093_v26, %v3090_v12  ;;  %v3117_v29 = vrot.slane %v3115_v58, 5  ;;  %v3121_v20 = vshll.u32 %v8172_v9, 16  ;;  %v3125_v23 = vshrl.u32 %v8172_v9, 16 }
  0xe0   : > { %6813 = vmatprep.mubr.msk.bf16.mxu1 %vm1574_vm12, %v10139_v27  ;;  %v10140_v32 = vcombine.low %v7966_v36, %v7984_v52  ;;  %v8211_v18 = vcombine.low %v3004_v54, %v3014_v1  ;;  %v8213_v56 = vcombine.low %v3028_v45, %v3038_v43  ;;  %v3104_v49 = vor.u32 %v3103_v28, %v8185_v57  ;;  %v8231_v45 = vld [vmem:[#allocation2 + $0x7c] sm:$0xf]  ;;  %v8233_v28 = vld [vmem:[#allocation2 + $0x74] sm:$0x1] }
  0xe1   : > { %v3136_v33 = vshrl.u32 %v2919_v39, 16  ;;  %v10141_v38 = vcombine.low %v7970_v50, %v7999_v60  ;;  %v8222_v19 = vcombine.low %v3052_v40, %v3062_v51  ;;  %v3081_v30 = vrot.slane %v3080_v10, 4  ;;  %10142 = vst [vmem:[#allocation13_spill] sm:$0xff] %v8231_v45  ;;  %10143 = vst [vmem:[#allocation14_spill] sm:$0xff] %v8233_v28 }
  0xe2   : > { %6848 = vmatmul.mubr.msk.bf16.gmra.mxu0 %vm1574_vm12, %v10140_v32  ;;  %v3085_v36 = vrot.slane %v3083_v2, 5  ;;  %v3118_v52 = vor.u32 %v3117_v29, %v3114_v41  ;;  %v3076_v12 = vsel %vm7352_vm13, %v3071_v13, %v8167_v35  ;;  %v3139_v46 = vshll.u32 %v2919_v39, 16  ;;  %v10145_v29 = vld [vmem:[#allocation7_spill] sm:$0xff] }
  0xe3   : > { %6851 = vmatprep.mubr.msk.bf16.mxu0 %vm1574_vm12, %v10141_v38  ;;  %v3145_v54 = vshll.u32 %v8199_v11, 16  ;;  %v3149_v1 = vshrl.u32 %v8199_v11, 16  ;;  %v3095_v26 = vrot.slane %v3094_v15, 4  ;;  %v3109_v37 = vrot.slane %v3107_v42, 5  ;;  %v2925_v15 = vld [vmem:[#allocation2 + $0x84] sm:$0xf] }
  0xe4   : > { %v8229_v50 = vrot.slane %v3121_v20, 5  ;;  %v3127_v60 = vrot.slane %v3125_v23, 4  ;;  %v3105_v43 = vrot.slane %v3104_v49, 4  ;;  %v3138_v10 = vrot.slane %v3136_v33, 4 }
  0xe5   : > { %v3141_v2 = vrot.slane %v3139_v46, 5  ;;  %v3160_v41 = vshrl.u32 %v2922_v59, 16  ;;  %v3086_v35 = vsel %vm7352_vm13, %v3081_v30, %v3085_v36  ;;  %v8237_v39 = vrot.slane %v3118_v52, 4 }
  0xe6   : > { %v3131_v58 = vshll.u32 %v8216_v31, 16  ;;  %v3163_v6 = vshll.u32 %v2922_v59, 16  ;;  %v10144_v40 = vcombine.low %v7627_v62, %v7638_v48  ;;  %v8244_v51 = vrot.slane %v3145_v54, 5  ;;  %v8254_v48 = vld [vmem:[#allocation2 + $0x88] sm:$0xf] }
  0xe7   : > { %v3151_v13 = vrot.slane %v3149_v1, 4  ;;  %v3162_v42 = vrot.slane %v3160_v41, 4  ;;  %v3169_v27 = vshll.u32 %v8231_v45, 16  ;;  %v10146_v20 = vcombine.low %v7691_v47, %v10145_v29  ;;  %10147 = vst [vmem:[#allocation7_spill] sm:$0xff] %v8254_v48  ;;  %v2928_v1 = vld [vmem:[#allocation2 + $0x90] sm:$0xf] }
  0xe8   : > { %6814 = vmatmul.mubr.msk.bf16.gmra.mxu1 %vm1574_vm12, %v10144_v40  ;;  %v3128_v23 = vor.u32 %v3127_v60, %v8229_v50  ;;  %v3155_v32 = vshll.u32 %v8233_v28, 16  ;;  %v3165_v49 = vrot.slane %v3163_v6, 5  ;;  %v3173_v62 = vshrl.u32 %v8231_v45, 16  ;;  %v589_v28 = vld [vmem:[%s7267_s13 + $0x78] sm:$0xf] }
  0xe9   : > { %6817 = vmatprep.mubr.msk.bf16.mxu1 %vm1574_vm12, %v10146_v20  ;;  %v3100_v47 = vsel %vm7352_vm13, %v3095_v26, %v8185_v57  ;;  %v3110_v33 = vsel %vm7352_vm13, %v3105_v43, %v3109_v37  ;;  %v3142_v38 = vor.u32 %v3141_v2, %v3138_v10  ;;  %v8265_v30 = vrot.slane %v3169_v27, 5  ;;  %v7096_v26 = vld [vmem:[#allocation2 + $0xc] sm:$0xff]   ;;  %v8287_v43 = vld [vmem:[#allocation2 + $0x94] sm:$0xf]  ;;  %v2931_v27 = vld [vmem:[#allocation2 + $0x9c] sm:$0xf] }
  0xea   : > { %6852 = vmatmul.mubr.msk.bf16.gmra.mxu0 %vm1574_vm12, %v6283_v25  ;;  %v8269_v36 = vcombine.low %v3076_v12, %v3086_v35  ;;  %v8271_v52 = vrot.slane %v3131_v58, 5  ;;  %v3175_v22 = vrot.slane %v3173_v62, 4  ;;  %v3184_v25 = vshrl.u32 %v2925_v15, 16  ;;  %10149 = vst [vmem:[#allocation16_spill] sm:$0xff] %v8287_v43  ;;  %v8293_v35 = vld [vmem:[#allocation2 + $0x8c] sm:$0x1] }
  0xeb   : > { %6891 = vmatprep.mubr.msk.bf16.mxu0 %vm1574_vm12, %v8124_v14  ;;  %v3152_v59 = vor.u32 %v3151_v13, %v8244_v51  ;;  %v3166_v57 = vor.u32 %v3165_v49, %v3162_v42  ;;  %v3187_v46 = vshll.u32 %v2925_v15, 16  ;;  %v3193_v54 = vshll.u32 %v8254_v48, 16  ;;  %10150 = vst [vmem:[#allocation17_spill] sm:$0xff] %v8293_v35  ;;  %v10151_v15 = vld [vmem:[#allocation9_spill] sm:$0xff]  ;;  %v8307_v62 = vld [vmem:[#allocation2 + $0xa0] sm:$0xf] }
  0xec   : > { %v8277_v37 = vcombine.low %v3100_v47, %v3110_v33  ;;  %v8283_v12 = vrot.slane %v3128_v23, 4  ;;  %v8285_v60 = vrot.slane %v3155_v32, 5  ;;  %v8289_v10 = vrot.slane %v3142_v38, 4  ;;  %10153 = vst [vmem:[#allocation9_spill] sm:$0xff] %v8307_v62 }
  0xed   : > { %v3176_v2 = vor.u32 %v3175_v22, %v8265_v30  ;;  %v3179_v41 = vshll.u32 %v8273_v16, 16  ;;  %v3197_v58 = vshrl.u32 %v8254_v48, 16  ;;  %v3186_v6 = vrot.slane %v3184_v25, 4  ;;  %v8356_v25 = vld [vmem:[#allocation2 + $0xac] sm:$0xf] }
  0xee   : > { %v3189_v40 = vrot.slane %v3187_v46, 5  ;;  %v3208_v13 = vshrl.u32 %v2928_v1, 16  ;;  %v3211_v42 = vshll.u32 %v2928_v1, 16  ;;  %v10152_v29 = vcombine.low %v10151_v15, %v7757_v24  ;;  %v8314_v24 = vld [vmem:[%s10061_s3 + $0x20] sm:$0xf]  ;;  %10157 = vst [vmem:[#allocation21_spill] sm:$0xff] %v8356_v25 }
  0xef   : > { %v8300_v20 = vrot.slane %v3152_v59, 4  ;;  %v8302_v23 = vrot.slane %v3166_v57, 4  ;;  %v8304_v32 = vrot.slane %v3193_v54, 5  ;;  %v3217_v49 = vshll.u32 %v8287_v43, 16  ;;  %10154 = vst [vmem:[#allocation18_spill] sm:$0xff] %v8314_v24 }
  0xf0   : > { %6818 = vmatmul.mubr.msk.bf16.gmra.mxu1 %vm1574_vm12, %v10152_v29  ;;  %v3199_v47 = vrot.slane %v3197_v58, 4  ;;  %v3210_v33 = vrot.slane %v3208_v13, 4  ;;  %v3213_v38 = vrot.slane %v3211_v42, 5  ;;  %v3221_v22 = vshrl.u32 %v8287_v43, 16  ;;  %v8330_v1 = vld [vmem:[#allocation2 + $0x98] sm:$0x1] }
  0xf1   : > { %6857 = vmatprep.mubr.msk.bf16.mxu1 %vm1574_vm12, %v7096_v26  ;;  %v8322_v59 = vrot.slane %v3176_v2, 4  ;;  %v8324_v57 = vrot.slane %v3179_v41, 5  ;;  %v3203_v46 = vshll.u32 %v8293_v35, 16  ;;  %v3190_v54 = vor.u32 %v3189_v40, %v3186_v6  ;;  %10155 = vst [vmem:[#allocation19_spill] sm:$0xff] %v8330_v1  ;;  %v7097_v13 = vld [vmem:[#allocation2 + $0x18] sm:$0xff]   ;;  %v7098_v6 = vld [vmem:[#allocation2 + $0x24] sm:$0xff]  }
  0xf2   : > { %6892 = vmatmul.mubr.msk.bf16.vlgmr.msra.gmra.mxu0 %vm1574_vm12, %v8142_v4  ;;  %v8332_v4 = vrot.slane %v3217_v49, 5  ;;  %v3223_v26 = vrot.slane %v3221_v22, 4  ;;  %v3232_v58 = vshrl.u32 %v2931_v27, 16  ;;  %v3235_v41 = vshll.u32 %v2931_v27, 16  ;;  %v8350_v29 = vld [vmem:[#allocation2 + $0xa4] sm:$0x1] }
  0xf3   : > { %6958 = vmatpush3.bf16.msra.mxu0 %v8088_v17  ;;  %6895 = vmatprep.mubr.msk.bf16.mxu0 %vm1574_vm12, %v8211_v18  ;;  %v3241_v18 = vshll.u32 %v8307_v62, 16  ;;  %v3200_v42 = vor.u32 %v3199_v47, %v8304_v32  ;;  %v3214_v15 = vor.u32 %v3213_v38, %v3210_v33  ;;  %10156 = vst [vmem:[#allocation20_spill] sm:$0xff] %v8350_v29  ;;  %v2934_v22 = vld [vmem:[#allocation2 + $0xa8] sm:$0xf]  ;;  %v3227_v27 = vshll.u32 %v8330_v1, 16 }
  0xf4   : > { %7070 = vmatprep.subr.msk.bf16.mxu0 %vm1623_vm0, %v8314_v24  ;;  %v3234_v49 = vrot.slane %v3232_v58, 4  ;;  %v3237_v2 = vrot.slane %v3235_v41, 5  ;;  %v3245_v14 = vshrl.u32 %v8307_v62, 16  ;;  %v8362_v47 = vrot.slane %v3190_v54, 4  ;;  %v8370_v58 = vld [vmem:[%s10061_s3 + $0x1c] sm:$0xf] }
  0xf5   : > { %v8353_v17 = vrot.slane %v3241_v18, 5  ;;  %v8364_v33 = vrot.slane %v3203_v46, 5  ;;  %v3224_v38 = vor.u32 %v3223_v26, %v8332_v4  ;;  %10158 = vst [vmem:[#allocation22_spill] sm:$0xff] %v8370_v58  ;;  %v3251_v18 = vshll.u32 %v8350_v29, 16  ;;  %v8374_v24 = vld [vmem:[#allocation2 + $0xb0] sm:$0x1] }
  0xf6   : > { %v3247_v41 = vrot.slane %v3245_v14, 4  ;;  %10159 = vst [vmem:[#allocation23_spill] sm:$0xff] %v8374_v24  ;;  %v3256_v62 = vshrl.u32 %v2934_v22, 16  ;;  %v3259_v40 = vshll.u32 %v2934_v22, 16  ;;  %v8378_v46 = vrot.slane %v3200_v42, 4 }
  0xf7   : > { %v3238_v54 = vor.u32 %v3237_v2, %v3234_v49  ;;  %v3265_v26 = vshll.u32 %v8356_v25, 16  ;;  %v3269_v1 = vshrl.u32 %v8356_v25, 16  ;;  %v2937_v43 = vld [vmem:[#allocation2 + $0xb4] sm:$0xf]  ;;  %v8384_v14 = vrot.slane %v3214_v15, 4  ;;  %v7100_v49 = vld [vmem:[#allocation2 + $0x3c] sm:$0xff]  }
  0xf8   : > { %6858 = vmatmul.mubr.msk.bf16.vlgmr.msra.gmra.mxu1 %vm1574_vm12, %v7097_v13  ;;  %v8386_v13 = vrot.slane %v3227_v27, 5  ;;  %v3248_v22 = vor.u32 %v3247_v41, %v8353_v17  ;;  %v8389_v29 = vld [vmem:[#allocation2 + $0xb8] sm:$0xf]  ;;  %v3261_v2 = vrot.slane %v3259_v40, 5  ;;  %v7099_v15 = vld [vmem:[#allocation2 + $0x30] sm:$0xff]   ;;  %v3225_v27 = vrot.slane %v3224_v38, 4 }
  0xf9   : > { %6924 = vmatpush3.bf16.msra.mxu1 %v8079_v44  ;;  %6861 = vmatprep.mubr.msk.bf16.mxu1 %vm1574_vm12, %v7098_v6  ;;  %v3258_v44 = vrot.slane %v3256_v62, 4  ;;  %10160 = vst [vmem:[#allocation24_spill] sm:$0xff] %v8389_v29  ;;  %v8395_v6 = vrot.slane %v3265_v26, 5  ;;  %v3271_v42 = vrot.slane %v3269_v1, 4  ;;  %v3253_v41 = vrot.slane %v3251_v18, 5 }
  0xfa   : > { %6896 = vmatmul.mubr.msk.bf16.gmra.mxu0 %vm1574_vm12, %v8213_v56  ;;  %7069 = vmatprep.subr.msk.bf16.mxu1 %vm1623_vm0, %v8370_v58  ;;  %v3275_v56 = vshll.u32 %v8374_v24, 16  ;;  %v3280_v62 = vshrl.u32 %v2937_v43, 16  ;;  %v3283_v25 = vshll.u32 %v2937_v43, 16  ;;  %v3239_v35 = vrot.slane %v3238_v54, 4  ;;  %v8399_v16 = vld [vmem:[#allocation2 + $0xbc] sm:$0x1] }
  0xfb   : > { %6899 = vmatprep.mubr.msk.bf16.mxu0 %vm1574_vm12, %v8222_v19  ;;  %v3262_v48 = vor.u32 %v3261_v2, %v3258_v44  ;;  %v3272_v58 = vor.u32 %v3271_v42, %v8395_v6  ;;  %v3289_v19 = vshll.u32 %v8389_v29, 16  ;;  %v497_v40 = vld [vmem:[#allocation2 + $0xc0] sm:$0x1]  ;;  %v3249_v1 = vrot.slane %v3248_v22, 4  ;;  %v590_v44 = vld [vmem:[%s7267_s13 + $0x7c] sm:$0xf] }
  0xfc   : > { %v3282_v26 = vrot.slane %v3280_v62, 4  ;;  %v3285_v24 = vrot.slane %v3283_v25, 5  ;;  %v3293_v45 = vshrl.u32 %v8389_v29, 16  ;;  %v3196_v43 = vsel %vm7352_vm13, %v8362_v47, %v8304_v32  ;;  %v553_v29 = vld [vmem:[#allocation2 + $0xc8] sm:$0x1] }
  0xfd   : > { %v3263_v38 = vrot.slane %v3262_v48, 4  ;;  %v3273_v18 = vrot.slane %v3272_v58, 4  ;;  %v3277_v54 = vrot.slane %v3275_v56, 5  ;;  %v8410_v42 = vrot.slane %v3289_v19, 5 }
  0xfe   : > { %v3286_v2 = vor.u32 %v3285_v24, %v3282_v26  ;;  %v3295_v22 = vrot.slane %v3293_v45, 4  ;;  %v498_v25 = vsel %vm7246_vm3, 0, %v497_v40  ;;  %v3206_v48 = vsel %vm7352_vm13, %v8378_v46, %v8364_v33 }
  0xff   : > { %v3220_v32 = vsel %vm7352_vm13, %v8384_v14, %v8332_v4  ;;  %499 = vst [vmem:[#allocation2 + $0xc0] sm:$0x1] %v498_v25  ;;  %v849_v24 = vshrl.u32 %v589_v28, 16  ;;  %v852_v47 = vshll.u32 %v589_v28, 16  ;;  %v3230_v45 = vsel %vm7352_vm13, %v3225_v27, %v8386_v13 }
 0x100   : > { %6862 = vmatmul.mubr.msk.bf16.gmra.mxu1 %vm1574_vm12, %v7099_v15  ;;  %v3244_v58 = vsel %vm7352_vm13, %v3239_v35, %v8353_v17  ;;  %v3254_v33 = vsel %vm7352_vm13, %v3249_v1, %v3253_v41  ;;  %v3299_v46 = vshll.u32 %v8399_v16, 16  ;;  %v857_v4 = vshrl.u32 %v590_v44, 16  ;;  %v7101_v15 = vld [vmem:[#allocation2 + $0x48] sm:$0xff]  }
 0x101   : > { %6865 = vmatprep.mubr.msk.bf16.mxu1 %vm1574_vm12, %v7100_v49  ;;  %v851_v28 = vrot.slane %v849_v24, 7  ;;  %v860_v14 = vshll.u32 %v590_v44, 16  ;;  %v554_v56 = vsel %vm7254_vm5, 0, %v553_v29  ;;  %v3268_v13 = vsel %vm7352_vm13, %v3263_v38, %v8395_v6 }
 0x102   : > { %6900 = vmatmul.mubr.msk.bf16.gmra.mxu0 %vm1574_vm12, %v8269_v36  ;;  %v3278_v35 = vsel %vm7352_vm13, %v3273_v18, %v3277_v54  ;;  %v8443_v17 = vrot.slane %v3286_v2, 4  ;;  %v3296_v49 = vor.u32 %v3295_v22, %v8410_v42  ;;  %555 = vst [vmem:[#allocation2 + $0xc8] sm:$0x1] %v554_v56  ;;  %v859_v19 = vrot.slane %v857_v4, 7  ;;  %v3623_v54 = vld [vmem:[#allocation2 + $0x24] sm:$0xe] }
 0x103   : > { %6903 = vmatprep.mubr.msk.bf16.mxu0 %vm1574_vm12, %v8277_v37  ;;  %v7102_v37 = vld [vmem:[#allocation2 + $0x54] sm:$0xff]   ;;  %v854_v27 = vor.u32 %v852_v47, %v851_v28  ;;  %v855_v41 = vrot.slane %v851_v28, 4  ;;  %v10163_v29 = vsel %vm7352_vm13, %v8283_v12, %v8271_v52  ;;  %v10164_v6 = vsel %vm7352_vm13, %v8237_v39, %v8229_v50  ;;  %v3626_v28 = vld [vmem:[#allocation2 + $0x48] sm:$0xe] }
 0x104   : > { %v6341_v40 = vcombine.low %v10164_v6, %v10163_v29  ;;  %v10165_v1 = vsel %vm7352_vm13, %v8300_v20, %v8285_v60  ;;  %v10166_v26 = vsel %vm7352_vm13, %v8289_v10, %v8244_v51  ;;  %v10167_v52 = vsel %vm7352_vm13, %v8322_v59, %v8324_v57  ;;  %v8480_v60 = vld [vmem:[#allocation2 + $0xc] sm:$0xe]  ;;  %v3624_v59 = vld [vmem:[#allocation2 + $0x30] sm:$0xe]  ;;  %v3625_v57 = vld [vmem:[#allocation2 + $0x3c] sm:$0xe] }
 0x105   : > { %v6342_v38 = vcombine.low %v10166_v26, %v10165_v1  ;;  %v10168_v50 = vsel %vm7352_vm13, %v8302_v23, %v8265_v30  ;;  %v8478_v12 = vcombine.low %v3196_v43, %v3206_v48  ;;  %v8482_v20 = vcombine.low %v3220_v32, %v3230_v45  ;;  %v10171_v47 = vld [vmem:[#allocation11_spill] sm:$0xff]  ;;  %v10172_v56 = vld [vmem:[#allocation10_spill] sm:$0xff] }
 0x106   : > { %v8476_v39 = vcombine.low %v10168_v50, %v10167_v52  ;;  %v8484_v51 = vcombine.low %v3244_v58, %v3254_v33  ;;  %v8486_v10 = vcombine.low %v3268_v13, %v3278_v35  ;;  %v862_v18 = vor.u32 %v860_v14, %v859_v19  ;;  %v1022_v2 = vld [vmem:[#allocation2 + $0xc0] sm:$0xf]  ;;  %v3627_v52 = vld [vmem:[#allocation2 + $0x54] sm:$0xe] }
 0x107   : > { %v3292_v30 = vsel %vm7352_vm13, %v8443_v17, %v8410_v42  ;;  %v3297_v23 = vrot.slane %v3296_v49, 4  ;;  %v3301_v43 = vrot.slane %v3299_v46, 5  ;;  %v864_v44 = vrot.slane %v859_v19, 4  ;;  %v7103_v17 = vld [vmem:[#allocation2 + $0x60] sm:$0xff]   ;;  %v10187_v22 = vld [vmem:[#allocation18_spill] sm:$0xff] }
 0x108   : > { %6866 = vmatmul.mubr.msk.bf16.gmra.mxu1 %vm1574_vm12, %v7101_v15  ;;  %v863_v25 = vsel %vm7287_vm8, %v855_v41, %v862_v18  ;;  %v1023_v32 = vsel %vm7295_vm9, %v854_v27, %v1022_v2  ;;  %v6366_v24 = vrot.slane %v8480_v60, 9  ;;  %v3687_v45 = vrot.slane %v10171_v47, 5  ;;  %v7104_v41 = vld [vmem:[#allocation2 + $0x6c] sm:$0xff]  }
 0x109   : > { %6869 = vmatprep.mubr.msk.bf16.mxu1 %vm1574_vm12, %v7102_v37  ;;  %1024 = vst [vmem:[#allocation2 + $0xc0] sm:$0xf] %v1023_v32  ;;  %1025 = vst.msk [vmem:[#allocation2 + $0xc4] sm:$0xf] %vm914_vm6, %v863_v25  ;;  %v3690_v42 = vrot.slane %v8011_v3, 5  ;;  %v6368_v58 = vrot.slane %v3623_v54, 9  ;;  %v3302_v49 = vsel %vm7352_vm13, %v3297_v23, %v3301_v43 }
 0x10a   : > { %6904 = vmatmul.mubr.msk.bf16.gmra.mxu0 %vm1574_vm12, %v6341_v40  ;;  %v3701_v33 = vrot.slane %v8033_v55, 5  ;;  %v3704_v46 = vrot.slane %v8071_v0, 5  ;;  %v1026_v4 = vld [vmem:[#allocation2 + $0xc8] sm:$0x1]  ;;  %v6369_v14 = vrot.slane %v3624_v59, 9  ;;  %v3708_v15 = vrot.slane %v10172_v56, 5 }
 0x10b   : > { %6907 = vmatprep.mubr.msk.bf16.mxu0 %vm1574_vm12, %v6342_v38  ;;  %v3711_v13 = vrot.slane %v8103_v61, 5  ;;  %v6370_v35 = vrot.slane %v3625_v57, 9  ;;  %v1027_v37 = vsel %vm7246_vm3, %v864_v44, %v1026_v4  ;;  %v8518_v19 = vrot.slane %v3687_v45, 4  ;;  %v3628_v23 = vld [vmem:[#allocation2 + $0x60] sm:$0xe]  ;;  %v7105_v32 = vld [vmem:[#allocation2 + $0x78] sm:$0xff]  }
 0x10c   : > { %v8514_v0 = vsel %vm7708_vm2, %v6368_v58, %v3701_v33  ;;  %v3703_v27 = vrot.slane %v3701_v33, 4  ;;  %1028 = vst [vmem:[#allocation2 + $0xc8] sm:$0x1] %v1027_v37  ;;  %v8522_v61 = vsel %vm7708_vm2, %v6369_v14, %v3708_v15  ;;  %v3710_v29 = vrot.slane %v3708_v15, 4  ;;  %v10174_v43 = vld [vmem:[#allocation12_spill] sm:$0xff] }
 0x10d   : > { %v3715_v6 = vrot.slane %v8090_v5, 5  ;;  %v3718_v1 = vrot.slane %v8131_v34, 5  ;;  %v6371_v26 = vrot.slane %v3626_v28, 9  ;;  %v3722_v38 = vrot.slane %v8136_v21, 5  ;;  %v3629_v14 = vld [vmem:[#allocation2 + $0x6c] sm:$0xe] }
 0x10e   : > { %v8527_v40 = vsel %vm7708_vm2, %v3703_v27, %v3704_v46  ;;  %v8535_v18 = vsel %vm7708_vm2, %v3710_v29, %v3711_v13  ;;  %v8542_v59 = vcombine.low %v3292_v30, %v3302_v49  ;;  %v3725_v57 = vrot.slane %v8163_v7, 5  ;;  %v7106_v37 = vld [vmem:[#allocation2 + $0x84] sm:$0xff]  }
 0x10f   : > { %v6385_v50 = vcombine.low %v8514_v0, %v8527_v40  ;;  %v8539_v5 = vsel %vm7708_vm2, %v6370_v35, %v3715_v6  ;;  %v3717_v54 = vrot.slane %v3715_v6, 4  ;;  %v6386_v34 = vcombine.low %v8522_v61, %v8535_v18  ;;  %v5176_v0 = vld [vmem:[#allocation2 + $0x18] sm:$0xe] }
 0x110   : > { %6870 = vmatmul.mubr.msk.bf16.gmra.mxu1 %vm1574_vm12, %v7103_v17  ;;  %v3724_v21 = vrot.slane %v3722_v38, 4  ;;  %v3694_v44 = vrot.slane %v10174_v43, 5  ;;  %v8555_v25 = vsel %vm7708_vm2, %v6371_v26, %v3722_v38  ;;  %v6372_v30 = vrot.slane %v3627_v52, 9  ;;  %v2940_v58 = vld [vmem:[#allocation2 + $0xc0] sm:$0xf] }
 0x111   : > { %6873 = vmatprep.mubr.msk.bf16.mxu1 %vm1574_vm12, %v7104_v41  ;;  %v8551_v2 = vsel %vm7708_vm2, %v3717_v54, %v3718_v1  ;;  %v8559_v7 = vld [vmem:[#allocation2 + $0xc4] sm:$0xf]  ;;  %v3729_v28 = vrot.slane %v8147_v8, 5  ;;  %v3732_v4 = vrot.slane %v8169_v63, 5  ;;  %v3304_v56 = vshrl.u32 %v2940_v58, 16 }
 0x112   : > { %6908 = vmatmul.mubr.msk.bf16.gmra.mxu0 %vm1574_vm12, %v8476_v39  ;;  %v8565_v46 = vsel %vm7708_vm2, %v3724_v21, %v3725_v57  ;;  %v3307_v39 = vshll.u32 %v2940_v58, 16  ;;  %v3313_v15 = vshll.u32 %v8559_v7, 16  ;;  %v3317_v13 = vshrl.u32 %v8559_v7, 16  ;;  %v3630_v52 = vld [vmem:[#allocation2 + $0x78] sm:$0xe] }
 0x113   : > { %6911 = vmatprep.mubr.msk.bf16.mxu0 %vm1574_vm12, %v8478_v12  ;;  %v8573_v35 = vld [vmem:[#allocation2 + $0xc8] sm:$0x1]  ;;  %v8579_v8 = vsel %vm7708_vm2, %v6372_v30, %v3729_v28  ;;  %v3731_v63 = vrot.slane %v3729_v28, 4  ;;  %v6373_v49 = vrot.slane %v3628_v23, 9  ;;  %v3306_v27 = vrot.slane %v3304_v56, 4  ;;  %v10175_v56 = vld [vmem:[#allocation14_spill] sm:$0xff] }
 0x114   : > { %v3309_v12 = vrot.slane %v3307_v39, 5  ;;  %v3315_v41 = vrot.slane %v3313_v15, 5  ;;  %v3319_v29 = vrot.slane %v3317_v13, 4  ;;  %v3323_v6 = vshll.u32 %v8573_v35, 16  ;;  %v556_v57 = vld [vmem:[#allocation2 + $0xd4] sm:$0x1] }
 0x115   : > { %v8584_v1 = vsel %vm7708_vm2, %v3731_v63, %v3732_v4  ;;  %v3736_v26 = vrot.slane %v8172_v9, 5  ;;  %v3739_v38 = vrot.slane %v8216_v31, 5  ;;  %v6374_v23 = vrot.slane %v3629_v14, 9 }
 0x116   : > { %v3310_v54 = vor.u32 %v3309_v12, %v3306_v27  ;;  %v3320_v21 = vor.u32 %v3319_v29, %v3315_v41  ;;  %v3325_v30 = vrot.slane %v3323_v6, 5  ;;  %v3743_v4 = vrot.slane %v8199_v11, 5  ;;  %v10176_v11 = vld [vmem:[#allocation13_spill] sm:$0xff]  ;;  %v10177_v12 = vld [vmem:[#allocation15_spill] sm:$0xff]  ;;  %v3632_v6 = vld [vmem:[#allocation2 + $0x90] sm:$0xe] }
 0x117   : > { %v8593_v58 = vsel %vm7708_vm2, %v6373_v49, %v3736_v26  ;;  %v3738_v28 = vrot.slane %v3736_v26, 4  ;;  %v3746_v39 = vrot.slane %v10175_v56, 5  ;;  %v6375_v15 = vrot.slane %v3630_v52, 9  ;;  %v3631_v49 = vld [vmem:[#allocation2 + $0x84] sm:$0xe]  ;;  %v7107_v26 = vld [vmem:[#allocation2 + $0x90] sm:$0xff]  }
 0x118   : > { %6874 = vmatmul.mubr.msk.bf16.gmra.mxu1 %vm1574_vm12, %v7105_v32  ;;  %v3311_v9 = vrot.slane %v3310_v54, 4  ;;  %v3321_v31 = vrot.slane %v3320_v21, 4  ;;  %v8606_v14 = vsel %vm7708_vm2, %v6374_v23, %v3743_v4  ;;  %v3745_v13 = vrot.slane %v3743_v4, 4  ;;  %v3633_v54 = vld [vmem:[#allocation2 + $0x9c] sm:$0xe] }
 0x119   : > { %6877 = vmatprep.mubr.msk.bf16.mxu1 %vm1574_vm12, %v7106_v37  ;;  %v8602_v32 = vsel %vm7708_vm2, %v3738_v28, %v3739_v38  ;;  %v3750_v63 = vrot.slane %v10176_v11, 5  ;;  %v3753_v29 = vrot.slane %v10177_v12, 5  ;;  %v7108_v21 = vld [vmem:[#allocation2 + $0x9c] sm:$0xff]   ;;  %v3635_v23 = vld [vmem:[#allocation2 + $0xb4] sm:$0xe]  ;;  %v3795_v17 = vrot.slane %v8573_v35, 5 }
 0x11a   : > { %6912 = vmatmul.mubr.msk.bf16.gmra.mxu0 %vm1574_vm12, %v8482_v20  ;;  %v3316_v37 = vsel %vm7352_vm13, %v3311_v9, %v3315_v41  ;;  %v3326_v20 = vsel %vm7352_vm13, %v3321_v31, %v3325_v30  ;;  %v8622_v52 = vsel %vm7708_vm2, %v3745_v13, %v3746_v39  ;;  %v6376_v30 = vrot.slane %v3631_v49, 9  ;;  %v10178_v28 = vld [vmem:[#allocation7_spill] sm:$0xff]  ;;  %v10179_v9 = vld [vmem:[#allocation17_spill] sm:$0xff]  ;;  %v10180_v13 = vld [vmem:[#allocation16_spill] sm:$0xff] }
 0x11b   : > { %6915 = vmatprep.mubr.msk.bf16.mxu0 %vm1574_vm12, %v8484_v51  ;;  %v8618_v38 = vcombine.low %v3316_v37, %v3326_v20  ;;  %v8626_v51 = vsel %vm7708_vm2, %v6375_v15, %v3750_v63  ;;  %v3752_v41 = vrot.slane %v3750_v63, 4  ;;  %v3757_v4 = vrot.slane %v10178_v28, 5  ;;  %v10181_v11 = vld [vmem:[#allocation19_spill] sm:$0xff]  ;;  %v3634_v37 = vld [vmem:[#allocation2 + $0xa8] sm:$0xe] }
 0x11c   : > { %v3760_v31 = vrot.slane %v10179_v9, 5  ;;  %v6377_v39 = vrot.slane %v3632_v6, 9  ;;  %v3764_v15 = vrot.slane %v10180_v13, 5  ;;  %v3767_v63 = vrot.slane %v10181_v11, 5  ;;  %v10183_v13 = vld [vmem:[#allocation20_spill] sm:$0xff] }
 0x11d   : > { %v8634_v56 = vsel %vm7708_vm2, %v3752_v41, %v3753_v29  ;;  %v8642_v49 = vsel %vm7708_vm2, %v6376_v30, %v3757_v4  ;;  %v3759_v12 = vrot.slane %v3757_v4, 4  ;;  %v6378_v28 = vrot.slane %v3633_v54, 9  ;;  %v10182_v41 = vld [vmem:[#allocation9_spill] sm:$0xff] }
 0x11e   : > { %v8647_v29 = vsel %vm7708_vm2, %v6377_v39, %v3764_v15  ;;  %v3766_v6 = vrot.slane %v3764_v15, 4  ;;  %v3771_v9 = vrot.slane %v10182_v41, 5  ;;  %v3774_v11 = vrot.slane %v10183_v13, 5  ;;  %v10184_v30 = vld [vmem:[#allocation21_spill] sm:$0xff]  ;;  %v10185_v39 = vld [vmem:[#allocation23_spill] sm:$0xff] }
 0x11f   : > { %v6379_v54 = vrot.slane %v3634_v37, 9  ;;  %v3778_v4 = vrot.slane %v10184_v30, 5  ;;  %v3781_v15 = vrot.slane %v10185_v39, 5  ;;  %v3636_v41 = vld [vmem:[#allocation2 + $0xc0] sm:$0xe]  ;;  %v6380_v30 = vrot.slane %v3635_v23, 9 }
 0x120   : > { %6878 = vmatmul.mubr.msk.bf16.gmra.mxu1 %vm1574_vm12, %v7107_v26  ;;  %v8659_v26 = vsel %vm7708_vm2, %v3759_v12, %v3760_v31  ;;  %v8669_v20 = vsel %vm7708_vm2, %v3766_v6, %v3767_v63  ;;  %v3773_v31 = vrot.slane %v3771_v9, 4  ;;  %v500_v39 = vld [vmem:[#allocation2 + $0xcc] sm:$0x1]  ;;  %v1058_v63 = vld [vmem:[%s423_s17] sm:$0xf]  ;;  %v6381_v27 = vrot.slane %v3636_v41, 9 }
 0x121   : > { %6881 = vmatprep.mubr.msk.bf16.mxu1 %vm1574_vm12, %v7108_v21  ;;  %v8673_v21 = vsel %vm7708_vm2, %v6378_v28, %v3771_v9  ;;  %v3780_v12 = vrot.slane %v3778_v4, 4  ;;  %v7109_v6 = vld [vmem:[#allocation2 + $0xa8] sm:$0xff]   ;;  %v10186_v9 = vld [vmem:[#allocation24_spill] sm:$0xff]  ;;  %v7110_v37 = vld [vmem:[#allocation2 + $0xb4] sm:$0xff]   ;;  %v557_v35 = vsel %vm7254_vm5, 0, %v556_v57  ;;  %v3696_v60 = vrot.slane %v3694_v44, 4 }
 0x122   : > { %6916 = vmatmul.mubr.msk.bf16.gmra.mxu0 %vm1574_vm12, %v8486_v10  ;;  %v8681_v10 = vsel %vm7708_vm2, %v6379_v54, %v3778_v4  ;;  %v8685_v28 = vsel %vm7708_vm2, %v3773_v31, %v3774_v11  ;;  %v3785_v13 = vrot.slane %v10186_v9, 5  ;;  %v3792_v4 = vrot.slane %v8559_v7, 5  ;;  %v1059_v11 = vld [vmem:[%s423_s17 + $0x4] sm:$0xf]  ;;  %v7112_v54 = vld [vmem:[#allocation2 + $0x18] sm:$0xff]  }
 0x123   : > { %6919 = vmatprep.mubr.msk.bf16.mxu0 %vm1574_vm12, %v8542_v59  ;;  %v3788_v59 = vrot.slane %v8399_v16, 5  ;;  %v8693_v23 = vsel %vm7708_vm2, %v3780_v12, %v3781_v15  ;;  %v501_v9 = vsel %vm7246_vm3, 0, %v500_v39  ;;  %v1061_v12 = vshrl.u32 %v1058_v63, 16  ;;  %v3622_v31 = vld [vmem:[#allocation2 + $0x18] sm:$0xe] }
 0x124   : > { %v8701_v16 = vsel %vm7708_vm2, %v6380_v30, %v3785_v13  ;;  %v3787_v41 = vrot.slane %v3785_v13, 4  ;;  %v8707_v15 = vsel %vm7708_vm2, %v6381_v27, %v3792_v4  ;;  %v3794_v7 = vrot.slane %v3792_v4, 4  ;;  %502 = vst [vmem:[#allocation2 + $0xcc] sm:$0x1] %v501_v9  ;;  %558 = vst [vmem:[#allocation2 + $0xd4] sm:$0x1] %v557_v35 }
 0x125   : > { %v1064_v30 = vshll.u32 %v1058_v63, 16  ;;  %v1069_v39 = vshrl.u32 %v1059_v11, 16  ;;  %v1072_v33 = vshll.u32 %v1059_v11, 16  ;;  %v1063_v57 = vrot.slane %v1061_v12, 7  ;;  %v7111_v4 = vld [vmem:[#allocation2 + $0xc0] sm:$0xff]  }
 0x126   : > { %v8714_v13 = vsel %vm7708_vm2, %v3787_v41, %v3788_v59  ;;  %v8721_v36 = vsel %vm7708_vm2, %v3794_v7, %v3795_v17  ;;  %v3688_v63 = vsel %vm7708_vm2, %v6366_v24, %v3687_v45  ;;  %v7148_v24 = vld [vmem:[#allocation2 + $0x20] sm:$0x1]  ;;  %v7113_v9 = vld [vmem:[#allocation2 + $0x24] sm:$0xff]   ;;  %v7114_v7 = vld [vmem:[#allocation2 + $0x30] sm:$0xff]   ;;  %v5451_v12 = vsel %vm1623_vm0, %v10187_v22, 0 }
 0x127   : > { %v1066_v59 = vor.u32 %v1064_v30, %v1063_v57  ;;  %v1067_v47 = vrot.slane %v1063_v57, 4  ;;  %v3697_v45 = vrot.slane %v7148_v24, 5  ;;  %v4450_v30 = vld [vmem:[#allocation2 + $0x18] sm:$0xf]  ;;  %v7116_v24 = vld [vmem:[#allocation2 + $0x48] sm:$0xff]  }
 0x128   : > { %6882 = vmatmul.mubr.msk.bf16.gmra.mxu1 %vm1574_vm12, %v7109_v6  ;;  %v1071_v6 = vrot.slane %v1069_v39, 7  ;;  %v8758_v39 = vld [vmem:[#allocation2 + $0x1c] sm:$0xf]  ;;  %v4499_v57 = vshrl.u32 %v4450_v30, 16  ;;  %v4456_v22 = vld [vmem:[#allocation2 + $0x30] sm:$0xf] }
 0x129   : > { %6885 = vmatprep.mubr.msk.bf16.mxu1 %vm1574_vm12, %v7110_v37  ;;  %v3691_v37 = vsel %vm7708_vm2, %v8518_v19, %v3690_v42  ;;  %v3698_v35 = vsel %vm7708_vm2, %v3696_v60, %v3697_v45  ;;  %v4512_v62 = vshrl.u32 %v8758_v39, 16  ;;  %v5242_v40 = vrot.slane %v8758_v39, 5  ;;  %v7121_v17 = vld [vmem:[#allocation2 + $0x84] sm:$0xff]  }
 0x12a   : > { %6920 = vmatmul.mubr.msk.bf16.gmra.mxu0 %vm1574_vm12, %v8618_v38  ;;  %v6367_v38 = vrot.slane %v3622_v31, 9  ;;  %v1074_v3 = vor.u32 %v1072_v33, %v1071_v6  ;;  %v1076_v11 = vrot.slane %v1071_v6, 4  ;;  %v6383_v41 = vcombine.low %v3688_v63, %v3691_v37  ;;  %v8764_v6 = vld [vmem:[#allocation2 + $0x28] sm:$0xf] }
 0x12b   : > { %6959 = vmatprep.mubr.msk.bf16.mxu0 %vm1574_vm12, %v7112_v54  ;;  %v1081_v19 = vld [vmem:[#allocation2 + $0xcc] sm:$0xf]  ;;  %v1085_v31 = vld [vmem:[#allocation2 + $0xd4] sm:$0x1]  ;;  %v4502_v63 = vshll.u32 %v4450_v30, 16  ;;  %v4508_v37 = vshll.u32 %v8758_v39, 16  ;;  %v8795_v39 = vpop.f32.mrf.mxu1 }
 0x12c   : > { %v1075_v42 = vsel %vm7287_vm8, %v1067_v47, %v1074_v3  ;;  %v1082_v54 = vsel %vm7295_vm9, %v1066_v59, %v1081_v19  ;;  %v3695_v33 = vsel %vm7708_vm2, %v6367_v38, %v3694_v44  ;;  %v1086_v48 = vsel %vm7246_vm3, %v1076_v11, %v1085_v31  ;;  %v4453_v44 = vld [vmem:[#allocation2 + $0x24] sm:$0xf]  ;;  %v10188_v38 = vld [vmem:[#allocation22_spill] sm:$0xff]  ;;  %v7115_v47 = vld [vmem:[#allocation2 + $0x3c] sm:$0xff]   ;;  %10190 = vst [vmem:[#allocation4_spill] sm:$0xff] %v8795_v39 }
 0x12d   : > { %1084 = vst.msk [vmem:[#allocation2 + $0xd0] sm:$0xf] %vm914_vm6, %v1075_v42  ;;  %1083 = vst [vmem:[#allocation2 + $0xcc] sm:$0xf] %v1082_v54  ;;  %v6384_v43 = vcombine.low %v3695_v33, %v3698_v35  ;;  %v4981_v59 = vsel %vm1623_vm0, %v10188_v38, 0  ;;  %v4526_v60 = vshll.u32 %v4453_v44, 16 }
 0x12e   : > { %1087 = vst [vmem:[#allocation2 + $0xd4] sm:$0x1] %v1086_v48  ;;  %v4532_v45 = vshll.u32 %v8764_v6, 16  ;;  %v4536_v3 = vshrl.u32 %v8764_v6, 16  ;;  %v4501_v11 = vrot.slane %v4499_v57, 4  ;;  %v4514_v42 = vrot.slane %v4512_v62, 4 }
 0x12f   : > { %v4452_v19 = vld [vmem:[#allocation2 + $0x20] sm:$0x1]  ;;  %v4528_v31 = vrot.slane %v4526_v60, 5  ;;  %v8788_v62 = vld [vmem:[#allocation2 + $0x34] sm:$0xf]  ;;  %v4547_v38 = vshrl.u32 %v4456_v22, 16 }
 0x130   : > { %6886 = vmatmul.mubr.msk.bf16.gmra.mxu1 %vm1574_vm12, %v7111_v4  ;;  %v4523_v4 = vshrl.u32 %v4453_v44, 16  ;;  %v8781_v33 = vrot.slane %v4532_v45, 5  ;;  %v4538_v35 = vrot.slane %v4536_v3, 4  ;;  %v4518_v30 = vshll.u32 %v4452_v19, 16 }
 0x131   : > { %6925 = vmatprep.mubr.msk.bf16.mxu1 %vm1574_vm12, %v6383_v41  ;;  %v4504_v41 = vrot.slane %v4502_v63, 5  ;;  %v5249_v44 = vrot.slane %v8764_v6, 5  ;;  %v5245_v60 = vrot.slane %v4452_v19, 5 }
 0x132   : > { %6960 = vmatmul.mubr.msk.bf16.vlgmr.msra.gmra.mxu0 %vm1574_vm12, %v7113_v9  ;;  %v8771_v9 = vrot.slane %v4508_v37, 5  ;;  %v4525_v54 = vrot.slane %v4523_v4, 4  ;;  %v5177_v37 = vld [vmem:[#allocation2 + $0x24] sm:$0xe]  ;;  %v6481_v4 = vrot.slane %v5176_v0, 9 }
 0x133   : > { %7026 = vmatpush3.bf16.msra.mxu0 %v5451_v12  ;;  %6963 = vmatprep.mubr.msk.bf16.mxu0 %vm1574_vm12, %v7114_v7  ;;  %v8778_v7 = vpop.f32.mrf.mxu0  ;;  %v4505_v12 = vor.u32 %v4504_v41, %v4501_v11  ;;  %v4520_v11 = vrot.slane %v4518_v30, 5  ;;  %v5244_v41 = vrot.slane %v5242_v40, 4  ;;  %v6482_v19 = vrot.slane %v5177_v37, 9  ;;  %v8808_v30 = vpop.f32.mrf.mxu1 }
 0x134   : > { %v4515_v48 = vor.u32 %v4514_v42, %v8771_v9  ;;  %v4529_v63 = vor.u32 %v4528_v31, %v4525_v54  ;;  %v10191_v42 = vcombine.low %v8539_v5, %v8551_v2  ;;  %v5251_v54 = vrot.slane %v5249_v44, 4  ;;  %10193 = vst [vmem:[#allocation6_spill] sm:$0xff] %v8808_v30 }
 0x135   : > { %v8786_v57 = vpop.f32.mrf.mxu0  ;;  %v4506_v6 = vrot.slane %v4505_v12, 4  ;;  %v4560_v12 = vshrl.u32 %v8788_v62, 16  ;;  %v5256_v2 = vrot.slane %v8788_v62, 5  ;;  %v8821_v37 = vsel %vm7708_vm2, %v5244_v41, %v5245_v60  ;;  %v4458_v60 = vld [vmem:[#allocation2 + $0x38] sm:$0x1] }
 0x136   : > { %10189 = vst [vmem:[#allocation3_spill] sm:$0xff] %v8786_v57  ;;  %v4516_v3 = vrot.slane %v4515_v48, 4  ;;  %v4530_v18 = vrot.slane %v4529_v63, 4  ;;  %v10201_v30 = vcombine.low %v8593_v58, %v8602_v32 }
 0x137   : > { %v8803_v61 = vpop.f32.mrf.mxu0  ;;  %v4511_v0 = vsel %vm7352_vm13, %v4506_v6, %v8771_v9  ;;  %v4459_v9 = vld [vmem:[#allocation2 + $0x3c] sm:$0xf]  ;;  %v5258_v41 = vrot.slane %v5256_v2, 4 }
 0x138   : > { %6926 = vmatmul.mubr.msk.bf16.vlgmr.msra.gmra.mxu1 %vm1574_vm12, %v6384_v43  ;;  %v7117_v43 = vld [vmem:[#allocation2 + $0x54] sm:$0xff]   ;;  %10192 = vst [vmem:[#allocation5_spill] sm:$0xff] %v8803_v61  ;;  %v4521_v63 = vsel %vm7352_vm13, %v4516_v3, %v4520_v11 }
 0x139   : > { %6992 = vmatpush3.bf16.msra.mxu1 %v4981_v59  ;;  %6929 = vmatprep.mubr.msk.bf16.mxu1 %vm1574_vm12, %v6385_v50  ;;  %v4455_v50 = vld [vmem:[#allocation2 + $0x2c] sm:$0x1]  ;;  %v4550_v59 = vshll.u32 %v4456_v22, 16  ;;  %v7120_v6 = vld [vmem:[#allocation2 + $0x78] sm:$0xff]  }
 0x13a   : > { %6964 = vmatmul.mubr.msk.bf16.gmra.mxu0 %vm1574_vm12, %v7115_v47  ;;  %v7118_v47 = vld [vmem:[#allocation2 + $0x60] sm:$0xff]   ;;  %v4542_v45 = vshll.u32 %v4455_v50, 16  ;;  %v5252_v31 = vrot.slane %v4455_v50, 5  ;;  %v8815_v50 = vsel %vm7708_vm2, %v6481_v4, %v5242_v40  ;;  %v7119_v40 = vld [vmem:[#allocation2 + $0x6c] sm:$0xff]   ;;  %v4535_v4 = vsel %vm7352_vm13, %v4530_v18, %v8781_v33 }
 0x13b   : > { %6967 = vmatprep.mubr.msk.bf16.mxu0 %vm1574_vm12, %v7116_v24  ;;  %v4539_v24 = vor.u32 %v4538_v35, %v8781_v33  ;;  %v4556_v35 = vshll.u32 %v8788_v62, 16  ;;  %v4552_v22 = vrot.slane %v4550_v59, 5  ;;  %v8825_v62 = vsel %vm7708_vm2, %v6482_v19, %v5249_v44  ;;  %v8831_v59 = vld [vmem:[#allocation2 + $0x40] sm:$0xf] }
 0x13c   : > { %v4544_v5 = vrot.slane %v4542_v45, 5  ;;  %v4562_v44 = vrot.slane %v4560_v12, 4  ;;  %v10195_v19 = vcombine.low %v8555_v25, %v8565_v46  ;;  %v4571_v33 = vshrl.u32 %v4459_v9, 16 }
 0x13d   : > { %v4540_v48 = vrot.slane %v4539_v24, 4  ;;  %v8838_v45 = vrot.slane %v4556_v35, 5  ;;  %v4580_v35 = vshll.u32 %v8831_v59, 16  ;;  %v4584_v18 = vshrl.u32 %v8831_v59, 16 }
 0x13e   : > { %v8859_v46 = vcombine.low %v4511_v0, %v4521_v63  ;;  %v4465_v63 = vld [vmem:[#allocation2 + $0x54] sm:$0xf] }
 0x13f   : > { %v4545_v3 = vsel %vm7352_vm13, %v4540_v48, %v4544_v5  ;;  %v4563_v48 = vor.u32 %v4562_v44, %v8838_v45  ;;  %v4566_v5 = vshll.u32 %v4458_v60, 16  ;;  %v4622_v27 = vshll.u32 %v4465_v63, 16 }
 0x140   : > { %6930 = vmatmul.mubr.msk.bf16.gmra.mxu1 %vm1574_vm12, %v6386_v34  ;;  %v4549_v34 = vrot.slane %v4547_v38, 4  ;;  %v8829_v38 = vsel %vm7708_vm2, %v5251_v54, %v5252_v31  ;;  %v8846_v54 = vpop.f32.mrf.mxu1  ;;  %v4574_v31 = vshll.u32 %v4459_v9, 16  ;;  %v8864_v9 = vld [vmem:[#allocation2 + $0x4c] sm:$0xf] }
 0x141   : > { %6933 = vmatprep.mubr.msk.bf16.mxu1 %vm1574_vm12, %v10191_v42  ;;  %v5259_v42 = vrot.slane %v4458_v60, 5  ;;  %10196 = vst [vmem:[#allocation10_spill] sm:$0xff] %v8846_v54 }
 0x142   : > { %6968 = vmatmul.mubr.msk.bf16.gmra.mxu0 %vm1574_vm12, %v7117_v43  ;;  %v5178_v43 = vld [vmem:[#allocation2 + $0x30] sm:$0xe]  ;;  %v4553_v24 = vor.u32 %v4552_v22, %v4549_v34  ;;  %v10197_v34 = vcombine.low %v8579_v8, %v8584_v1  ;;  %v8867_v8 = vcombine.low %v4535_v4, %v4545_v3  ;;  %v8879_v60 = vpop.f32.mrf.mxu1  ;;  %v4576_v44 = vrot.slane %v4574_v31, 5  ;;  %v4461_v3 = vld [vmem:[#allocation2 + $0x44] sm:$0x1] }
 0x143   : > { %6971 = vmatprep.mubr.msk.bf16.mxu0 %vm1574_vm12, %v7118_v47  ;;  %v8833_v47 = vpop.f32.mrf.mxu0  ;;  %v6483_v11 = vrot.slane %v5178_v43, 9  ;;  %v4462_v43 = vld [vmem:[#allocation2 + $0x48] sm:$0xf]  ;;  %v8877_v0 = vsel %vm7708_vm2, %v5258_v41, %v5259_v42  ;;  %10199 = vst [vmem:[#allocation12_spill] sm:$0xff] %v8879_v60  ;;  %v4586_v4 = vrot.slane %v4584_v18, 4  ;;  %v7122_v41 = vld [vmem:[#allocation2 + $0x90] sm:$0xff]  }
 0x144   : > { %10194 = vst [vmem:[#allocation11_spill] sm:$0xff] %v8833_v47  ;;  %v8861_v12 = vrot.slane %v4553_v24, 4  ;;  %v4573_v24 = vrot.slane %v4571_v33, 4  ;;  %v4598_v1 = vshll.u32 %v4462_v43, 16  ;;  %v8893_v31 = vrot.slane %v4563_v48, 4  ;;  %v8904_v39 = vpop.f32.mrf.mxu1 }
 0x145   : > { %v8857_v25 = vpop.f32.mrf.mxu0  ;;  %v5263_v18 = vrot.slane %v8831_v59, 5  ;;  %v4619_v22 = vshrl.u32 %v4465_v63, 16  ;;  %10202 = vst [vmem:[#allocation13_spill] sm:$0xff] %v8904_v39  ;;  %v4590_v33 = vshll.u32 %v4461_v3, 16  ;;  %v10203_v63 = vcombine.low %v8606_v14, %v8622_v52  ;;  %v8920_v14 = vld [vmem:[#allocation2 + $0x5c] sm:$0x1] }
 0x146   : > { %10198 = vst [vmem:[#allocation8_spill] sm:$0xff] %v8857_v25  ;;  %v4600_v47 = vrot.slane %v4598_v1, 5  ;;  %v5270_v39 = vrot.slane %v8864_v9, 5 }
 0x147   : > { %v8887_v42 = vpop.f32.mrf.mxu0  ;;  %v4621_v52 = vrot.slane %v4619_v22, 4  ;;  %v4468_v22 = vld [vmem:[#allocation2 + $0x60] sm:$0xf] }
 0x148   : > { %6934 = vmatmul.mubr.msk.bf16.gmra.mxu1 %vm1574_vm12, %v10195_v19  ;;  %v8881_v19 = vrot.slane %v4580_v35, 5  ;;  %10200 = vst [vmem:[#allocation14_spill] sm:$0xff] %v8887_v42  ;;  %v8895_v35 = vrot.slane %v4566_v5, 5  ;;  %v4577_v5 = vor.u32 %v4576_v44, %v4573_v24  ;;  %v4464_v42 = vld [vmem:[#allocation2 + $0x50] sm:$0x1]  ;;  %v5265_v24 = vrot.slane %v5263_v18, 4 }
 0x149   : > { %6937 = vmatprep.mubr.msk.bf16.mxu1 %vm1574_vm12, %v10197_v34  ;;  %v4595_v34 = vshrl.u32 %v4462_v43, 16  ;;  %v5179_v43 = vld [vmem:[#allocation2 + $0x3c] sm:$0xe]  ;;  %v5266_v44 = vrot.slane %v4461_v3, 5  ;;  %v5273_v57 = vrot.slane %v4464_v42, 5 }
 0x14a   : > { %6972 = vmatmul.mubr.msk.bf16.gmra.mxu0 %vm1574_vm12, %v7119_v40  ;;  %v8873_v40 = vsel %vm7708_vm2, %v6483_v11, %v5256_v2  ;;  %v4604_v2 = vshll.u32 %v8864_v9, 16  ;;  %v4608_v11 = vshrl.u32 %v8864_v9, 16  ;;  %v4587_v59 = vor.u32 %v4586_v4, %v8881_v19  ;;  %v5180_v4 = vld [vmem:[#allocation2 + $0x48] sm:$0xe] }
 0x14b   : > { %6975 = vmatprep.mubr.msk.bf16.mxu0 %vm1574_vm12, %v7120_v6  ;;  %v8883_v6 = vld [vmem:[#allocation2 + $0x58] sm:$0xf]  ;;  %v4597_v25 = vrot.slane %v4595_v34, 4  ;;  %v6484_v48 = vrot.slane %v5179_v43, 9  ;;  %v4624_v34 = vrot.slane %v4622_v27, 5  ;;  %v4578_v3 = vrot.slane %v4577_v5, 4 }
 0x14c   : > { %v4628_v60 = vshll.u32 %v8883_v6, 16  ;;  %v4632_v54 = vshrl.u32 %v8883_v6, 16  ;;  %v8913_v58 = vrot.slane %v4604_v2, 5  ;;  %v4610_v32 = vrot.slane %v4608_v11, 4  ;;  %v8924_v11 = vpop.f32.mrf.mxu1  ;;  %v7123_v27 = vld [vmem:[#allocation2 + $0x9c] sm:$0xff]  }
 0x14d   : > { %10205 = vst [vmem:[#allocation7_spill] sm:$0xff] %v8924_v11  ;;  %v4588_v43 = vrot.slane %v4587_v59, 4  ;;  %v4601_v9 = vor.u32 %v4600_v47, %v4597_v25  ;;  %v6485_v61 = vrot.slane %v5180_v4, 9  ;;  %v5272_v11 = vrot.slane %v5270_v39, 4  ;;  %v5181_v5 = vld [vmem:[#allocation2 + $0x54] sm:$0xe] }
 0x14e   : > { %v8922_v1 = vrot.slane %v4628_v60, 5  ;;  %v4634_v2 = vrot.slane %v4632_v54, 4  ;;  %v8935_v54 = vsel %vm7708_vm2, %v6484_v48, %v5263_v18  ;;  %v8940_v47 = vsel %vm7708_vm2, %v5265_v24, %v5266_v44  ;;  %v8948_v18 = vpop.f32.mrf.mxu1  ;;  %v8955_v24 = vld [vmem:[#allocation2 + $0x64] sm:$0xf] }
 0x14f   : > { %v4625_v25 = vor.u32 %v4624_v34, %v4621_v52  ;;  %v5277_v59 = vrot.slane %v8883_v6, 5  ;;  %10207 = vst [vmem:[#allocation17_spill] sm:$0xff] %v8948_v18  ;;  %v4643_v44 = vshrl.u32 %v4468_v22, 16  ;;  %v4646_v4 = vshll.u32 %v4468_v22, 16 }
 0x150   : > { %6938 = vmatmul.mubr.msk.bf16.gmra.mxu1 %vm1574_vm12, %v10201_v30  ;;  %v8916_v30 = vpop.f32.mrf.mxu0  ;;  %v10208_v6 = vcombine.low %v8642_v49, %v8659_v26  ;;  %v8963_v34 = vsel %vm7708_vm2, %v6485_v61, %v5270_v39  ;;  %v5280_v49 = vrot.slane %v8920_v14, 5  ;;  %v4652_v39 = vshll.u32 %v8955_v24, 16  ;;  %v4471_v61 = vld [vmem:[#allocation2 + $0x6c] sm:$0xf] }
 0x151   : > { %6941 = vmatprep.mubr.msk.bf16.mxu1 %vm1574_vm12, %v10203_v63  ;;  %10204 = vst [vmem:[#allocation15_spill] sm:$0xff] %v8916_v30  ;;  %v4592_v63 = vrot.slane %v4590_v33, 5  ;;  %v4614_v30 = vshll.u32 %v4464_v42, 16  ;;  %v4635_v33 = vor.u32 %v4634_v2, %v8922_v1  ;;  %v4583_v42 = vsel %vm7352_vm13, %v4578_v3, %v8881_v19 }
 0x152   : > { %6976 = vmatmul.mubr.msk.bf16.gmra.mxu0 %vm1574_vm12, %v7121_v17  ;;  %v4569_v17 = vsel %vm7352_vm13, %v8893_v31, %v8895_v35  ;;  %v8931_v60 = vpop.f32.mrf.mxu0  ;;  %v4638_v31 = vshll.u32 %v8920_v14, 16  ;;  %v7124_v35 = vld [vmem:[#allocation2 + $0xa8] sm:$0xff]   ;;  %v8970_v2 = vsel %vm7708_vm2, %v5272_v11, %v5273_v57  ;;  %v4626_v26 = vrot.slane %v4625_v25, 4 }
 0x153   : > { %6979 = vmatprep.mubr.msk.bf16.mxu0 %vm1574_vm12, %v7122_v41  ;;  %v4611_v41 = vor.u32 %v4610_v32, %v8913_v58  ;;  %v10206_v32 = vcombine.low %v8626_v51, %v8634_v56  ;;  %v4593_v48 = vsel %vm7352_vm13, %v4588_v43, %v4592_v63  ;;  %v4602_v51 = vrot.slane %v4601_v9, 4  ;;  %v8975_v9 = vpop.f32.mrf.mxu1 }
 0x154   : > { %v4616_v52 = vrot.slane %v4614_v30, 5  ;;  %v8966_v19 = vpop.f32.mrf.mxu0  ;;  %v4640_v3 = vrot.slane %v4638_v31, 5  ;;  %v6486_v43 = vrot.slane %v5181_v5, 9  ;;  %v4636_v30 = vrot.slane %v4635_v33, 4  ;;  %10209 = vst [vmem:[#allocation16_spill] sm:$0xff] %v8975_v9 }
 0x155   : > { %v4612_v56 = vrot.slane %v4611_v41, 4  ;;  %v5279_v63 = vrot.slane %v5277_v59, 4  ;;  %v10210_v57 = vsel %vm7352_vm13, %v8861_v12, %v8838_v45  ;;  %v4645_v41 = vrot.slane %v4643_v44, 4  ;;  %v8994_v45 = vld [vmem:[#allocation2 + $0x70] sm:$0xf] }
 0x156   : > { %v8982_v11 = vcombine.low %v10210_v57, %v4569_v17  ;;  %v4648_v22 = vrot.slane %v4646_v4, 5  ;;  %v4656_v14 = vshrl.u32 %v8955_v24, 16  ;;  %v8985_v31 = vcombine.low %v4583_v42, %v4593_v48  ;;  %v8996_v12 = vpop.f32.mrf.mxu0  ;;  %v4474_v48 = vld [vmem:[#allocation2 + $0x78] sm:$0xf]  ;;  %v9004_v44 = vld [vmem:[#allocation2 + $0x7c] sm:$0xf] }
 0x157   : > { %v4607_v25 = vsel %vm7352_vm13, %v4602_v51, %v8913_v58  ;;  %v4617_v33 = vsel %vm7352_vm13, %v4612_v56, %v4616_v52  ;;  %v9002_v5 = vsel %vm7708_vm2, %v6486_v43, %v5277_v59  ;;  %v4670_v42 = vshll.u32 %v4471_v61, 16  ;;  %v7126_v58 = vld [vmem:[#allocation2 + $0xc0] sm:$0xff]   ;;  %v9015_v56 = vld [vmem:[#allocation2 + $0x68] sm:$0x1]  ;;  %v9023_v43 = vpop.f32.mrf.mxu1  ;;  %v9045_v17 = vld [vmem:[#allocation2 + $0x74] sm:$0x1] }
 0x158   : > { %6942 = vmatmul.mubr.msk.bf16.gmra.mxu1 %vm1574_vm12, %v10206_v32  ;;  %v4667_v32 = vshrl.u32 %v4471_v61, 16  ;;  %v4631_v4 = vsel %vm7352_vm13, %v4626_v26, %v8922_v1  ;;  %v9013_v51 = vsel %vm7708_vm2, %v5279_v63, %v5280_v49  ;;  %v9017_v59 = vrot.slane %v4652_v39, 5  ;;  %10212 = vst [vmem:[#allocation19_spill] sm:$0xff] %v9023_v43  ;;  %v5182_v26 = vld [vmem:[#allocation2 + $0x60] sm:$0xe]  ;;  %v9034_v57 = vpop.f32.mrf.mxu0 }
 0x159   : > { %6945 = vmatprep.mubr.msk.bf16.mxu1 %vm1574_vm12, %v10208_v6  ;;  %v4641_v6 = vsel %vm7352_vm13, %v4636_v30, %v4640_v3  ;;  %v10211_v52 = vcombine.low %v8647_v29, %v8669_v20  ;;  %v4649_v61 = vor.u32 %v4648_v22, %v4645_v41  ;;  %v4658_v1 = vrot.slane %v4656_v14, 4 }
 0x15a   : > { %6980 = vmatmul.mubr.msk.bf16.gmra.mxu0 %vm1574_vm12, %v7123_v27  ;;  %v7125_v27 = vld [vmem:[#allocation2 + $0xb4] sm:$0xff]   ;;  %v4676_v3 = vshll.u32 %v8994_v45, 16  ;;  %v4680_v30 = vshrl.u32 %v8994_v45, 16  ;;  %v10213_v49 = vcombine.low %v8673_v21, %v8685_v28  ;;  %v4691_v63 = vshrl.u32 %v4474_v48, 16 }
 0x15b   : > { %6983 = vmatprep.mubr.msk.bf16.mxu0 %vm1574_vm12, %v7124_v35  ;;  %v4694_v39 = vshll.u32 %v4474_v48, 16  ;;  %v4700_v20 = vshll.u32 %v9004_v44, 16  ;;  %v4704_v29 = vshrl.u32 %v9004_v44, 16  ;;  %v9036_v41 = vcombine.low %v4607_v25, %v4617_v33 }
 0x15c   : > { %v4662_v22 = vshll.u32 %v9015_v56, 16  ;;  %v4669_v14 = vrot.slane %v4667_v32, 4  ;;  %v9040_v21 = vcombine.low %v4631_v4, %v4641_v6  ;;  %v6487_v48 = vrot.slane %v5182_v26, 9  ;;  %v9056_v26 = vpop.f32.mrf.mxu0 }
 0x15d   : > { %v9049_v25 = vrot.slane %v4649_v61, 4  ;;  %v4659_v33 = vor.u32 %v4658_v1, %v9017_v59  ;;  %v9052_v32 = vrot.slane %v4676_v3, 5  ;;  %v4693_v4 = vrot.slane %v4691_v63, 4  ;;  %10215 = vst [vmem:[#allocation20_spill] sm:$0xff] %v9056_v26  ;;  %v9062_v1 = vld [vmem:[#allocation2 + $0x80] sm:$0x1] }
 0x15e   : > { %v4696_v6 = vrot.slane %v4694_v39, 5  ;;  %v9054_v35 = vrot.slane %v4700_v20, 5  ;;  %v4706_v28 = vrot.slane %v4704_v29, 4  ;;  %v9058_v43 = vrot.slane %v4662_v22, 5  ;;  %v5183_v63 = vld [vmem:[#allocation2 + $0x6c] sm:$0xe] }
 0x15f   : > { %v4686_v9 = vshll.u32 %v9045_v17, 16  ;;  %v10216_v29 = vcombine.low %v8681_v10, %v8693_v23  ;;  %v10218_v10 = vcombine.low %v8701_v16, %v8714_v13  ;;  %v6488_v18 = vrot.slane %v5183_v63, 9 }
 0x160   : > { %6946 = vmatmul.mubr.msk.bf16.gmra.mxu1 %vm1574_vm12, %v10211_v52  ;;  %v4672_v52 = vrot.slane %v4670_v42, 5  ;;  %v4682_v42 = vrot.slane %v4680_v30, 4  ;;  %v4697_v23 = vor.u32 %v4696_v6, %v4693_v4  ;;  %v5294_v16 = vrot.slane %v9045_v17, 5 }
 0x161   : > { %6949 = vmatprep.mubr.msk.bf16.mxu1 %vm1574_vm12, %v10213_v49  ;;  %v5284_v49 = vrot.slane %v8955_v24, 5  ;;  %v7127_v24 = vld [vmem:[#allocation2 + $0xcc] sm:$0xff]   ;;  %v10220_v13 = vcombine.low %v8815_v50, %v8821_v37  ;;  %v5301_v17 = vrot.slane %v9062_v1, 5 }
 0x162   : > { %6984 = vmatmul.mubr.msk.bf16.gmra.mxu0 %vm1574_vm12, %v7125_v27  ;;  %v9047_v27 = vpop.f32.mrf.mxu1  ;;  %v4673_v61 = vor.u32 %v4672_v52, %v4669_v14  ;;  %v9078_v14 = vrot.slane %v4659_v33, 4  ;;  %v4683_v52 = vor.u32 %v4682_v42, %v9052_v32  ;;  %v5298_v33 = vrot.slane %v9004_v44, 5 }
 0x163   : > { %6987 = vmatprep.mubr.msk.bf16.mxu0 %vm1574_vm12, %v7126_v58  ;;  %10214 = vst [vmem:[#allocation9_spill] sm:$0xff] %v9047_v27  ;;  %v4477_v58 = vld [vmem:[#allocation2 + $0x84] sm:$0xf]  ;;  %v5287_v27 = vrot.slane %v9015_v56, 5  ;;  %v9066_v3 = vsel %vm7708_vm2, %v6487_v48, %v5284_v49  ;;  %v5286_v30 = vrot.slane %v5284_v49, 4  ;;  %v5291_v48 = vrot.slane %v8994_v45, 5 }
 0x164   : > { %v4715_v39 = vshrl.u32 %v4477_v58, 16  ;;  %v4718_v20 = vshll.u32 %v4477_v58, 16  ;;  %v9072_v22 = vpop.f32.mrf.mxu1  ;;  %v9082_v49 = vld [vmem:[#allocation2 + $0x88] sm:$0xf]  ;;  %v4707_v58 = vor.u32 %v4706_v28, %v9054_v35  ;;  %v9094_v45 = vrot.slane %v4673_v61, 4 }
 0x165   : > { %10217 = vst [vmem:[#allocation21_spill] sm:$0xff] %v9072_v22  ;;  %v5184_v22 = vld [vmem:[#allocation2 + $0x78] sm:$0xe]  ;;  %v9096_v42 = vrot.slane %v4686_v9, 5  ;;  %v4724_v44 = vshll.u32 %v9082_v49, 16  ;;  %v4728_v6 = vshrl.u32 %v9082_v49, 16 }
 0x166   : > { %v4717_v28 = vrot.slane %v4715_v39, 4  ;;  %v4720_v4 = vrot.slane %v4718_v20, 5  ;;  %v4684_v9 = vrot.slane %v4683_v52, 4  ;;  %v5293_v61 = vrot.slane %v5291_v48, 4  ;;  %v4479_v52 = vld [vmem:[#allocation2 + $0x8c] sm:$0x1] }
 0x167   : > { %v6489_v63 = vrot.slane %v5184_v22, 9  ;;  %v4708_v26 = vrot.slane %v4707_v58, 4  ;;  %v5300_v37 = vrot.slane %v5298_v33, 4  ;;  %v4665_v20 = vsel %vm7352_vm13, %v9078_v14, %v9058_v43  ;;  %v9131_v14 = vld [vmem:[#allocation2 + $0x94] sm:$0xf] }
 0x168   : > { %6950 = vmatmul.mubr.msk.bf16.gmra.mxu1 %vm1574_vm12, %v10216_v29  ;;  %v4710_v29 = vshll.u32 %v9062_v1, 16  ;;  %v4679_v1 = vsel %vm7352_vm13, %v9094_v45, %v9052_v32  ;;  %v9126_v22 = vsel %vm7708_vm2, %v6488_v18, %v5291_v48  ;;  %v4721_v58 = vor.u32 %v4720_v4, %v4717_v28 }
 0x169   : > { %6953 = vmatprep.mubr.msk.bf16.mxu1 %vm1574_vm12, %v10218_v10  ;;  %v9091_v56 = vpop.f32.mrf.mxu0  ;;  %v9105_v10 = vpop.f32.mrf.mxu1  ;;  %v5305_v43 = vrot.slane %v9082_v49, 5  ;;  %v4689_v18 = vsel %vm7352_vm13, %v4684_v9, %v9096_v42  ;;  %v9146_v48 = vsel %vm7708_vm2, %v5293_v61, %v5294_v16  ;;  %v9157_v28 = vsel %vm7708_vm2, %v6489_v63, %v5298_v33 }
 0x16a   : > { %10219 = vst [vmem:[#allocation23_spill] sm:$0xff] %v9091_v56  ;;  %6988 = vmatmul.mubr.msk.bf16.gmra.mxu0 %vm1574_vm12, %v7127_v24  ;;  %10221 = vst [vmem:[#allocation24_spill] sm:$0xff] %v9105_v10  ;;  %v4698_v56 = vrot.slane %v4697_v23, 4  ;;  %v4712_v50 = vrot.slane %v4710_v29, 5  ;;  %v9118_v10 = vsel %vm7708_vm2, %v5286_v30, %v5287_v27  ;;  %v5185_v23 = vld [vmem:[#allocation2 + $0x84] sm:$0xe]  ;;  %v10225_v30 = vcombine.low %v8707_v15, %v8721_v36 }
 0x16b   : > { %7027 = vmatprep.mubr.msk.bf16.mxu0 %vm1574_vm12, %v10220_v13  ;;  %v9107_v24 = vpop.f32.mrf.mxu0  ;;  %v4480_v13 = vld [vmem:[#allocation2 + $0x90] sm:$0xf]  ;;  %v9128_v29 = vrot.slane %v4724_v44, 5  ;;  %v9161_v42 = vsel %vm7708_vm2, %v5300_v37, %v5301_v17  ;;  %v4752_v44 = vshrl.u32 %v9131_v14, 16  ;;  %v10229_v33 = vcombine.low %v8873_v40, %v8877_v0  ;;  %v9227_v40 = vld [vmem:[#allocation2 + $0xac] sm:$0xf] }
 0x16c   : > { %10222 = vst [vmem:[#allocation18_spill] sm:$0xff] %v9107_v24  ;;  %v4739_v49 = vshrl.u32 %v4480_v13, 16  ;;  %v4742_v45 = vshll.u32 %v4480_v13, 16  ;;  %v4703_v15 = vsel %vm7352_vm13, %v4698_v56, %v9054_v35  ;;  %v4713_v36 = vsel %vm7352_vm13, %v4708_v26, %v4712_v50  ;;  %v9261_v24 = vld [vmem:[#allocation2 + $0xa4] sm:$0x1] }
 0x16d   : > { %v9110_v39 = vpop.f32.mrf.mxu0  ;;  %v4734_v35 = vshll.u32 %v4479_v52, 16  ;;  %v6490_v56 = vrot.slane %v5185_v23, 9  ;;  %v4748_v26 = vshll.u32 %v9131_v14, 16  ;;  %v5307_v61 = vrot.slane %v5305_v43, 4 }
 0x16e   : > { %10223 = vst [vmem:[#allocation22_spill] sm:$0xff] %v9110_v39  ;;  %v4730_v39 = vrot.slane %v4728_v6, 4  ;;  %v9175_v6 = vrot.slane %v4721_v58, 4  ;;  %v5308_v63 = vrot.slane %v4479_v52, 5  ;;  %v10231_v50 = vsel %vm7352_vm13, %v9049_v25, %v9017_v59  ;;  %v4483_v59 = vld [vmem:[#allocation2 + $0x9c] sm:$0xf] }
 0x16f   : > { %v9133_v27 = vpop.f32.mrf.mxu1  ;;  %v9139_v32 = vpop.f32.mrf.mxu0  ;;  %v9187_v37 = vcombine.low %v10231_v50, %v4665_v20  ;;  %v4741_v0 = vrot.slane %v4739_v49, 4  ;;  %v4744_v13 = vrot.slane %v4742_v45, 5  ;;  %v9195_v23 = vcombine.low %v4703_v15, %v4713_v36  ;;  %v9208_v45 = vld [vmem:[#allocation2 + $0xa0] sm:$0xf] }
 0x170   : > { %10224 = vst [vmem:[#allocation25_spill] sm:$0xff] %v9133_v27  ;;  %6954 = vmatmul.mubr.msk.bf16.gmra.mxu1 %vm1574_vm12, %v10225_v30  ;;  %10226 = vst [vmem:[#allocation26_spill] sm:$0xff] %v9139_v32  ;;  %v4731_v9 = vor.u32 %v4730_v39, %v9128_v29  ;;  %v9191_v39 = vcombine.low %v4679_v1, %v4689_v18  ;;  %v9199_v30 = vld [vmem:[#allocation2 + $0x90] sm:$0xe]  ;;  %v9205_v49 = vrot.slane %v4748_v26, 5  ;;  %v4754_v1 = vrot.slane %v4752_v44, 4 }
 0x171   : > { %6993 = vmatprep.mubr.msk.bf16.mxu1 %vm1574_vm12, %v8859_v46  ;;  %v9163_v16 = vpop.f32.mrf.mxu1  ;;  %v10228_v46 = vcombine.low %v8825_v62, %v8829_v38  ;;  %v9178_v62 = vld [vmem:[#allocation2 + $0x98] sm:$0x1]  ;;  %10233 = vst [vmem:[#allocation30_spill] sm:$0xff] %v9195_v23  ;;  %v4486_v26 = vld [vmem:[#allocation2 + $0xa8] sm:$0xf]  ;;  %v4745_v58 = vor.u32 %v4744_v13, %v4741_v0  ;;  %v6491_v52 = vrot.slane %v9199_v30, 9  ;;  %v10235_v0 = vcombine.low %v8935_v54, %v8940_v47 }
 0x172   : > { %10227 = vst [vmem:[#allocation27_spill] sm:$0xff] %v9163_v16  ;;  %v6825_v4 = vpop.f32.mrf.mxu0  ;;  %10232 = vst [vmem:[#allocation29_spill] sm:$0xff] %v9191_v39  ;;  %v4758_v18 = vshll.u32 %v9178_v62, 16  ;;  %v9214_v36 = vrot.slane %v4731_v9, 4  ;;  %v4763_v15 = vshrl.u32 %v4483_v59, 16  ;;  %v4766_v9 = vshll.u32 %v4483_v59, 16 }
 0x173   : > { %7028 = vmatmul.mubr.msk.bf16.vlgmr.msra.gmra.mxu0 %vm1574_vm12, %v10228_v46  ;;  %v9180_v38 = vpop.f32.mrf.mxu1  ;;  %v9203_v46 = vrot.slane %v4734_v35, 5  ;;  %v9222_v35 = vsel %vm7708_vm2, %v5307_v61, %v5308_v63  ;;  %v4772_v61 = vshll.u32 %v9208_v45, 16  ;;  %v4776_v63 = vshrl.u32 %v9208_v45, 16  ;;  %v10268_v53 = vld [vmem:[#allocation24_spill] sm:$0xff] }
 0x174   : > { %7031 = vmatprep.mubr.msk.bf16.mxu0 %vm1574_vm12, %v10229_v33  ;;  %10230 = vst [vmem:[#allocation28_spill] sm:$0xff] %v9180_v38  ;;  %v2378_v17 = vpop.f32.mrf.mxu0  ;;  %v9218_v33 = vsel %vm7708_vm2, %v6490_v56, %v5305_v43  ;;  %v5312_v56 = vrot.slane %v9131_v14, 5  ;;  %v4755_v13 = vor.u32 %v4754_v1, %v9205_v49  ;;  %v9240_v30 = vrot.slane %v4758_v18, 5  ;;  %v10237_v14 = vld [vmem:[#allocation3_spill] sm:$0xff] }
 0x175   : > { %v9201_v25 = vpop.f32.mrf.mxu1  ;;  %v4790_v59 = vshll.u32 %v4486_v26, 16  ;;  %v10238_v38 = vcombine.low %v8963_v34, %v8970_v2  ;;  %v4796_v16 = vshll.u32 %v9227_v40, 16  ;;  %v4800_v54 = vshrl.u32 %v9227_v40, 16 }
 0x176   : > { %10234 = vst [vmem:[#allocation31_spill] sm:$0xff] %v9201_v25  ;;  %v6826_v20 = vpop.f32.mrf.mxu0  ;;  %v9251_v1 = vrot.slane %v4745_v58, 4  ;;  %v5315_v18 = vrot.slane %v9178_v62, 5  ;;  %v4778_v34 = vrot.slane %v4776_v63, 4  ;;  %v9259_v27 = vrot.slane %v4755_v13, 4  ;;  %v10240_v62 = vld [vmem:[#allocation11_spill] sm:$0xff] }
 0x177   : > { %v6791_v44 = vpop.f32.mrf.mxu1  ;;  %v5314_v32 = vrot.slane %v5312_v56, 4  ;;  %v4792_v23 = vrot.slane %v4790_v59, 5  ;;  %v5319_v59 = vrot.slane %v9208_v45, 5 }
 0x178   : > { %6994 = vmatmul.mubr.msk.bf16.vlgmr.msra.gmra.mxu1 %vm1574_vm12, %v8867_v8  ;;  %v2381_v50 = vpop.f32.mrf.mxu0  ;;  %v1962_v43 = vadd.f32 %v6791_v44, %v8778_v7  ;;  %v4787_v7 = vshrl.u32 %v4486_v26, 16  ;;  %v4765_v26 = vrot.slane %v4763_v15, 4  ;;  %v4751_v45 = vsel %vm7352_vm13, %v9251_v1, %v9205_v49 }
 0x179   : > { %6997 = vmatprep.mubr.msk.bf16.mxu1 %vm1574_vm12, %v8982_v11  ;;  %v1953_v8 = vpop.f32.mrf.mxu1 }
 0x17a   : > { %v6829_v25 = vpop.f32.mrf.mxu0  ;;  %v9242_v11 = vadd.f32 %v6825_v4, %v1962_v43  ;;  %v1954_v44 = vadd.f32 %v1953_v8, %v10237_v14  ;;  %v4768_v4 = vrot.slane %v4766_v9, 5  ;;  %v10239_v8 = vld [vmem:[#allocation5_spill] sm:$0xff]  ;;  %v4789_v58 = vrot.slane %v4787_v7, 4 }
 0x17b   : > { %7032 = vmatmul.mubr.msk.bf16.gmra.mxu0 %vm1574_vm12, %v10235_v0  ;;  %v6792_v47 = vpop.f32.mrf.mxu1  ;;  %v9268_v9 = vrot.slane %v4796_v16, 5 }
 0x17c   : > { %10236 = vst [vmem:[#allocation32_spill] sm:$0xff] %v9242_v11  ;;  %7035 = vmatprep.mubr.msk.bf16.mxu0 %vm1574_vm12, %v10238_v38  ;;  %v2394_v0 = vpop.f32.mrf.mxu0  ;;  %v9254_v43 = vadd.f32 %v2378_v17, %v1954_v44  ;;  %v1965_v14 = vadd.f32 %v6792_v47, %v10239_v8  ;;  %v9257_v11 = vrot.slane %v4772_v61, 5  ;;  %v9266_v17 = vld [vmem:[#allocation2 + $0xb0] sm:$0x1]  ;;  %v4802_v61 = vrot.slane %v4800_v54, 4  ;;  %v10241_v54 = vld [vmem:[#allocation8_spill] sm:$0xff] }
 0x17d   : > { %v1956_v2 = vpop.f32.mrf.mxu1  ;;  %v4769_v7 = vor.u32 %v4768_v4, %v4765_v26  ;;  %v4782_v8 = vshll.u32 %v9261_v24, 16  ;;  %v10244_v4 = vcombine.low %v9066_v3, %v9118_v10  ;;  %v4793_v49 = vor.u32 %v4792_v23, %v4789_v58  ;;  %v5188_v3 = vld [vmem:[#allocation2 + $0xa8] sm:$0xe] }
 0x17e   : > { %v6830_v38 = vpop.f32.mrf.mxu0  ;;  %v9263_v39 = vadd.f32 %v6826_v20, %v1965_v14  ;;  %v1957_v15 = vadd.f32 %v1956_v2, %v10240_v62  ;;  %v9278_v20 = vsel %vm7708_vm2, %v6491_v52, %v5312_v56  ;;  %v5187_v14 = vld [vmem:[#allocation2 + $0x9c] sm:$0xe]  ;;  %v10242_v52 = vcombine.low %v9002_v5, %v9013_v51  ;;  %v10243_v5 = vld [vmem:[#allocation14_spill] sm:$0xff] }
 0x17f   : > { %v6795_v44 = vpop.f32.mrf.mxu1  ;;  %v4806_v56 = vshll.u32 %v9266_v17, 16  ;;  %v4803_v1 = vor.u32 %v4802_v61, %v9268_v9  ;;  %v5326_v58 = vrot.slane %v9227_v40, 5 }
 0x180   : > { %6998 = vmatmul.mubr.msk.bf16.gmra.mxu1 %vm1574_vm12, %v8985_v31  ;;  %v2397_v63 = vpop.f32.mrf.mxu0  ;;  %v9281_v16 = vadd.f32 %v2381_v50, %v1957_v15  ;;  %v1978_v47 = vadd.f32 %v6795_v44, %v10241_v54  ;;  %v4779_v31 = vor.u32 %v4778_v34, %v9257_v11  ;;  %v9302_v50 = vsel %vm7708_vm2, %v5314_v32, %v5315_v18  ;;  %v4489_v34 = vld [vmem:[#allocation2 + $0xb4] sm:$0xf]  ;;  %v10245_v54 = vld [vmem:[#allocation15_spill] sm:$0xff] }
 0x181   : > { %7001 = vmatprep.mubr.msk.bf16.mxu1 %vm1574_vm12, %v9036_v41  ;;  %v1969_v2 = vpop.f32.mrf.mxu1  ;;  %v4761_v41 = vsel %vm7352_vm13, %v9259_v27, %v9240_v30  ;;  %v4770_v15 = vrot.slane %v4769_v7, 4  ;;  %v6492_v32 = vrot.slane %v5187_v14, 9  ;;  %v5321_v18 = vrot.slane %v5319_v59, 4 }
 0x182   : > { %v6833_v62 = vpop.f32.mrf.mxu0  ;;  %v9305_v26 = vadd.f32 %v6829_v25, %v1978_v47  ;;  %v1970_v51 = vadd.f32 %v1969_v2, %v10243_v5  ;;  %v5322_v44 = vrot.slane %v9261_v24, 5  ;;  %v4780_v2 = vrot.slane %v4779_v31, 4 }
 0x183   : > { %7036 = vmatmul.mubr.msk.bf16.gmra.mxu0 %vm1574_vm12, %v10242_v52  ;;  %v6796_v27 = vpop.f32.mrf.mxu1  ;;  %v4784_v52 = vrot.slane %v4782_v8, 5  ;;  %v4808_v23 = vrot.slane %v4806_v56, 5  ;;  %v4811_v61 = vshrl.u32 %v4489_v34, 16  ;;  %v4794_v14 = vrot.slane %v4793_v49, 4 }
 0x184   : > { %7039 = vmatprep.mubr.msk.bf16.mxu0 %vm1574_vm12, %v10244_v4  ;;  %v2410_v30 = vpop.f32.mrf.mxu0  ;;  %v9314_v25 = vadd.f32 %v2394_v0, %v1970_v51  ;;  %v1981_v47 = vadd.f32 %v6796_v27, %v10245_v54  ;;  %v4814_v4 = vshll.u32 %v4489_v34, 16  ;;  %v4804_v24 = vrot.slane %v4803_v1, 4  ;;  %v9321_v0 = vld [vmem:[#allocation2 + $0xb8] sm:$0xf] }
 0x185   : > { %v1972_v10 = vpop.f32.mrf.mxu1  ;;  %v4775_v8 = vsel %vm7352_vm13, %v4770_v15, %v9257_v11  ;;  %v9330_v40 = vsel %vm7708_vm2, %v6492_v32, %v5319_v59  ;;  %v5329_v11 = vrot.slane %v9266_v17, 5  ;;  %v10246_v34 = vcombine.low %v9126_v22, %v9146_v48 }
 0x186   : > { %v6834_v5 = vpop.f32.mrf.mxu0  ;;  %v9318_v13 = vadd.f32 %v6830_v38, %v1981_v47  ;;  %v1973_v7 = vadd.f32 %v1972_v10, %v8931_v60  ;;  %v9334_v60 = vsel %vm7708_vm2, %v5321_v18, %v5322_v44  ;;  %v6493_v38 = vrot.slane %v5188_v3, 9 }
 0x187   : > { %v6799_v51 = vpop.f32.mrf.mxu1  ;;  %v5328_v27 = vrot.slane %v5326_v58, 4  ;;  %v4816_v15 = vrot.slane %v4814_v4, 5  ;;  %v10247_v18 = vcombine.low %v9157_v28, %v9161_v42  ;;  %v4799_v22 = vsel %vm7352_vm13, %v4794_v14, %v9268_v9 }
 0x188   : > { %7002 = vmatmul.mubr.msk.bf16.gmra.mxu1 %vm1574_vm12, %v9040_v21  ;;  %v2413_v31 = vpop.f32.mrf.mxu0  ;;  %v9336_v56 = vadd.f32 %v2397_v63, %v1973_v7  ;;  %v1994_v49 = vadd.f32 %v6799_v51, %v8966_v19  ;;  %v4785_v21 = vsel %vm7352_vm13, %v4780_v2, %v4784_v52  ;;  %v4813_v63 = vrot.slane %v4811_v61, 4  ;;  %v5189_v61 = vld [vmem:[#allocation2 + $0xb4] sm:$0xe]  ;;  %v10251_v7 = vld [vmem:[#allocation29_spill] sm:$0xff] }
 0x189   : > { %7005 = vmatprep.mubr.msk.bf16.mxu1 %vm1574_vm12, %v9187_v37  ;;  %v1985_v1 = vpop.f32.mrf.mxu1  ;;  %v4820_v19 = vshll.u32 %v9321_v0, 16  ;;  %v4809_v48 = vsel %vm7352_vm13, %v4804_v24, %v4808_v23  ;;  %v6507_v42 = vcombine.low %v9218_v33, %v9222_v35  ;;  %v9375_v9 = vcombine.low %v4751_v45, %v4761_v41  ;;  %v9395_v45 = vld [vmem:[#allocation2 + $0xbc] sm:$0x1] }
 0x18a   : > { %v6837_v59 = vpop.f32.mrf.mxu0  ;;  %v9349_v32 = vadd.f32 %v6833_v62, %v1994_v49  ;;  %v1986_v37 = vadd.f32 %v1985_v1, %v8996_v12  ;;  %v10248_v62 = vsel %vm7352_vm13, %v9214_v36, %v9203_v46  ;;  %v10249_v12 = vsel %vm7352_vm13, %v9175_v6, %v9128_v29  ;;  %v4492_v29 = vld [vmem:[#allocation2 + $0xc0] sm:$0xf]  ;;  %v9385_v6 = vld [vmem:[#allocation2 + $0xc4] sm:$0xf] }
 0x18b   : > { %7040 = vmatmul.mubr.msk.bf16.gmra.mxu0 %vm1574_vm12, %v10246_v34  ;;  %v6800_v17 = vpop.f32.mrf.mxu1  ;;  %v9371_v28 = vcombine.low %v10249_v12, %v10248_v62  ;;  %v6508_v54 = vcombine.low %v9278_v20, %v9302_v50  ;;  %v6509_v46 = vcombine.low %v9330_v40, %v9334_v60  ;;  %v4824_v36 = vshrl.u32 %v9321_v0, 16  ;;  %v10250_v50 = vld [vmem:[#allocation20_spill] sm:$0xff]  ;;  %v5191_v40 = vld [vmem:[#allocation2 + $0xcc] sm:$0xe] }
 0x18c   : > { %7043 = vmatprep.mubr.msk.bf16.mxu0 %vm1574_vm12, %v10247_v18  ;;  %v2426_v44 = vpop.f32.mrf.mxu0  ;;  %v9379_v47 = vadd.f32 %v2410_v30, %v1986_v37  ;;  %v1997_v2 = vadd.f32 %v6800_v17, %v9034_v57  ;;  %v9387_v33 = vcombine.low %v4775_v8, %v4785_v21  ;;  %v9389_v35 = vcombine.low %v4799_v22, %v4809_v48  ;;  %v10253_v21 = vld [vmem:[#allocation30_spill] sm:$0xff]  ;;  %v4494_v17 = vld [vmem:[#allocation2 + $0xc8] sm:$0x1]  ;;  %v5190_v62 = vld [vmem:[#allocation2 + $0xc0] sm:$0xe] }
 0x18d   : > { %v1988_v52 = vpop.f32.mrf.mxu1  ;;  %v9393_v20 = vsel %vm7708_vm2, %v6493_v38, %v5326_v58  ;;  %v4817_v57 = vor.u32 %v4816_v15, %v4813_v63  ;;  %v9402_v10 = vsel %vm7708_vm2, %v5328_v27, %v5329_v11  ;;  %v9404_v23 = vrot.slane %v4820_v19, 5  ;;  %v10252_v38 = vld [vmem:[#allocation23_spill] sm:$0xff]  ;;  %v10254_v18 = vld [vmem:[#allocation18_spill] sm:$0xff] }
 0x18e   : > { %v6838_v3 = vpop.f32.mrf.mxu0  ;;  %v9397_v41 = vadd.f32 %v6834_v5, %v1997_v2  ;;  %v1989_v30 = vadd.f32 %v1988_v52, %v10250_v50  ;;  %v4835_v14 = vshrl.u32 %v4492_v29, 16  ;;  %v4838_v24 = vshll.u32 %v4492_v29, 16 }
 0x18f   : > { %v6803_v4 = vpop.f32.mrf.mxu1  ;;  %v4844_v51 = vshll.u32 %v9385_v6, 16  ;;  %v4848_v5 = vshrl.u32 %v9385_v6, 16  ;;  %v4826_v11 = vrot.slane %v4824_v36, 4  ;;  %v4830_v1 = vshll.u32 %v9395_v45, 16 }
 0x190   : > { %7006 = vmatmul.mubr.msk.bf16.gmra.mxu1 %vm1574_vm12, %v10251_v7  ;;  %v2429_v58 = vpop.f32.mrf.mxu0  ;;  %v9410_v8 = vadd.f32 %v2413_v31, %v1989_v30  ;;  %v2010_v49 = vadd.f32 %v6803_v4, %v10252_v38  ;;  %v6510_v63 = vcombine.low %v9393_v20, %v9402_v10  ;;  %v9419_v15 = vrot.slane %v4817_v57, 4 }
 0x191   : > { %7009 = vmatprep.mubr.msk.bf16.mxu1 %vm1574_vm12, %v10253_v21  ;;  %v2001_v34 = vpop.f32.mrf.mxu1  ;;  %v6494_v19 = vrot.slane %v5189_v61, 9  ;;  %v5333_v31 = vrot.slane %v9321_v0, 5  ;;  %v5336_v48 = vrot.slane %v9395_v45, 5  ;;  %v5340_v12 = vrot.slane %v9385_v6, 5  ;;  %v4495_v45 = vld [vmem:[#allocation2 + $0xcc] sm:$0xf] }
 0x192   : > { %v6841_v27 = vpop.f32.mrf.mxu0  ;;  %v9422_v37 = vadd.f32 %v6837_v59, %v2010_v49  ;;  %v2002_v22 = vadd.f32 %v2001_v34, %v10254_v18  ;;  %v4837_v36 = vrot.slane %v4835_v14, 4  ;;  %v4840_v29 = vrot.slane %v4838_v24, 5  ;;  %v10255_v59 = vld [vmem:[#allocation22_spill] sm:$0xff]  ;;  %v10257_v18 = vld [vmem:[#allocation4_spill] sm:$0xff] }
 0x193   : > { %7044 = vmatmul.mubr.msk.bf16.gmra.mxu0 %vm1574_vm12, %v6507_v42  ;;  %v6804_v42 = vpop.f32.mrf.mxu1  ;;  %v9428_v52 = vrot.slane %v4844_v51, 5  ;;  %v4850_v20 = vrot.slane %v4848_v5, 4  ;;  %v4827_v50 = vor.u32 %v4826_v11, %v9404_v23  ;;  %v9438_v6 = vsel %vm7708_vm2, %v6494_v19, %v5333_v31  ;;  %v9440_v14 = vld [vmem:[#allocation2 + $0xd0] sm:$0xf] }
 0x194   : > { %7047 = vmatprep.mubr.msk.bf16.mxu0 %vm1574_vm12, %v6508_v54  ;;  %v2442_v2 = vpop.f32.mrf.mxu0  ;;  %v9430_v0 = vadd.f32 %v2426_v44, %v2002_v22  ;;  %v2013_v57 = vadd.f32 %v6804_v42, %v10255_v59  ;;  %v9434_v54 = vrot.slane %v4830_v1, 5  ;;  %v5335_v61 = vrot.slane %v5333_v31, 4  ;;  %v10256_v24 = vld [vmem:[#allocation26_spill] sm:$0xff] }
 0x195   : > { %v2004_v30 = vpop.f32.mrf.mxu1  ;;  %v4854_v4 = vshll.u32 %v4494_v17, 16  ;;  %v6495_v7 = vrot.slane %v5190_v62, 9  ;;  %v5342_v5 = vrot.slane %v5340_v12, 4  ;;  %v5343_v38 = vrot.slane %v4494_v17, 5 }
 0x196   : > { %v6842_v10 = vpop.f32.mrf.mxu0  ;;  %v9442_v44 = vadd.f32 %v6838_v3, %v2013_v57  ;;  %v2005_v51 = vadd.f32 %v2004_v30, %v10256_v24  ;;  %v4841_v11 = vor.u32 %v4840_v29, %v4837_v36  ;;  %v4851_v1 = vor.u32 %v4850_v20, %v9428_v52  ;;  %v10258_v20 = vld [vmem:[#allocation6_spill] sm:$0xff] }
 0x197   : > { %v6807_v49 = vpop.f32.mrf.mxu1  ;;  %v4859_v34 = vshrl.u32 %v4495_v45, 16  ;;  %v4862_v19 = vshll.u32 %v4495_v45, 16  ;;  %v4868_v3 = vshll.u32 %v9440_v14, 16  ;;  %v4872_v17 = vshrl.u32 %v9440_v14, 16 }
 0x198   : > { %7010 = vmatmul.mubr.msk.bf16.gmra.mxu1 %vm1574_vm12, %v9371_v28  ;;  %v2445_v21 = vpop.f32.mrf.mxu0  ;;  %v9448_v31 = vadd.f32 %v2429_v58, %v2005_v51  ;;  %v2026_v22 = vadd.f32 %v6807_v49, %v10257_v18  ;;  %v4828_v28 = vrot.slane %v4827_v50, 4  ;;  %v5337_v58 = vsel %vm7708_vm2, %v5335_v61, %v5336_v48 }
 0x199   : > { %7013 = vmatprep.mubr.msk.bf16.mxu1 %vm1574_vm12, %v9375_v9  ;;  %v2017_v62 = vpop.f32.mrf.mxu1  ;;  %v4856_v36 = vrot.slane %v4854_v4, 5  ;;  %v5341_v29 = vsel %vm7708_vm2, %v6495_v7, %v5340_v12  ;;  %v5344_v57 = vsel %vm7708_vm2, %v5342_v5, %v5343_v38  ;;  %v5347_v60 = vrot.slane %v9440_v14, 5  ;;  %v4497_v7 = vld [vmem:[#allocation2 + $0xd4] sm:$0x1] }
 0x19a   : > { %v6845_v42 = vpop.f32.mrf.mxu0  ;;  %v9463_v9 = vadd.f32 %v6841_v27, %v2026_v22  ;;  %v2018_v59 = vadd.f32 %v2017_v62, %v10258_v20  ;;  %v4842_v45 = vrot.slane %v4841_v11, 4  ;;  %v4852_v48 = vrot.slane %v4851_v1, 4  ;;  %v10259_v27 = vld [vmem:[#allocation10_spill] sm:$0xff]  ;;  %v10261_v62 = vld [vmem:[#allocation13_spill] sm:$0xff] }
 0x19b   : > { %7048 = vmatmul.mubr.msk.bf16.gmra.mxu0 %vm1574_vm12, %v6509_v46  ;;  %v6808_v46 = vpop.f32.mrf.mxu1  ;;  %v4861_v30 = vrot.slane %v4859_v34, 4  ;;  %v4864_v61 = vrot.slane %v4862_v19, 5  ;;  %v4870_v24 = vrot.slane %v4868_v3, 5  ;;  %v4874_v51 = vrot.slane %v4872_v17, 4 }
 0x19c   : > { %7051 = vmatprep.mubr.msk.bf16.mxu0 %vm1574_vm12, %v6510_v63  ;;  %v2458_v50 = vpop.f32.mrf.mxu0  ;;  %v9470_v4 = vadd.f32 %v2442_v2, %v2018_v59  ;;  %v2029_v12 = vadd.f32 %v6808_v46, %v10259_v27  ;;  %v4823_v14 = vsel %vm7352_vm13, %v9419_v15, %v9404_v23  ;;  %v6511_v5 = vcombine.low %v9438_v6, %v5337_v58  ;;  %v10260_v2 = vld [vmem:[#allocation12_spill] sm:$0xff] }
 0x19d   : > { %v2020_v63 = vpop.f32.mrf.mxu1  ;;  %v6512_v38 = vcombine.low %v5341_v29, %v5344_v57  ;;  %v6496_v11 = vrot.slane %v5191_v40, 9  ;;  %v5349_v19 = vrot.slane %v5347_v60, 4  ;;  %v5350_v18 = vrot.slane %v4497_v7, 5 }
 0x19e   : > { %v6846_v49 = vpop.f32.mrf.mxu0  ;;  %v9478_v1 = vadd.f32 %v6842_v10, %v2029_v12  ;;  %v2021_v34 = vadd.f32 %v2020_v63, %v10260_v2  ;;  %v4833_v17 = vsel %vm7352_vm13, %v4828_v28, %v9434_v54  ;;  %v4847_v23 = vsel %vm7352_vm13, %v4842_v45, %v9428_v52  ;;  %v10262_v52 = vld [vmem:[#allocation7_spill] sm:$0xff] }
 0x19f   : > { %v6811_v22 = vpop.f32.mrf.mxu1  ;;  %v4857_v15 = vsel %vm7352_vm13, %v4852_v48, %v4856_v36  ;;  %v4878_v10 = vshll.u32 %v4497_v7, 16  ;;  %v4875_v29 = vor.u32 %v4874_v51, %v4870_v24  ;;  %v5351_v36 = vsel %vm7708_vm2, %v5349_v19, %v5350_v18 }
 0x1a0   : > { %7014 = vmatmul.mubr.msk.bf16.gmra.mxu1 %vm1574_vm12, %v9387_v33  ;;  %v2461_v3 = vpop.f32.mrf.mxu0  ;;  %v9491_v6 = vadd.f32 %v2445_v21, %v2021_v34  ;;  %v2042_v58 = vadd.f32 %v6811_v22, %v10261_v62  ;;  %v4865_v33 = vor.u32 %v4864_v61, %v4861_v30  ;;  %v5348_v21 = vsel %vm7708_vm2, %v6496_v11, %v5347_v60  ;;  %v10263_v30 = vld [vmem:[#allocation17_spill] sm:$0xff]  ;;  %v10264_v60 = vld [vmem:[#allocation16_spill] sm:$0xff]  ;;  %v10265_v11 = vld [vmem:[#allocation19_spill] sm:$0xff] }
 0x1a1   : > { %7017 = vmatprep.mubr.msk.bf16.mxu1 %vm1574_vm12, %v9389_v35  ;;  %v2033_v20 = vpop.f32.mrf.mxu1  ;;  %v6462_v35 = vcombine.low %v4823_v14, %v4833_v17  ;;  %v6463_v46 = vcombine.low %v4847_v23, %v4857_v15  ;;  %v4880_v45 = vrot.slane %v4878_v10, 5  ;;  %v4876_v27 = vrot.slane %v4875_v29, 4  ;;  %v10266_v22 = vld [vmem:[#allocation9_spill] sm:$0xff] }
 0x1a2   : > { %v6849_v59 = vpop.f32.mrf.mxu0  ;;  %v9497_v54 = vadd.f32 %v6845_v42, %v2042_v58  ;;  %v2034_v28 = vadd.f32 %v2033_v20, %v10262_v52  ;;  %v4866_v61 = vrot.slane %v4865_v33, 4  ;;  %v6513_v51 = vcombine.low %v5348_v21, %v5351_v36  ;;  %v10267_v62 = vld [vmem:[#allocation21_spill] sm:$0xff] }
 0x1a3   : > { %7052 = vmatmul.mubr.msk.bf16.gmra.mxu0 %vm1574_vm12, %v6511_v5  ;;  %v6812_v57 = vpop.f32.mrf.mxu1  ;;  %v4881_v34 = vsel %vm7352_vm13, %v4876_v27, %v4880_v45  ;;  %v10269_v21 = vld [vmem:[#allocation25_spill] sm:$0xff]  ;;  %v10271_v27 = vld [vmem:[#allocation28_spill] sm:$0xff] }
 0x1a4   : > { %7055 = vmatprep.mubr.msk.bf16.mxu0 %vm1574_vm12, %v6512_v38  ;;  %v2474_v40 = vpop.f32.mrf.mxu0  ;;  %v9505_v48 = vadd.f32 %v2458_v50, %v2034_v28  ;;  %v2045_v42 = vadd.f32 %v6812_v57, %v10263_v30  ;;  %v4871_v2 = vsel %vm7352_vm13, %v4866_v61, %v4870_v24 }
 0x1a5   : > { %v2036_v12 = vpop.f32.mrf.mxu1  ;;  %v6464_v23 = vcombine.low %v4871_v2, %v4881_v34  ;;  %v10273_v2 = vld [vmem:[#allocation32_spill] sm:$0xff] }
 0x1a6   : > { %v6850_v7 = vpop.f32.mrf.mxu0  ;;  %v9508_v63 = vadd.f32 %v6846_v49, %v2045_v42  ;;  %v2037_v5 = vadd.f32 %v2036_v12, %v10264_v60 }
 0x1a8   : > { %v6815_v55 = vpop.f32.mrf.mxu1  ;;  %7018 = vmatmul.mubr.msk.bf16.gmra.mxu1 %vm1574_vm12, %v6462_v35  ;;  %v2477_v14 = vpop.f32.mrf.mxu0  ;;  %v9512_v38 = vadd.f32 %v2461_v3, %v2037_v5  ;;  %v10272_v5 = vld [vmem:[#allocation31_spill] sm:$0xff] }
 0x1a9   : > { %v2058_v50 = vadd.f32 %v6815_v55, %v10265_v11  ;;  %7021 = vmatprep.mubr.msk.bf16.mxu1 %vm1574_vm12, %v6463_v46  ;;  %v10270_v46 = vld [vmem:[#allocation27_spill] sm:$0xff] }
 0x1aa   : > { %v2049_v49 = vpop.f32.mrf.mxu1  ;;  %v6853_v19 = vpop.f32.mrf.mxu0 }
 0x1ab   : > { %7056 = vmatmul.mubr.msk.bf16.gmra.mxu0 %vm1574_vm12, %v6513_v51  ;;  %v9521_v18 = vadd.f32 %v6849_v59, %v2058_v50  ;;  %v2050_v17 = vadd.f32 %v2049_v49, %v10266_v22 }
 0x1ac   : > { %v6816_v3 = vpop.f32.mrf.mxu1  ;;  %v2490_v15 = vpop.f32.mrf.mxu0 }
 0x1ad   : > { %v9524_v10 = vadd.f32 %v2474_v40, %v2050_v17  ;;  %v2061_v58 = vadd.f32 %v6816_v3, %v10267_v62 }
 0x1ae   : > { %v2052_v33 = vpop.f32.mrf.mxu1  ;;  %v6854_v24 = vpop.f32.mrf.mxu0 }
 0x1af   : > { %v9527_v29 = vadd.f32 %v6850_v7, %v2061_v58  ;;  %v2053_v20 = vadd.f32 %v2052_v33, %v10268_v53 }
 0x1b0   : > { %v6819_v52 = vpop.f32.mrf.mxu1  ;;  %7022 = vmatmul.mubr.msk.bf16.gmra.mxu1 %vm1574_vm12, %v6464_v23  ;;  %v2493_v59 = vpop.f32.mrf.mxu0 }
 0x1b1   : > { %v9531_v28 = vadd.f32 %v2477_v14, %v2053_v20  ;;  %v2074_v36 = vadd.f32 %v6819_v52, %v10269_v21 }
 0x1b2   : > { %v2065_v57 = vpop.f32.mrf.mxu1  ;;  %v6893_v35 = vpop.f32.mrf.mxu0 }
 0x1b3   : > { %v9534_v40 = vadd.f32 %v6853_v19, %v2074_v36  ;;  %v2066_v45 = vadd.f32 %v2065_v57, %v10270_v46 }
 0x1b4   : > { %v6820_v30 = vpop.f32.mrf.mxu1  ;;  %v3462_v42 = vpop.f32.mrf.mxu0 }
 0x1b5   : > { %v9537_v61 = vadd.f32 %v2490_v15, %v2066_v45  ;;  %v2077_v12 = vadd.f32 %v6820_v30, %v10271_v27 }
 0x1b6   : > { %v2068_v7 = vpop.f32.mrf.mxu1  ;;  %v6894_v51 = vpop.f32.mrf.mxu0 }
 0x1b7   : > { %v9540_v60 = vadd.f32 %v6854_v24, %v2077_v12  ;;  %v2069_v55 = vadd.f32 %v2068_v7, %v10272_v5 }
 0x1b8   : > { %v6859_v14 = vpop.f32.mrf.mxu1  ;;  %v3465_v11 = vpop.f32.mrf.mxu0 }
 0x1b9   : > { %v9543_v50 = vadd.f32 %v2493_v59, %v2069_v55  ;;  %v2865_v34 = vadd.f32 %v6859_v14, %v10273_v2 }
 0x1ba   : > { %v2736_v49 = vpop.f32.mrf.mxu1  ;;  %v6897_v19 = vpop.f32.mrf.mxu0 }
 0x1bb   : > { %v9546_v22 = vadd.f32 %v6893_v35, %v2865_v34  ;;  %v2863_v17 = vadd.f32 %v2736_v49, %v9254_v43 }
 0x1bc   : > { %v6860_v3 = vpop.f32.mrf.mxu1  ;;  %v3478_v23 = vpop.f32.mrf.mxu0 }
 0x1bd   : > { %v9549_v15 = vadd.f32 %v3462_v42, %v2863_v17  ;;  %v2866_v62 = vadd.f32 %v6860_v3, %v9263_v39 }
 0x1be   : > { %v2739_v58 = vpop.f32.mrf.mxu1  ;;  %v6898_v33 = vpop.f32.mrf.mxu0 }
 0x1bf   : > { %v9552_v24 = vadd.f32 %v6894_v51, %v2866_v62  ;;  %v2864_v53 = vadd.f32 %v2739_v58, %v9281_v16 }
 0x1c0   : > { %v6863_v20 = vpop.f32.mrf.mxu1  ;;  %v3481_v52 = vpop.f32.mrf.mxu0 }
 0x1c1   : > { %v9555_v59 = vadd.f32 %v3465_v11, %v2864_v53  ;;  %v2869_v21 = vadd.f32 %v6863_v20, %v9305_v26 }
 0x1c2   : > { %v2752_v36 = vpop.f32.mrf.mxu1  ;;  %v6901_v43 = vpop.f32.mrf.mxu0 }
 0x1c3   : > { %v9558_v57 = vadd.f32 %v6897_v19, %v2869_v21  ;;  %v2867_v35 = vadd.f32 %v2752_v36, %v9314_v25 }
 0x1c4   : > { %v6864_v46 = vpop.f32.mrf.mxu1  ;;  %v3494_v39 = vpop.f32.mrf.mxu0 }
 0x1c5   : > { %v9561_v45 = vadd.f32 %v3478_v23, %v2867_v35  ;;  %v2870_v30 = vadd.f32 %v6864_v46, %v9318_v13 }
 0x1c6   : > { %v2755_v42 = vpop.f32.mrf.mxu1  ;;  %v6902_v16 = vpop.f32.mrf.mxu0 }
 0x1c7   : > { %v9564_v27 = vadd.f32 %v6898_v33, %v2870_v30  ;;  %v2868_v12 = vadd.f32 %v2755_v42, %v9336_v56 }
 0x1c8   : > { %v6867_v7 = vpop.f32.mrf.mxu1  ;;  %v3497_v26 = vpop.f32.mrf.mxu0 }
 0x1c9   : > { %v9567_v51 = vadd.f32 %v3481_v52, %v2868_v12  ;;  %v2873_v5 = vadd.f32 %v6867_v7, %v9349_v32 }
 0x1ca   : > { %v2768_v55 = vpop.f32.mrf.mxu1  ;;  %v6905_v25 = vpop.f32.mrf.mxu0 }
 0x1cb   : > { %v9570_v14 = vadd.f32 %v6901_v43, %v2873_v5  ;;  %v2871_v11 = vadd.f32 %v2768_v55, %v9379_v47 }
 0x1cc   : > { %v6868_v2 = vpop.f32.mrf.mxu1  ;;  %v3510_v13 = vpop.f32.mrf.mxu0 }
 0x1cd   : > { %v9573_v34 = vadd.f32 %v3494_v39, %v2871_v11  ;;  %v2874_v49 = vadd.f32 %v6868_v2, %v9397_v41 }
 0x1ce   : > { %v2771_v19 = vpop.f32.mrf.mxu1  ;;  %v6906_v56 = vpop.f32.mrf.mxu0 }
 0x1cf   : > { %v9576_v17 = vadd.f32 %v6902_v16, %v2874_v49  ;;  %v2872_v3 = vadd.f32 %v2771_v19, %v9410_v8 }
 0x1d0   : > { %v6871_v23 = vpop.f32.mrf.mxu1  ;;  %v3513_v32 = vpop.f32.mrf.mxu0 }
 0x1d1   : > { %v9579_v62 = vadd.f32 %v3497_v26, %v2872_v3  ;;  %v2877_v58 = vadd.f32 %v6871_v23, %v9422_v37 }
 0x1d2   : > { %v2784_v33 = vpop.f32.mrf.mxu1  ;;  %v6909_v47 = vpop.f32.mrf.mxu0 }
 0x1d3   : > { %v9582_v53 = vadd.f32 %v6905_v25, %v2877_v58  ;;  %v2875_v20 = vadd.f32 %v2784_v33, %v9430_v0 }
 0x1d4   : > { %v6872_v52 = vpop.f32.mrf.mxu1  ;;  %v3526_v41 = vpop.f32.mrf.mxu0 }
 0x1d5   : > { %v9585_v21 = vadd.f32 %v3510_v13, %v2875_v20  ;;  %v2878_v36 = vadd.f32 %v6872_v52, %v9442_v44 }
 0x1d6   : > { %v2787_v43 = vpop.f32.mrf.mxu1  ;;  %v6910_v8 = vpop.f32.mrf.mxu0 }
 0x1d7   : > { %v9588_v35 = vadd.f32 %v6906_v56, %v2878_v36  ;;  %v2876_v46 = vadd.f32 %v2787_v43, %v9448_v31 }
 0x1d8   : > { %v6875_v39 = vpop.f32.mrf.mxu1  ;;  %v3529_v37 = vpop.f32.mrf.mxu0 }
 0x1d9   : > { %v9591_v30 = vadd.f32 %v3513_v32, %v2876_v46  ;;  %v2881_v42 = vadd.f32 %v6875_v39, %v9463_v9 }
 0x1da   : > { %v2800_v16 = vpop.f32.mrf.mxu1  ;;  %v6913_v0 = vpop.f32.mrf.mxu0 }
 0x1db   : > { %v9594_v12 = vadd.f32 %v6909_v47, %v2881_v42  ;;  %v2879_v7 = vadd.f32 %v2800_v16, %v9470_v4 }
 0x1dc   : > { %v6876_v26 = vpop.f32.mrf.mxu1  ;;  %v3542_v44 = vpop.f32.mrf.mxu0 }
 0x1dd   : > { %v9597_v5 = vadd.f32 %v3526_v41, %v2879_v7  ;;  %v2882_v55 = vadd.f32 %v6876_v26, %v9478_v1 }
 0x1de   : > { %v2803_v25 = vpop.f32.mrf.mxu1  ;;  %v6914_v31 = vpop.f32.mrf.mxu0 }
 0x1df   : > { %v9600_v11 = vadd.f32 %v6910_v8, %v2882_v55  ;;  %v2880_v2 = vadd.f32 %v2803_v25, %v9491_v6 }
 0x1e0   : > { %v6879_v13 = vpop.f32.mrf.mxu1  ;;  %v3545_v9 = vpop.f32.mrf.mxu0 }
 0x1e1   : > { %v9603_v49 = vadd.f32 %v3529_v37, %v2880_v2  ;;  %v2885_v19 = vadd.f32 %v6879_v13, %v9497_v54 }
 0x1e2   : > { %v2816_v56 = vpop.f32.mrf.mxu1  ;;  %v6917_v4 = vpop.f32.mrf.mxu0 }
 0x1e3   : > { %10274 = vst [vmem:[#allocation3_spill] sm:$0xff] %v9603_v49  ;;  %v9606_v3 = vadd.f32 %v6913_v0, %v2885_v19  ;;  %v2883_v23 = vadd.f32 %v2816_v56, %v9505_v48 }
 0x1e4   : > { %v6880_v32 = vpop.f32.mrf.mxu1  ;;  %v3558_v1 = vpop.f32.mrf.mxu0 }
 0x1e5   : > { %10275 = vst [vmem:[#allocation5_spill] sm:$0xff] %v9606_v3  ;;  %v9609_v58 = vadd.f32 %v3542_v44, %v2883_v23  ;;  %v2886_v33 = vadd.f32 %v6880_v32, %v9508_v63 }
 0x1e6   : > { %v2819_v47 = vpop.f32.mrf.mxu1  ;;  %v6918_v6 = vpop.f32.mrf.mxu0 }
 0x1e7   : > { %10276 = vst [vmem:[#allocation11_spill] sm:$0xff] %v9609_v58  ;;  %v9612_v20 = vadd.f32 %v6914_v31, %v2886_v33  ;;  %v2884_v52 = vadd.f32 %v2819_v47, %v9512_v38 }
 0x1e8   : > { %v6883_v41 = vpop.f32.mrf.mxu1  ;;  %v3561_v54 = vpop.f32.mrf.mxu0 }
 0x1e9   : > { %10277 = vst [vmem:[#allocation8_spill] sm:$0xff] %v9612_v20  ;;  %v9615_v36 = vadd.f32 %v3545_v9, %v2884_v52  ;;  %v2889_v43 = vadd.f32 %v6883_v41, %v9521_v18 }
 0x1ea   : > { %v2832_v8 = vpop.f32.mrf.mxu1  ;;  %v6921_v48 = vpop.f32.mrf.mxu0 }
 0x1eb   : > { %10278 = vst [vmem:[#allocation14_spill] sm:$0xff] %v9615_v36  ;;  %v9618_v46 = vadd.f32 %v6917_v4, %v2889_v43  ;;  %v2887_v39 = vadd.f32 %v2832_v8, %v9524_v10 }
 0x1ec   : > { %v6884_v37 = vpop.f32.mrf.mxu1  ;;  %v3574_v63 = vpop.f32.mrf.mxu0 }
 0x1ed   : > { %10279 = vst [vmem:[#allocation15_spill] sm:$0xff] %v9618_v46  ;;  %v9621_v42 = vadd.f32 %v3558_v1, %v2887_v39  ;;  %v2890_v16 = vadd.f32 %v6884_v37, %v9527_v29 }
 0x1ee   : > { %v2835_v0 = vpop.f32.mrf.mxu1  ;;  %v6922_v38 = vpop.f32.mrf.mxu0 }
 0x1ef   : > { %10280 = vst [vmem:[#allocation20_spill] sm:$0xff] %v9621_v42  ;;  %v9624_v7 = vadd.f32 %v6918_v6, %v2890_v16  ;;  %v2888_v26 = vadd.f32 %v2835_v0, %v9531_v28 }
 0x1f0   : > { %v6887_v44 = vpop.f32.mrf.mxu1  ;;  %v3577_v18 = vpop.f32.mrf.mxu0 }
 0x1f1   : > { %10281 = vst [vmem:[#allocation29_spill] sm:$0xff] %v9624_v7  ;;  %v9627_v55 = vadd.f32 %v3561_v54, %v2888_v26  ;;  %v2893_v25 = vadd.f32 %v6887_v44, %v9534_v40 }
 0x1f2   : > { %v2848_v31 = vpop.f32.mrf.mxu1  ;;  %v9630_v10 = vpop.f32.mrf.mxu0 }
 0x1f3   : > { %10282 = vst [vmem:[#allocation23_spill] sm:$0xff] %v9627_v55  ;;  %v9632_v2 = vadd.f32 %v6921_v48, %v2893_v25  ;;  %v2891_v13 = vadd.f32 %v2848_v31, %v9537_v61 }
 0x1f4   : > { %v6888_v29 = vpop.f32.mrf.mxu1  ;;  %v9635_v9 = vpop.f32.mrf.mxu0 }
 0x1f5   : > { %10283 = vst [vmem:[#allocation30_spill] sm:$0xff] %v9632_v2  ;;  %v9637_v19 = vadd.f32 %v3574_v63, %v2891_v13  ;;  %v2894_v28 = vadd.f32 %v6888_v29, %v9540_v60 }
 0x1f6   : > { %v2851_v56 = vpop.f32.mrf.mxu1  ;;  %v9640_v4 = vpop.f32.mrf.mxu0 }
 0x1f7   : > { %10284 = vst [vmem:[#allocation18_spill] sm:$0xff] %v9637_v19  ;;  %v9642_v23 = vadd.f32 %v6922_v38, %v2894_v28  ;;  %v2892_v40 = vadd.f32 %v2851_v56, %v9543_v50 }
 0x1f8   : > { %v6927_v32 = vpop.f32.mrf.mxu1  ;;  %v9645_v1 = vpop.f32.mrf.mxu0 }
 0x1f9   : > { %10285 = vst [vmem:[#allocation22_spill] sm:$0xff] %v9642_v23  ;;  %v9647_v33 = vadd.f32 %v3577_v18, %v2892_v40 }
 0x1fa   : > { %v3932_v61 = vpop.f32.mrf.mxu1  ;;  %v9649_v47 = vpop.f32.mrf.mxu0 }
 0x1fb   : > { %10286 = vst [vmem:[#allocation26_spill] sm:$0xff] %v9647_v33 }
 0x1fc   : > { %v6928_v6 = vpop.f32.mrf.mxu1  ;;  %v9651_v52 = vpop.f32.mrf.mxu0 }
 0x1fe   : > { %v3935_v41 = vpop.f32.mrf.mxu1  ;;  %v9653_v60 = vpop.f32.mrf.mxu0 }
 0x200   : > { %v6931_v54 = vpop.f32.mrf.mxu1  ;;  %v9655_v43 = vpop.f32.mrf.mxu0 }
 0x202   : > { %v3948_v8 = vpop.f32.mrf.mxu1  ;;  %v9657_v48 = vpop.f32.mrf.mxu0 }
 0x204   : > { %v6932_v50 = vpop.f32.mrf.mxu1  ;;  %v9659_v39 = vpop.f32.mrf.mxu0 }
 0x206   : > { %v3951_v37 = vpop.f32.mrf.mxu1  ;;  %v9661_v63 = vpop.f32.mrf.mxu0 }
 0x208   : > { %v6935_v16 = vpop.f32.mrf.mxu1  ;;  %v9663_v0 = vpop.f32.mrf.mxu0 }
 0x20a   : > { %v3964_v38 = vpop.f32.mrf.mxu1  ;;  %v9665_v26 = vpop.f32.mrf.mxu0 }
 0x20c   : > { %v6936_v44 = vpop.f32.mrf.mxu1  ;;  %v9667_v18 = vpop.f32.mrf.mxu0 }
 0x20e   : > { %v3967_v25 = vpop.f32.mrf.mxu1  ;;  %v9669_v31 = vpop.f32.mrf.mxu0 }
 0x210   : > { %v6939_v13 = vpop.f32.mrf.mxu1  ;;  %v9671_v29 = vpop.f32.mrf.mxu0 }
 0x211   : > { %10287 = vst [vmem:[#allocation4_spill] sm:$0xff] %v9671_v29 }
 0x212   : > { %v3980_v28 = vpop.f32.mrf.mxu1  ;;  %v9673_v56 = vpop.f32.mrf.mxu0 }
 0x213   : > { %10288 = vst [vmem:[#allocation6_spill] sm:$0xff] %v9673_v56 }
 0x214   : > { %v6940_v40 = vpop.f32.mrf.mxu1  ;;  %v9675_v33 = vpop.f32.mrf.mxu0 }
 0x215   : > { %10289 = vst [vmem:[#allocation10_spill] sm:$0xff] %v9675_v33 }
 0x216   : > { %v3983_v23 = vpop.f32.mrf.mxu1  ;;  %v9677_v19 = vpop.f32.mrf.mxu0 }
 0x217   : > { %10290 = vst [vmem:[#allocation12_spill] sm:$0xff] %v9677_v19 }
 0x218   : > { %v6943_v2 = vpop.f32.mrf.mxu1  ;;  %v9679_v55 = vpop.f32.mrf.mxu0 }
 0x219   : > { %10291 = vst [vmem:[#allocation13_spill] sm:$0xff] %v9679_v55 }
 0x21a   : > { %v3996_v7 = vpop.f32.mrf.mxu1  ;;  %v9681_v42 = vpop.f32.mrf.mxu0 }
 0x21b   : > { %10292 = vst [vmem:[#allocation7_spill] sm:$0xff] %v9681_v42 }
 0x21c   : > { %v6944_v46 = vpop.f32.mrf.mxu1  ;;  %v9683_v36 = vpop.f32.mrf.mxu0 }
 0x21d   : > { %10293 = vst [vmem:[#allocation17_spill] sm:$0xff] %v9683_v36 }
 0x21e   : > { %v9685_v20 = vpop.f32.mrf.mxu1  ;;  %v9687_v58 = vpop.f32.mrf.mxu0 }
 0x21f   : > { %10294 = vst [vmem:[#allocation16_spill] sm:$0xff] %v9685_v20  ;;  %10295 = vst [vmem:[#allocation19_spill] sm:$0xff] %v9687_v58 }
 0x220   : > { %v9689_v3 = vpop.f32.mrf.mxu1  ;;  %v9691_v49 = vpop.f32.mrf.mxu0 }
 0x221   : > { %10296 = vst [vmem:[#allocation9_spill] sm:$0xff] %v9689_v3  ;;  %10297 = vst [vmem:[#allocation21_spill] sm:$0xff] %v9691_v49 }
 0x222   : > { %v9693_v33 = vpop.f32.mrf.mxu1  ;;  %v9695_v19 = vpop.f32.mrf.mxu0 }
 0x223   : > { %10298 = vst [vmem:[#allocation24_spill] sm:$0xff] %v9693_v33  ;;  %10299 = vst [vmem:[#allocation25_spill] sm:$0xff] %v9695_v19  ;;  %v4061_v19 = vadd.f32 %v6927_v32, %v9546_v22  ;;  %v4063_v22 = vadd.f32 %v3948_v8, %v9561_v45  ;;  %v4066_v32 = vadd.f32 %v6932_v50, %v9564_v27 }
 0x224   : > { %v9697_v56 = vpop.f32.mrf.mxu1  ;;  %v9699_v55 = vpop.f32.mrf.mxu0  ;;  %v4073_v45 = vadd.f32 %v6939_v13, %v9582_v53  ;;  %v4077_v53 = vadd.f32 %v6943_v2, %v9594_v12  ;;  %v4075_v2 = vadd.f32 %v3996_v7, %v9597_v5 }
 0x225   : > { %10300 = vst [vmem:[#allocation27_spill] sm:$0xff] %v9697_v56  ;;  %10301 = vst [vmem:[#allocation28_spill] sm:$0xff] %v9699_v55 }
 0x226   : > { %v9701_v42 = vpop.f32.mrf.mxu1  ;;  %v9703_v29 = vpop.f32.mrf.mxu0  ;;  %v9775_v12 = vadd.f32 %v9665_v26, %v4073_v45  ;;  %v10314_v5 = vld [vmem:[#allocation16_spill] sm:$0xff] }
 0x227   : > { %10302 = vst [vmem:[#allocation31_spill] sm:$0xff] %v9701_v42  ;;  %10303 = vst [vmem:[#allocation32_spill] sm:$0xff] %v9703_v29  ;;  %v4059_v29 = vadd.f32 %v3932_v61, %v9549_v15  ;;  %v4064_v15 = vadd.f32 %v3951_v37, %v9567_v51  ;;  %v4067_v61 = vadd.f32 %v3964_v38, %v9573_v34 }
 0x228   : > { %v9705_v36 = vpop.f32.mrf.mxu1  ;;  %v9707_v20 = vpop.f32.mrf.mxu0  ;;  %v4071_v51 = vadd.f32 %v3980_v28, %v9585_v21  ;;  %v4072_v34 = vadd.f32 %v3983_v23, %v9591_v30 }
 0x229   : > { %10304 = vst [vmem:[#allocation33_spill] sm:$0xff] %v9705_v36  ;;  %10305 = vst [vmem:[#allocation34_spill] sm:$0xff] %v9707_v20  ;;  %v4062_v36 = vadd.f32 %v6928_v6, %v9552_v24  ;;  %v4069_v24 = vadd.f32 %v6935_v16, %v9570_v14  ;;  %v4070_v6 = vadd.f32 %v6936_v44, %v9576_v17  ;;  %v10319_v44 = vld [vmem:[#allocation8_spill] sm:$0xff] }
 0x22a   : > { %v9709_v58 = vpop.f32.mrf.mxu1  ;;  %v9711_v3 = vpop.f32.mrf.mxu0  ;;  %v4074_v14 = vadd.f32 %v6940_v40, %v9588_v35  ;;  %v9766_v35 = vadd.f32 %v9659_v39, %v4067_v61  ;;  %v10313_v39 = vld [vmem:[#allocation3_spill] sm:$0xff]  ;;  %v10318_v16 = vld [vmem:[#allocation24_spill] sm:$0xff]  ;;  %v10323_v40 = vld [vmem:[#allocation10_spill] sm:$0xff] }
 0x22b   : > { %10306 = vst [vmem:[#allocation35_spill] sm:$0xff] %v9711_v3  ;;  %v4060_v3 = vadd.f32 %v3935_v41, %v9555_v59  ;;  %v4418_v59 = vadd.f32 %v9635_v9, %v4059_v29  ;;  %v9751_v9 = vadd.f32 %v9651_v52, %v4063_v22  ;;  %v9763_v21 = vadd.f32 %v9657_v48, %v4069_v24  ;;  %v10312_v48 = vld [vmem:[#allocation6_spill] sm:$0xff]  ;;  %v10325_v24 = vld [vmem:[#allocation15_spill] sm:$0xff] }
 0x22c   : > { %v9713_v49 = vpop.f32.mrf.mxu1  ;;  %v9715_v33 = vpop.f32.mrf.mxu0  ;;  %v9769_v30 = vadd.f32 %v9661_v63, %v4070_v6  ;;  %v9780_v52 = vadd.f32 %v9667_v18, %v4071_v51  ;;  %v9789_v50 = vadd.f32 %v10312_v48, %v4077_v53  ;;  %v4076_v7 = vadd.f32 %v10314_v5, %v10313_v39  ;;  %v10317_v63 = vld [vmem:[#allocation11_spill] sm:$0xff]  ;;  %v10328_v51 = vld [vmem:[#allocation29_spill] sm:$0xff] }
 0x22d   : > { %10307 = vst [vmem:[#allocation36_spill] sm:$0xff] %v9713_v49  ;;  %10308 = vst [vmem:[#allocation37_spill] sm:$0xff] %v9715_v33  ;;  %v4420_v49 = vadd.f32 %v9630_v10, %v4061_v19  ;;  %v4065_v33 = vadd.f32 %v6931_v54, %v9558_v57  ;;  %v4421_v10 = vadd.f32 %v9640_v4, %v4062_v36  ;;  %v10311_v54 = vld [vmem:[#allocation4_spill] sm:$0xff]  ;;  %v10320_v18 = vld [vmem:[#allocation27_spill] sm:$0xff] }
 0x22e   : > { %v9718_v56 = vpop.f32.mrf.mxu1  ;;  %v9720_v55 = vpop.f32.mrf.mxu0  ;;  %v4068_v57 = vadd.f32 %v3967_v25, %v9579_v62  ;;  %v4419_v41 = vadd.f32 %v9645_v1, %v4060_v3  ;;  %v9754_v62 = vadd.f32 %v9653_v60, %v4066_v32  ;;  %v9760_v3 = vadd.f32 %v9655_v43, %v4064_v15  ;;  %v10322_v13 = vld [vmem:[#allocation31_spill] sm:$0xff]  ;;  %v10324_v32 = vld [vmem:[#allocation12_spill] sm:$0xff]  ;;  %v10332_v48 = vld [vmem:[#allocation13_spill] sm:$0xff] }
 0x22f   : > { %10309 = vst [vmem:[#allocation38_spill] sm:$0xff] %v9718_v56  ;;  %10310 = vst [vmem:[#allocation39_spill] sm:$0xff] %v9720_v55  ;;  %v4424_v17 = vadd.f32 %v9649_v47, %v4065_v33  ;;  %v4078_v1 = vadd.f32 %v6944_v46, %v9600_v11  ;;  %v9783_v60 = vadd.f32 %v9669_v31, %v4074_v14  ;;  %v10315_v11 = vld [vmem:[#allocation5_spill] sm:$0xff]  ;;  %v10321_v31 = vld [vmem:[#allocation14_spill] sm:$0xff] }
 0x230   : > { %v9724_v42 = vpop.f32.mrf.mxu1  ;;  %v9726_v20 = vpop.f32.mrf.mxu0  ;;  %v9772_v23 = vadd.f32 %v9663_v0, %v4068_v57  ;;  %v9786_v43 = vadd.f32 %v10311_v54, %v4072_v34  ;;  %v10316_v46 = vld [vmem:[#allocation9_spill] sm:$0xff]  ;;  %v4079_v0 = vadd.f32 %v10318_v16, %v10317_v63  ;;  %v4082_v25 = vadd.f32 %v10320_v18, %v10319_v44  ;;  %v10327_v57 = vld [vmem:[#allocation20_spill] sm:$0xff]  ;;  %v10330_v53 = vld [vmem:[#allocation23_spill] sm:$0xff] }
 0x231   : > { %v4081_v37 = vadd.f32 %v10316_v46, %v10315_v11  ;;  %v9809_v22 = vadd.f32 %v10323_v40, %v4075_v2  ;;  %v9812_v15 = vadd.f32 %v10324_v32, %v4078_v1  ;;  %v10326_v61 = vld [vmem:[#allocation33_spill] sm:$0xff]  ;;  %v4083_v45 = vadd.f32 %v9709_v58, %v10327_v57  ;;  %v10333_v39 = vld [vmem:[#allocation7_spill] sm:$0xff]  ;;  %v10334_v11 = vld [vmem:[#allocation30_spill] sm:$0xff] }
 0x232   : > { %v9733_v56 = vpop.f32.mrf.mxu1  ;;  %v4085_v6 = vadd.f32 %v10326_v61, %v10325_v24  ;;  %v9823_v1 = vadd.f32 %v10332_v48, %v4076_v7  ;;  %v4089_v58 = vadd.f32 %v9724_v42, %v10334_v11  ;;  %v10336_v18 = vld [vmem:[#allocation19_spill] sm:$0xff]  ;;  %v10339_v42 = vld [vmem:[#allocation28_spill] sm:$0xff] }
 0x233   : > { %v7029_v55 = vpop.f32.mrf.mxu0  ;;  %v9826_v5 = vadd.f32 %v10333_v39, %v4081_v37  ;;  %v10338_v37 = vld [vmem:[#allocation25_spill] sm:$0xff]  ;;  %v10340_v61 = vld [vmem:[#allocation32_spill] sm:$0xff] }
 0x234   : > { %v9743_v27 = vpop.f32.mrf.mxu1  ;;  %v10329_v14 = vld [vmem:[#allocation36_spill] sm:$0xff] }
 0x235   : > { %v5487_v19 = vpop.f32.mrf.mxu0  ;;  %v4086_v34 = vadd.f32 %v10329_v14, %v10328_v51 }
 0x236   : > { %v9757_v36 = vpop.f32.mrf.mxu1 }
 0x237   : > { %v7030_v4 = vpop.f32.mrf.mxu0  ;;  %v9848_v57 = vadd.f32 %v10340_v61, %v4086_v34  ;;  %v10344_v34 = vld [vmem:[#allocation22_spill] sm:$0xff] }
 0x238   : > { %v6995_v33 = vpop.f32.mrf.mxu1  ;;  %v9862_v48 = vadd.f32 %v9743_v27, %v10344_v34 }
 0x239   : > { %v5490_v47 = vpop.f32.mrf.mxu0  ;;  %v5146_v8 = vadd.f32 %v6995_v33, %v4420_v49  ;;  %v4080_v49 = vadd.f32 %v10322_v13, %v10321_v31  ;;  %v10331_v33 = vld [vmem:[#allocation38_spill] sm:$0xff]  ;;  %v9834_v31 = vadd.f32 %v10336_v18, %v4082_v25 }
 0x23a   : > { %v5017_v38 = vpop.f32.mrf.mxu1  ;;  %v4084_v54 = vadd.f32 %v10331_v33, %v10330_v53  ;;  %v10341_v25 = vld [vmem:[#allocation34_spill] sm:$0xff] }
 0x23b   : > { %v7033_v26 = vpop.f32.mrf.mxu0  ;;  %v5616_v29 = vadd.f32 %v7029_v55, %v5146_v8  ;;  %v5144_v28 = vadd.f32 %v5017_v38, %v4418_v59  ;;  %v10335_v38 = vld [vmem:[#allocation17_spill] sm:$0xff] }
 0x23c   : > { %v6996_v55 = vpop.f32.mrf.mxu1  ;;  %v9831_v44 = vadd.f32 %v10335_v38, %v4079_v0 }
 0x23d   : > { %v5503_v59 = vpop.f32.mrf.mxu0  ;;  %v6570_v2 = vpack.c.bf16 %v5616_v29, %v5616_v29  ;;  %v5614_v8 = vadd.f32 %v5487_v19, %v5144_v28  ;;  %v5147_v46 = vadd.f32 %v6996_v55, %v4421_v10  ;;  %v10337_v19 = vld [vmem:[#allocation21_spill] sm:$0xff]  ;;  %v9842_v28 = vadd.f32 %v10338_v37, %v4085_v6  ;;  %v10342_v6 = vld [vmem:[#allocation35_spill] sm:$0xff] }
 0x23e   : > { %v5020_v63 = vpop.f32.mrf.mxu1  ;;  %v9837_v13 = vadd.f32 %v10337_v19, %v4080_v49  ;;  %v9845_v10 = vadd.f32 %v10339_v42, %v4083_v45  ;;  %v9851_v49 = vadd.f32 %v10341_v25, %v4084_v54  ;;  %v9856_v14 = vadd.f32 %v10342_v6, %v4089_v58  ;;  %v10343_v45 = vld [vmem:[#allocation18_spill] sm:$0xff] }
 0x23f   : > { %v7034_v16 = vpop.f32.mrf.mxu0  ;;  %5776 = vst.msk [vmem:[%s9806_s19 + $0x8] sm:$0xf] %vm914_vm6, %v6570_v2  ;;  %v6568_v7 = vpack.c.bf16 %v5614_v8, %v5614_v8  ;;  %v5617_v40 = vadd.f32 %v7030_v4, %v5147_v46  ;;  %v5145_v32 = vadd.f32 %v5020_v63, %v4419_v41  ;;  %v5877_v55 = vmul.f32 %v5614_v8, %v5614_v8 }
 0x240   : > { %v6999_v24 = vpop.f32.mrf.mxu1  ;;  %v4087_v4 = vadd.f32 %v9733_v56, %v10343_v45  ;;  %v5879_v54 = vmul.f32 %v5616_v29, %v5616_v29  ;;  %v5809_v38 = vsel %vm1574_vm12, %v5616_v29, 0.0 }
 0x241   : > { %v5506_v0 = vpop.f32.mrf.mxu0  ;;  %5774 = vst.msk [vmem:[%s9806_s19] sm:$0xf] %vm914_vm6, %v6568_v7  ;;  %v5150_v51 = vadd.f32 %v6999_v24, %v4424_v17  ;;  %v6571_v41 = vpack.c.bf16 %v5617_v40, %v5617_v40  ;;  %v5615_v53 = vadd.f32 %v5490_v47, %v5145_v32  ;;  %v5806_v17 = vsel %vm1574_vm12, %v5614_v8, 0.0 }
 0x242   : > { %v5033_v33 = vpop.f32.mrf.mxu1  ;;  %v5909_v27 = vsel %vm1574_vm12, %v5877_v55, 0.0  ;;  %v5912_v32 = vsel %vm1574_vm12, %v5879_v54, 0.0  ;;  %v5811_v25 = vsel %vm1574_vm12, %v5617_v40, 0.0 }
 0x243   : > { %v7037_v2 = vpop.f32.mrf.mxu0  ;;  %v5620_v39 = vadd.f32 %v7033_v26, %v5150_v51  ;;  %v5148_v11 = vadd.f32 %v5033_v33, %v9751_v9  ;;  %5777 = vst.msk [vmem:[%s9806_s19 + $0xc] sm:$0xf] %vm914_vm6, %v6571_v41  ;;  %v6569_v58 = vpack.c.bf16 %v5615_v53, %v5615_v53  ;;  %v5807_v56 = vsel %vm1574_vm12, %v5615_v53, 0.0 }
 0x244   : > { %v5878_v46 = vmul.f32 %v5615_v53, %v5615_v53  ;;  %v7000_v47 = vpop.f32.mrf.mxu1  ;;  %v5808_v18 = vadd.f32 %v5807_v56, %v5806_v17  ;;  %v5880_v26 = vmul.f32 %v5617_v40, %v5617_v40 }
 0x245   : > { %v5519_v63 = vpop.f32.mrf.mxu0  ;;  %v6574_v19 = vpack.c.bf16 %v5620_v39, %v5620_v39  ;;  %5775 = vst.msk [vmem:[%s9806_s19 + $0x4] sm:$0xf] %vm914_vm6, %v6569_v58  ;;  %v5618_v8 = vadd.f32 %v5503_v59, %v5148_v11  ;;  %v5151_v7 = vadd.f32 %v7000_v47, %v9754_v62  ;;  %v5883_v54 = vmul.f32 %v5620_v39, %v5620_v39 }
 0x246   : > { %v5910_v9 = vsel %vm1574_vm12, %v5878_v46, 0.0  ;;  %v5036_v37 = vpop.f32.mrf.mxu1  ;;  %v5810_v24 = vadd.f32 %v5809_v38, %v5808_v18  ;;  %v5914_v34 = vsel %vm1574_vm12, %v5880_v26, 0.0 }
 0x247   : > { %v7038_v42 = vpop.f32.mrf.mxu0  ;;  %v5911_v61 = vadd.f32 %v5910_v9, %v5909_v27  ;;  %5780 = vst.msk [vmem:[%s9806_s19 + $0x18] sm:$0xf] %vm914_vm6, %v6574_v19  ;;  %v5149_v29 = vadd.f32 %v5036_v37, %v9760_v3  ;;  %v6572_v55 = vpack.c.bf16 %v5618_v8, %v5618_v8  ;;  %v5881_v51 = vmul.f32 %v5618_v8, %v5618_v8  ;;  %v10345_v19 = vld [vmem:[#allocation37_spill] sm:$0xff] }
 0x248   : > { %v5621_v6 = vadd.f32 %v7034_v16, %v5151_v7  ;;  %v7003_v45 = vpop.f32.mrf.mxu1  ;;  %v5812_v62 = vadd.f32 %v5811_v25, %v5810_v24  ;;  %v5813_v3 = vsel %vm1574_vm12, %v5618_v8, 0.0  ;;  %v9891_v26 = vadd.f32 %v10345_v19, %v4087_v4 }
 0x249   : > { %v5522_v59 = vpop.f32.mrf.mxu0  ;;  %v5913_v41 = vadd.f32 %v5912_v32, %v5911_v61  ;;  %v5619_v53 = vadd.f32 %v5506_v0, %v5149_v29  ;;  %v5154_v33 = vadd.f32 %v7003_v45, %v9763_v21  ;;  %5778 = vst.msk [vmem:[%s9806_s19 + $0x10] sm:$0xf] %vm914_vm6, %v6572_v55  ;;  %v5916_v0 = vsel %vm1574_vm12, %v5881_v51, 0.0  ;;  %v10346_v51 = vld [vmem:[#allocation39_spill] sm:$0xff] }
 0x24a   : > { %v6575_v11 = vpack.c.bf16 %v5621_v6, %v5621_v6  ;;  %v5049_v40 = vpop.f32.mrf.mxu1  ;;  %v5814_v16 = vadd.f32 %v5813_v3, %v5812_v62  ;;  %v5817_v37 = vsel %vm1574_vm12, %v5620_v39, 0.0  ;;  %v5884_v32 = vmul.f32 %v5621_v6, %v5621_v6 }
 0x24b   : > { %v7041_v17 = vpop.f32.mrf.mxu0  ;;  %v5915_v58 = vadd.f32 %v5914_v34, %v5913_v41  ;;  %v6573_v56 = vpack.c.bf16 %v5619_v53, %v5619_v53  ;;  %v5815_v46 = vsel %vm1574_vm12, %v5619_v53, 0.0  ;;  %v5882_v21 = vmul.f32 %v5619_v53, %v5619_v53 }
 0x24c   : > { %5781 = vst.msk [vmem:[%s9806_s19 + $0x1c] sm:$0xf] %vm914_vm6, %v6575_v11  ;;  %v5624_v47 = vadd.f32 %v7037_v2, %v5154_v33  ;;  %v5152_v38 = vadd.f32 %v5049_v40, %v9766_v35  ;;  %v7004_v27 = vpop.f32.mrf.mxu1  ;;  %v5816_v8 = vadd.f32 %v5815_v46, %v5814_v16  ;;  %v9900_v45 = vadd.f32 %v10346_v51, %v9862_v48  ;;  %v10347_v33 = vld [vmem:[#allocation26_spill] sm:$0xff] }
 0x24d   : > { %v5535_v18 = vpop.f32.mrf.mxu0  ;;  %v5917_v9 = vadd.f32 %v5916_v0, %v5915_v58  ;;  %5779 = vst.msk [vmem:[%s9806_s19 + $0x14] sm:$0xf] %vm914_vm6, %v6573_v56  ;;  %v5155_v7 = vadd.f32 %v7004_v27, %v9769_v30  ;;  %v5918_v24 = vsel %vm1574_vm12, %v5882_v21, 0.0  ;;  %v5920_v41 = vsel %vm1574_vm12, %v5883_v54, 0.0 }
 0x24e   : > { %v6578_v2 = vpack.c.bf16 %v5624_v47, %v5624_v47  ;;  %v5052_v61 = vpop.f32.mrf.mxu1  ;;  %v5818_v29 = vadd.f32 %v5817_v37, %v5816_v8  ;;  %v5622_v55 = vadd.f32 %v5519_v63, %v5152_v38  ;;  %v5819_v30 = vsel %vm1574_vm12, %v5621_v6, 0.0 }
 0x24f   : > { %v7042_v35 = vpop.f32.mrf.mxu0  ;;  %v5919_v25 = vadd.f32 %v5918_v24, %v5917_v9  ;;  %v5625_v4 = vadd.f32 %v7038_v42, %v5155_v7  ;;  %v5153_v39 = vadd.f32 %v5052_v61, %v9772_v23  ;;  %v4088_v34 = vadd.f32 %v9757_v36, %v10347_v33 }
 0x250   : > { %5784 = vst.msk [vmem:[%s9806_s19 + $0x28] sm:$0xf] %vm914_vm6, %v6578_v2  ;;  %v7007_v62 = vpop.f32.mrf.mxu1  ;;  %v6576_v42 = vpack.c.bf16 %v5622_v55, %v5622_v55  ;;  %v5820_v3 = vadd.f32 %v5819_v30, %v5818_v29  ;;  %v5922_v48 = vsel %vm1574_vm12, %v5884_v32, 0.0  ;;  %v5821_v54 = vsel %vm1574_vm12, %v5622_v55, 0.0 }
 0x251   : > { %v5538_v53 = vpop.f32.mrf.mxu0  ;;  %v5921_v63 = vadd.f32 %v5920_v41, %v5919_v25  ;;  %v5885_v11 = vmul.f32 %v5622_v55, %v5622_v55  ;;  %v6579_v40 = vpack.c.bf16 %v5625_v4, %v5625_v4  ;;  %v5623_v56 = vadd.f32 %v5522_v59, %v5153_v39 }
 0x252   : > { %v5065_v6 = vpop.f32.mrf.mxu1  ;;  %5782 = vst.msk [vmem:[%s9806_s19 + $0x20] sm:$0xf] %vm914_vm6, %v6576_v42  ;;  %v5822_v23 = vadd.f32 %v5821_v54, %v5820_v3  ;;  %v5158_v36 = vadd.f32 %v7007_v62, %v9775_v12  ;;  %v5887_v46 = vmul.f32 %v5624_v47, %v5624_v47  ;;  %v5888_v21 = vmul.f32 %v5625_v4, %v5625_v4 }
 0x253   : > { %v9911_v16 = vpop.f32.mrf.mxu0  ;;  %v5923_v58 = vadd.f32 %v5922_v48, %v5921_v63  ;;  %v5924_v0 = vsel %vm1574_vm12, %v5885_v11, 0.0  ;;  %5785 = vst.msk [vmem:[%s9806_s19 + $0x2c] sm:$0xf] %vm914_vm6, %v6579_v40  ;;  %v5156_v38 = vadd.f32 %v5065_v6, %v9780_v52  ;;  %v6577_v8 = vpack.c.bf16 %v5623_v56, %v5623_v56 }
 0x254   : > { %v7008_v27 = vpop.f32.mrf.mxu1  ;;  %v5823_v7 = vsel %vm1574_vm12, %v5623_v56, 0.0  ;;  %v5886_v37 = vmul.f32 %v5623_v56, %v5623_v56  ;;  %v5628_v59 = vadd.f32 %v7041_v17, %v5158_v36  ;;  %v9925_v29 = vadd.f32 %v9726_v20, %v4088_v34 }
 0x255   : > { %v5551_v19 = vpop.f32.mrf.mxu0  ;;  %v5925_v9 = vadd.f32 %v5924_v0, %v5923_v58  ;;  %v5824_v32 = vadd.f32 %v5823_v7, %v5822_v23  ;;  %v5626_v24 = vadd.f32 %v5535_v18, %v5156_v38  ;;  %v5159_v12 = vadd.f32 %v7008_v27, %v9783_v60  ;;  %5783 = vst.msk [vmem:[%s9806_s19 + $0x24] sm:$0xf] %vm914_vm6, %v6577_v8 }
 0x256   : > { %v5068_v2 = vpop.f32.mrf.mxu1  ;;  %v5825_v52 = vsel %vm1574_vm12, %v5624_v47, 0.0  ;;  %v5926_v25 = vsel %vm1574_vm12, %v5886_v37, 0.0  ;;  %v5928_v17 = vsel %vm1574_vm12, %v5887_v46, 0.0  ;;  %v6582_v60 = vpack.c.bf16 %v5628_v59, %v5628_v59 }
 0x257   : > { %v9922_v61 = vpop.f32.mrf.mxu0  ;;  %v5157_v55 = vadd.f32 %v5068_v2, %v9786_v43  ;;  %v5826_v18 = vadd.f32 %v5825_v52, %v5824_v32  ;;  %v5927_v51 = vadd.f32 %v5926_v25, %v5925_v9  ;;  %v5827_v20 = vsel %vm1574_vm12, %v5625_v4, 0.0 }
 0x258   : > { %v7011_v41 = vpop.f32.mrf.mxu1  ;;  %v5930_v39 = vsel %vm1574_vm12, %v5888_v21, 0.0  ;;  %v6580_v62 = vpack.c.bf16 %v5626_v24, %v5626_v24  ;;  %v5889_v47 = vmul.f32 %v5626_v24, %v5626_v24  ;;  %5788 = vst.msk [vmem:[%s9806_s19 + $0x38] sm:$0xf] %vm914_vm6, %v6582_v60  ;;  %v5629_v63 = vadd.f32 %v7042_v35, %v5159_v12 }
 0x259   : > { %v5554_v30 = vpop.f32.mrf.mxu0  ;;  %v5929_v33 = vadd.f32 %v5928_v17, %v5927_v51  ;;  %v5828_v34 = vadd.f32 %v5827_v20, %v5826_v18  ;;  %v5627_v43 = vadd.f32 %v5538_v53, %v5157_v55  ;;  %v5891_v48 = vmul.f32 %v5628_v59, %v5628_v59 }
 0x25a   : > { %v5081_v42 = vpop.f32.mrf.mxu1  ;;  %5786 = vst.msk [vmem:[%s9806_s19 + $0x30] sm:$0xf] %vm914_vm6, %v6580_v62  ;;  %v5829_v54 = vsel %vm1574_vm12, %v5626_v24, 0.0  ;;  %v5162_v4 = vadd.f32 %v7011_v41, %v9789_v50  ;;  %v5932_v23 = vsel %vm1574_vm12, %v5889_v47, 0.0  ;;  %v6583_v35 = vpack.c.bf16 %v5629_v63, %v5629_v63 }
 0x25b   : > { %v9937_v3 = vpop.f32.mrf.mxu0  ;;  %v5160_v11 = vadd.f32 %v5081_v42, %v9809_v22  ;;  %v5830_v40 = vadd.f32 %v5829_v54, %v5828_v34  ;;  %v5931_v6 = vadd.f32 %v5930_v39, %v5929_v33  ;;  %v5892_v56 = vmul.f32 %v5629_v63, %v5629_v63 }
 0x25c   : > { %v7012_v53 = vpop.f32.mrf.mxu1  ;;  %v6581_v36 = vpack.c.bf16 %v5627_v43, %v5627_v43  ;;  %v5831_v46 = vsel %vm1574_vm12, %v5627_v43, 0.0  ;;  %v5890_v0 = vmul.f32 %v5627_v43, %v5627_v43  ;;  %5789 = vst.msk [vmem:[%s9806_s19 + $0x3c] sm:$0xf] %vm914_vm6, %v6583_v35  ;;  %v5632_v50 = vadd.f32 %v9911_v16, %v5162_v4 }
 0x25d   : > { %v5567_v58 = vpop.f32.mrf.mxu0  ;;  %v5933_v21 = vadd.f32 %v5932_v23, %v5931_v6  ;;  %v5832_v38 = vadd.f32 %v5831_v46, %v5830_v40  ;;  %v5630_v22 = vadd.f32 %v5551_v19, %v5160_v11  ;;  %v5833_v8 = vsel %vm1574_vm12, %v5628_v59, 0.0 }
 0x25e   : > { %v5084_v27 = vpop.f32.mrf.mxu1  ;;  %5787 = vst.msk [vmem:[%s9806_s19 + $0x34] sm:$0xf] %vm914_vm6, %v6581_v36  ;;  %v5934_v7 = vsel %vm1574_vm12, %v5890_v0, 0.0  ;;  %v5163_v37 = vadd.f32 %v7012_v53, %v9812_v15  ;;  %v5936_v24 = vsel %vm1574_vm12, %v5891_v48, 0.0  ;;  %v6586_v16 = vpack.c.bf16 %v5632_v50, %v5632_v50 }
 0x25f   : > { %v9949_v9 = vpop.f32.mrf.mxu0  ;;  %v5161_v32 = vadd.f32 %v5084_v27, %v9823_v1  ;;  %v5834_v12 = vadd.f32 %v5833_v8, %v5832_v38  ;;  %v5935_v2 = vadd.f32 %v5934_v7, %v5933_v21  ;;  %v5835_v25 = vsel %vm1574_vm12, %v5629_v63, 0.0 }
 0x260   : > { %v7015_v19 = vpop.f32.mrf.mxu1  ;;  %v5938_v59 = vsel %vm1574_vm12, %v5892_v56, 0.0  ;;  %v6584_v55 = vpack.c.bf16 %v5630_v22, %v5630_v22  ;;  %v5893_v17 = vmul.f32 %v5630_v22, %v5630_v22  ;;  %5792 = vst.msk [vmem:[%s9806_s19 + $0x48] sm:$0xf] %vm914_vm6, %v6586_v16  ;;  %v5633_v1 = vadd.f32 %v9922_v61, %v5163_v37 }
 0x261   : > { %v5570_v52 = vpop.f32.mrf.mxu0  ;;  %v5937_v18 = vadd.f32 %v5936_v24, %v5935_v2  ;;  %v5836_v15 = vadd.f32 %v5835_v25, %v5834_v12  ;;  %v5631_v51 = vadd.f32 %v5554_v30, %v5161_v32  ;;  %v5895_v20 = vmul.f32 %v5632_v50, %v5632_v50 }
 0x262   : > { %v5097_v60 = vpop.f32.mrf.mxu1  ;;  %5790 = vst.msk [vmem:[%s9806_s19 + $0x40] sm:$0xf] %vm914_vm6, %v6584_v55  ;;  %v5837_v39 = vsel %vm1574_vm12, %v5630_v22, 0.0  ;;  %v5166_v62 = vadd.f32 %v7015_v19, %v9826_v5  ;;  %v5940_v63 = vsel %vm1574_vm12, %v5893_v17, 0.0  ;;  %v6587_v43 = vpack.c.bf16 %v5633_v1, %v5633_v1 }
 0x263   : > { %v7053_v41 = vpop.f32.mrf.mxu0  ;;  %v5164_v47 = vadd.f32 %v5097_v60, %v9831_v44  ;;  %v5838_v33 = vadd.f32 %v5837_v39, %v5836_v15  ;;  %v5939_v34 = vadd.f32 %v5938_v59, %v5937_v18  ;;  %v5896_v42 = vmul.f32 %v5633_v1, %v5633_v1 }
 0x264   : > { %v7016_v61 = vpop.f32.mrf.mxu1  ;;  %v6585_v48 = vpack.c.bf16 %v5631_v51, %v5631_v51  ;;  %v5839_v54 = vsel %vm1574_vm12, %v5631_v51, 0.0  ;;  %v5894_v4 = vmul.f32 %v5631_v51, %v5631_v51  ;;  %5793 = vst.msk [vmem:[%s9806_s19 + $0x4c] sm:$0xf] %vm914_vm6, %v6587_v43  ;;  %v5636_v5 = vadd.f32 %v9937_v3, %v5166_v62 }
 0x265   : > { %v5583_v30 = vpop.f32.mrf.mxu0  ;;  %v5941_v11 = vadd.f32 %v5940_v63, %v5939_v34  ;;  %v5840_v40 = vadd.f32 %v5839_v54, %v5838_v33  ;;  %v5634_v44 = vadd.f32 %v5567_v58, %v5164_v47  ;;  %v5841_v35 = vsel %vm1574_vm12, %v5632_v50, 0.0 }
 0x266   : > { %v5100_v6 = vpop.f32.mrf.mxu1  ;;  %5791 = vst.msk [vmem:[%s9806_s19 + $0x44] sm:$0xf] %vm914_vm6, %v6585_v48  ;;  %v5942_v53 = vsel %vm1574_vm12, %v5894_v4, 0.0  ;;  %v5167_v56 = vadd.f32 %v7016_v61, %v9834_v31  ;;  %v5944_v46 = vsel %vm1574_vm12, %v5895_v20, 0.0  ;;  %v6590_v3 = vpack.c.bf16 %v5636_v5, %v5636_v5 }
 0x267   : > { %v7054_v23 = vpop.f32.mrf.mxu0  ;;  %v5165_v36 = vadd.f32 %v5100_v6, %v9837_v13  ;;  %v5842_v0 = vadd.f32 %v5841_v35, %v5840_v40  ;;  %v5943_v21 = vadd.f32 %v5942_v53, %v5941_v11  ;;  %v5843_v38 = vsel %vm1574_vm12, %v5633_v1, 0.0 }
 0x268   : > { %v7019_v58 = vpop.f32.mrf.mxu1  ;;  %v5946_v50 = vsel %vm1574_vm12, %v5896_v42, 0.0  ;;  %v6588_v22 = vpack.c.bf16 %v5634_v44, %v5634_v44  ;;  %v5897_v27 = vmul.f32 %v5634_v44, %v5634_v44  ;;  %5796 = vst.msk [vmem:[%s9806_s19 + $0x58] sm:$0xf] %vm914_vm6, %v6590_v3  ;;  %v5637_v13 = vadd.f32 %v9949_v9, %v5167_v56 }
 0x269   : > { %v5586_v8 = vpop.f32.mrf.mxu0  ;;  %v5945_v7 = vadd.f32 %v5944_v46, %v5943_v21  ;;  %v5844_v31 = vadd.f32 %v5843_v38, %v5842_v0  ;;  %v5635_v37 = vadd.f32 %v5570_v52, %v5165_v36  ;;  %v5899_v24 = vmul.f32 %v5636_v5, %v5636_v5 }
 0x26a   : > { %v5113_v32 = vpop.f32.mrf.mxu1  ;;  %5794 = vst.msk [vmem:[%s9806_s19 + $0x50] sm:$0xf] %vm914_vm6, %v6588_v22  ;;  %v5845_v12 = vsel %vm1574_vm12, %v5634_v44, 0.0  ;;  %v5170_v2 = vadd.f32 %v7019_v58, %v9842_v28  ;;  %v5948_v59 = vsel %vm1574_vm12, %v5897_v27, 0.0  ;;  %v6591_v55 = vpack.c.bf16 %v5637_v13, %v5637_v13 }
 0x26b   : > { %v5168_v16 = vadd.f32 %v5113_v32, %v9845_v10  ;;  %v5846_v19 = vadd.f32 %v5845_v12, %v5844_v31  ;;  %v5947_v25 = vadd.f32 %v5946_v50, %v5945_v7  ;;  %v5900_v9 = vmul.f32 %v5637_v13, %v5637_v13  ;;  %v7057_v1 = vpop.f32.mrf.mxu0 }
 0x26c   : > { %v7020_v17 = vpop.f32.mrf.mxu1  ;;  %v6589_v52 = vpack.c.bf16 %v5635_v37, %v5635_v37  ;;  %v5847_v18 = vsel %vm1574_vm12, %v5635_v37, 0.0  ;;  %v5898_v15 = vmul.f32 %v5635_v37, %v5635_v37  ;;  %5797 = vst.msk [vmem:[%s9806_s19 + $0x5c] sm:$0xf] %vm914_vm6, %v6591_v55  ;;  %v5640_v28 = vadd.f32 %v7053_v41, %v5170_v2 }
 0x26d   : > { %v5949_v51 = vadd.f32 %v5948_v59, %v5947_v25  ;;  %v5848_v60 = vadd.f32 %v5847_v18, %v5846_v19  ;;  %v5638_v20 = vadd.f32 %v5583_v30, %v5168_v16  ;;  %v5849_v39 = vsel %vm1574_vm12, %v5636_v5, 0.0  ;;  %v5599_v4 = vpop.f32.mrf.mxu0 }
 0x26e   : > { %v5116_v10 = vpop.f32.mrf.mxu1  ;;  %5795 = vst.msk [vmem:[%s9806_s19 + $0x54] sm:$0xf] %vm914_vm6, %v6589_v52  ;;  %v5950_v62 = vsel %vm1574_vm12, %v5898_v15, 0.0  ;;  %v5171_v47 = vadd.f32 %v7020_v17, %v9848_v57  ;;  %v5952_v34 = vsel %vm1574_vm12, %v5899_v24, 0.0  ;;  %v6594_v61 = vpack.c.bf16 %v5640_v28, %v5640_v28 }
 0x26f   : > { %v5169_v33 = vadd.f32 %v5116_v10, %v9851_v49  ;;  %v5850_v63 = vadd.f32 %v5849_v39, %v5848_v60  ;;  %v5951_v43 = vadd.f32 %v5950_v62, %v5949_v51  ;;  %v5851_v30 = vsel %vm1574_vm12, %v5637_v13, 0.0  ;;  %v7058_v50 = vpop.f32.mrf.mxu0 }
 0x270   : > { %v7023_v41 = vpop.f32.mrf.mxu1  ;;  %v5954_v42 = vsel %vm1574_vm12, %v5900_v9, 0.0  ;;  %v6592_v48 = vpack.c.bf16 %v5638_v20, %v5638_v20  ;;  %v5901_v54 = vmul.f32 %v5638_v20, %v5638_v20  ;;  %5800 = vst.msk [vmem:[%s9806_s19 + $0x68] sm:$0xf] %vm914_vm6, %v6594_v61  ;;  %v5641_v40 = vadd.f32 %v7054_v23, %v5171_v47 }
 0x271   : > { %v5953_v11 = vadd.f32 %v5952_v34, %v5951_v43  ;;  %v5852_v57 = vadd.f32 %v5851_v30, %v5850_v63  ;;  %v5639_v49 = vadd.f32 %v5586_v8, %v5169_v33  ;;  %v5857_v44 = vsel %vm1574_vm12, %v5640_v28, 0.0  ;;  %v5602_v59 = vpop.f32.mrf.mxu0 }
 0x272   : > { %v5129_v5 = vpop.f32.mrf.mxu1  ;;  %5798 = vst.msk [vmem:[%s9806_s19 + $0x60] sm:$0xf] %vm914_vm6, %v6592_v48  ;;  %v5853_v6 = vsel %vm1574_vm12, %v5638_v20, 0.0  ;;  %v5174_v35 = vadd.f32 %v7023_v41, %v9856_v14  ;;  %v5903_v56 = vmul.f32 %v5640_v28, %v5640_v28  ;;  %v6595_v0 = vpack.c.bf16 %v5641_v40, %v5641_v40 }
 0x273   : > { %v5172_v53 = vadd.f32 %v5129_v5, %v9891_v26  ;;  %v5854_v36 = vadd.f32 %v5853_v6, %v5852_v57  ;;  %v5955_v46 = vadd.f32 %v5954_v42, %v5953_v11  ;;  %v5956_v23 = vsel %vm1574_vm12, %v5901_v54, 0.0 }
 0x274   : > { %v7024_v21 = vpop.f32.mrf.mxu1  ;;  %v6593_v3 = vpack.c.bf16 %v5639_v49, %v5639_v49  ;;  %v5855_v58 = vsel %vm1574_vm12, %v5639_v49, 0.0  ;;  %v5902_v38 = vmul.f32 %v5639_v49, %v5639_v49  ;;  %5801 = vst.msk [vmem:[%s9806_s19 + $0x6c] sm:$0xf] %vm914_vm6, %v6595_v0  ;;  %v5644_v14 = vadd.f32 %v7057_v1, %v5174_v35 }
 0x275   : > { %v5957_v22 = vadd.f32 %v5956_v23, %v5955_v46  ;;  %v5856_v27 = vadd.f32 %v5855_v58, %v5854_v36  ;;  %v5642_v8 = vadd.f32 %v5599_v4, %v5172_v53  ;;  %v5904_v7 = vmul.f32 %v5641_v40, %v5641_v40 }
 0x276   : > { %v5132_v26 = vpop.f32.mrf.mxu1  ;;  %5799 = vst.msk [vmem:[%s9806_s19 + $0x64] sm:$0xf] %vm914_vm6, %v6593_v3  ;;  %v5958_v31 = vsel %vm1574_vm12, %v5902_v38, 0.0  ;;  %v5175_v13 = vadd.f32 %v7024_v21, %v9900_v45  ;;  %v6598_v12 = vpack.c.bf16 %v5644_v14, %v5644_v14  ;;  %v5960_v2 = vsel %vm1574_vm12, %v5903_v56, 0.0 }
 0x277   : > { %v5173_v37 = vadd.f32 %v5132_v26, %v9925_v29  ;;  %v5858_v32 = vadd.f32 %v5857_v44, %v5856_v27  ;;  %v5959_v24 = vadd.f32 %v5958_v31, %v5957_v22  ;;  %v5859_v16 = vsel %vm1574_vm12, %v5641_v40, 0.0 }
 0x278   : > { %v6596_v19 = vpack.c.bf16 %v5642_v8, %v5642_v8  ;;  %v5905_v25 = vmul.f32 %v5642_v8, %v5642_v8  ;;  %5804 = vst.msk [vmem:[%s9806_s19 + $0x78] sm:$0xf] %vm914_vm6, %v6598_v12  ;;  %v5645_v9 = vadd.f32 %v7058_v50, %v5175_v13  ;;  %v5962_v52 = vsel %vm1574_vm12, %v5904_v7, 0.0 }
 0x279   : > { %v5961_v55 = vadd.f32 %v5960_v2, %v5959_v24  ;;  %v5860_v17 = vadd.f32 %v5859_v16, %v5858_v32  ;;  %v5643_v45 = vadd.f32 %v5602_v59, %v5173_v37  ;;  %v5861_v29 = vsel %vm1574_vm12, %v5642_v8, 0.0 }
 0x27a   : > { %5802 = vst.msk [vmem:[%s9806_s19 + $0x70] sm:$0xf] %vm914_vm6, %v6596_v19  ;;  %v5907_v18 = vmul.f32 %v5644_v14, %v5644_v14  ;;  %v6599_v51 = vpack.c.bf16 %v5645_v9, %v5645_v9  ;;  %v5964_v60 = vsel %vm1574_vm12, %v5905_v25, 0.0  ;;  %v5865_v47 = vsel %vm1574_vm12, %v5644_v14, 0.0 }
 0x27b   : > { %v5862_v15 = vadd.f32 %v5861_v29, %v5860_v17  ;;  %v5963_v1 = vadd.f32 %v5962_v52, %v5961_v55  ;;  %v6597_v28 = vpack.c.bf16 %v5643_v45, %v5643_v45  ;;  %v5863_v20 = vsel %vm1574_vm12, %v5643_v45, 0.0 }
 0x27c   : > { %v5906_v10 = vmul.f32 %v5643_v45, %v5643_v45  ;;  %5805 = vst.msk [vmem:[%s9806_s19 + $0x7c] sm:$0xf] %vm914_vm6, %v6599_v51  ;;  %v5908_v33 = vmul.f32 %v5645_v9, %v5645_v9  ;;  %v5968_v61 = vsel %vm1574_vm12, %v5907_v18, 0.0  ;;  %v5867_v41 = vsel %vm1574_vm12, %v5645_v9, 0.0 }
 0x27d   : > { %v5965_v39 = vadd.f32 %v5964_v60, %v5963_v1  ;;  %v5864_v62 = vadd.f32 %v5863_v20, %v5862_v15  ;;  %5803 = vst.msk [vmem:[%s9806_s19 + $0x74] sm:$0xf] %vm914_vm6, %v6597_v28 }
 0x27e   : > { %v5966_v34 = vsel %vm1574_vm12, %v5906_v10, 0.0  ;;  %v5970_v48 = vsel %vm1574_vm12, %v5908_v33, 0.0 }
 0x27f   : > { %v5866_v63 = vadd.f32 %v5865_v47, %v5864_v62  ;;  %v5967_v43 = vadd.f32 %v5966_v34, %v5965_v39 }
 0x281   : > { %v5868_v30 = vadd.f32 %v5867_v41, %v5866_v63  ;;  %v5969_v42 = vadd.f32 %v5968_v61, %v5967_v43 }
 0x283   : > { %v5869_v54 = vrot.slane %v5868_v30, 4  ;;  %v5971_v4 = vadd.f32 %v5970_v48, %v5969_v42 }
 0x285   : > { %v5870_v11 = vadd.f32 %v5869_v54, %v5868_v30  ;;  %v5972_v57 = vrot.slane %v5971_v4, 4 }
 0x287   : > { %v5871_v40 = vrot.slane %v5870_v11, 2  ;;  %v5973_v49 = vadd.f32 %v5972_v57, %v5971_v4 }
 0x289   : > { %v5872_v5 = vadd.f32 %v5871_v40, %v5870_v11  ;;  %v5974_v44 = vrot.slane %v5973_v49, 2 }
 0x28b   : > { %v5873_v6 = vrot.slane %v5872_v5, 1  ;;  %v5975_v35 = vadd.f32 %v5974_v44, %v5973_v49 }
 0x28d   : > { %v5874_v53 = vadd.f32 %v5873_v6, %v5872_v5  ;;  %v5976_v56 = vrot.slane %v5975_v35, 1 }
 0x28f   : > { %5876 = vst.msk [vmem:[%s438_s21] sm:$0x1] %vm446_vm1, %v5874_v53  ;;  %v5977_v36 = vadd.f32 %v5976_v56, %v5975_v35 }
 0x291   : > { %5978 = vst.msk [vmem:[%s443_s24] sm:$0x1] %vm446_vm1, %v5977_v36 }
 0x292 PF: > { %s19_s29 = sadd.s32 1, %s7171_s29   ;;  %s10348_s27 = smov %s7167_s28 }
 0x293   : > { %p16_p5 = scmp.ge.s32.totalorder %s19_s29, 4   ;;  %s10349_s28 = smov %s10351_s4 }
 0x295   :  { %18 = sbr.rel (!%p16_p5) target bundleno = 2 (0x2), region = 115 }

// kernel: double_conv_forward.4
= control target key start
LH: loop header
LB: loop body
LE: loop exit
PB: predicated region body
PF: predicated region fallthrough
CT: control target
= control target key end

     0   :  { %s7699_s27 = smov 0   ;;  %s7701_s28 = smov 0   ;;  %s10730_s0 = inlined_call_operand.vmem [shape: bf16[2,16,16,8], index: 0, kind: input, shape index: {}]   ;;  %s10731_s1 = inlined_call_operand.vmem [shape: bf16[2,1,16,8], index: 1, kind: input, shape index: {}, may-alias: {1,2}]   ;;  %s10732_s2 = inlined_call_operand.vmem [shape: bf16[2,1,16,8], index: 2, kind: input, shape index: {}, may-alias: {1,2}]   ;;  %s10733_s3 = inlined_call_operand.vmem [shape: bf16[9,8,8], index: 3, kind: input, shape index: {}]   ;;  %s10734_s4 = inlined_call_operand.vmem [shape: f32[1,8], index: 4, kind: input, shape index: {}]   ;;  %s10735_s5 = inlined_call_operand.vmem [shape: f32[1,8], index: 5, kind: input, shape index: {}]   ;;  %s10736_s6 = inlined_call_operand.vmem [shape: bf16[2,16,16,8], index: 6, kind: output, shape index: {0}]   ;;  %s10737_s7 = inlined_call_operand.vmem [shape: f32[2,1,8], index: 7, kind: output, shape index: {1}]   ;;  %s10738_s8 = inlined_call_operand.vmem [shape: f32[2,1,8], index: 8, kind: output, shape index: {2}]  }
   0x1   :  { %s7703_s29 = smov 0  }
   0x2 LB: > { %s31_s30 = sadd.s32 1, %s7648_s28  ;;  %p6483_p0 = scmp.ge.s32.totalorder %s7652_s29, 1  ;;  %s7652_s29 = sphi %s7703_s29, %s19_s29   ;;  %s7648_s28 = sphi %s7701_s28, %s10998_s28   ;;  %s7644_s27 = sphi %s7699_s27, %s10997_s27  }
   0x3   : > { %p33_p1 = scmp.ge.s32.totalorder %s31_s30, 2  ;;  %p325_p2 = scmp.lt.s32.totalorder %s7652_s29, 3 }
   0x5   : > { %s11000_s30 = smov (%p33_p1, %s31_s30), 0  ;;  %p326_p3 = pnand %p6483_p0, %p325_p2 }
   0x7   : > { %329 = sbr.rel (%p326_p3) target bundleno = 684 (0x2ac), region = 44 }
   0xc   : > { %v6534_v0 = vld [vmem:[%s10733_s3 + $0x4] sm:$0xf]  ;;  %vm1929_vm0 = vcmask 1043456   ;;  %p396_p4 = scmp.lt.s32.totalorder %s7644_s27, 1  ;;  %vm446_vm1 = vcmask 57344   ;;  %vm1152_vm6 = vcmask 60416  }
   0xd   : > { %7533 = vmatprep.subr.msk.bf16.mxu1 %vm1929_vm0, %v6534_v0  ;;  %v1931_v1 = vsel %vm1929_vm0, %v6534_v0, 0  ;;  %7532 = vmatprep.subr.msk.bf16.mxu0 %vm1929_vm0, %v6534_v0  ;;  %vm447_vm2 = vsmask.f32 256  ;;  %v473_v2 = vld [vmem:[#allocation2 + $0x60] sm:$0x1]  ;;  %vm1880_vm12 = vcmask 64512  }
   0xe   : > { %7531 = vmatpush3.bf16.msra.mxu1 %v1931_v1  ;;  %7225 = vmatpush3.bf16.msra.mxu0 %v1931_v1  ;;  %s11002_s27 = smov (!%p396_p4, %s7644_s27), 1  ;;  %vm7727_vm3 = vmand %vm446_vm1, %vm447_vm2  ;;  %vm503_vm4 = vsmask.f32 7938  ;;  %v529_v4 = vld [vmem:[#allocation2 + $0x68] sm:$0x1]  ;;  %vm2434_vm14 = vcmask 1042432  }
   0xf   : > { %v474_v5 = vsel %vm7727_vm3, 0, %v473_v2  ;;  %vm7735_vm5 = vmand %vm446_vm1, %vm503_vm4  ;;  %s6912_s11 = sshll.u32 %s11002_s27, 7  ;;  %v7752_v8 = vld [vmem:[%s10734_s4] ss:$0 sm:$0xff]  ;;  %v476_v10 = vld [vmem:[#allocation2 + $0x6c] sm:$0x1]  ;;  %s438_s13 = scalar_lea.vmem %s10737_s7, %s11002_s27 }
  0x10   : > { %475 = vst [vmem:[#allocation2 + $0x60] sm:$0x1] %v474_v5  ;;  %v530_v7 = vsel %vm7735_vm5, 0, %v529_v4  ;;  %s7747_s14 = scalar_lea.vmem %s10730_s0, %s6912_s11  ;;  %v7757_v9 = vld [vmem:[%s10733_s3] sm:$0xf]  ;;  %v477_v13 = vsel %vm7727_vm3, 0, %v476_v10  ;;  %vm7812_vm8 = vmand %vm1152_vm6, %vm503_vm4  ;;  %s10446_s10 = scalar_lea.vmem %s10736_s6, %s6912_s11 }
  0x11   : > { %531 = vst [vmem:[#allocation2 + $0x68] sm:$0x1] %v530_v7  ;;  %v7062_v11 = vld [vmem:[%s7747_s14 + $0x38] sm:$0xff]   ;;  %v7763_v12 = vld [vmem:[%s10735_s5] ss:$0 sm:$0xff]  ;;  %7534 = vmatprep.subr.msk.bf16.mxu1 %vm1929_vm0, %v7757_v9  ;;  %s6913_s21 = sshll.u32 %s11002_s27, 3  ;;  %s443_s16 = scalar_lea.vmem %s10738_s8, %s11002_s27 }
  0x12   : > { %v532_v14 = vld [vmem:[#allocation2 + $0x74] sm:$0x1]  ;;  %v7014_v15 = vunpack.c.l.bf16 %v7062_v11  ;;  %v7015_v16 = vunpack.c.h.bf16 %v7062_v11  ;;  %478 = vst [vmem:[#allocation2 + $0x6c] sm:$0x1] %v477_v13  ;;  %v7063_v18 = vld [vmem:[%s7747_s14 + $0x40] sm:$0xff]   ;;  %s414_s24 = scalar_lea.vmem %s10731_s1, %s6913_s21  ;;  %vm2435_vm15 = vcmask 1046532   ;;  %s423_s22 = scalar_lea.vmem %s10732_s2, %s6913_s21 }
  0x13   : > { %v533_v17 = vsel %vm7735_vm5, 0, %v532_v14  ;;  %v449_v19 = vld [vmem:[#allocation2] sm:$0x1]  ;;  %v505_v20 = vld [vmem:[#allocation2 + $0x8] sm:$0x1]  ;;  %v7018_v21 = vunpack.c.l.bf16 %v7063_v18  ;;  %v7019_v22 = vunpack.c.h.bf16 %v7063_v18 }
  0x14   : > { %534 = vst [vmem:[#allocation2 + $0x74] sm:$0x1] %v533_v17  ;;  %v450_v23 = vsel %vm7727_vm3, 0, %v449_v19  ;;  %v506_v24 = vsel %vm7735_vm5, 0, %v505_v20  ;;  %v7049_v25 = vld [vmem:[%s414_s24] sm:$0xff]   ;;  %v644_v27 = vmul.f32 %v7014_v15, %v7752_v8  ;;  %v645_v28 = vmul.f32 %v7015_v16, %v7752_v8 }
  0x15   : > { %v7785_v26 = vld [vmem:[%s10733_s3 + $0x8] sm:$0xf]  ;;  %vm829_vm7 = vsmask.f32 4368  ;;  %451 = vst [vmem:[#allocation2] sm:$0x1] %v450_v23  ;;  %v7050_v29 = vunpack.c.l.bf16 %v7049_v25  ;;  %v7051_v30 = vunpack.c.h.bf16 %v7049_v25  ;;  %v646_v34 = vmul.f32 %v7018_v21, %v7752_v8 }
  0x16   : > { %507 = vst [vmem:[#allocation2 + $0x8] sm:$0x1] %v506_v24  ;;  %7535 = vmatprep.subr.msk.bf16.mxu0 %vm1929_vm0, %v7785_v26  ;;  %v452_v31 = vld [vmem:[#allocation2 + $0xc] sm:$0x1]  ;;  %v508_v32 = vld [vmem:[#allocation2 + $0x14] sm:$0x1]  ;;  %v647_v35 = vmul.f32 %v7019_v22, %v7752_v8  ;;  %v683_v38 = vadd.f32 %v7763_v12, %v644_v27  ;;  %v684_v39 = vadd.f32 %v7763_v12, %v645_v28  ;;  %vm7818_vm9 = vmor %vm447_vm2, %vm829_vm7 }
  0x17   : > { %v6985_v33 = vld [vmem:[%s7747_s14] sm:$0xff]   ;;  %v453_v36 = vsel %vm7727_vm3, 0, %v452_v31  ;;  %v509_v37 = vsel %vm7735_vm5, 0, %v508_v32  ;;  %v1281_v40 = vmul.f32 %v7050_v29, %v7752_v8  ;;  %v1282_v41 = vmul.f32 %v7051_v30, %v7752_v8  ;;  %vm8243_vm2 = vmor %vm2434_vm14, %vm2435_vm15 }
  0x18   : > { %454 = vst [vmem:[#allocation2 + $0xc] sm:$0x1] %v453_v36  ;;  %510 = vst [vmem:[#allocation2 + $0x14] sm:$0x1] %v509_v37  ;;  %v685_v42 = vadd.f32 %v7763_v12, %v646_v34  ;;  %v686_v43 = vadd.f32 %v7763_v12, %v647_v35  ;;  %v6986_v44 = vunpack.c.l.bf16 %v6985_v33  ;;  %v6987_v45 = vunpack.c.h.bf16 %v6985_v33  ;;  %v1204_v14 = vld [vmem:[#allocation2 + $0x60] sm:$0xf] }
  0x19   : > { %v715_v46 = vmax.f32 %v683_v38, 0.0  ;;  %v716_v47 = vmax.f32 %v684_v39, 0.0  ;;  %v1290_v48 = vadd.f32 %v7763_v12, %v1281_v40  ;;  %v1291_v49 = vadd.f32 %v7763_v12, %v1282_v41  ;;  %v1208_v18 = vld [vmem:[#allocation2 + $0x68] sm:$0x1]  ;;  %v1211_v28 = vld [vmem:[#allocation2 + $0x6c] sm:$0xf] }
  0x1a   : > { %v717_v50 = vmax.f32 %v685_v42, 0.0  ;;  %v718_v51 = vmax.f32 %v686_v43, 0.0  ;;  %v630_v52 = vmul.f32 %v6986_v44, %v7752_v8  ;;  %v631_v53 = vmul.f32 %v6987_v45, %v7752_v8  ;;  %v479_v38 = vld [vmem:[#allocation2 + $0x78] sm:$0x1] }
  0x1b   : > { %v6930_v54 = vpack.c.bf16 %v715_v46, %v715_v46  ;;  %v6931_v55 = vpack.c.bf16 %v716_v47, %v716_v47  ;;  %v1292_v56 = vmax.f32 %v1290_v48, 0.0  ;;  %v1293_v57 = vmax.f32 %v1291_v49, 0.0  ;;  %v1215_v29 = vld [vmem:[#allocation2 + $0x74] sm:$0x1]  ;;  %v535_v47 = vld [vmem:[#allocation2 + $0x80] sm:$0x1] }
  0x1c   : > { %v6932_v58 = vpack.c.bf16 %v717_v50, %v717_v50  ;;  %v6933_v59 = vpack.c.bf16 %v718_v51, %v718_v51  ;;  %v669_v60 = vadd.f32 %v7763_v12, %v630_v52  ;;  %v670_v61 = vadd.f32 %v7763_v12, %v631_v53  ;;  %v7837_v48 = vld [vmem:[%s7747_s14 + $0x48] sm:$0xff]  }
  0x1d   : > { %v951_v62 = vshrl.u32 %v6930_v54, 16  ;;  %v954_v63 = vshll.u32 %v6930_v54, 16  ;;  %v959_v0 = vshrl.u32 %v6931_v55, 16  ;;  %v962_v1 = vshll.u32 %v6931_v55, 16 }
  0x1e   : > { %v968_v2 = vshrl.u32 %v6932_v58, 16  ;;  %v971_v4 = vshll.u32 %v6932_v58, 16  ;;  %v976_v5 = vshrl.u32 %v6933_v59, 16  ;;  %v979_v7 = vshll.u32 %v6933_v59, 16 }
  0x1f   : > { %v953_v10 = vrot.slane %v951_v62, 7  ;;  %v961_v11 = vrot.slane %v959_v0, 7  ;;  %v1295_v15 = vmul.f32 0.0, %v1292_v56  ;;  %v1296_v16 = vmul.f32 0.0, %v1293_v57  ;;  %v1323_v57 = vld [vmem:[#allocation2] sm:$0xf] }
  0x20   : > { %v970_v19 = vrot.slane %v968_v2, 7  ;;  %v978_v20 = vrot.slane %v976_v5, 7  ;;  %v701_v21 = vmax.f32 %v669_v60, 0.0  ;;  %v702_v22 = vmax.f32 %v670_v61, 0.0  ;;  %v1327_v5 = vld [vmem:[#allocation2 + $0x8] sm:$0x1] }
  0x21   : > { %v956_v23 = vor.u32 %v954_v63, %v953_v10  ;;  %v957_v24 = vrot.slane %v953_v10, 4  ;;  %v964_v25 = vor.u32 %v962_v1, %v961_v11  ;;  %v966_v27 = vrot.slane %v961_v11, 4 }
  0x22   : > { %v973_v30 = vor.u32 %v971_v4, %v970_v19  ;;  %v974_v31 = vrot.slane %v970_v19, 4  ;;  %v981_v32 = vor.u32 %v979_v7, %v978_v20  ;;  %v983_v33 = vrot.slane %v978_v20, 4 }
  0x23   : > { %v965_v34 = vsel %vm7818_vm9, %v957_v24, %v964_v25  ;;  %v1205_v35 = vsel %vm7812_vm8, %v956_v23, %v1204_v14  ;;  %v1209_v36 = vsel %vm7727_vm3, %v966_v27, %v1208_v18  ;;  %v6948_v37 = vpack.c.bf16 %v1295_v15, %v1295_v15 }
  0x24   : > { %1206 = vst [vmem:[#allocation2 + $0x60] sm:$0xf] %v1205_v35  ;;  %1207 = vst.msk [vmem:[#allocation2 + $0x64] sm:$0xf] %vm1152_vm6, %v965_v34  ;;  %v982_v39 = vsel %vm7818_vm9, %v974_v31, %v981_v32  ;;  %v1212_v40 = vsel %vm7812_vm8, %v973_v30, %v1211_v28  ;;  %v1216_v41 = vsel %vm7727_vm3, %v983_v33, %v1215_v29  ;;  %vm1443_vm10 = vsmask.f32 3328 }
  0x25   : > { %1210 = vst [vmem:[#allocation2 + $0x68] sm:$0x1] %v1209_v36  ;;  %v6949_v42 = vpack.c.bf16 %v1296_v16, %v1296_v16  ;;  %1213 = vst [vmem:[#allocation2 + $0x6c] sm:$0xf] %v1212_v40  ;;  %v1304_v43 = vshrl.u32 %v6948_v37, 16  ;;  %v1307_v44 = vshll.u32 %v6948_v37, 16  ;;  %v6916_v45 = vpack.c.bf16 %v701_v21, %v701_v21 }
  0x26   : > { %1214 = vst.msk [vmem:[#allocation2 + $0x70] sm:$0xf] %vm1152_vm6, %v982_v39  ;;  %1217 = vst [vmem:[#allocation2 + $0x74] sm:$0x1] %v1216_v41  ;;  %v6917_v46 = vpack.c.bf16 %v702_v22, %v702_v22  ;;  %v480_v51 = vsel %vm7727_vm3, 0, %v479_v38  ;;  %v536_v59 = vsel %vm7735_vm5, 0, %v535_v47  ;;  %v7022_v60 = vunpack.c.l.bf16 %v7837_v48 }
  0x27   : > { %v1312_v49 = vshrl.u32 %v6949_v42, 16  ;;  %v1315_v50 = vshll.u32 %v6949_v42, 16  ;;  %v1306_v52 = vrot.slane %v1304_v43, 7  ;;  %v832_v53 = vshrl.u32 %v6916_v45, 16  ;;  %481 = vst [vmem:[#allocation2 + $0x78] sm:$0x1] %v480_v51 }
  0x28   : > { %v835_v54 = vshll.u32 %v6916_v45, 16  ;;  %v840_v55 = vshrl.u32 %v6917_v46, 16  ;;  %v843_v58 = vshll.u32 %v6917_v46, 16  ;;  %537 = vst [vmem:[#allocation2 + $0x80] sm:$0x1] %v536_v59  ;;  %v7848_v1 = vsel %vm1929_vm0, %v7757_v9, 0 }
  0x29   : > { %v1314_v56 = vrot.slane %v1312_v49, 7  ;;  %v1309_v61 = vor.u32 %v1307_v44, %v1306_v52  ;;  %v1310_v62 = vrot.slane %v1306_v52, 4  ;;  %v834_v63 = vrot.slane %v832_v53, 7  ;;  %v1154_v34 = vld [vmem:[#allocation2 + $0xc] sm:$0xf] }
  0x2a   : > { %v7844_v0 = vrot.slane %v840_v55, 7  ;;  %vm1444_vm11 = vsmask.f32 7440  ;;  %v7023_v16 = vunpack.c.h.bf16 %v7837_v48  ;;  %v7854_v18 = vmul.f32 %v7022_v60, %v7752_v8  ;;  %v1159_v43 = vld [vmem:[#allocation2 + $0x14] sm:$0x1] }
  0x2b   : > { %v1317_v2 = vor.u32 %v1315_v50, %v1314_v56  ;;  %v1319_v4 = vrot.slane %v1314_v56, 4  ;;  %v1410_v7 = vld [vmem:[#allocation2 + $0x60] sm:$0xf]  ;;  %v1411_v10 = vld [vmem:[#allocation2 + $0x64] sm:$0xf]  ;;  %v1324_v14 = vsel %vm7812_vm8, %v1309_v61, %v1323_v57  ;;  %v837_v15 = vor.u32 %v835_v54, %v834_v63  ;;  %vm7864_vm13 = vmor %vm1443_vm10, %vm1444_vm11 }
  0x2c   : > { %v1435_v11 = vld [vmem:[#allocation2 + $0x68] sm:$0x1]  ;;  %v1639_v19 = vshrl.u32 %v1410_v7, 16  ;;  %v1642_v20 = vshll.u32 %v1410_v7, 16  ;;  %v1648_v21 = vshll.u32 %v1411_v10, 16  ;;  %v1652_v9 = vshrl.u32 %v1411_v10, 16 }
  0x2d   : > { %v1412_v22 = vld [vmem:[#allocation2 + $0x6c] sm:$0xf]  ;;  %1325 = vst [vmem:[#allocation2] sm:$0xf] %v1324_v14  ;;  %v1658_v23 = vshll.u32 %v1435_v11, 16  ;;  %v1318_v27 = vsel %vm7818_vm9, %v1310_v62, %v1317_v2  ;;  %v1328_v28 = vsel %vm7727_vm3, %v1319_v4, %v1327_v5  ;;  %v845_v29 = vor.u32 %v843_v58, %v7844_v0 }
  0x2e   : > { %v1413_v24 = vld [vmem:[#allocation2 + $0x70] sm:$0xf]  ;;  %v1436_v25 = vld [vmem:[#allocation2 + $0x74] sm:$0x1]  ;;  %v1641_v30 = vrot.slane %v1639_v19, 4  ;;  %v1644_v31 = vrot.slane %v1642_v20, 5  ;;  %v1155_v58 = vsel %vm7812_vm8, %v837_v15, %v1154_v34 }
  0x2f   : > { %v1650_v32 = vrot.slane %v1648_v21, 5  ;;  %v1654_v33 = vrot.slane %v1652_v9, 4  ;;  %1326 = vst.msk [vmem:[#allocation2 + $0x4] sm:$0xf] %vm1152_vm6, %v1318_v27  ;;  %1329 = vst [vmem:[#allocation2 + $0x8] sm:$0x1] %v1328_v28 }
  0x30   : > { %v1660_v35 = vrot.slane %v1658_v23, 5  ;;  %v1663_v36 = vshrl.u32 %v1412_v22, 16  ;;  %v1666_v37 = vshll.u32 %v1412_v22, 16  ;;  %v1672_v38 = vshll.u32 %v1413_v24, 16  ;;  %1156 = vst [vmem:[#allocation2 + $0xc] sm:$0xf] %v1155_v58 }
  0x31   : > { %v1645_v39 = vor.u32 %v1644_v31, %v1641_v30  ;;  %v1655_v40 = vor.u32 %v1654_v33, %v1650_v32  ;;  %v1676_v41 = vshrl.u32 %v1413_v24, 16  ;;  %v1682_v42 = vshll.u32 %v1436_v25, 16  ;;  %v482_v22 = vld [vmem:[#allocation2 + $0x84] sm:$0x1]  ;;  %v538_v23 = vld [vmem:[#allocation2 + $0x8c] sm:$0x1] }
  0x32   : > { %v1665_v45 = vrot.slane %v1663_v36, 4  ;;  %v1668_v46 = vrot.slane %v1666_v37, 5  ;;  %v1674_v47 = vrot.slane %v1672_v38, 5  ;;  %v838_v49 = vrot.slane %v834_v63, 4  ;;  %v7065_v63 = vld [vmem:[%s7747_s14 + $0x50] sm:$0xff]  }
  0x33   : > { %v1646_v50 = vrot.slane %v1645_v39, 4  ;;  %v1656_v51 = vrot.slane %v1655_v40, 4  ;;  %v1678_v52 = vrot.slane %v1676_v41, 4  ;;  %v1684_v53 = vrot.slane %v1682_v42, 5 }
  0x34   : > { %v1669_v54 = vor.u32 %v1668_v46, %v1665_v45  ;;  %v1394_v55 = vld [vmem:[#allocation2] sm:$0xf]  ;;  %v846_v56 = vsel %vm7818_vm9, %v838_v49, %v845_v29  ;;  %v847_v57 = vrot.slane %v7844_v0, 4  ;;  %v7026_v24 = vunpack.c.l.bf16 %v7065_v63 }
  0x35   : > { %v1651_v59 = vsel %vm7864_vm13, %v1646_v50, %v1650_v32  ;;  %v1661_v60 = vsel %vm7864_vm13, %v1656_v51, %v1660_v35  ;;  %v1679_v61 = vor.u32 %v1678_v52, %v1674_v47  ;;  %v1447_v62 = vshrl.u32 %v1394_v55, 16  ;;  %1158 = vst.msk [vmem:[#allocation2 + $0x10] sm:$0xf] %vm1152_vm6, %v846_v56  ;;  %v455_v51 = vld [vmem:[#allocation2 + $0x18] sm:$0x1] }
  0x36   : > { %v6543_v2 = vcombine.low %v1651_v59, %v1661_v60  ;;  %v1670_v4 = vrot.slane %v1669_v54, 4  ;;  %v1395_v5 = vld [vmem:[#allocation2 + $0x4] sm:$0xf]  ;;  %v1427_v7 = vld [vmem:[#allocation2 + $0x8] sm:$0x1]  ;;  %v1450_v0 = vshll.u32 %v1394_v55, 16  ;;  %v1160_v10 = vsel %vm7727_vm3, %v847_v57, %v1159_v43 }
  0x37   : > { %v1680_v11 = vrot.slane %v1679_v61, 4  ;;  %v1449_v14 = vrot.slane %v1447_v62, 4  ;;  %v1456_v15 = vshll.u32 %v1395_v5, 16  ;;  %v1460_v19 = vshrl.u32 %v1395_v5, 16  ;;  %1161 = vst [vmem:[#allocation2 + $0x14] sm:$0x1] %v1160_v10 }
  0x38   : > { %7242 = vmatprep.mubr.msk.bf16.mxu1 %vm1880_vm12, %v6543_v2  ;;  %v1675_v20 = vsel %vm7864_vm13, %v1670_v4, %v1674_v47  ;;  %v1452_v21 = vrot.slane %v1450_v0, 5  ;;  %v1466_v9 = vshll.u32 %v1427_v7, 16  ;;  %v649_v29 = vmul.f32 %v7023_v16, %v7752_v8  ;;  %v1396_v48 = vld [vmem:[#allocation2 + $0xc] sm:$0xf]  ;;  %v511_v7 = vld [vmem:[#allocation2 + $0x20] sm:$0x1] }
  0x39   : > { %v1685_v25 = vsel %vm7864_vm13, %v1680_v11, %v1684_v53  ;;  %v1458_v27 = vrot.slane %v1456_v15, 5  ;;  %v1462_v28 = vrot.slane %v1460_v19, 4  ;;  %v687_v33 = vadd.f32 %v7763_v12, %v7854_v18 }
  0x3a   : > { %v6544_v30 = vcombine.low %v1675_v20, %v1685_v25  ;;  %v1453_v31 = vor.u32 %v1452_v21, %v1449_v14  ;;  %v1468_v32 = vrot.slane %v1466_v9, 5  ;;  %v688_v35 = vadd.f32 %v7763_v12, %v649_v29  ;;  %v7056_v14 = vld [vmem:[%s7747_s14 + $0x8] sm:$0xff]  }
  0x3b   : > { %v1463_v34 = vor.u32 %v1462_v28, %v1458_v27  ;;  %v483_v36 = vsel %vm7727_vm3, 0, %v482_v22  ;;  %v539_v37 = vsel %vm7735_vm5, 0, %v538_v23  ;;  %v719_v39 = vmax.f32 %v687_v33, 0.0 }
  0x3c   : > { %7243 = vmatmul.mubr.msk.bf16.vlgmr.msra.gmra.mxu1 %vm1880_vm12, %v6544_v30  ;;  %v1454_v38 = vrot.slane %v1453_v31, 4  ;;  %v1397_v16 = vld [vmem:[#allocation2 + $0x10] sm:$0xf]  ;;  %484 = vst [vmem:[#allocation2 + $0x84] sm:$0x1] %v483_v36  ;;  %v7027_v40 = vunpack.c.h.bf16 %v7065_v63  ;;  %v1471_v41 = vshrl.u32 %v1396_v48, 16  ;;  %v650_v50 = vmul.f32 %v7026_v24, %v7752_v8 }
  0x3d   : > { %540 = vst [vmem:[#allocation2 + $0x8c] sm:$0x1] %v539_v37  ;;  %7259 = vmatpush3.bf16.msra.mxu1 %v7848_v1  ;;  %v1464_v18 = vrot.slane %v1463_v34, 4  ;;  %v1474_v42 = vshll.u32 %v1396_v48, 16  ;;  %v1480_v43 = vshll.u32 %v1397_v16, 16  ;;  %v1484_v47 = vshrl.u32 %v1397_v16, 16 }
  0x3e   : > { %v1459_v45 = vsel %vm7864_vm13, %v1454_v38, %v1458_v27  ;;  %v1428_v46 = vld [vmem:[#allocation2 + $0x14] sm:$0x1]  ;;  %v720_v49 = vmax.f32 %v688_v35, 0.0  ;;  %v1473_v53 = vrot.slane %v1471_v41, 4  ;;  %v2648_v58 = vsel %vm1929_vm0, %v7785_v26, 0 }
  0x3f   : > { %v1469_v52 = vsel %vm7864_vm13, %v1464_v18, %v1468_v32  ;;  %v1476_v54 = vrot.slane %v1474_v42, 5  ;;  %v1482_v55 = vrot.slane %v1480_v43, 5  ;;  %v1486_v56 = vrot.slane %v1484_v47, 4  ;;  %v1218_v27 = vld [vmem:[#allocation2 + $0x78] sm:$0xf]  ;;  %v7057_v43 = vld [vmem:[%s7747_s14 + $0x10] sm:$0xff]  }
  0x40   : > { %v6535_v1 = vcombine.low %v1459_v45, %v1469_v52  ;;  %v1490_v57 = vshll.u32 %v1428_v46, 16  ;;  %v6934_v60 = vpack.c.bf16 %v719_v39, %v719_v39  ;;  %v6935_v61 = vpack.c.bf16 %v720_v49, %v720_v49  ;;  %v1222_v35 = vld [vmem:[#allocation2 + $0x80] sm:$0x1]  ;;  %v458_v36 = vld [vmem:[#allocation2 + $0x24] sm:$0x1] }
  0x41   : > { %v1477_v59 = vor.u32 %v1476_v54, %v1473_v53  ;;  %v651_v62 = vmul.f32 %v7027_v40, %v7752_v8  ;;  %v1487_v63 = vor.u32 %v1486_v56, %v1482_v55  ;;  %v689_v4 = vadd.f32 %v7763_v12, %v650_v50  ;;  %v514_v39 = vld [vmem:[#allocation2 + $0x2c] sm:$0x1]  ;;  %v485_v50 = vld [vmem:[#allocation2 + $0x90] sm:$0x1] }
  0x42   : > { %7226 = vmatprep.mubr.msk.bf16.mxu0 %vm1880_vm12, %v6535_v1  ;;  %v1492_v2 = vrot.slane %v1490_v57, 5  ;;  %v456_v5 = vsel %vm7727_vm3, 0, %v455_v51  ;;  %v985_v10 = vshrl.u32 %v6934_v60, 16  ;;  %v988_v11 = vshll.u32 %v6934_v60, 16  ;;  %v6648_v1 = vld [vmem:[%s10733_s3 + $0xc] sm:$0xf] }
  0x43   : > { %v1478_v0 = vrot.slane %v1477_v59, 4  ;;  %v993_v26 = vshrl.u32 %v6935_v61, 16  ;;  %457 = vst [vmem:[#allocation2 + $0x18] sm:$0x1] %v456_v5  ;;  %v1488_v15 = vrot.slane %v1487_v63, 4  ;;  %v996_v19 = vshll.u32 %v6935_v61, 16  ;;  %7536 = vmatprep.subr.msk.bf16.mxu1 %vm1929_vm0, %v6648_v1 }
  0x44   : > { %v690_v20 = vadd.f32 %v7763_v12, %v651_v62  ;;  %v721_v21 = vmax.f32 %v689_v4, 0.0  ;;  %v987_v22 = vrot.slane %v985_v10, 7  ;;  %v512_v24 = vsel %vm7735_vm5, 0, %v511_v7  ;;  %v1225_v51 = vld [vmem:[#allocation2 + $0x84] sm:$0xf]  ;;  %v7945_v7 = vld [vmem:[%s7747_s14 + $0x58] sm:$0xff]  }
  0x45   : > { %v1483_v9 = vsel %vm7864_vm13, %v1478_v0, %v1482_v55  ;;  %v995_v23 = vrot.slane %v993_v26, 7  ;;  %v1493_v25 = vsel %vm7864_vm13, %v1488_v15, %v1492_v2  ;;  %513 = vst [vmem:[#allocation2 + $0x20] sm:$0x1] %v512_v24  ;;  %v6990_v30 = vunpack.c.l.bf16 %v7056_v14  ;;  %v541_v60 = vld [vmem:[#allocation2 + $0x98] sm:$0x1] }
  0x46   : > { %v722_v28 = vmax.f32 %v690_v20, 0.0  ;;  %v6936_v29 = vpack.c.bf16 %v721_v21, %v721_v21  ;;  %v6536_v31 = vcombine.low %v1483_v9, %v1493_v25  ;;  %v990_v32 = vor.u32 %v988_v11, %v987_v22  ;;  %v6681_v61 = vld [vmem:[%s10733_s3 + $0x10] sm:$0xf]  ;;  %v1229_v62 = vld [vmem:[#allocation2 + $0x8c] sm:$0x1] }
  0x47   : > { %v991_v33 = vrot.slane %v987_v22, 4  ;;  %v998_v34 = vor.u32 %v996_v19, %v995_v23  ;;  %v1000_v37 = vrot.slane %v995_v23, 4  ;;  %v6991_v41 = vunpack.c.h.bf16 %v7056_v14 }
  0x48   : > { %v6937_v38 = vpack.c.bf16 %v722_v28, %v722_v28  ;;  %v1002_v48 = vshrl.u32 %v6936_v29, 16  ;;  %v1005_v16 = vshll.u32 %v6936_v29, 16  ;;  %7227 = vmatmul.mubr.msk.bf16.vlgmr.msra.gmra.mxu0 %vm1880_vm12, %v6536_v31  ;;  %v1219_v18 = vsel %vm7812_vm8, %v990_v32, %v1218_v27 }
  0x49   : > { %v999_v40 = vsel %vm7818_vm9, %v991_v33, %v998_v34  ;;  %v632_v42 = vmul.f32 %v6990_v30, %v7752_v8  ;;  %7293 = vmatpush3.bf16.msra.mxu0 %v2648_v58  ;;  %1220 = vst [vmem:[#allocation2 + $0x78] sm:$0xf] %v1219_v18  ;;  %v1223_v45 = vsel %vm7727_vm3, %v1000_v37, %v1222_v35  ;;  %v459_v54 = vsel %vm7727_vm3, 0, %v458_v36 }
  0x4a   : > { %1221 = vst.msk [vmem:[#allocation2 + $0x7c] sm:$0xf] %vm1152_vm6, %v999_v40  ;;  %v1004_v46 = vrot.slane %v1002_v48, 7  ;;  %v1010_v47 = vshrl.u32 %v6937_v38, 16  ;;  %v1013_v49 = vshll.u32 %v6937_v38, 16  ;;  %v633_v52 = vmul.f32 %v6991_v41, %v7752_v8  ;;  %7537 = vmatprep.subr.msk.bf16.mxu0 %vm1929_vm0, %v6681_v61 }
  0x4b   : > { %1224 = vst [vmem:[#allocation2 + $0x80] sm:$0x1] %v1223_v45  ;;  %v671_v53 = vadd.f32 %v7763_v12, %v632_v42  ;;  %v515_v55 = vsel %vm7735_vm5, 0, %v514_v39  ;;  %460 = vst [vmem:[#allocation2 + $0x24] sm:$0x1] %v459_v54  ;;  %v6994_v59 = vunpack.c.l.bf16 %v7057_v43  ;;  %v6995_v4 = vunpack.c.h.bf16 %v7057_v43 }
  0x4c   : > { %v1007_v56 = vor.u32 %v1005_v16, %v1004_v46  ;;  %v1008_v57 = vrot.slane %v1004_v46, 4  ;;  %v1012_v58 = vrot.slane %v1010_v47, 7  ;;  %516 = vst [vmem:[#allocation2 + $0x2c] sm:$0x1] %v515_v55  ;;  %v672_v63 = vadd.f32 %v7763_v12, %v633_v52  ;;  %v1162_v46 = vld [vmem:[#allocation2 + $0x18] sm:$0xf] }
  0x4d   : > { %v703_v2 = vmax.f32 %v671_v53, 0.0  ;;  %v486_v5 = vsel %vm7727_vm3, 0, %v485_v50  ;;  %v634_v26 = vmul.f32 %v6994_v59, %v7752_v8  ;;  %v635_v19 = vmul.f32 %v6995_v4, %v7752_v8 }
  0x4e   : > { %v1015_v0 = vor.u32 %v1013_v49, %v1012_v58  ;;  %v1017_v10 = vrot.slane %v1012_v58, 4  ;;  %v1226_v11 = vsel %vm7812_vm8, %v1007_v56, %v1225_v51  ;;  %487 = vst [vmem:[#allocation2 + $0x90] sm:$0x1] %v486_v5  ;;  %v704_v14 = vmax.f32 %v672_v63, 0.0  ;;  %v1166_v56 = vld [vmem:[#allocation2 + $0x20] sm:$0x1] }
  0x4f   : > { %1227 = vst [vmem:[#allocation2 + $0x84] sm:$0xf] %v1226_v11  ;;  %v6918_v15 = vpack.c.bf16 %v703_v2, %v703_v2  ;;  %v542_v20 = vsel %vm7735_vm5, 0, %v541_v60  ;;  %v673_v22 = vadd.f32 %v7763_v12, %v634_v26  ;;  %v7030_v23 = vunpack.c.l.bf16 %v7945_v7 }
  0x50   : > { %v1016_v21 = vsel %vm7818_vm9, %v1008_v57, %v1015_v0  ;;  %v1230_v9 = vsel %vm7727_vm3, %v1017_v10, %v1229_v62  ;;  %543 = vst [vmem:[#allocation2 + $0x98] sm:$0x1] %v542_v20  ;;  %v1414_v24 = vld [vmem:[#allocation2 + $0x78] sm:$0xf]  ;;  %v6919_v27 = vpack.c.bf16 %v704_v14, %v704_v14  ;;  %v674_v30 = vadd.f32 %v7763_v12, %v635_v19  ;;  %v488_v14 = vld [vmem:[#allocation2 + $0x9c] sm:$0x1] }
  0x51   : > { %v1415_v25 = vld [vmem:[#allocation2 + $0x7c] sm:$0xf]  ;;  %1228 = vst.msk [vmem:[#allocation2 + $0x88] sm:$0xf] %vm1152_vm6, %v1016_v21  ;;  %1231 = vst [vmem:[#allocation2 + $0x8c] sm:$0x1] %v1230_v9 }
  0x52   : > { %v849_v28 = vshrl.u32 %v6918_v15, 16  ;;  %v852_v29 = vshll.u32 %v6918_v15, 16  ;;  %v1437_v31 = vld [vmem:[#allocation2 + $0x80] sm:$0x1]  ;;  %v1687_v32 = vshrl.u32 %v1414_v24, 16  ;;  %v1690_v33 = vshll.u32 %v1414_v24, 16 }
  0x53   : > { %v1696_v34 = vshll.u32 %v1415_v25, 16  ;;  %v1700_v35 = vshrl.u32 %v1415_v25, 16  ;;  %v1706_v36 = vshll.u32 %v1437_v31, 16  ;;  %v857_v38 = vshrl.u32 %v6919_v27, 16 }
  0x54   : > { %v851_v37 = vrot.slane %v849_v28, 7  ;;  %v860_v48 = vshll.u32 %v6919_v27, 16  ;;  %v1689_v16 = vrot.slane %v1687_v32, 4  ;;  %v1692_v39 = vrot.slane %v1690_v33, 5 }
  0x55   : > { %v1698_v40 = vrot.slane %v1696_v34, 5  ;;  %v1702_v18 = vrot.slane %v1700_v35, 4  ;;  %v1708_v41 = vrot.slane %v1706_v36, 5  ;;  %v859_v45 = vrot.slane %v857_v38, 7 }
  0x56   : > { %v854_v42 = vor.u32 %v852_v29, %v851_v37  ;;  %v855_v43 = vrot.slane %v851_v37, 4  ;;  %v1693_v47 = vor.u32 %v1692_v39, %v1689_v16  ;;  %v1416_v50 = vld [vmem:[#allocation2 + $0x84] sm:$0xf]  ;;  %v705_v51 = vmax.f32 %v673_v22, 0.0 }
  0x57   : > { %v1703_v49 = vor.u32 %v1702_v18, %v1698_v40  ;;  %v706_v52 = vmax.f32 %v674_v30, 0.0  ;;  %v1711_v53 = vshrl.u32 %v1416_v50, 16  ;;  %v1714_v54 = vshll.u32 %v1416_v50, 16  ;;  %v1169_v37 = vld [vmem:[#allocation2 + $0x24] sm:$0xf] }
  0x58   : > { %v862_v55 = vor.u32 %v860_v48, %v859_v45  ;;  %v864_v1 = vrot.slane %v859_v45, 4  ;;  %v1694_v57 = vrot.slane %v1693_v47, 4  ;;  %v1417_v59 = vld [vmem:[#allocation2 + $0x88] sm:$0xf]  ;;  %v1438_v60 = vld [vmem:[#allocation2 + $0x8c] sm:$0x1]  ;;  %v1163_v61 = vsel %vm7812_vm8, %v854_v42, %v1162_v46 }
  0x59   : > { %v1704_v58 = vrot.slane %v1703_v49, 4  ;;  %v6920_v62 = vpack.c.bf16 %v705_v51, %v705_v51  ;;  %v1713_v63 = vrot.slane %v1711_v53, 4  ;;  %v1716_v2 = vrot.slane %v1714_v54, 5  ;;  %1164 = vst [vmem:[#allocation2 + $0x18] sm:$0xf] %v1163_v61  ;;  %v7067_v53 = vld [vmem:[%s7747_s14 + $0x60] sm:$0xff]  }
  0x5a   : > { %v1720_v4 = vshll.u32 %v1417_v59, 16  ;;  %v1724_v5 = vshrl.u32 %v1417_v59, 16  ;;  %v1699_v0 = vsel %vm7864_vm13, %v1694_v57, %v1698_v40  ;;  %v1730_v11 = vshll.u32 %v1438_v60, 16  ;;  %v544_v46 = vld [vmem:[#allocation2 + $0xa4] sm:$0x1] }
  0x5b   : > { %v1709_v10 = vsel %vm7864_vm13, %v1704_v58, %v1708_v41  ;;  %v863_v26 = vsel %vm7818_vm9, %v855_v43, %v862_v55  ;;  %v1717_v19 = vor.u32 %v1716_v2, %v1713_v63  ;;  %v1167_v22 = vsel %vm7727_vm3, %v864_v1, %v1166_v56  ;;  %v1173_v41 = vld [vmem:[#allocation2 + $0x2c] sm:$0x1] }
  0x5c   : > { %v6545_v15 = vcombine.low %v1699_v0, %v1709_v10  ;;  %v1722_v20 = vrot.slane %v1720_v4, 5  ;;  %v1726_v21 = vrot.slane %v1724_v5, 4  ;;  %1165 = vst.msk [vmem:[#allocation2 + $0x1c] sm:$0xf] %vm1152_vm6, %v863_v26  ;;  %v1732_v9 = vrot.slane %v1730_v11, 5 }
  0x5d   : > { %v6921_v24 = vpack.c.bf16 %v706_v52, %v706_v52  ;;  %v866_v25 = vshrl.u32 %v6920_v62, 16  ;;  %v1718_v27 = vrot.slane %v1717_v19, 4  ;;  %1168 = vst [vmem:[#allocation2 + $0x20] sm:$0x1] %v1167_v22  ;;  %v869_v29 = vshll.u32 %v6920_v62, 16 }
  0x5e   : > { %7246 = vmatprep.mubr.msk.bf16.mxu1 %vm1880_vm12, %v6545_v15  ;;  %v1727_v28 = vor.u32 %v1726_v21, %v1722_v20  ;;  %v7031_v30 = vunpack.c.h.bf16 %v7945_v7  ;;  %v652_v34 = vmul.f32 %v7030_v23, %v7752_v8  ;;  %v489_v48 = vsel %vm7727_vm3, 0, %v488_v14  ;;  %v517_v21 = vld [vmem:[#allocation2 + $0x38] sm:$0x1] }
  0x5f   : > { %v868_v31 = vrot.slane %v866_v25, 7  ;;  %v874_v32 = vshrl.u32 %v6921_v24, 16  ;;  %v877_v33 = vshll.u32 %v6921_v24, 16  ;;  %v1723_v35 = vsel %vm7864_vm13, %v1718_v27, %v1722_v20  ;;  %490 = vst [vmem:[#allocation2 + $0x9c] sm:$0x1] %v489_v48 }
  0x60   : > { %v1728_v36 = vrot.slane %v1727_v28, 4  ;;  %v653_v38 = vmul.f32 %v7031_v30, %v7752_v8  ;;  %v1398_v16 = vld [vmem:[#allocation2 + $0x18] sm:$0xf]  ;;  %v691_v42 = vadd.f32 %v7763_v12, %v652_v34  ;;  %v545_v10 = vsel %vm7735_vm5, 0, %v544_v46  ;;  %v461_v20 = vld [vmem:[#allocation2 + $0x30] sm:$0x1] }
  0x61   : > { %v871_v39 = vor.u32 %v869_v29, %v868_v31  ;;  %v872_v40 = vrot.slane %v868_v31, 4  ;;  %v876_v18 = vrot.slane %v874_v32, 7  ;;  %v1495_v23 = vshrl.u32 %v1398_v16, 16  ;;  %546 = vst [vmem:[#allocation2 + $0xa4] sm:$0x1] %v545_v10 }
  0x62   : > { %v1733_v7 = vsel %vm7864_vm13, %v1728_v36, %v1732_v9  ;;  %v1498_v43 = vshll.u32 %v1398_v16, 16  ;;  %v692_v45 = vadd.f32 %v7763_v12, %v653_v38  ;;  %v723_v60 = vmax.f32 %v691_v42, 0.0  ;;  %v1232_v48 = vld [vmem:[#allocation2 + $0x90] sm:$0xf]  ;;  %v8038_v10 = vld [vmem:[%s10734_s4] ss:$0 sm:$0xff] }
  0x63   : > { %v6546_v47 = vcombine.low %v1723_v35, %v1733_v7  ;;  %v1399_v49 = vld [vmem:[#allocation2 + $0x1c] sm:$0xf]  ;;  %v879_v50 = vor.u32 %v877_v33, %v876_v18  ;;  %v881_v51 = vrot.slane %v876_v18, 4  ;;  %v1170_v52 = vsel %vm7812_vm8, %v871_v39, %v1169_v37 }
  0x64   : > { %v1497_v54 = vrot.slane %v1495_v23, 4  ;;  %v1500_v55 = vrot.slane %v1498_v43, 5  ;;  %v1504_v1 = vshll.u32 %v1399_v49, 16  ;;  %v1508_v56 = vshrl.u32 %v1399_v49, 16  ;;  %1171 = vst [vmem:[#allocation2 + $0x24] sm:$0xf] %v1170_v52 }
  0x65   : > { %7247 = vmatmul.mubr.msk.bf16.gmra.mxu1 %vm1880_vm12, %v6546_v47  ;;  %v1429_v57 = vld [vmem:[#allocation2 + $0x20] sm:$0x1]  ;;  %v880_v58 = vsel %vm7818_vm9, %v872_v40, %v879_v50  ;;  %v1174_v59 = vsel %vm7727_vm3, %v881_v51, %v1173_v41  ;;  %v724_v61 = vmax.f32 %v692_v45, 0.0  ;;  %v6938_v5 = vpack.c.bf16 %v723_v60, %v723_v60  ;;  %v7058_v7 = vld [vmem:[%s7747_s14 + $0x18] sm:$0xff]  }
  0x66   : > { %v1501_v62 = vor.u32 %v1500_v55, %v1497_v54  ;;  %v1506_v63 = vrot.slane %v1504_v1, 5  ;;  %v1510_v2 = vrot.slane %v1508_v56, 4  ;;  %v1514_v4 = vshll.u32 %v1429_v57, 16  ;;  %1172 = vst.msk [vmem:[#allocation2 + $0x28] sm:$0xf] %vm1152_vm6, %v880_v58 }
  0x67   : > { %1175 = vst [vmem:[#allocation2 + $0x2c] sm:$0x1] %v1174_v59  ;;  %v6939_v0 = vpack.c.bf16 %v724_v61, %v724_v61  ;;  %v7034_v11 = vunpack.c.l.bf16 %v7067_v53  ;;  %v7035_v19 = vunpack.c.h.bf16 %v7067_v53  ;;  %v1019_v9 = vshrl.u32 %v6938_v5, 16  ;;  %v1236_v47 = vld [vmem:[#allocation2 + $0x98] sm:$0x1] }
  0x68   : > { %v1502_v26 = vrot.slane %v1501_v62, 4  ;;  %v1511_v14 = vor.u32 %v1510_v2, %v1506_v63  ;;  %v1516_v15 = vrot.slane %v1514_v4, 5  ;;  %v1022_v22 = vshll.u32 %v6938_v5, 16  ;;  %v464_v49 = vld [vmem:[#allocation2 + $0x3c] sm:$0x1]  ;;  %v8033_v5 = vld [vmem:[%s7747_s14 + $0x20] sm:$0xff]  }
  0x69   : > { %v1027_v24 = vshrl.u32 %v6939_v0, 16  ;;  %v1030_v25 = vshll.u32 %v6939_v0, 16  ;;  %v654_v29 = vmul.f32 %v7034_v11, %v7752_v8  ;;  %v655_v30 = vmul.f32 %v7035_v19, %v7752_v8  ;;  %v520_v53 = vld [vmem:[#allocation2 + $0x44] sm:$0x1]  ;;  %v8027_v56 = vld [vmem:[%s10735_s5] ss:$0 sm:$0xff] }
  0x6a   : > { %v1507_v27 = vsel %vm7864_vm13, %v1502_v26, %v1506_v63  ;;  %v1512_v28 = vrot.slane %v1511_v14, 4  ;;  %v1021_v32 = vrot.slane %v1019_v9, 7  ;;  %v462_v34 = vsel %vm7727_vm3, 0, %v461_v20 }
  0x6b   : > { %v8002_v31 = vld [vmem:[#allocation2 + $0x24] sm:$0xf]  ;;  %v1029_v33 = vrot.slane %v1027_v24, 7  ;;  %v518_v35 = vsel %vm7735_vm5, 0, %v517_v21  ;;  %v693_v8 = vadd.f32 %v7763_v12, %v654_v29  ;;  %463 = vst [vmem:[#allocation2 + $0x30] sm:$0x1] %v462_v34  ;;  %v694_v57 = vadd.f32 %v8027_v56, %v655_v30 }
  0x6c   : > { %v1517_v36 = vsel %vm7864_vm13, %v1512_v28, %v1516_v15  ;;  %v1519_v37 = vshrl.u32 %v8002_v31, 16  ;;  %v1522_v38 = vshll.u32 %v8002_v31, 16  ;;  %519 = vst [vmem:[#allocation2 + $0x38] sm:$0x1] %v518_v35  ;;  %v1024_v18 = vor.u32 %v1022_v22, %v1021_v32  ;;  %v1239_v30 = vld [vmem:[#allocation2 + $0x9c] sm:$0xf] }
  0x6d   : > { %v6537_v16 = vcombine.low %v1507_v27, %v1517_v36  ;;  %v8013_v39 = vld [vmem:[#allocation2 + $0x28] sm:$0xf]  ;;  %v1025_v41 = vrot.slane %v1021_v32, 4  ;;  %v1032_v42 = vor.u32 %v1030_v25, %v1029_v33  ;;  %v1034_v51 = vrot.slane %v1029_v33, 4 }
  0x6e   : > { %v1430_v40 = vld [vmem:[#allocation2 + $0x2c] sm:$0x1]  ;;  %v1521_v23 = vrot.slane %v1519_v37, 4  ;;  %v1524_v43 = vrot.slane %v1522_v38, 5  ;;  %v1528_v45 = vshll.u32 %v8013_v39, 16  ;;  %v1532_v46 = vshrl.u32 %v8013_v39, 16 }
  0x6f   : > { %7230 = vmatprep.mubr.msk.bf16.mxu0 %vm1880_vm12, %v6537_v16  ;;  %v1538_v12 = vshll.u32 %v1430_v40, 16  ;;  %v1033_v50 = vsel %vm7818_vm9, %v1025_v41, %v1032_v42  ;;  %v1233_v52 = vsel %vm7812_vm8, %v1024_v18, %v1232_v48  ;;  %v1237_v59 = vsel %vm7727_vm3, %v1034_v51, %v1236_v47  ;;  %v1243_v18 = vld [vmem:[#allocation2 + $0xa4] sm:$0x1] }
  0x70   : > { %v1525_v54 = vor.u32 %v1524_v43, %v1521_v23  ;;  %v1530_v55 = vrot.slane %v1528_v45, 5  ;;  %v1534_v1 = vrot.slane %v1532_v46, 4  ;;  %1234 = vst [vmem:[#allocation2 + $0x90] sm:$0xf] %v1233_v52  ;;  %1235 = vst.msk [vmem:[#allocation2 + $0x94] sm:$0xf] %vm1152_vm6, %v1033_v50  ;;  %v6998_v61 = vunpack.c.l.bf16 %v7058_v7 }
  0x71   : > { %v1540_v58 = vrot.slane %v1538_v12, 5  ;;  %v725_v60 = vmax.f32 %v693_v8, 0.0  ;;  %1238 = vst [vmem:[#allocation2 + $0x98] sm:$0x1] %v1237_v59  ;;  %v726_v2 = vmax.f32 %v694_v57, 0.0  ;;  %v6999_v4 = vunpack.c.h.bf16 %v7058_v7 }
  0x72   : > { %v1526_v62 = vrot.slane %v1525_v54, 4  ;;  %v1535_v63 = vor.u32 %v1534_v1, %v1530_v55  ;;  %v636_v11 = vmul.f32 %v8038_v10, %v6998_v61  ;;  %v465_v26 = vsel %vm7727_vm3, 0, %v464_v49  ;;  %v491_v61 = vld [vmem:[#allocation2 + $0xa8] sm:$0x1] }
  0x73   : > { %v6940_v0 = vpack.c.bf16 %v725_v60, %v725_v60  ;;  %v521_v14 = vsel %vm7735_vm5, 0, %v520_v53  ;;  %v6941_v20 = vpack.c.bf16 %v726_v2, %v726_v2  ;;  %v637_v21 = vmul.f32 %v8038_v10, %v6999_v4  ;;  %466 = vst [vmem:[#allocation2 + $0x3c] sm:$0x1] %v465_v26 }
  0x74   : > { %v1531_v15 = vsel %vm7864_vm13, %v1526_v62, %v1530_v55  ;;  %v1536_v19 = vrot.slane %v1535_v63, 4  ;;  %522 = vst [vmem:[#allocation2 + $0x44] sm:$0x1] %v521_v14  ;;  %v675_v24 = vadd.f32 %v8027_v56, %v636_v11  ;;  %v7002_v25 = vunpack.c.l.bf16 %v8033_v5  ;;  %v547_v14 = vld [vmem:[#allocation2 + $0xb0] sm:$0x1] }
  0x75   : > { %v1036_v9 = vshrl.u32 %v6940_v0, 16  ;;  %v1039_v22 = vshll.u32 %v6940_v0, 16  ;;  %v1044_v28 = vshrl.u32 %v6941_v20, 16  ;;  %v1047_v29 = vshll.u32 %v6941_v20, 16 }
  0x76   : > { %v1541_v27 = vsel %vm7864_vm13, %v1536_v19, %v1540_v58  ;;  %v676_v32 = vadd.f32 %v8027_v56, %v637_v21  ;;  %v707_v37 = vmax.f32 %v675_v24, 0.0  ;;  %v7003_v38 = vunpack.c.h.bf16 %v8033_v5 }
  0x77   : > { %v6538_v33 = vcombine.low %v1531_v15, %v1541_v27  ;;  %v1418_v34 = vld [vmem:[#allocation2 + $0x90] sm:$0xf]  ;;  %v1419_v35 = vld [vmem:[#allocation2 + $0x94] sm:$0xf]  ;;  %v1038_v36 = vrot.slane %v1036_v9, 7  ;;  %v1046_v23 = vrot.slane %v1044_v28, 7  ;;  %v638_v60 = vmul.f32 %v8038_v10, %v7002_v25 }
  0x78   : > { %v1735_v48 = vshrl.u32 %v1418_v34, 16  ;;  %v1738_v8 = vshll.u32 %v1418_v34, 16  ;;  %v1744_v16 = vshll.u32 %v1419_v35, 16  ;;  %v1748_v40 = vshrl.u32 %v1419_v35, 16  ;;  %v1439_v41 = vld [vmem:[#allocation2 + $0x98] sm:$0x1] }
  0x79   : > { %7231 = vmatmul.mubr.msk.bf16.gmra.mxu0 %vm1880_vm12, %v6538_v33  ;;  %v1041_v42 = vor.u32 %v1039_v22, %v1038_v36  ;;  %v1042_v7 = vrot.slane %v1038_v36, 4  ;;  %v708_v43 = vmax.f32 %v676_v32, 0.0  ;;  %v1754_v12 = vshll.u32 %v1439_v41, 16  ;;  %v7068_v15 = vld [vmem:[%s7747_s14 + $0x68] sm:$0xff]   ;;  %v1176_v25 = vld [vmem:[#allocation2 + $0x30] sm:$0xf] }
  0x7a   : > { %v1737_v45 = vrot.slane %v1735_v48, 4  ;;  %v1740_v46 = vrot.slane %v1738_v8, 5  ;;  %v1746_v47 = vrot.slane %v1744_v16, 5  ;;  %v1750_v49 = vrot.slane %v1748_v40, 4  ;;  %v1180_v32 = vld [vmem:[#allocation2 + $0x38] sm:$0x1] }
  0x7b   : > { %v1049_v50 = vor.u32 %v1047_v29, %v1046_v23  ;;  %v1051_v51 = vrot.slane %v1046_v23, 4  ;;  %v1240_v52 = vsel %vm7812_vm8, %v1041_v42, %v1239_v30  ;;  %v6922_v55 = vpack.c.bf16 %v707_v37, %v707_v37 }
  0x7c   : > { %v1741_v53 = vor.u32 %v1740_v46, %v1737_v45  ;;  %v1751_v54 = vor.u32 %v1750_v49, %v1746_v47  ;;  %1241 = vst [vmem:[#allocation2 + $0x9c] sm:$0xf] %v1240_v52  ;;  %v6923_v1 = vpack.c.bf16 %v708_v43, %v708_v43  ;;  %v1756_v57 = vrot.slane %v1754_v12, 5 }
  0x7d   : > { %v1050_v58 = vsel %vm7818_vm9, %v1042_v7, %v1049_v50  ;;  %v1244_v59 = vsel %vm7727_vm3, %v1051_v51, %v1243_v18  ;;  %v883_v2 = vshrl.u32 %v6922_v55, 16  ;;  %v886_v4 = vshll.u32 %v6922_v55, 16 }
  0x7e   : > { %v1742_v62 = vrot.slane %v1741_v53, 4  ;;  %v1752_v63 = vrot.slane %v1751_v54, 4  ;;  %1242 = vst.msk [vmem:[#allocation2 + $0xa0] sm:$0xf] %vm1152_vm6, %v1050_v58  ;;  %1245 = vst [vmem:[#allocation2 + $0xa4] sm:$0x1] %v1244_v59  ;;  %v639_v11 = vmul.f32 %v8038_v10, %v7003_v38  ;;  %v677_v26 = vadd.f32 %v8027_v56, %v638_v60 }
  0x7f   : > { %v891_v5 = vshrl.u32 %v6923_v1, 16  ;;  %v894_v0 = vshll.u32 %v6923_v1, 16  ;;  %v885_v21 = vrot.slane %v883_v2, 7  ;;  %v492_v9 = vsel %vm7727_vm3, 0, %v491_v61  ;;  %v494_v54 = vld [vmem:[#allocation2 + $0xb4] sm:$0x1] }
  0x80   : > { %v1747_v19 = vsel %vm7864_vm13, %v1742_v62, %v1746_v47  ;;  %v1757_v20 = vsel %vm7864_vm13, %v1752_v63, %v1756_v57  ;;  %v678_v27 = vadd.f32 %v8027_v56, %v639_v11  ;;  %v709_v28 = vmax.f32 %v677_v26, 0.0  ;;  %493 = vst [vmem:[#allocation2 + $0xa8] sm:$0x1] %v492_v9  ;;  %v1183_v59 = vld [vmem:[#allocation2 + $0x3c] sm:$0xf] }
  0x81   : > { %v6547_v22 = vcombine.low %v1747_v19, %v1757_v20  ;;  %v893_v24 = vrot.slane %v891_v5, 7  ;;  %v888_v29 = vor.u32 %v886_v4, %v885_v21  ;;  %v889_v30 = vrot.slane %v885_v21, 4  ;;  %v1187_v5 = vld [vmem:[#allocation2 + $0x44] sm:$0x1] }
  0x82   : > { %v548_v33 = vsel %vm7735_vm5, 0, %v547_v14  ;;  %v7038_v34 = vunpack.c.l.bf16 %v7068_v15  ;;  %v710_v38 = vmax.f32 %v678_v27, 0.0  ;;  %v6924_v48 = vpack.c.bf16 %v709_v28, %v709_v28 }
  0x83   : > { %7250 = vmatprep.mubr.msk.bf16.mxu1 %vm1880_vm12, %v6547_v22  ;;  %v8076_v35 = vld [vmem:[#allocation2 + $0x9c] sm:$0xf]  ;;  %v896_v36 = vor.u32 %v894_v0, %v893_v24  ;;  %v898_v37 = vrot.slane %v893_v24, 4  ;;  %549 = vst [vmem:[#allocation2 + $0xb0] sm:$0x1] %v548_v33  ;;  %v1177_v40 = vsel %vm7812_vm8, %v888_v29, %v1176_v25  ;;  %v7039_v18 = vunpack.c.h.bf16 %v7068_v15 }
  0x84   : > { %v1759_v8 = vshrl.u32 %v8076_v35, 16  ;;  %v1762_v16 = vshll.u32 %v8076_v35, 16  ;;  %1178 = vst [vmem:[#allocation2 + $0x30] sm:$0xf] %v1177_v40  ;;  %v6925_v43 = vpack.c.bf16 %v710_v38, %v710_v38  ;;  %v900_v45 = vshrl.u32 %v6924_v48, 16 }
  0x85   : > { %v8082_v41 = vld [vmem:[#allocation2 + $0xa0] sm:$0xf]  ;;  %v8084_v42 = vld [vmem:[#allocation2 + $0xa4] sm:$0x1]  ;;  %v897_v7 = vsel %vm7818_vm9, %v889_v30, %v896_v36  ;;  %v1181_v23 = vsel %vm7727_vm3, %v898_v37, %v1180_v32  ;;  %v903_v52 = vshll.u32 %v6924_v48, 16  ;;  %v656_v0 = vmul.f32 %v8038_v10, %v7038_v34  ;;  %v7069_v48 = vld [vmem:[%s7747_s14 + $0x70] sm:$0xff]  }
  0x86   : > { %v1761_v46 = vrot.slane %v1759_v8, 4  ;;  %v1764_v47 = vrot.slane %v1762_v16, 5  ;;  %v1768_v49 = vshll.u32 %v8082_v41, 16  ;;  %v1772_v12 = vshrl.u32 %v8082_v41, 16  ;;  %1179 = vst.msk [vmem:[#allocation2 + $0x34] sm:$0xf] %vm1152_vm6, %v897_v7 }
  0x87   : > { %1182 = vst [vmem:[#allocation2 + $0x38] sm:$0x1] %v1181_v23  ;;  %v1778_v50 = vshll.u32 %v8084_v42, 16  ;;  %v902_v51 = vrot.slane %v900_v45, 7  ;;  %v908_v53 = vshrl.u32 %v6925_v43, 16  ;;  %v911_v58 = vshll.u32 %v6925_v43, 16 }
  0x88   : > { %v1765_v55 = vor.u32 %v1764_v47, %v1761_v46  ;;  %v1770_v1 = vrot.slane %v1768_v49, 5  ;;  %v1774_v57 = vrot.slane %v1772_v12, 4  ;;  %v657_v11 = vmul.f32 %v8038_v10, %v7039_v18  ;;  %v550_v38 = vld [vmem:[#allocation2 + $0xbc] sm:$0x1]  ;;  %v467_v7 = vld [vmem:[#allocation2 + $0x48] sm:$0x1] }
  0x89   : > { %v1780_v60 = vrot.slane %v1778_v50, 5  ;;  %v905_v61 = vor.u32 %v903_v52, %v902_v51  ;;  %v906_v62 = vrot.slane %v902_v51, 4  ;;  %v910_v63 = vrot.slane %v908_v53, 7 }
  0x8a   : > { %v1766_v2 = vrot.slane %v1765_v55, 4  ;;  %v1775_v4 = vor.u32 %v1774_v57, %v1770_v1  ;;  %v495_v19 = vsel %vm7727_vm3, 0, %v494_v54  ;;  %v695_v22 = vadd.f32 %v8027_v56, %v656_v0 }
  0x8b   : > { %v913_v26 = vor.u32 %v911_v58, %v910_v63  ;;  %v915_v14 = vrot.slane %v910_v63, 4  ;;  %v1184_v15 = vsel %vm7812_vm8, %v905_v61, %v1183_v59  ;;  %v8102_v9 = vld [vmem:[#allocation2 + $0x30] sm:$0xf]  ;;  %v696_v24 = vadd.f32 %v8027_v56, %v657_v11  ;;  %496 = vst [vmem:[#allocation2 + $0xb4] sm:$0x1] %v495_v19 }
  0x8c   : > { %v1771_v20 = vsel %vm7864_vm13, %v1766_v2, %v1770_v1  ;;  %v1776_v21 = vrot.slane %v1775_v4, 4  ;;  %1185 = vst [vmem:[#allocation2 + $0x3c] sm:$0xf] %v1184_v15  ;;  %v1543_v28 = vshrl.u32 %v8102_v9, 16  ;;  %v1546_v29 = vshll.u32 %v8102_v9, 16 }
  0x8d   : > { %v8106_v25 = vld [vmem:[#allocation2 + $0x34] sm:$0xf]  ;;  %v914_v30 = vsel %vm7818_vm9, %v906_v62, %v913_v26  ;;  %v1188_v32 = vsel %vm7727_vm3, %v915_v14, %v1187_v5  ;;  %v727_v18 = vmax.f32 %v695_v22, 0.0  ;;  %v728_v46 = vmax.f32 %v696_v24, 0.0 }
  0x8e   : > { %v8108_v27 = vld [vmem:[#allocation2 + $0x38] sm:$0x1]  ;;  %v1781_v33 = vsel %vm7864_vm13, %v1776_v21, %v1780_v60  ;;  %v1552_v34 = vshll.u32 %v8106_v25, 16  ;;  %v1556_v36 = vshrl.u32 %v8106_v25, 16  ;;  %1186 = vst.msk [vmem:[#allocation2 + $0x40] sm:$0xf] %vm1152_vm6, %v914_v30  ;;  %v7042_v50 = vunpack.c.l.bf16 %v7069_v48 }
  0x8f   : > { %v1562_v37 = vshll.u32 %v8108_v27, 16  ;;  %1189 = vst [vmem:[#allocation2 + $0x44] sm:$0x1] %v1188_v32  ;;  %v6548_v8 = vcombine.low %v1771_v20, %v1781_v33  ;;  %v1545_v16 = vrot.slane %v1543_v28, 4  ;;  %v1548_v40 = vrot.slane %v1546_v29, 5 }
  0x90   : > { %v1554_v23 = vrot.slane %v1552_v34, 5  ;;  %v1558_v43 = vrot.slane %v1556_v36, 4  ;;  %v6942_v49 = vpack.c.bf16 %v727_v18, %v727_v18  ;;  %v551_v12 = vsel %vm7735_vm5, 0, %v550_v38  ;;  %v1246_v21 = vld [vmem:[#allocation2 + $0xa8] sm:$0xf] }
  0x91   : > { %v1564_v45 = vrot.slane %v1562_v37, 5  ;;  %7251 = vmatmul.mubr.msk.bf16.gmra.mxu1 %vm1880_vm12, %v6548_v8  ;;  %v1549_v47 = vor.u32 %v1548_v40, %v1545_v16  ;;  %v6943_v52 = vpack.c.bf16 %v728_v46, %v728_v46  ;;  %552 = vst [vmem:[#allocation2 + $0xbc] sm:$0x1] %v551_v12  ;;  %v7043_v53 = vunpack.c.h.bf16 %v7069_v48  ;;  %v523_v36 = vld [vmem:[#allocation2 + $0x50] sm:$0x1]  ;;  %v7060_v37 = vld [vmem:[%s7747_s14 + $0x28] sm:$0xff]  }
  0x92   : > { %v1559_v51 = vor.u32 %v1558_v43, %v1554_v23  ;;  %v468_v54 = vsel %vm7727_vm3, 0, %v467_v7  ;;  %v1053_v57 = vshrl.u32 %v6942_v49, 16  ;;  %v1056_v58 = vshll.u32 %v6942_v49, 16  ;;  %v1250_v16 = vld [vmem:[#allocation2 + $0xb0] sm:$0x1] }
  0x93   : > { %v1550_v55 = vrot.slane %v1549_v47, 4  ;;  %v8128_v1 = vld [vmem:[#allocation2 + $0x3c] sm:$0xf]  ;;  %v658_v59 = vmul.f32 %v8038_v10, %v7042_v50  ;;  %469 = vst [vmem:[#allocation2 + $0x48] sm:$0x1] %v468_v54  ;;  %v1061_v63 = vshrl.u32 %v6943_v52, 16  ;;  %v659_v26 = vmul.f32 %v8038_v10, %v7043_v53 }
  0x94   : > { %v1560_v60 = vrot.slane %v1559_v51, 4  ;;  %v1567_v61 = vshrl.u32 %v8128_v1, 16  ;;  %v1570_v62 = vshll.u32 %v8128_v1, 16  ;;  %v1055_v0 = vrot.slane %v1053_v57, 7  ;;  %v470_v18 = vld [vmem:[#allocation2 + $0x54] sm:$0x1] }
  0x95   : > { %v1555_v2 = vsel %vm7864_vm13, %v1550_v55, %v1554_v23  ;;  %v8135_v4 = vld [vmem:[#allocation2 + $0x40] sm:$0xf]  ;;  %v1064_v11 = vshll.u32 %v6943_v52, 16  ;;  %v1063_v34 = vrot.slane %v1061_v63, 7  ;;  %v697_v40 = vadd.f32 %v8027_v56, %v658_v59  ;;  %v526_v46 = vld [vmem:[#allocation2 + $0x5c] sm:$0x1] }
  0x96   : > { %v8137_v5 = vld [vmem:[#allocation2 + $0x44] sm:$0x1]  ;;  %v1565_v14 = vsel %vm7864_vm13, %v1560_v60, %v1564_v45  ;;  %v1569_v15 = vrot.slane %v1567_v61, 4  ;;  %v1572_v19 = vrot.slane %v1570_v62, 5  ;;  %v1576_v20 = vshll.u32 %v8135_v4, 16  ;;  %v7061_v47 = vld [vmem:[%s7747_s14 + $0x30] sm:$0xff]  }
  0x97   : > { %v6539_v22 = vcombine.low %v1555_v2, %v1565_v14  ;;  %v1580_v24 = vshrl.u32 %v8135_v4, 16  ;;  %v1586_v28 = vshll.u32 %v8137_v5, 16  ;;  %v1058_v29 = vor.u32 %v1056_v58, %v1055_v0  ;;  %v4765_v13 = vld [vmem:[#allocation2 + $0x3c] sm:$0xf] }
  0x98   : > { %v1573_v30 = vor.u32 %v1572_v19, %v1569_v15  ;;  %v1578_v32 = vrot.slane %v1576_v20, 5  ;;  %v1059_v33 = vrot.slane %v1055_v0, 4  ;;  %v1066_v23 = vor.u32 %v1064_v11, %v1063_v34 }
  0x99   : > { %7234 = vmatprep.mubr.msk.bf16.mxu0 %vm1880_vm12, %v6539_v22  ;;  %v1582_v38 = vrot.slane %v1580_v24, 4  ;;  %v1588_v48 = vrot.slane %v1586_v28, 5  ;;  %v1247_v8 = vsel %vm7812_vm8, %v1058_v29, %v1246_v21  ;;  %v1068_v43 = vrot.slane %v1063_v34, 4 }
  0x9a   : > { %v1574_v7 = vrot.slane %v1573_v30, 4  ;;  %1248 = vst [vmem:[#allocation2 + $0xa8] sm:$0xf] %v1247_v8  ;;  %v698_v45 = vadd.f32 %v8027_v56, %v659_v26  ;;  %v729_v12 = vmax.f32 %v697_v40, 0.0  ;;  %v524_v50 = vsel %vm7735_vm5, 0, %v523_v36 }
  0x9b   : > { %v1583_v49 = vor.u32 %v1582_v38, %v1578_v32  ;;  %v7006_v51 = vunpack.c.l.bf16 %v7060_v37  ;;  %v1067_v53 = vsel %vm7818_vm9, %v1059_v33, %v1066_v23  ;;  %v1251_v54 = vsel %vm7727_vm3, %v1068_v43, %v1250_v16  ;;  %525 = vst [vmem:[#allocation2 + $0x50] sm:$0x1] %v524_v50  ;;  %v1257_v8 = vld [vmem:[#allocation2 + $0xbc] sm:$0x1] }
  0x9c   : > { %v1579_v52 = vsel %vm7864_vm13, %v1574_v7, %v1578_v32  ;;  %v730_v55 = vmax.f32 %v698_v45, 0.0  ;;  %1249 = vst.msk [vmem:[#allocation2 + $0xac] sm:$0xf] %vm1152_vm6, %v1067_v53  ;;  %1252 = vst [vmem:[#allocation2 + $0xb0] sm:$0x1] %v1251_v54  ;;  %v6944_v58 = vpack.c.bf16 %v729_v12, %v729_v12  ;;  %v7007_v59 = vunpack.c.h.bf16 %v7060_v37 }
  0x9d   : > { %v1584_v57 = vrot.slane %v1583_v49, 4  ;;  %v640_v60 = vmul.f32 %v8038_v10, %v7006_v51  ;;  %v471_v62 = vsel %vm7727_vm3, 0, %v470_v18  ;;  %v527_v63 = vsel %vm7735_vm5, 0, %v526_v46 }
  0x9e   : > { %v6945_v61 = vpack.c.bf16 %v730_v55, %v730_v55  ;;  %v7010_v2 = vunpack.c.l.bf16 %v7061_v47  ;;  %v1070_v11 = vshrl.u32 %v6944_v58, 16  ;;  %v1073_v26 = vshll.u32 %v6944_v58, 16  ;;  %472 = vst [vmem:[#allocation2 + $0x54] sm:$0x1] %v471_v62  ;;  %528 = vst [vmem:[#allocation2 + $0x5c] sm:$0x1] %v527_v63 }
  0x9f   : > { %v1589_v0 = vsel %vm7864_vm13, %v1584_v57, %v1588_v48  ;;  %v641_v14 = vmul.f32 %v8038_v10, %v7007_v59  ;;  %v679_v21 = vadd.f32 %v8027_v56, %v640_v60  ;;  %v7011_v29 = vunpack.c.h.bf16 %v7061_v47  ;;  %v1253_v48 = vld [vmem:[#allocation2 + $0xb4] sm:$0xf] }
  0xa0   : > { %v6540_v15 = vcombine.low %v1579_v52, %v1589_v0  ;;  %v1078_v19 = vshrl.u32 %v6945_v61, 16  ;;  %v1081_v20 = vshll.u32 %v6945_v61, 16  ;;  %v1072_v24 = vrot.slane %v1070_v11, 7 }
  0xa1   : > { %v8170_v22 = vld [vmem:[#allocation2 + $0xa8] sm:$0xf]  ;;  %v680_v28 = vadd.f32 %v8027_v56, %v641_v14  ;;  %v642_v30 = vmul.f32 %v8038_v10, %v7010_v2  ;;  %v711_v36 = vmax.f32 %v679_v21, 0.0  ;;  %v643_v40 = vmul.f32 %v8038_v10, %v7011_v29 }
  0xa2   : > { %7235 = vmatmul.mubr.msk.bf16.gmra.mxu0 %vm1880_vm12, %v6540_v15  ;;  %v1783_v32 = vshrl.u32 %v8170_v22, 16  ;;  %v1786_v33 = vshll.u32 %v8170_v22, 16  ;;  %v1080_v34 = vrot.slane %v1078_v19, 7  ;;  %v1075_v37 = vor.u32 %v1073_v26, %v1072_v24  ;;  %v1190_v15 = vld [vmem:[#allocation2 + $0x48] sm:$0xf] }
  0xa3   : > { %v1076_v38 = vrot.slane %v1072_v24, 4  ;;  %v712_v16 = vmax.f32 %v680_v28, 0.0  ;;  %v8178_v18 = vld [vmem:[#allocation2 + $0xac] sm:$0xf]  ;;  %v8180_v7 = vld [vmem:[#allocation2 + $0xb0] sm:$0x1]  ;;  %v6926_v46 = vpack.c.bf16 %v711_v36, %v711_v36  ;;  %v681_v0 = vadd.f32 %v8027_v56, %v642_v30 }
  0xa4   : > { %v1785_v23 = vrot.slane %v1783_v32, 4  ;;  %v1788_v43 = vrot.slane %v1786_v33, 5  ;;  %v1083_v45 = vor.u32 %v1081_v20, %v1080_v34  ;;  %v1792_v47 = vshll.u32 %v8178_v18, 16  ;;  %v1194_v21 = vld [vmem:[#allocation2 + $0x50] sm:$0x1] }
  0xa5   : > { %v1796_v49 = vshrl.u32 %v8178_v18, 16  ;;  %v1802_v12 = vshll.u32 %v8180_v7, 16  ;;  %v1085_v50 = vrot.slane %v1080_v34, 4  ;;  %v1254_v10 = vsel %vm7812_vm8, %v1075_v37, %v1253_v48 }
  0xa6   : > { %v1789_v51 = vor.u32 %v1788_v43, %v1785_v23  ;;  %v1084_v52 = vsel %vm7818_vm9, %v1076_v38, %v1083_v45  ;;  %v6927_v53 = vpack.c.bf16 %v712_v16, %v712_v16  ;;  %v1794_v54 = vrot.slane %v1792_v47, 5  ;;  %1255 = vst [vmem:[#allocation2 + $0xb4] sm:$0xf] %v1254_v10 }
  0xa7   : > { %v1798_v55 = vrot.slane %v1796_v49, 4  ;;  %v1804_v57 = vrot.slane %v1802_v12, 5  ;;  %1256 = vst.msk [vmem:[#allocation2 + $0xb8] sm:$0xf] %vm1152_vm6, %v1084_v52  ;;  %v1258_v58 = vsel %vm7727_vm3, %v1085_v50, %v1257_v8  ;;  %v917_v60 = vshrl.u32 %v6926_v46, 16 }
  0xa8   : > { %v1790_v59 = vrot.slane %v1789_v51, 4  ;;  %1259 = vst [vmem:[#allocation2 + $0xbc] sm:$0x1] %v1258_v58  ;;  %v920_v61 = vshll.u32 %v6926_v46, 16  ;;  %v925_v62 = vshrl.u32 %v6927_v53, 16  ;;  %v928_v2 = vshll.u32 %v6927_v53, 16 }
  0xa9   : > { %v1799_v63 = vor.u32 %v1798_v55, %v1794_v54  ;;  %v682_v11 = vadd.f32 %v8027_v56, %v643_v40  ;;  %v919_v26 = vrot.slane %v917_v60, 7  ;;  %v713_v24 = vmax.f32 %v681_v0, 0.0 }
  0xaa   : > { %v927_v14 = vrot.slane %v925_v62, 7  ;;  %v1795_v19 = vsel %vm7864_vm13, %v1790_v59, %v1794_v54  ;;  %v1197_v62 = vld [vmem:[#allocation2 + $0x54] sm:$0xf] }
  0xab   : > { %v1800_v20 = vrot.slane %v1799_v63, 4  ;;  %v714_v28 = vmax.f32 %v682_v11, 0.0  ;;  %v922_v29 = vor.u32 %v920_v61, %v919_v26  ;;  %v923_v32 = vrot.slane %v919_v26, 4  ;;  %v1201_v63 = vld [vmem:[#allocation2 + $0x5c] sm:$0x1] }
  0xac   : > { %v930_v33 = vor.u32 %v928_v2, %v927_v14  ;;  %v932_v34 = vrot.slane %v927_v14, 4  ;;  %v6928_v30 = vpack.c.bf16 %v713_v24, %v713_v24 }
  0xad   : > { %v1805_v36 = vsel %vm7864_vm13, %v1800_v20, %v1804_v57  ;;  %v6929_v37 = vpack.c.bf16 %v714_v28, %v714_v28  ;;  %v8198_v38 = vld [vmem:[#allocation2 + $0xb4] sm:$0xf]  ;;  %v1191_v16 = vsel %vm7812_vm8, %v922_v29, %v1190_v15 }
  0xae   : > { %v6549_v56 = vcombine.low %v1795_v19, %v1805_v36  ;;  %v8200_v48 = vld [vmem:[#allocation2 + $0xb8] sm:$0xf]  ;;  %v931_v8 = vsel %vm7818_vm9, %v923_v32, %v930_v33  ;;  %v1195_v40 = vsel %vm7727_vm3, %v932_v34, %v1194_v21  ;;  %v1807_v43 = vshrl.u32 %v8198_v38, 16  ;;  %1192 = vst [vmem:[#allocation2 + $0x48] sm:$0xf] %v1191_v16 }
  0xaf   : > { %v8208_v23 = vld [vmem:[#allocation2 + $0xbc] sm:$0x1]  ;;  %v1810_v45 = vshll.u32 %v8198_v38, 16  ;;  %v1816_v46 = vshll.u32 %v8200_v48, 16  ;;  %v1820_v47 = vshrl.u32 %v8200_v48, 16  ;;  %v934_v12 = vshrl.u32 %v6928_v30, 16 }
  0xb0   : > { %1193 = vst.msk [vmem:[#allocation2 + $0x4c] sm:$0xf] %vm1152_vm6, %v931_v8  ;;  %1196 = vst [vmem:[#allocation2 + $0x50] sm:$0x1] %v1195_v40  ;;  %7254 = vmatprep.mubr.msk.bf16.mxu1 %vm1880_vm12, %v6549_v56  ;;  %v1826_v49 = vshll.u32 %v8208_v23, 16  ;;  %v937_v50 = vshll.u32 %v6928_v30, 16 }
  0xb1   : > { %v942_v51 = vshrl.u32 %v6929_v37, 16  ;;  %v1809_v52 = vrot.slane %v1807_v43, 4  ;;  %v1812_v10 = vrot.slane %v1810_v45, 5  ;;  %v1818_v53 = vrot.slane %v1816_v46, 5  ;;  %v7601_v19 = vld [vmem:[#allocation2 + $0x4] sm:$0xf] }
  0xb2   : > { %v1822_v54 = vrot.slane %v1820_v47, 4  ;;  %v936_v55 = vrot.slane %v934_v12, 7  ;;  %v945_v58 = vshll.u32 %v6929_v37, 16  ;;  %v1828_v61 = vrot.slane %v1826_v49, 5  ;;  %v7602_v34 = vld [vmem:[#allocation2] sm:$0xf] }
  0xb3   : > { %v944_v57 = vrot.slane %v942_v51, 7  ;;  %v1813_v59 = vor.u32 %v1812_v10, %v1809_v52  ;;  %v2439_v20 = vrot.slane %v7601_v19, 5  ;;  %v6567_v36 = vcombine.low %v7602_v34, %v7601_v19  ;;  %v2386_v16 = vld [vmem:[#allocation2] sm:$0xe]  ;;  %v7603_v47 = vld [vmem:[#allocation2 + $0x8] sm:$0x1] }
  0xb4   : > { %v1823_v60 = vor.u32 %v1822_v54, %v1818_v53  ;;  %v939_v2 = vor.u32 %v937_v50, %v936_v55  ;;  %v940_v0 = vrot.slane %v936_v55, 4  ;;  %v2442_v49 = vrot.slane %v7603_v47, 5  ;;  %v7604_v12 = vld [vmem:[#allocation2 + $0x10] sm:$0xf]  ;;  %v7609_v47 = vld [vmem:[#allocation2 + $0x1c] sm:$0xf] }
  0xb5   : > { %v947_v11 = vor.u32 %v945_v58, %v944_v57  ;;  %v949_v26 = vrot.slane %v944_v57, 4  ;;  %v1814_v14 = vrot.slane %v1813_v59, 4  ;;  %v8217_v21 = vld [vmem:[#allocation2 + $0x48] sm:$0xf]  ;;  %v2446_v50 = vrot.slane %v7604_v12, 5 }
  0xb6   : > { %v1824_v15 = vrot.slane %v1823_v60, 4  ;;  %v1198_v32 = vsel %vm7812_vm8, %v939_v2, %v1197_v62  ;;  %v1591_v56 = vshrl.u32 %v8217_v21, 16  ;;  %v1594_v8 = vshll.u32 %v8217_v21, 16  ;;  %v2387_v57 = vld [vmem:[#allocation2 + $0xc] sm:$0xe] }
  0xb7   : > { %v8219_v24 = vld [vmem:[#allocation2 + $0x4c] sm:$0xf]  ;;  %v8221_v28 = vld [vmem:[#allocation2 + $0x50] sm:$0x1]  ;;  %v948_v29 = vsel %vm7818_vm9, %v940_v0, %v947_v11  ;;  %v1202_v33 = vsel %vm7727_vm3, %v949_v26, %v1201_v63  ;;  %v1819_v30 = vsel %vm7864_vm13, %v1814_v14, %v1818_v53  ;;  %1199 = vst [vmem:[#allocation2 + $0x54] sm:$0xf] %v1198_v32 }
  0xb8   : > { %v1829_v37 = vsel %vm7864_vm13, %v1824_v15, %v1828_v61  ;;  %1200 = vst.msk [vmem:[#allocation2 + $0x58] sm:$0xf] %vm1152_vm6, %v948_v29  ;;  %1203 = vst [vmem:[#allocation2 + $0x5c] sm:$0x1] %v1202_v33  ;;  %v1600_v43 = vshll.u32 %v8219_v24, 16  ;;  %v1604_v45 = vshrl.u32 %v8219_v24, 16 }
  0xb9   : > { %v6550_v40 = vcombine.low %v1819_v30, %v1829_v37  ;;  %v1610_v46 = vshll.u32 %v8221_v28, 16  ;;  %v1593_v51 = vrot.slane %v1591_v56, 4  ;;  %v1596_v52 = vrot.slane %v1594_v8, 5  ;;  %v7605_v60 = vld [vmem:[#allocation2 + $0x14] sm:$0x1] }
  0xba   : > { %v1602_v10 = vrot.slane %v1600_v43, 5  ;;  %v1606_v53 = vrot.slane %v1604_v45, 4  ;;  %v6599_v54 = vrot.slane %v2386_v16, 9  ;;  %v2441_v55 = vrot.slane %v2439_v20, 4  ;;  %v7606_v0 = vld [vmem:[#allocation2 + $0xc] sm:$0xf] }
  0xbb   : > { %7255 = vmatmul.mubr.msk.bf16.gmra.mxu1 %vm1880_vm12, %v6550_v40  ;;  %v1597_v58 = vor.u32 %v1596_v52, %v1593_v51  ;;  %v10780_v59 = vmov 0  ;;  %v2449_v61 = vrot.slane %v7605_v60, 5  ;;  %v1612_v63 = vrot.slane %v1610_v46, 5  ;;  %v7607_v26 = vld [vmem:[%s10733_s3 + $0xc] sm:$0xf] }
  0xbc   : > { %7260 = vmatprep.mubr.msk.bf16.mxu1 %vm1880_vm12, %v6567_v36  ;;  %v10781_v59 = vsel %vm8243_vm2, 4294967295, %v10780_v59  ;;  %v1607_v62 = vor.u32 %v1606_v53, %v1602_v10  ;;  %v6568_v11 = vcombine.low %v7606_v0, %v7604_v12  ;;  %v3006_v14 = vsel %vm1929_vm0, %v7607_v26, 0  ;;  %v7608_v46 = vld [vmem:[#allocation2 + $0x18] sm:$0xf]  ;;  %v2390_v12 = vld [vmem:[#allocation2 + $0x30] sm:$0xe] }
  0xbd   : > { %10782 = vst [vmem:[#allocation3_spill] sm:$0xff] %v10781_v59  ;;  %v1598_v2 = vrot.slane %v1597_v58, 4  ;;  %v6600_v15 = vrot.slane %v2387_v57, 9  ;;  %v8257_v33 = vsel %vm8243_vm2, %v6599_v54, %v2439_v20  ;;  %v8261_v34 = vsel %vm8243_vm2, %v2441_v55, %v2442_v49  ;;  %v8273_v20 = vld [vmem:[%s10733_s3 + $0x14] sm:$0xf] }
  0xbe   : > { %v1608_v19 = vrot.slane %v1607_v62, 4  ;;  %v8251_v29 = vld [vmem:[#allocation2 + $0x54] sm:$0xf]  ;;  %v2448_v36 = vrot.slane %v2446_v50, 4  ;;  %v6569_v49 = vcombine.low %v7608_v46, %v7609_v47  ;;  %v6616_v55 = vcombine.low %v8257_v33, %v8261_v34  ;;  %v2388_v58 = vld [vmem:[#allocation2 + $0x18] sm:$0xe] }
  0xbf   : > { %v8253_v32 = vld [vmem:[#allocation2 + $0x58] sm:$0xf]  ;;  %v1603_v30 = vsel %vm7864_vm13, %v1598_v2, %v1602_v10  ;;  %v8265_v37 = vld [vmem:[#allocation2 + $0x5c] sm:$0x1]  ;;  %v1615_v56 = vshrl.u32 %v8251_v29, 16  ;;  %v1618_v8 = vshll.u32 %v8251_v29, 16  ;;  %v8284_v57 = vsel %vm8243_vm2, %v6600_v15, %v2446_v50 }
  0xc0   : > { %v1624_v16 = vshll.u32 %v8253_v32, 16  ;;  %v1613_v40 = vsel %vm7864_vm13, %v1608_v19, %v1612_v63  ;;  %v1628_v43 = vshrl.u32 %v8253_v32, 16  ;;  %v1634_v45 = vshll.u32 %v8265_v37, 16  ;;  %v2391_v15 = vld [vmem:[#allocation2 + $0x3c] sm:$0xe] }
  0xc1   : > { %v6541_v51 = vcombine.low %v1603_v30, %v1613_v40  ;;  %v1617_v52 = vrot.slane %v1615_v56, 4  ;;  %v1620_v10 = vrot.slane %v1618_v8, 5  ;;  %v8289_v62 = vsel %vm8243_vm2, %v2448_v36, %v2449_v61  ;;  %v7610_v33 = vld [vmem:[#allocation2 + $0x20] sm:$0x1]  ;;  %v2389_v46 = vld [vmem:[#allocation2 + $0x24] sm:$0xe] }
  0xc2   : > { %v1626_v53 = vrot.slane %v1624_v16, 5  ;;  %v1630_v54 = vrot.slane %v1628_v43, 4  ;;  %v6570_v63 = vcombine.low %v8002_v31, %v8013_v39  ;;  %v2453_v2 = vrot.slane %v7609_v47, 5 }
  0xc3   : > { %7261 = vmatmul.mubr.msk.bf16.vlgmr.msra.gmra.mxu1 %vm1880_vm12, %v6568_v11  ;;  %7238 = vmatprep.mubr.msk.bf16.mxu0 %vm1880_vm12, %v6541_v51  ;;  %v1621_v60 = vor.u32 %v1620_v10, %v1617_v52  ;;  %v1636_v11 = vrot.slane %v1634_v45, 5  ;;  %v6603_v26 = vrot.slane %v2390_v12, 9  ;;  %v2467_v50 = vrot.slane %v8106_v25, 5 }
  0xc4   : > { %7327 = vmatpush3.bf16.msra.mxu1 %v3006_v14  ;;  %v1631_v0 = vor.u32 %v1630_v54, %v1626_v53  ;;  %7264 = vmatprep.mubr.msk.bf16.mxu1 %vm1880_vm12, %v6569_v49  ;;  %v6601_v19 = vrot.slane %v2388_v58, 9  ;;  %v2456_v61 = vrot.slane %v7610_v33, 5  ;;  %v6571_v34 = vcombine.low %v8102_v9, %v8106_v25 }
  0xc5   : > { %7538 = vmatprep.subr.msk.bf16.mxu1 %vm1929_vm0, %v8273_v20  ;;  %v1622_v14 = vrot.slane %v1621_v60, 4  ;;  %v8301_v36 = vsel %vm8243_vm2, %v6603_v26, %v2467_v50  ;;  %v2469_v30 = vrot.slane %v2467_v50, 4  ;;  %v2470_v56 = vrot.slane %v8108_v27, 5  ;;  %v2393_v60 = vld [vmem:[#allocation2 + $0x54] sm:$0xe] }
  0xc6   : > { %v1632_v31 = vrot.slane %v1631_v0, 4  ;;  %v2455_v16 = vrot.slane %v2453_v2, 4  ;;  %v6604_v40 = vrot.slane %v2391_v15, 9  ;;  %v2474_v43 = vrot.slane %v8135_v4, 5  ;;  %v7611_v26 = vld [vmem:[#allocation2 + $0x2c] sm:$0x1] }
  0xc7   : > { %v1627_v8 = vsel %vm7864_vm13, %v1622_v14, %v1626_v53  ;;  %v2460_v9 = vrot.slane %v8013_v39, 5  ;;  %v8312_v25 = vsel %vm8243_vm2, %v2469_v30, %v2470_v56  ;;  %v2477_v47 = vrot.slane %v8137_v5, 5  ;;  %v2392_v5 = vld [vmem:[#allocation2 + $0x48] sm:$0xe]  ;;  %v8345_v30 = vld [vmem:[#allocation2 + $0x64] sm:$0xf] }
  0xc8   : > { %v1637_v45 = vsel %vm7864_vm13, %v1632_v31, %v1636_v11  ;;  %v6620_v49 = vcombine.low %v8301_v36, %v8312_v25  ;;  %v8319_v12 = vsel %vm8243_vm2, %v6604_v40, %v2474_v43  ;;  %v2476_v51 = vrot.slane %v2474_v43, 4  ;;  %v8368_v40 = vld [vmem:[%s10733_s3 + $0x18] sm:$0xf] }
  0xc9   : > { %v6542_v27 = vcombine.low %v1627_v8, %v1637_v45  ;;  %v2481_v52 = vrot.slane %v8219_v24, 5  ;;  %v2488_v10 = vrot.slane %v8253_v32, 5  ;;  %v6617_v53 = vcombine.low %v8284_v57, %v8289_v62  ;;  %v2394_v62 = vld [vmem:[#allocation2 + $0x60] sm:$0xe] }
  0xca   : > { %v8327_v39 = vsel %vm8243_vm2, %v2476_v51, %v2477_v47  ;;  %v6602_v54 = vrot.slane %v2389_v46, 9  ;;  %v2457_v0 = vsel %vm8243_vm2, %v2455_v16, %v2456_v61  ;;  %v2462_v11 = vrot.slane %v2460_v9, 4  ;;  %v8380_v46 = vld [vmem:[#allocation2 + $0x70] sm:$0xf]  ;;  %v7615_v47 = vld [vmem:[#allocation2 + $0x68] sm:$0x1] }
  0xcb   : > { %7265 = vmatmul.mubr.msk.bf16.gmra.mxu1 %vm1880_vm12, %v6570_v63  ;;  %7239 = vmatmul.mubr.msk.bf16.gmra.mxu0 %vm1880_vm12, %v6542_v27  ;;  %v2454_v63 = vsel %vm8243_vm2, %v6601_v19, %v2453_v2  ;;  %v2463_v50 = vrot.slane %v7611_v26, 5  ;;  %v6605_v15 = vrot.slane %v2392_v5, 9  ;;  %v2483_v14 = vrot.slane %v2481_v52, 4  ;;  %v2395_v19 = vld [vmem:[#allocation2 + $0x6c] sm:$0xe] }
  0xcc   : > { %7268 = vmatprep.mubr.msk.bf16.mxu1 %vm1880_vm12, %v6571_v34  ;;  %7294 = vmatprep.mubr.msk.bf16.mxu0 %vm1880_vm12, %v6616_v55  ;;  %v6572_v55 = vcombine.low %v8128_v1, %v8135_v4  ;;  %v2484_v57 = vrot.slane %v8221_v28, 5  ;;  %v6573_v33 = vcombine.low %v8217_v21, %v8219_v24  ;;  %v6606_v34 = vrot.slane %v2393_v60, 9  ;;  %v7613_v1 = vld [vmem:[%s10733_s3 + $0x10] sm:$0xf] }
  0xcd   : > { %v2490_v31 = vrot.slane %v2488_v10, 4  ;;  %v2491_v2 = vrot.slane %v8265_v37, 5  ;;  %v6618_v61 = vcombine.low %v2454_v63, %v2457_v0  ;;  %v2495_v56 = vrot.slane %v8345_v30, 5  ;;  %v8391_v63 = vld [vmem:[#allocation2 + $0x6c] sm:$0xf] }
  0xce   : > { %v3732_v4 = vsel %vm1929_vm0, %v7613_v1, 0  ;;  %v2461_v28 = vsel %vm8243_vm2, %v6602_v54, %v2460_v9  ;;  %v2464_v21 = vsel %vm8243_vm2, %v2462_v11, %v2463_v50  ;;  %v8359_v24 = vsel %vm8243_vm2, %v6605_v15, %v2481_v52  ;;  %v7616_v54 = vld [vmem:[#allocation2 + $0x60] sm:$0xf]  ;;  %v7618_v11 = vld [vmem:[#allocation2 + $0x74] sm:$0x1] }
  0xcf   : > { %v8363_v37 = vsel %vm8243_vm2, %v2483_v14, %v2484_v57  ;;  %v6607_v8 = vrot.slane %v2394_v62, 9  ;;  %v6608_v16 = vrot.slane %v2395_v19, 9  ;;  %v8374_v43 = vsel %vm8243_vm2, %v6606_v34, %v2488_v10  ;;  %v8386_v10 = vld [vmem:[#allocation2 + $0x78] sm:$0xe]  ;;  %v8409_v15 = vld [vmem:[#allocation2 + $0x7c] sm:$0xf] }
  0xd0   : > { %v8378_v45 = vsel %vm8243_vm2, %v2490_v31, %v2491_v2  ;;  %v2502_v9 = vrot.slane %v8380_v46, 5  ;;  %v2498_v27 = vrot.slane %v7615_v47, 5  ;;  %v6619_v51 = vcombine.low %v2461_v28, %v2464_v21  ;;  %v2397_v57 = vld [vmem:[#allocation2 + $0x84] sm:$0xe]  ;;  %v2400_v62 = vld [vmem:[#allocation2 + $0xa8] sm:$0xe] }
  0xd1   : > { %v6574_v52 = vcombine.low %v8251_v29, %v8253_v32  ;;  %v2497_v5 = vrot.slane %v2495_v56, 4  ;;  %v6575_v60 = vcombine.low %v7616_v54, %v8345_v30  ;;  %v2505_v26 = vrot.slane %v7618_v11, 5  ;;  %v8413_v34 = vld [vmem:[#allocation2 + $0x84] sm:$0xf]  ;;  %v8415_v31 = vld [vmem:[#allocation2 + $0x88] sm:$0xf] }
  0xd2   : > { %v8401_v32 = vsel %vm8243_vm2, %v6607_v8, %v2495_v56  ;;  %v8405_v50 = vsel %vm8243_vm2, %v6608_v16, %v2502_v9  ;;  %v6609_v19 = vrot.slane %v8386_v10, 9  ;;  %v2401_v30 = vld [vmem:[#allocation2 + $0xb4] sm:$0xe]  ;;  %v7623_v1 = vld [vmem:[#allocation2 + $0x80] sm:$0x1]  ;;  %v2516_v28 = vrot.slane %v8415_v31, 5 }
  0xd3   : > { %7269 = vmatmul.mubr.msk.bf16.gmra.mxu1 %vm1880_vm12, %v6572_v55  ;;  %7295 = vmatmul.mubr.msk.bf16.vlgmr.msra.gmra.mxu0 %vm1880_vm12, %v6617_v53  ;;  %v8407_v55 = vld [vmem:[#allocation2 + $0x78] sm:$0xf]  ;;  %v8423_v56 = vsel %vm8243_vm2, %v2497_v5, %v2498_v27  ;;  %v6610_v8 = vrot.slane %v2397_v57, 9  ;;  %v2398_v16 = vld [vmem:[#allocation2 + $0x90] sm:$0xe]  ;;  %v6613_v54 = vrot.slane %v2400_v62, 9 }
  0xd4   : > { %7272 = vmatprep.mubr.msk.bf16.mxu1 %vm1880_vm12, %v6573_v33  ;;  %7361 = vmatpush3.bf16.msra.mxu0 %v3732_v4  ;;  %v2504_v33 = vrot.slane %v2502_v9, 4  ;;  %v2512_v4 = vrot.slane %v7623_v1, 5  ;;  %v8428_v9 = vld [vmem:[#allocation2 + $0x94] sm:$0xf]  ;;  %v2530_v27 = vrot.slane %v8082_v41, 5  ;;  %v2537_v5 = vrot.slane %v8178_v18, 5 }
  0xd5   : > { %7298 = vmatprep.mubr.msk.bf16.mxu0 %vm1880_vm12, %v6618_v61  ;;  %7539 = vmatprep.subr.msk.bf16.mxu0 %vm1929_vm0, %v8368_v40  ;;  %v2509_v61 = vrot.slane %v8409_v15, 5  ;;  %v2523_v47 = vrot.slane %v8428_v9, 5  ;;  %v2540_v11 = vrot.slane %v8180_v7, 5  ;;  %v6614_v1 = vrot.slane %v2401_v30, 9  ;;  %v7625_v21 = vld [vmem:[#allocation2 + $0x8c] sm:$0x1] }
  0xd6   : > { %v2519_v29 = vrot.slane %v7625_v21, 5  ;;  %v2399_v2 = vld [vmem:[#allocation2 + $0x9c] sm:$0xe]  ;;  %v2544_v10 = vrot.slane %v8200_v48, 5  ;;  %v2547_v62 = vrot.slane %v8208_v23, 5  ;;  %v6611_v7 = vrot.slane %v2398_v16, 9 }
  0xd7   : > { %v2511_v57 = vrot.slane %v2509_v61, 4  ;;  %v2525_v30 = vrot.slane %v2523_v47, 4  ;;  %v7626_v53 = vld [vmem:[#allocation2 + $0x98] sm:$0x1]  ;;  %v6612_v58 = vrot.slane %v2399_v2, 9  ;;  %v2532_v0 = vrot.slane %v2530_v27, 4 }
  0xd8   : > { %v2526_v21 = vrot.slane %v7626_v53, 5  ;;  %v8451_v14 = vsel %vm8243_vm2, %v6614_v1, %v2544_v10  ;;  %v2546_v23 = vrot.slane %v2544_v10, 4  ;;  %v2533_v36 = vrot.slane %v8084_v42, 5 }
  0xd9   : > { %v8460_v16 = vsel %vm8243_vm2, %v2504_v33, %v2505_v26  ;;  %v8464_v53 = vsel %vm8243_vm2, %v6609_v19, %v2509_v61  ;;  %v8474_v42 = vsel %vm8243_vm2, %v2511_v57, %v2512_v4  ;;  %v8488_v19 = vsel %vm8243_vm2, %v6611_v7, %v2523_v47  ;;  %v8494_v4 = vld [vmem:[#allocation2 + $0x10] sm:$0xf]  ;;  %v8512_v57 = vld [vmem:[#allocation2 + $0x14] sm:$0x1]  ;;  %v8539_v7 = vld [vmem:[#allocation2 + $0x28] sm:$0xf] }
  0xda   : > { %v8470_v2 = vsel %vm8243_vm2, %v2546_v23, %v2547_v62  ;;  %v8492_v61 = vsel %vm8243_vm2, %v2525_v30, %v2526_v21  ;;  %v8510_v1 = vsel %vm8243_vm2, %v2532_v0, %v2533_v36  ;;  %10784 = vst [vmem:[#allocation4_spill] sm:$0xff] %v8512_v57  ;;  %v8527_v62 = vld [vmem:[#allocation2 + $0x1c] sm:$0xf]  ;;  %10789 = vst [vmem:[#allocation6_spill] sm:$0xff] %v8539_v7  ;;  %v3210_v21 = vld [vmem:[#allocation2 + $0x30] sm:$0xf] }
  0xdb   : > { %7273 = vmatmul.mubr.msk.bf16.gmra.mxu1 %vm1880_vm12, %v6574_v52  ;;  %7299 = vmatmul.mubr.msk.bf16.gmra.mxu0 %vm1880_vm12, %v6619_v51  ;;  %v2518_v52 = vrot.slane %v2516_v28, 4  ;;  %v8447_v51 = vsel %vm8243_vm2, %v6613_v54, %v2537_v5  ;;  %v8478_v54 = vsel %vm8243_vm2, %v6610_v8, %v2516_v28  ;;  %v10783_v8 = vcombine.low %v8391_v63, %v8380_v46  ;;  %v3213_v47 = vld [vmem:[#allocation2 + $0x3c] sm:$0xf] }
  0xdc   : > { %7276 = vmatprep.mubr.msk.bf16.mxu1 %vm1880_vm12, %v6575_v60  ;;  %7302 = vmatprep.mubr.msk.bf16.mxu0 %vm1880_vm12, %v6620_v49  ;;  %v2539_v60 = vrot.slane %v2537_v5, 4  ;;  %v3201_v49 = vld [vmem:[#allocation2 + $0xc] sm:$0xf]  ;;  %v10785_v46 = vcombine.low %v8319_v12, %v8327_v39  ;;  %v10786_v63 = vcombine.low %v8407_v55, %v8409_v15  ;;  %10787 = vst [vmem:[#allocation5_spill] sm:$0xff] %v8527_v62  ;;  %v3259_v15 = vshll.u32 %v8494_v4, 16 }
  0xdd   : > { %v8482_v26 = vsel %vm8243_vm2, %v2518_v52, %v2519_v29  ;;  %v3250_v5 = vshrl.u32 %v3201_v49, 16  ;;  %v3253_v28 = vshll.u32 %v3201_v49, 16  ;;  %v6624_v29 = vcombine.low %v8401_v32, %v8423_v56  ;;  %v7627_v32 = vld [vmem:[#allocation2 + $0x90] sm:$0xf]  ;;  %v3207_v52 = vld [vmem:[#allocation2 + $0x24] sm:$0xf] }
  0xde   : > { %v8456_v25 = vsel %vm8243_vm2, %v2539_v60, %v2540_v11  ;;  %v8506_v11 = vsel %vm8243_vm2, %v6612_v58, %v2530_v27  ;;  %v6579_v56 = vcombine.low %v7627_v32, %v8428_v9  ;;  %v3204_v27 = vld [vmem:[#allocation2 + $0x18] sm:$0xf]  ;;  %v10788_v12 = vcombine.low %v8359_v24, %v8363_v37 }
  0xdf   : > { %v3263_v9 = vshrl.u32 %v8494_v4, 16  ;;  %v3252_v30 = vrot.slane %v3250_v5, 4  ;;  %v3255_v24 = vrot.slane %v3253_v28, 5  ;;  %v3269_v37 = vshll.u32 %v8512_v57, 16 }
  0xe0   : > { %v3274_v23 = vshrl.u32 %v3204_v27, 16  ;;  %v3277_v36 = vshll.u32 %v3204_v27, 16  ;;  %v3283_v49 = vshll.u32 %v8527_v62, 16  ;;  %v3301_v32 = vshll.u32 %v3207_v52, 16 }
  0xe1   : > { %v3311_v33 = vshrl.u32 %v8539_v7, 16  ;;  %v8552_v5 = vsel %vm1929_vm0, %v8273_v20, 0  ;;  %v8554_v28 = vrot.slane %v3259_v15, 5  ;;  %v3265_v10 = vrot.slane %v3263_v9, 4 }
  0xe2   : > { %v3322_v27 = vshrl.u32 %v3210_v21, 16  ;;  %v3256_v60 = vor.u32 %v3255_v24, %v3252_v30  ;;  %v8556_v55 = vrot.slane %v3269_v37, 5  ;;  %v3325_v39 = vshll.u32 %v3210_v21, 16  ;;  %v8572_v30 = vld [vmem:[#allocation2 + $0x20] sm:$0x1] }
  0xe3   : > { %7277 = vmatmul.mubr.msk.bf16.gmra.mxu1 %vm1880_vm12, %v10783_v8  ;;  %7303 = vmatmul.mubr.msk.bf16.gmra.mxu0 %vm1880_vm12, %v10785_v46  ;;  %v3287_v8 = vshrl.u32 %v8527_v62, 16  ;;  %v8546_v46 = vld [vmem:[#allocation2 + $0x34] sm:$0xf]  ;;  %v3276_v0 = vrot.slane %v3274_v23, 4  ;;  %v3279_v59 = vrot.slane %v3277_v36, 5  ;;  %v8563_v20 = vrot.slane %v3283_v49, 5 }
  0xe4   : > { %7280 = vmatprep.mubr.msk.bf16.mxu1 %vm1880_vm12, %v10786_v63  ;;  %7306 = vmatprep.mubr.msk.bf16.mxu0 %vm1880_vm12, %v10788_v12  ;;  %10790 = vst [vmem:[#allocation7_spill] sm:$0xff] %v8546_v46  ;;  %v3298_v63 = vshrl.u32 %v3207_v52, 16  ;;  %v3307_v12 = vshll.u32 %v8539_v7, 16  ;;  %v3331_v58 = vshll.u32 %v8546_v46, 16  ;;  %v10791_v52 = vcombine.low %v8413_v34, %v8415_v31  ;;  %v8565_v7 = vld [vmem:[#allocation2 + $0x40] sm:$0xf] }
  0xe5   : > { %v3289_v15 = vrot.slane %v3287_v8, 4  ;;  %v10792_v9 = vcombine.low %v8374_v43, %v8378_v45  ;;  %10793 = vst [vmem:[#allocation8_spill] sm:$0xff] %v8572_v30  ;;  %v3303_v34 = vrot.slane %v3301_v32, 5  ;;  %v3313_v37 = vrot.slane %v3311_v33, 4  ;;  %v8578_v23 = vld [vmem:[#allocation2 + $0x2c] sm:$0x1] }
  0xe6   : > { %v3300_v24 = vrot.slane %v3298_v63, 4  ;;  %v8574_v31 = vrot.slane %v3307_v12, 5  ;;  %v3266_v21 = vor.u32 %v3265_v10, %v8554_v28  ;;  %v3324_v36 = vrot.slane %v3322_v27, 4  ;;  %v8581_v49 = vld [vmem:[#allocation2 + $0x38] sm:$0x1] }
  0xe7   : > { %v3335_v43 = vshrl.u32 %v8546_v46, 16  ;;  %v3346_v45 = vshrl.u32 %v3213_v47, 16  ;;  %v8583_v8 = vrot.slane %v3331_v58, 5  ;;  %v3349_v63 = vshll.u32 %v3213_v47, 16  ;;  %v3216_v58 = vld [vmem:[#allocation2 + $0x48] sm:$0xf] }
  0xe8   : > { %v3355_v32 = vshll.u32 %v8565_v7, 16  ;;  %v3280_v12 = vor.u32 %v3279_v59, %v3276_v0  ;;  %v3293_v33 = vshll.u32 %v8572_v30, 16  ;;  %v8589_v10 = vsel %vm1929_vm0, %v8368_v40, 0 }
  0xe9   : > { %v3290_v27 = vor.u32 %v3289_v15, %v8563_v20  ;;  %v3341_v47 = vshll.u32 %v8581_v49, 16  ;;  %v3348_v46 = vrot.slane %v3346_v45, 4  ;;  %v3351_v57 = vrot.slane %v3349_v63, 5 }
  0xea   : > { %v3359_v59 = vshrl.u32 %v8565_v7, 16  ;;  %v3257_v0 = vrot.slane %v3256_v60, 4  ;;  %v8597_v62 = vrot.slane %v3355_v32, 5  ;;  %v10794_v15 = vcombine.low %v8076_v35, %v8082_v41 }
  0xeb   : > { %7281 = vmatmul.mubr.msk.bf16.gmra.mxu1 %vm1880_vm12, %v10791_v52  ;;  %7307 = vmatmul.mubr.msk.bf16.gmra.mxu0 %vm1880_vm12, %v10792_v9  ;;  %v3304_v52 = vor.u32 %v3303_v34, %v3300_v24  ;;  %v3314_v9 = vor.u32 %v3313_v37, %v8574_v31  ;;  %v3267_v24 = vrot.slane %v3266_v21, 4  ;;  %v8603_v34 = vld [vmem:[#allocation2 + $0x44] sm:$0x1]  ;;  %v3373_v45 = vshll.u32 %v3216_v58, 16  ;;  %v8613_v21 = vld [vmem:[#allocation2 + $0x4c] sm:$0xf] }
  0xec   : > { %7284 = vmatprep.mubr.msk.bf16.mxu1 %vm1880_vm12, %v6579_v56  ;;  %7310 = vmatprep.mubr.msk.bf16.mxu0 %vm1880_vm12, %v6624_v29  ;;  %v3327_v56 = vrot.slane %v3325_v39, 5  ;;  %v3337_v29 = vrot.slane %v3335_v43, 4  ;;  %v3317_v39 = vshll.u32 %v8578_v23, 16  ;;  %v3361_v37 = vrot.slane %v3359_v59, 4 }
  0xed   : > { %v3370_v43 = vshrl.u32 %v3216_v58, 16  ;;  %v10795_v63 = vcombine.low %v8405_v50, %v8460_v16  ;;  %v10796_v60 = vcombine.low %v8170_v22, %v8178_v18  ;;  %v3291_v35 = vrot.slane %v3290_v27, 4 }
  0xee   : > { %v3328_v30 = vor.u32 %v3327_v56, %v3324_v36  ;;  %v3338_v40 = vor.u32 %v3337_v29, %v8583_v8  ;;  %v3281_v36 = vrot.slane %v3280_v12, 4  ;;  %v3295_v41 = vrot.slane %v3293_v33, 5  ;;  %v8621_v12 = vld [vmem:[#allocation2 + $0x50] sm:$0x1] }
  0xef   : > { %v3319_v56 = vrot.slane %v3317_v39, 5  ;;  %v10797_v32 = vcombine.low %v8464_v53, %v8474_v42  ;;  %v3305_v29 = vrot.slane %v3304_v52, 4  ;;  %v3315_v50 = vrot.slane %v3314_v9, 4  ;;  %v7567_v42 = vld [vmem:[#allocation2 + $0xc] sm:$0xff]  }
  0xf0   : > { %v3343_v16 = vrot.slane %v3341_v47, 5  ;;  %v3352_v58 = vor.u32 %v3351_v57, %v3348_v46  ;;  %v3329_v59 = vrot.slane %v3328_v30, 4  ;;  %v3362_v22 = vor.u32 %v3361_v37, %v8597_v62 }
  0xf1   : > { %v3365_v18 = vshll.u32 %v8603_v34, 16  ;;  %v3372_v33 = vrot.slane %v3370_v43, 4  ;;  %v3375_v27 = vrot.slane %v3373_v45, 5  ;;  %v3379_v39 = vshll.u32 %v8613_v21, 16  ;;  %v8647_v43 = vld [vmem:[#allocation2 + $0x58] sm:$0xf] }
  0xf2   : > { %v3383_v53 = vshrl.u32 %v8613_v21, 16  ;;  %v3262_v52 = vsel %vm7864_vm13, %v3257_v0, %v8554_v28  ;;  %v3272_v57 = vsel %vm7864_vm13, %v3267_v24, %v8556_v55  ;;  %v3286_v46 = vsel %vm7864_vm13, %v3281_v36, %v8563_v20  ;;  %v3219_v0 = vld [vmem:[#allocation2 + $0x54] sm:$0xf] }
  0xf3   : > { %7285 = vmatmul.mubr.msk.bf16.gmra.mxu1 %vm1880_vm12, %v10794_v15  ;;  %7311 = vmatmul.mubr.msk.bf16.gmra.mxu0 %vm1880_vm12, %v10795_v63  ;;  %v3339_v15 = vrot.slane %v3338_v40, 4  ;;  %v3296_v30 = vsel %vm7864_vm13, %v3291_v35, %v3295_v41  ;;  %v3310_v9 = vsel %vm7864_vm13, %v3305_v29, %v8574_v31  ;;  %v3320_v47 = vsel %vm7864_vm13, %v3315_v50, %v3319_v56  ;;  %v3222_v35 = vld [vmem:[#allocation2 + $0x60] sm:$0xf] }
  0xf4   : > { %7288 = vmatprep.mubr.msk.bf16.mxu1 %vm1880_vm12, %v10796_v60  ;;  %7314 = vmatprep.mubr.msk.bf16.mxu0 %vm1880_vm12, %v10797_v32  ;;  %v3353_v40 = vrot.slane %v3352_v58, 4  ;;  %v3389_v28 = vshll.u32 %v8621_v12, 16  ;;  %v3334_v55 = vsel %vm7864_vm13, %v3329_v59, %v8583_v8  ;;  %v3363_v24 = vrot.slane %v3362_v22, 4  ;;  %v8666_v32 = vld [vmem:[#allocation2 + $0x64] sm:$0xf] }
  0xf5   : > { %v3344_v20 = vsel %vm7864_vm13, %v3339_v15, %v3343_v16  ;;  %v3367_v37 = vrot.slane %v3365_v18, 5  ;;  %v10798_v31 = vcombine.low %v8198_v38, %v8200_v48  ;;  %v8653_v45 = vcombine.low %v3262_v52, %v3272_v57  ;;  %v3225_v58 = vld [vmem:[#allocation2 + $0x6c] sm:$0xf]  ;;  %v8680_v59 = vld [vmem:[#allocation2 + $0x70] sm:$0xf] }
  0xf6   : > { %v3376_v63 = vor.u32 %v3375_v27, %v3372_v33  ;;  %v8655_v60 = vrot.slane %v3379_v39, 5  ;;  %v3385_v36 = vrot.slane %v3383_v53, 4  ;;  %v10799_v8 = vcombine.low %v8478_v54, %v8482_v26  ;;  %10801 = vst [vmem:[#allocation9_spill] sm:$0xff] %v8680_v59  ;;  %v8684_v22 = vld [vmem:[#allocation2 + $0x5c] sm:$0x1] }
  0xf7   : > { %v8662_v41 = vcombine.low %v3286_v46, %v3296_v30  ;;  %v8664_v56 = vcombine.low %v3310_v9, %v3320_v47  ;;  %v3394_v38 = vshrl.u32 %v3219_v0, 16  ;;  %v3397_v48 = vshll.u32 %v3219_v0, 16  ;;  %v7568_v33 = vld [vmem:[#allocation2 + $0x18] sm:$0xff]   ;;  %v7569_v9 = vld [vmem:[#allocation2 + $0x24] sm:$0xff]  }
  0xf8   : > { %v10800_v29 = vcombine.low %v8488_v19, %v8492_v61  ;;  %v8672_v50 = vcombine.low %v3334_v55, %v3344_v20  ;;  %v3358_v54 = vsel %vm7864_vm13, %v3353_v40, %v8597_v62  ;;  %v8677_v26 = vrot.slane %v3389_v28, 5  ;;  %v3228_v30 = vld [vmem:[#allocation2 + $0x78] sm:$0xf]  ;;  %v8695_v28 = vld [vmem:[#allocation2 + $0x68] sm:$0x1] }
  0xf9   : > { %v3403_v16 = vshll.u32 %v8647_v43, 16  ;;  %v3368_v15 = vsel %vm7864_vm13, %v3363_v24, %v3367_v37  ;;  %v3407_v19 = vshrl.u32 %v8647_v43, 16  ;;  %v3418_v61 = vshrl.u32 %v3222_v35, 16  ;;  %10802 = vst [vmem:[#allocation10_spill] sm:$0xff] %v8695_v28  ;;  %v8699_v20 = vld [vmem:[#allocation2 + $0x7c] sm:$0xf] }
  0xfa   : > { %v3421_v18 = vshll.u32 %v3222_v35, 16  ;;  %v8687_v27 = vrot.slane %v3376_v63, 4  ;;  %v3386_v62 = vor.u32 %v3385_v36, %v8655_v60  ;;  %v3427_v39 = vshll.u32 %v8666_v32, 16  ;;  %10803 = vst [vmem:[#allocation11_spill] sm:$0xff] %v8699_v20  ;;  %v8703_v36 = vld [vmem:[#allocation2 + $0x74] sm:$0x1] }
  0xfb   : > { %7289 = vmatmul.mubr.msk.bf16.gmra.mxu1 %vm1880_vm12, %v10798_v31  ;;  %7315 = vmatmul.mubr.msk.bf16.gmra.mxu0 %vm1880_vm12, %v10799_v8  ;;  %v3431_v53 = vshrl.u32 %v8666_v32, 16  ;;  %v3399_v52 = vrot.slane %v3397_v48, 5  ;;  %v3442_v57 = vshrl.u32 %v3225_v58, 16  ;;  %v3445_v46 = vshll.u32 %v3225_v58, 16  ;;  %10804 = vst [vmem:[#allocation12_spill] sm:$0xff] %v8703_v36 }
  0xfc   : > { %7328 = vmatprep.mubr.msk.bf16.mxu1 %vm1880_vm12, %v7567_v42  ;;  %7318 = vmatprep.mubr.msk.bf16.mxu0 %vm1880_vm12, %v10800_v29  ;;  %v3396_v42 = vrot.slane %v3394_v38, 4  ;;  %v8692_v47 = vcombine.low %v3358_v54, %v3368_v15  ;;  %v3413_v40 = vshll.u32 %v8684_v22, 16  ;;  %v3451_v0 = vshll.u32 %v8680_v59, 16  ;;  %v8717_v29 = vld [vmem:[%s10733_s3 + $0x1c] sm:$0xf] }
  0xfd   : > { %v3455_v55 = vshrl.u32 %v8680_v59, 16  ;;  %v8701_v24 = vrot.slane %v3403_v16, 5  ;;  %v3409_v37 = vrot.slane %v3407_v19, 4  ;;  %v3420_v31 = vrot.slane %v3418_v61, 4  ;;  %v3231_v61 = vld [vmem:[#allocation2 + $0x84] sm:$0xf] }
  0xfe   : > { %v3423_v63 = vrot.slane %v3421_v18, 5  ;;  %v8710_v8 = vrot.slane %v3386_v62, 4  ;;  %v8712_v38 = vrot.slane %v3427_v39, 5  ;;  %v3433_v48 = vrot.slane %v3431_v53, 4  ;;  %v8732_v39 = vld [vmem:[#allocation2 + $0x88] sm:$0xf] }
  0xff   : > { %v10805_v54 = vcombine.low %v8506_v11, %v8510_v1  ;;  %v3444_v16 = vrot.slane %v3442_v57, 4  ;;  %v3447_v58 = vrot.slane %v3445_v46, 5  ;;  %v3466_v15 = vshrl.u32 %v3228_v30, 16  ;;  %10807 = vst [vmem:[#allocation13_spill] sm:$0xff] %v8732_v39 }
 0x100   : > { %v3469_v19 = vshll.u32 %v3228_v30, 16  ;;  %v10806_v18 = vcombine.low %v8447_v51, %v8456_v25  ;;  %v8729_v62 = vrot.slane %v3451_v0, 5  ;;  %v3457_v11 = vrot.slane %v3455_v55, 4  ;;  %v7570_v51 = vld [vmem:[#allocation2 + $0x30] sm:$0xff]  }
 0x101   : > { %v3475_v1 = vshll.u32 %v8699_v20, 16  ;;  %v3424_v53 = vor.u32 %v3423_v63, %v3420_v31  ;;  %v3437_v57 = vshll.u32 %v8695_v28, 16  ;;  %v3479_v46 = vshrl.u32 %v8699_v20, 16 }
 0x102   : > { %v3434_v25 = vor.u32 %v3433_v48, %v8712_v38  ;;  %v3493_v30 = vshll.u32 %v3231_v61, 16  ;;  %v3448_v0 = vor.u32 %v3447_v58, %v3444_v16  ;;  %v3468_v55 = vrot.slane %v3466_v15, 4  ;;  %v8746_v48 = vld [vmem:[#allocation2 + $0x80] sm:$0x1]  ;;  %v8749_v15 = vld [vmem:[#allocation2 + $0x8c] sm:$0x1] }
 0x103   : > { %7329 = vmatmul.mubr.msk.bf16.vlgmr.msra.gmra.mxu1 %vm1880_vm12, %v7568_v33  ;;  %7319 = vmatmul.mubr.msk.bf16.gmra.mxu0 %vm1880_vm12, %v10805_v54  ;;  %v3400_v33 = vor.u32 %v3399_v52, %v3396_v42  ;;  %v3461_v42 = vshll.u32 %v8703_v36, 16  ;;  %v3490_v52 = vshrl.u32 %v3231_v61, 16  ;;  %v3471_v54 = vrot.slane %v3469_v19, 5  ;;  %10808 = vst [vmem:[#allocation14_spill] sm:$0xff] %v8746_v48  ;;  %10809 = vst [vmem:[#allocation15_spill] sm:$0xff] %v8749_v15 }
 0x104   : > { %7395 = vmatpush3.bf16.msra.mxu1 %v8552_v5  ;;  %7322 = vmatprep.mubr.msk.bf16.mxu0 %vm1880_vm12, %v10806_v18  ;;  %v3410_v5 = vor.u32 %v3409_v37, %v8701_v24  ;;  %v3499_v37 = vshll.u32 %v8732_v39, 16  ;;  %v3458_v31 = vor.u32 %v3457_v11, %v8729_v62  ;;  %v8743_v63 = vrot.slane %v3475_v1, 5 }
 0x105   : > { %7332 = vmatprep.mubr.msk.bf16.mxu1 %vm1880_vm12, %v7569_v9  ;;  %7540 = vmatprep.subr.msk.bf16.mxu1 %vm1929_vm0, %v8717_v29  ;;  %v7571_v9 = vld [vmem:[#allocation2 + $0x3c] sm:$0xff]   ;;  %v3481_v18 = vrot.slane %v3479_v46, 4  ;;  %v3503_v35 = vshrl.u32 %v8732_v39, 16  ;;  %v3401_v20 = vrot.slane %v3400_v33, 4  ;;  %v3415_v28 = vrot.slane %v3413_v40, 5 }
 0x106   : > { %v3492_v36 = vrot.slane %v3490_v52, 4  ;;  %v3495_v59 = vrot.slane %v3493_v30, 5  ;;  %v3411_v16 = vrot.slane %v3410_v5, 4  ;;  %v3439_v58 = vrot.slane %v3437_v57, 5  ;;  %v3234_v52 = vld [vmem:[#allocation2 + $0x90] sm:$0xf] }
 0x107   : > { %v8751_v19 = vrot.slane %v3499_v37, 5  ;;  %v3505_v61 = vrot.slane %v3503_v35, 4  ;;  %v10810_v11 = vcombine.low %v8451_v14, %v8470_v2  ;;  %v3425_v40 = vrot.slane %v3424_v53, 4  ;;  %v8770_v30 = vld [vmem:[#allocation2 + $0x94] sm:$0xf] }
 0x108   : > { %v3435_v33 = vrot.slane %v3434_v25, 4  ;;  %v3449_v1 = vrot.slane %v3448_v0, 4  ;;  %v3472_v46 = vor.u32 %v3471_v54, %v3468_v55  ;;  %v3459_v5 = vrot.slane %v3458_v31, 4  ;;  %10811 = vst [vmem:[#allocation16_spill] sm:$0xff] %v8770_v30  ;;  %v7573_v54 = vld [vmem:[#allocation2 + $0x54] sm:$0xff]  }
 0x109   : > { %v3463_v57 = vrot.slane %v3461_v42, 5  ;;  %v3485_v35 = vshll.u32 %v8746_v48, 16  ;;  %v3392_v14 = vsel %vm7864_vm13, %v8710_v8, %v8677_v26  ;;  %v3406_v2 = vsel %vm7864_vm13, %v3401_v20, %v8701_v24  ;;  %v3237_v31 = vld [vmem:[#allocation2 + $0x9c] sm:$0xf] }
 0x10a   : > { %v3496_v53 = vor.u32 %v3495_v59, %v3492_v36  ;;  %v3509_v25 = vshll.u32 %v8749_v15, 16  ;;  %v3416_v42 = vsel %vm7864_vm13, %v3411_v16, %v3415_v28  ;;  %v3514_v0 = vshrl.u32 %v3234_v52, 16  ;;  %v8785_v36 = vld [vmem:[#allocation2 + $0x98] sm:$0x1] }
 0x10b   : > { %7333 = vmatmul.mubr.msk.bf16.gmra.mxu1 %vm1880_vm12, %v7570_v51  ;;  %7323 = vmatmul.mubr.msk.bf16.gmra.mxu0 %vm1880_vm12, %v10810_v11  ;;  %v3482_v51 = vor.u32 %v3481_v18, %v8743_v63  ;;  %v3517_v55 = vshll.u32 %v3234_v52, 16  ;;  %v3430_v26 = vsel %vm7864_vm13, %v3425_v40, %v8712_v38  ;;  %v3440_v59 = vsel %vm7864_vm13, %v3435_v33, %v3439_v58  ;;  %v8807_v11 = vld [vmem:[#allocation2 + $0xa0] sm:$0xf]  ;;  %v3240_v40 = vld [vmem:[#allocation2 + $0xa8] sm:$0xf] }
 0x10c   : > { %7336 = vmatprep.mubr.msk.bf16.mxu1 %vm1880_vm12, %v7571_v9  ;;  %7362 = vmatprep.mubr.msk.bf16.mxu0 %vm1880_vm12, %v8653_v45  ;;  %v7572_v45 = vld [vmem:[#allocation2 + $0x48] sm:$0xff]   ;;  %v3506_v9 = vor.u32 %v3505_v61, %v8751_v19  ;;  %v3454_v20 = vsel %vm7864_vm13, %v3449_v1, %v8729_v62  ;;  %v8783_v24 = vrot.slane %v3472_v46, 4  ;;  %10812 = vst [vmem:[#allocation17_spill] sm:$0xff] %v8785_v36  ;;  %v8791_v37 = vrot.slane %v3485_v35, 5  ;;  %v497_v35 = vld [vmem:[#allocation2 + $0xc0] sm:$0x1] }
 0x10d   : > { %v3464_v28 = vsel %vm7864_vm13, %v3459_v5, %v3463_v57  ;;  %v8789_v8 = vrot.slane %v3482_v51, 4  ;;  %v3523_v38 = vshll.u32 %v8770_v30, 16  ;;  %v10813_v18 = vsel %vm7864_vm13, %v8687_v27, %v8655_v60  ;;  %10814 = vst [vmem:[#allocation18_spill] sm:$0xff] %v8807_v11  ;;  %v8816_v60 = vld [vmem:[%s10733_s3 + $0x20] sm:$0xf] }
 0x10e   : > { %v8799_v62 = vcombine.low %v10813_v18, %v3392_v14  ;;  %v8801_v16 = vcombine.low %v3406_v2, %v3416_v42  ;;  %v8803_v58 = vrot.slane %v3496_v53, 4  ;;  %v8805_v61 = vrot.slane %v3509_v25, 5  ;;  %v8839_v25 = vld [vmem:[#allocation2 + $0xac] sm:$0xf] }
 0x10f   : > { %v8810_v33 = vrot.slane %v3506_v9, 4  ;;  %v3516_v1 = vrot.slane %v3514_v0, 4  ;;  %v3519_v46 = vrot.slane %v3517_v55, 5  ;;  %v3527_v52 = vshrl.u32 %v8770_v30, 16  ;;  %10815 = vst [vmem:[#allocation19_spill] sm:$0xff] %v8839_v25  ;;  %v7070_v0 = vld [vmem:[%s7747_s14 + $0x78] sm:$0xff]  }
 0x110   : > { %v8821_v27 = vcombine.low %v3430_v26, %v3440_v59  ;;  %v8823_v5 = vcombine.low %v3454_v20, %v3464_v28  ;;  %v3533_v51 = vshll.u32 %v8785_v36, 16  ;;  %v8837_v14 = vrot.slane %v3523_v38, 5  ;;  %v7575_v20 = vld [vmem:[#allocation2 + $0x6c] sm:$0xff]   ;;  %v3243_v36 = vld [vmem:[#allocation2 + $0xb4] sm:$0xf] }
 0x111   : > { %v3538_v2 = vshrl.u32 %v3237_v31, 16  ;;  %v3541_v53 = vshll.u32 %v3237_v31, 16  ;;  %v3551_v42 = vshrl.u32 %v8807_v11, 16  ;;  %v3562_v9 = vshrl.u32 %v3240_v40, 16 }
 0x112   : > { %v3520_v26 = vor.u32 %v3519_v46, %v3516_v1  ;;  %v3529_v59 = vrot.slane %v3527_v52, 4  ;;  %v8854_v28 = vrot.slane %v3533_v51, 5  ;;  %v3571_v38 = vshll.u32 %v8839_v25, 16  ;;  %v8862_v51 = vld [vmem:[#allocation2 + $0xb8] sm:$0xf] }
 0x113   : > { %7337 = vmatmul.mubr.msk.bf16.gmra.mxu1 %vm1880_vm12, %v7572_v45  ;;  %7363 = vmatmul.mubr.msk.bf16.vlgmr.msra.gmra.mxu0 %vm1880_vm12, %v8662_v41  ;;  %v3547_v45 = vshll.u32 %v8807_v11, 16  ;;  %v3575_v31 = vshrl.u32 %v8839_v25, 16  ;;  %v498_v18 = vsel %vm7727_vm3, 0, %v497_v35  ;;  %v3543_v57 = vrot.slane %v3541_v53, 5  ;;  %10816 = vst [vmem:[#allocation20_spill] sm:$0xff] %v8862_v51 }
 0x114   : > { %7340 = vmatprep.mubr.msk.bf16.mxu1 %vm1880_vm12, %v7573_v54  ;;  %7429 = vmatpush3.bf16.msra.mxu0 %v8589_v10  ;;  %v3565_v10 = vshll.u32 %v3240_v40, 16  ;;  %v3540_v40 = vrot.slane %v3538_v2, 4  ;;  %499 = vst [vmem:[#allocation2 + $0xc0] sm:$0x1] %v498_v18  ;;  %v7046_v55 = vunpack.c.l.bf16 %v7070_v0  ;;  %v7047_v41 = vunpack.c.h.bf16 %v7070_v0  ;;  %v8868_v35 = vld [vmem:[#allocation2 + $0xa4] sm:$0x1] }
 0x115   : > { %7366 = vmatprep.mubr.msk.bf16.mxu0 %vm1880_vm12, %v8664_v56  ;;  %7541 = vmatprep.subr.msk.bf16.mxu0 %vm1929_vm0, %v8816_v60  ;;  %v7574_v56 = vld [vmem:[#allocation2 + $0x60] sm:$0xff]   ;;  %v8860_v11 = vrot.slane %v3547_v45, 5  ;;  %v3553_v1 = vrot.slane %v3551_v42, 4  ;;  %v3564_v46 = vrot.slane %v3562_v9, 4  ;;  %v8865_v54 = vrot.slane %v3520_v26, 4  ;;  %10817 = vst [vmem:[#allocation21_spill] sm:$0xff] %v8868_v35 }
 0x116   : > { %v3567_v52 = vrot.slane %v3565_v10, 5  ;;  %v3530_v25 = vor.u32 %v3529_v59, %v8837_v14  ;;  %v7628_v2 = vld [vmem:[%s10734_s4] ss:$0 sm:$0xff]  ;;  %v8876_v42 = vld [vmem:[#allocation2 + $0xb0] sm:$0x1]  ;;  %v8878_v9 = vrot.slane %v3571_v38, 5  ;;  %v3544_v18 = vor.u32 %v3543_v57, %v3540_v40 }
 0x117   : > { %v660_v53 = vmul.f32 %v7628_v2, %v7046_v55  ;;  %v661_v45 = vmul.f32 %v7628_v2, %v7047_v41  ;;  %10818 = vst [vmem:[#allocation22_spill] sm:$0xff] %v8876_v42  ;;  %v3577_v10 = vrot.slane %v3575_v31, 4  ;;  %v3586_v0 = vshrl.u32 %v3243_v36, 16  ;;  %v7629_v55 = vld [vmem:[%s10735_s5] ss:$0 sm:$0xff]  ;;  %v7576_v2 = vld [vmem:[#allocation2 + $0x78] sm:$0xff]  }
 0x118   : > { %v3599_v59 = vshrl.u32 %v8862_v51, 16  ;;  %v3554_v38 = vor.u32 %v3553_v1, %v8860_v11  ;;  %v3557_v31 = vshll.u32 %v8868_v35, 16  ;;  %v8889_v15 = vrot.slane %v3530_v25, 4 }
 0x119   : > { %v699_v41 = vadd.f32 %v7629_v55, %v660_v53  ;;  %v700_v26 = vadd.f32 %v7629_v55, %v661_v45  ;;  %v7577_v53 = vld [vmem:[#allocation2 + $0x84] sm:$0xff]   ;;  %v3578_v45 = vor.u32 %v3577_v10, %v8878_v9  ;;  %v3588_v55 = vrot.slane %v3586_v0, 4 }
 0x11a   : > { %v3601_v25 = vrot.slane %v3599_v59, 4 }
 0x11b   : > { %7341 = vmatmul.mubr.msk.bf16.gmra.mxu1 %vm1880_vm12, %v7574_v56  ;;  %7367 = vmatmul.mubr.msk.bf16.gmra.mxu0 %vm1880_vm12, %v8672_v50  ;;  %v3589_v56 = vshll.u32 %v3243_v36, 16  ;;  %v3595_v50 = vshll.u32 %v8862_v51, 16  ;;  %v3568_v36 = vor.u32 %v3567_v52, %v3564_v46  ;;  %v731_v48 = vmax.f32 %v699_v41, 0.0  ;;  %v8895_v51 = vld [vmem:[#allocation2 + $0xbc] sm:$0x1] }
 0x11c   : > { %7344 = vmatprep.mubr.msk.bf16.mxu1 %vm1880_vm12, %v7575_v20  ;;  %7370 = vmatprep.mubr.msk.bf16.mxu0 %vm1880_vm12, %v8692_v47  ;;  %v553_v20 = vld [vmem:[#allocation2 + $0xc8] sm:$0x1]  ;;  %v3581_v47 = vshll.u32 %v8876_v42, 16  ;;  %v732_v30 = vmax.f32 %v700_v26, 0.0  ;;  %v3545_v52 = vrot.slane %v3544_v18, 4  ;;  %v3555_v42 = vrot.slane %v3554_v38, 4 }
 0x11d   : > { %v3591_v39 = vrot.slane %v3589_v56, 5  ;;  %v554_v57 = vsel %vm7735_vm5, 0, %v553_v20  ;;  %v6946_v40 = vpack.c.bf16 %v731_v48, %v731_v48  ;;  %v8897_v46 = vrot.slane %v3595_v50, 5 }
 0x11e   : > { %v6947_v1 = vpack.c.bf16 %v732_v30, %v732_v30  ;;  %555 = vst [vmem:[#allocation2 + $0xc8] sm:$0x1] %v554_v57  ;;  %v3559_v41 = vrot.slane %v3557_v31, 5  ;;  %v3569_v26 = vrot.slane %v3568_v36, 4  ;;  %v3579_v48 = vrot.slane %v3578_v45, 4  ;;  %v7579_v57 = vld [vmem:[#allocation2 + $0x9c] sm:$0xff]  }
 0x11f   : > { %v1087_v10 = vshrl.u32 %v6946_v40, 16  ;;  %v1090_v0 = vshll.u32 %v6946_v40, 16  ;;  %v3583_v30 = vrot.slane %v3581_v47, 5  ;;  %v3592_v50 = vor.u32 %v3591_v39, %v3588_v55  ;;  %v1260_v36 = vld [vmem:[#allocation2 + $0xc0] sm:$0xf] }
 0x120   : > { %v1095_v56 = vshrl.u32 %v6947_v1, 16  ;;  %v1098_v35 = vshll.u32 %v6947_v1, 16  ;;  %v3605_v59 = vshll.u32 %v8895_v51, 16  ;;  %v3526_v20 = vsel %vm7864_vm13, %v8865_v54, %v8837_v14  ;;  %v7578_v14 = vld [vmem:[#allocation2 + $0x90] sm:$0xff]   ;;  %v3927_v55 = vld [vmem:[#allocation2 + $0xc] sm:$0xe] }
 0x121   : > { %v1089_v18 = vrot.slane %v1087_v10, 7  ;;  %v3602_v31 = vor.u32 %v3601_v25, %v8897_v46  ;;  %v3550_v39 = vsel %vm7864_vm13, %v3545_v52, %v8860_v11  ;;  %v3584_v11 = vsel %vm7864_vm13, %v3579_v48, %v3583_v30  ;;  %v3928_v52 = vld [vmem:[#allocation2 + $0x18] sm:$0xe] }
 0x122   : > { %v1097_v38 = vrot.slane %v1095_v56, 7  ;;  %v3607_v40 = vrot.slane %v3605_v59, 5  ;;  %v10820_v10 = vsel %vm7864_vm13, %v8789_v8, %v8791_v37  ;;  %v10822_v48 = vsel %vm7864_vm13, %v8810_v33, %v8805_v61  ;;  %v10824_v37 = vld [vmem:[#allocation4_spill] sm:$0xff]  ;;  %v10825_v33 = vld [vmem:[#allocation6_spill] sm:$0xff] }
 0x123   : > { %7345 = vmatmul.mubr.msk.bf16.gmra.mxu1 %vm1880_vm12, %v7576_v2  ;;  %7371 = vmatmul.mubr.msk.bf16.gmra.mxu0 %vm1880_vm12, %v8799_v62  ;;  %v3536_v62 = vsel %vm7864_vm13, %v8889_v15, %v8854_v28  ;;  %v3993_v2 = vrot.slane %v8494_v4, 5  ;;  %v1092_v54 = vor.u32 %v1090_v0, %v1089_v18  ;;  %v1093_v47 = vrot.slane %v1089_v18, 4  ;;  %v3929_v61 = vld [vmem:[#allocation2 + $0x24] sm:$0xe] }
 0x124   : > { %7348 = vmatprep.mubr.msk.bf16.mxu1 %vm1880_vm12, %v7577_v53  ;;  %7374 = vmatprep.mubr.msk.bf16.mxu0 %vm1880_vm12, %v8801_v16  ;;  %v3560_v16 = vsel %vm7864_vm13, %v3555_v42, %v3559_v41  ;;  %v1100_v53 = vor.u32 %v1098_v35, %v1097_v38  ;;  %v1102_v45 = vrot.slane %v1097_v38, 4  ;;  %v3574_v15 = vsel %vm7864_vm13, %v3569_v26, %v8878_v9  ;;  %v10819_v41 = vld [vmem:[#allocation5_spill] sm:$0xff] }
 0x125   : > { %v3593_v28 = vrot.slane %v3592_v50, 4  ;;  %v1264_v42 = vld [vmem:[#allocation2 + $0xc8] sm:$0x1]  ;;  %v1261_v1 = vsel %vm7812_vm8, %v1092_v54, %v1260_v36  ;;  %v3603_v35 = vrot.slane %v3602_v31, 4  ;;  %v6714_v9 = vrot.slane %v3927_v55, 9  ;;  %v10826_v31 = vld [vmem:[#allocation7_spill] sm:$0xff] }
 0x126   : > { %v1101_v4 = vsel %vm7818_vm9, %v1093_v47, %v1100_v53  ;;  %v1265_v25 = vsel %vm7727_vm3, %v1102_v45, %v1264_v42  ;;  %1262 = vst [vmem:[#allocation2 + $0xc0] sm:$0xf] %v1261_v1  ;;  %v4000_v26 = vrot.slane %v10819_v41, 5  ;;  %v10821_v0 = vsel %vm7864_vm13, %v8783_v24, %v8743_v63  ;;  %v10828_v54 = vld [vmem:[#allocation8_spill] sm:$0xff]  ;;  %v7580_v53 = vld [vmem:[#allocation2 + $0xa8] sm:$0xff]   ;;  %v7581_v45 = vld [vmem:[#allocation2 + $0xb4] sm:$0xff]  }
 0x127   : > { %1263 = vst.msk [vmem:[#allocation2 + $0xc4] sm:$0xf] %vm1152_vm6, %v1101_v4  ;;  %1266 = vst [vmem:[#allocation2 + $0xc8] sm:$0x1] %v1265_v25  ;;  %v6691_v56 = vcombine.low %v10821_v0, %v10820_v10  ;;  %v10823_v30 = vsel %vm7864_vm13, %v8803_v58, %v8751_v19  ;;  %v3995_v8 = vrot.slane %v3993_v2, 4  ;;  %v3996_v59 = vrot.slane %v10824_v37, 5 }
 0x128   : > { %v6692_v50 = vcombine.low %v10823_v30, %v10822_v48  ;;  %v8958_v63 = vcombine.low %v3526_v20, %v3536_v62  ;;  %v8961_v24 = vcombine.low %v3550_v39, %v3560_v16  ;;  %v8963_v18 = vcombine.low %v3574_v15, %v3584_v11  ;;  %v3930_v20 = vld [vmem:[#allocation2 + $0x30] sm:$0xe]  ;;  %v3931_v39 = vld [vmem:[#allocation2 + $0x3c] sm:$0xe]  ;;  %v3932_v42 = vld [vmem:[#allocation2 + $0x48] sm:$0xe] }
 0x129   : > { %v4007_v38 = vrot.slane %v10825_v33, 5  ;;  %v3598_v19 = vsel %vm7864_vm13, %v3593_v28, %v8897_v46  ;;  %v3608_v58 = vsel %vm7864_vm13, %v3603_v35, %v3607_v40  ;;  %v4014_v62 = vrot.slane %v10826_v31, 5 }
 0x12a   : > { %v8976_v36 = vsel %vm8243_vm2, %v6714_v9, %v3993_v2  ;;  %v4003_v47 = vrot.slane %v10828_v54, 5  ;;  %v8982_v46 = vsel %vm8243_vm2, %v3995_v8, %v3996_v59  ;;  %v8986_v55 = vsel %vm1929_vm0, %v8717_v29, 0  ;;  %v3933_v8 = vld [vmem:[#allocation2 + $0x54] sm:$0xe] }
 0x12b   : > { %7349 = vmatmul.mubr.msk.bf16.gmra.mxu1 %vm1880_vm12, %v7578_v14  ;;  %7375 = vmatmul.mubr.msk.bf16.gmra.mxu0 %vm1880_vm12, %v8821_v27  ;;  %v6715_v27 = vrot.slane %v3928_v52, 9  ;;  %v4002_v14 = vrot.slane %v4000_v26, 4  ;;  %v4010_v15 = vrot.slane %v8578_v23, 5  ;;  %v4009_v2 = vrot.slane %v4007_v38, 4 }
 0x12c   : > { %7352 = vmatprep.mubr.msk.bf16.mxu1 %vm1880_vm12, %v7579_v57  ;;  %7378 = vmatprep.mubr.msk.bf16.mxu0 %vm1880_vm12, %v8823_v5  ;;  %v4021_v5 = vrot.slane %v8565_v7, 5  ;;  %v6716_v57 = vrot.slane %v3929_v61, 9  ;;  %v6717_v11 = vrot.slane %v3930_v20, 9  ;;  %v4017_v28 = vrot.slane %v8581_v49, 5 }
 0x12d   : > { %v6718_v40 = vrot.slane %v3931_v39, 9  ;;  %v8990_v7 = vcombine.low %v3598_v19, %v3608_v58  ;;  %v8994_v4 = vsel %vm8243_vm2, %v6715_v27, %v4000_v26  ;;  %v4016_v1 = vrot.slane %v4014_v62, 4  ;;  %v3246_v29 = vld [vmem:[#allocation2 + $0xc0] sm:$0xf] }
 0x12e   : > { %v4024_v35 = vrot.slane %v8603_v34, 5  ;;  %v8997_v25 = vld [vmem:[#allocation2 + $0xc4] sm:$0xf]  ;;  %v6731_v23 = vcombine.low %v8976_v36, %v8982_v46  ;;  %v9003_v49 = vsel %vm8243_vm2, %v4002_v14, %v4003_v47  ;;  %v4023_v9 = vrot.slane %v4021_v5, 4 }
 0x12f   : > { %v4028_v52 = vrot.slane %v8613_v21, 5  ;;  %v3610_v41 = vshrl.u32 %v3246_v29, 16  ;;  %v3613_v26 = vshll.u32 %v3246_v29, 16  ;;  %v3619_v34 = vshll.u32 %v8997_v25, 16  ;;  %v7582_v58 = vld [vmem:[#allocation2 + $0xc0] sm:$0xff]   ;;  %v10830_v29 = vld [vmem:[#allocation10_spill] sm:$0xff] }
 0x130   : > { %v3623_v10 = vshrl.u32 %v8997_v25, 16  ;;  %v9013_v0 = vsel %vm1929_vm0, %v8816_v60, 0  ;;  %v9017_v21 = vsel %vm8243_vm2, %v6716_v57, %v4007_v38  ;;  %v9021_v48 = vsel %vm8243_vm2, %v4009_v2, %v4010_v15  ;;  %v9031_v60 = vld [vmem:[#allocation2 + $0xc8] sm:$0x1] }
 0x131   : > { %v6719_v30 = vrot.slane %v3932_v42, 9  ;;  %v3612_v37 = vrot.slane %v3610_v41, 4  ;;  %v9024_v59 = vrot.slane %v3619_v34, 5  ;;  %v6732_v33 = vcombine.low %v8994_v4, %v9003_v49  ;;  %v10831_v41 = vld [vmem:[#allocation11_spill] sm:$0xff] }
 0x132   : > { %v3625_v61 = vrot.slane %v3623_v10, 4  ;;  %v9037_v38 = vsel %vm8243_vm2, %v6717_v11, %v4014_v62  ;;  %v9045_v19 = vsel %vm8243_vm2, %v6718_v40, %v4021_v5  ;;  %v9049_v27 = vsel %vm8243_vm2, %v4023_v9, %v4024_v35  ;;  %v3934_v62 = vld [vmem:[#allocation2 + $0x60] sm:$0xe]  ;;  %v3935_v40 = vld [vmem:[#allocation2 + $0x6c] sm:$0xe] }
 0x133   : > { %7353 = vmatmul.mubr.msk.bf16.gmra.mxu1 %vm1880_vm12, %v7580_v53  ;;  %7379 = vmatmul.mubr.msk.bf16.gmra.mxu0 %vm1880_vm12, %v6691_v56  ;;  %v3615_v56 = vrot.slane %v3613_v26, 5  ;;  %v4030_v20 = vrot.slane %v4028_v52, 4  ;;  %v4031_v31 = vrot.slane %v8621_v12, 5  ;;  %v4035_v39 = vrot.slane %v8647_v43, 5  ;;  %v9056_v5 = vld [vmem:[%s423_s22] sm:$0xff]  }
 0x134   : > { %7356 = vmatprep.mubr.msk.bf16.mxu1 %vm1880_vm12, %v7581_v45  ;;  %7382 = vmatprep.mubr.msk.bf16.mxu0 %vm1880_vm12, %v6692_v50  ;;  %v9041_v50 = vsel %vm8243_vm2, %v4016_v1, %v4017_v28  ;;  %v6733_v14 = vcombine.low %v9017_v21, %v9021_v48  ;;  %v6720_v54 = vrot.slane %v3933_v8, 9  ;;  %v4042_v47 = vrot.slane %v8666_v32, 5  ;;  %v10829_v32 = vld [vmem:[#allocation9_spill] sm:$0xff] }
 0x135   : > { %v3616_v36 = vor.u32 %v3615_v56, %v3612_v37  ;;  %v3626_v53 = vor.u32 %v3625_v61, %v9024_v59  ;;  %v3629_v45 = vshll.u32 %v9031_v60, 16  ;;  %v6734_v46 = vcombine.low %v9037_v38, %v9041_v50  ;;  %v10832_v8 = vld [vmem:[#allocation13_spill] sm:$0xff]  ;;  %v10833_v61 = vld [vmem:[#allocation12_spill] sm:$0xff] }
 0x136   : > { %v9064_v12 = vsel %vm8243_vm2, %v6719_v30, %v4028_v52  ;;  %v6735_v43 = vcombine.low %v9045_v19, %v9049_v27  ;;  %v4038_v57 = vrot.slane %v8684_v22, 5  ;;  %v6721_v15 = vrot.slane %v3934_v62, 9  ;;  %v3936_v52 = vld [vmem:[#allocation2 + $0x78] sm:$0xe]  ;;  %v10834_v62 = vld [vmem:[#allocation16_spill] sm:$0xff] }
 0x137   : > { %v4049_v2 = vrot.slane %v10829_v32, 5  ;;  %v9073_v11 = vsel %vm8243_vm2, %v4030_v20, %v4031_v31  ;;  %v4037_v28 = vrot.slane %v4035_v39, 4  ;;  %v7054_v42 = vunpack.c.l.bf16 %v9056_v5  ;;  %v3937_v20 = vld [vmem:[#allocation2 + $0x84] sm:$0xe]  ;;  %v10835_v32 = vld [vmem:[#allocation14_spill] sm:$0xff] }
 0x138   : > { %v7055_v1 = vunpack.c.h.bf16 %v9056_v5  ;;  %v3617_v35 = vrot.slane %v3616_v36, 4  ;;  %v4044_v22 = vrot.slane %v4042_v47, 4  ;;  %v4045_v9 = vrot.slane %v10830_v29, 5  ;;  %v10836_v29 = vld [vmem:[#allocation15_spill] sm:$0xff] }
 0x139   : > { %v4056_v26 = vrot.slane %v10831_v41, 5  ;;  %v3627_v34 = vrot.slane %v3626_v53, 4  ;;  %v3631_v10 = vrot.slane %v3629_v45, 5  ;;  %v9086_v30 = vsel %vm8243_vm2, %v6720_v54, %v4035_v39  ;;  %v3939_v41 = vld [vmem:[#allocation2 + $0x9c] sm:$0xe] }
 0x13a   : > { %v6722_v37 = vrot.slane %v3935_v40, 9  ;;  %v4051_v56 = vrot.slane %v4049_v2, 4  ;;  %v9094_v31 = vsel %vm8243_vm2, %v4037_v28, %v4038_v57  ;;  %v6723_v39 = vrot.slane %v3936_v52, 9  ;;  %v3938_v57 = vld [vmem:[#allocation2 + $0x90] sm:$0xe] }
 0x13b   : > { %7357 = vmatmul.mubr.msk.bf16.gmra.mxu1 %vm1880_vm12, %v7582_v58  ;;  %7383 = vmatmul.mubr.msk.bf16.gmra.mxu0 %vm1880_vm12, %v8958_v63  ;;  %v4063_v63 = vrot.slane %v10832_v8, 5  ;;  %v4052_v58 = vrot.slane %v10833_v61, 5  ;;  %v4070_v36 = vrot.slane %v10834_v62, 5  ;;  %v3622_v54 = vsel %vm7864_vm13, %v3617_v35, %v9024_v59  ;;  %v3940_v61 = vld [vmem:[#allocation2 + $0xa8] sm:$0xe] }
 0x13c   : > { %7396 = vmatprep.mubr.msk.bf16.mxu1 %vm1880_vm12, %v6731_v23  ;;  %7386 = vmatprep.mubr.msk.bf16.mxu0 %vm1880_vm12, %v8961_v24  ;;  %v6736_v23 = vcombine.low %v9064_v12, %v9073_v11  ;;  %v9098_v24 = vsel %vm8243_vm2, %v6721_v15, %v4042_v47  ;;  %v9106_v53 = vsel %vm8243_vm2, %v4044_v22, %v4045_v9  ;;  %v4058_v45 = vrot.slane %v4056_v26, 4  ;;  %v10837_v22 = vld [vmem:[#allocation18_spill] sm:$0xff] }
 0x13d   : > { %v4059_v40 = vrot.slane %v10835_v32, 5  ;;  %v3632_v28 = vsel %vm7864_vm13, %v3627_v34, %v3631_v10  ;;  %v6724_v47 = vrot.slane %v3937_v20, 9  ;;  %v4065_v15 = vrot.slane %v4063_v63, 4  ;;  %v500_v34 = vld [vmem:[#allocation2 + $0xcc] sm:$0x1] }
 0x13e   : > { %v4066_v52 = vrot.slane %v10836_v29, 5  ;;  %v6737_v8 = vcombine.low %v9086_v30, %v9094_v31  ;;  %v9116_v59 = vsel %vm8243_vm2, %v6722_v37, %v4049_v2  ;;  %v9120_v35 = vsel %vm8243_vm2, %v4051_v56, %v4052_v58  ;;  %v10838_v2 = vld [vmem:[#allocation17_spill] sm:$0xff]  ;;  %v556_v32 = vld [vmem:[#allocation2 + $0xd4] sm:$0x1]  ;;  %v10840_v29 = vld [vmem:[#allocation19_spill] sm:$0xff] }
 0x13f   : > { %v4077_v9 = vrot.slane %v10837_v22, 5  ;;  %v6725_v20 = vrot.slane %v3938_v57, 9  ;;  %v4072_v62 = vrot.slane %v4070_v36, 4  ;;  %v4073_v37 = vrot.slane %v10838_v2, 5  ;;  %v9191_v22 = vld [vmem:[#allocation2 + $0x1c] sm:$0xf] }
 0x140   : > { %v6697_v56 = vcombine.low %v3622_v54, %v3632_v28  ;;  %v9135_v58 = vsel %vm8243_vm2, %v6723_v39, %v4056_v26  ;;  %v9139_v4 = vsel %vm8243_vm2, %v4058_v45, %v4059_v40  ;;  %v6726_v49 = vrot.slane %v3939_v41, 9  ;;  %v10839_v39 = vld [vmem:[#allocation21_spill] sm:$0xff]  ;;  %v4756_v41 = vld [vmem:[#allocation2 + $0x18] sm:$0xf] }
 0x141   : > { %v9158_v26 = vsel %vm8243_vm2, %v4065_v15, %v4066_v52  ;;  %v4080_v54 = vrot.slane %v10839_v39, 5  ;;  %v4079_v21 = vrot.slane %v4077_v9, 4  ;;  %v6727_v48 = vrot.slane %v3940_v61, 9  ;;  %v7583_v61 = vld [vmem:[#allocation2 + $0x18] sm:$0xff]   ;;  %v9212_v39 = vpop.f32.mrf.mxu1 }
 0x142   : > { %v501_v45 = vsel %vm7727_vm3, 0, %v500_v34  ;;  %v9174_v57 = vsel %vm8243_vm2, %v6725_v20, %v4070_v36  ;;  %v9178_v28 = vsel %vm8243_vm2, %v4072_v62, %v4073_v37  ;;  %v9186_v15 = vsel %vm8243_vm2, %v6726_v49, %v4077_v9  ;;  %v10841_v34 = vld [vmem:[#allocation22_spill] sm:$0xff]  ;;  %v10842_v62 = vld [vmem:[#allocation20_spill] sm:$0xff]  ;;  %10843 = vst [vmem:[#allocation5_spill] sm:$0xff] %v9212_v39 }
 0x143   : > { %7397 = vmatmul.mubr.msk.bf16.vlgmr.msra.gmra.mxu1 %vm1880_vm12, %v6732_v33  ;;  %7387 = vmatmul.mubr.msk.bf16.gmra.mxu0 %vm1880_vm12, %v8963_v18  ;;  %v6530_v33 = vld [vmem:[%s10734_s4] ss:$0 sm:$0xff]  ;;  %502 = vst [vmem:[#allocation2 + $0xcc] sm:$0x1] %v501_v45  ;;  %v4084_v52 = vrot.slane %v10840_v29, 5  ;;  %v4087_v20 = vrot.slane %v10841_v34, 5  ;;  %v9200_v49 = vsel %vm8243_vm2, %v4079_v21, %v4080_v54  ;;  %v9229_v34 = vpop.f32.mrf.mxu1  ;;  %v10848_v3 = vcombine.low %v9098_v24, %v9106_v53 }
 0x144   : > { %7463 = vmatpush3.bf16.msra.mxu1 %v8986_v55  ;;  %7390 = vmatprep.mubr.msk.bf16.mxu0 %vm1880_vm12, %v8990_v7  ;;  %v9154_v55 = vsel %vm8243_vm2, %v6724_v47, %v4063_v63  ;;  %v6531_v7 = vld [vmem:[%s10735_s5] ss:$0 sm:$0xff]  ;;  %v557_v63 = vsel %vm7735_vm5, 0, %v556_v32  ;;  %v1344_v47 = vmul.f32 %v7054_v42, %v6530_v33  ;;  %v1345_v36 = vmul.f32 %v7055_v1, %v6530_v33  ;;  %v4759_v32 = vld [vmem:[#allocation2 + $0x24] sm:$0xf] }
 0x145   : > { %7400 = vmatprep.mubr.msk.bf16.mxu1 %vm1880_vm12, %v6733_v14  ;;  %v9164_v14 = vld [vmem:[#allocation2 + $0xb4] sm:$0xe]  ;;  %558 = vst [vmem:[#allocation2 + $0xd4] sm:$0x1] %v557_v63  ;;  %v4091_v2 = vrot.slane %v10842_v62, 5  ;;  %v9204_v5 = vsel %vm8243_vm2, %v6727_v48, %v4084_v52  ;;  %v4805_v63 = vshrl.u32 %v4756_v41, 16 }
 0x146   : > { %v1353_v37 = vadd.f32 %v6531_v7, %v1344_v47  ;;  %v1354_v1 = vadd.f32 %v6531_v7, %v1345_v36  ;;  %v9206_v33 = vld [vmem:[#allocation2 + $0x28] sm:$0xf]  ;;  %v4808_v47 = vshll.u32 %v4756_v41, 16  ;;  %v4814_v54 = vshll.u32 %v9191_v22, 16  ;;  %10844 = vst [vmem:[#allocation4_spill] sm:$0xff] %v9229_v34 }
 0x147   : > { %v4818_v21 = vshrl.u32 %v9191_v22, 16  ;;  %v4829_v38 = vshrl.u32 %v4759_v32, 16  ;;  %v4832_v50 = vshll.u32 %v4759_v32, 16  ;;  %v4838_v29 = vshll.u32 %v9206_v33, 16  ;;  %v7584_v41 = vld [vmem:[#allocation2 + $0x24] sm:$0xff]  }
 0x148   : > { %v1355_v45 = vmax.f32 %v1353_v37, 0.0  ;;  %v1356_v7 = vmax.f32 %v1354_v1, 0.0  ;;  %v4842_v36 = vshrl.u32 %v9206_v33, 16  ;;  %v4093_v19 = vrot.slane %v4091_v2, 4  ;;  %v7585_v1 = vld [vmem:[#allocation2 + $0x30] sm:$0xff]  }
 0x149   : > { %v4098_v27 = vrot.slane %v8997_v25, 5  ;;  %v9231_v32 = vrot.slane %v4814_v54, 5  ;;  %v4820_v6 = vrot.slane %v4818_v21, 4  ;;  %v4831_v40 = vrot.slane %v4829_v38, 4  ;;  %v9233_v42 = vld [vmem:[#allocation2 + $0x20] sm:$0x1]  ;;  %v9246_v21 = vpop.f32.mrf.mxu1 }
 0x14a   : > { %v1358_v48 = vmul.f32 0.0, %v1355_v45  ;;  %v3942_v45 = vld [vmem:[#allocation2 + $0xc0] sm:$0xe]  ;;  %v9235_v25 = vrot.slane %v4838_v29, 5  ;;  %10845 = vst [vmem:[#allocation6_spill] sm:$0xff] %v9246_v21  ;;  %v4101_v29 = vrot.slane %v9031_v60, 5 }
 0x14b   : > { %7401 = vmatmul.mubr.msk.bf16.gmra.mxu1 %vm1880_vm12, %v6734_v46  ;;  %7391 = vmatmul.mubr.msk.bf16.gmra.mxu0 %vm1880_vm12, %v6697_v56  ;;  %v4086_v46 = vrot.slane %v4084_v52, 4  ;;  %v4810_v52 = vrot.slane %v4808_v47, 5  ;;  %v4834_v56 = vrot.slane %v4832_v50, 5  ;;  %v6729_v38 = vrot.slane %v3942_v45, 9  ;;  %v7587_v45 = vld [vmem:[#allocation2 + $0x48] sm:$0xff]  }
 0x14c   : > { %7404 = vmatprep.mubr.msk.bf16.mxu1 %vm1880_vm12, %v6735_v43  ;;  %7430 = vmatprep.mubr.msk.bf16.mxu0 %vm1880_vm12, %v7583_v61  ;;  %v1359_v43 = vmul.f32 0.0, %v1356_v7  ;;  %v6950_v37 = vpack.c.bf16 %v1358_v48, %v1358_v48  ;;  %v4807_v61 = vrot.slane %v4805_v63, 4  ;;  %v4844_v7 = vrot.slane %v4842_v36, 4  ;;  %v5483_v53 = vld [vmem:[#allocation2 + $0x24] sm:$0xe] }
 0x14d   : > { %v9239_v48 = vsel %vm8243_vm2, %v4086_v46, %v4087_v20  ;;  %v4094_v63 = vrot.slane %v8895_v51, 5  ;;  %v4100_v50 = vrot.slane %v4098_v27, 4  ;;  %v1387_v20 = vld [vmem:[#allocation2 + $0xcc] sm:$0xf]  ;;  %v4821_v12 = vor.u32 %v4820_v6, %v9231_v32  ;;  %v1391_v46 = vld [vmem:[#allocation2 + $0xd4] sm:$0x1] }
 0x14e   : > { %v6951_v9 = vpack.c.bf16 %v1359_v43, %v1359_v43  ;;  %v1367_v18 = vshrl.u32 %v6950_v37, 16  ;;  %v1370_v10 = vshll.u32 %v6950_v37, 16  ;;  %v4824_v11 = vshll.u32 %v9233_v42, 16  ;;  %v9271_v37 = vpop.f32.mrf.mxu1 }
 0x14f   : > { %v4835_v43 = vor.u32 %v4834_v56, %v4831_v40  ;;  %v4845_v30 = vor.u32 %v4844_v7, %v9235_v25  ;;  %10847 = vst [vmem:[#allocation7_spill] sm:$0xff] %v9271_v37  ;;  %v9279_v40 = vsel %vm8243_vm2, %v6729_v38, %v4098_v27  ;;  %v4762_v56 = vld [vmem:[#allocation2 + $0x30] sm:$0xf]  ;;  %v4822_v7 = vrot.slane %v4821_v12, 4  ;;  %v5482_v38 = vld [vmem:[#allocation2 + $0x18] sm:$0xe] }
 0x150   : > { %v1375_v47 = vshrl.u32 %v6951_v9, 16  ;;  %v1378_v54 = vshll.u32 %v6951_v9, 16  ;;  %v1369_v36 = vrot.slane %v1367_v18, 7  ;;  %v4811_v9 = vor.u32 %v4810_v52, %v4807_v61  ;;  %v7586_v61 = vld [vmem:[#allocation2 + $0x3c] sm:$0xff]  }
 0x151   : > { %v9288_v52 = vsel %vm8243_vm2, %v4100_v50, %v4101_v29  ;;  %v4853_v50 = vshrl.u32 %v4762_v56, 16  ;;  %v4856_v29 = vshll.u32 %v4762_v56, 16  ;;  %v9304_v12 = vld [vmem:[#allocation2 + $0x40] sm:$0xf] }
 0x152   : > { %v1377_v51 = vrot.slane %v1375_v47, 7  ;;  %v1372_v60 = vor.u32 %v1370_v10, %v1369_v36  ;;  %v1373_v18 = vrot.slane %v1369_v36, 4  ;;  %v9275_v10 = vsel %vm8243_vm2, %v4093_v19, %v4094_v63 }
 0x153   : > { %7405 = vmatmul.mubr.msk.bf16.gmra.mxu1 %vm1880_vm12, %v6736_v23  ;;  %7431 = vmatmul.mubr.msk.bf16.vlgmr.msra.gmra.mxu0 %vm1880_vm12, %v7584_v41  ;;  %v9256_v23 = vld [vmem:[#allocation2 + $0x2c] sm:$0x1]  ;;  %v4826_v63 = vrot.slane %v4824_v11, 5  ;;  %v4836_v47 = vrot.slane %v4835_v43, 4  ;;  %v4877_v11 = vshrl.u32 %v4765_v13, 16  ;;  %v4855_v43 = vrot.slane %v4853_v50, 4 }
 0x154   : > { %7408 = vmatprep.mubr.msk.bf16.mxu1 %vm1880_vm12, %v6737_v8  ;;  %7497 = vmatpush3.bf16.msra.mxu0 %v9013_v0  ;;  %v10846_v8 = vrot.slane %v9164_v14, 9  ;;  %v1380_v0 = vor.u32 %v1378_v54, %v1377_v51  ;;  %v1382_v41 = vrot.slane %v1377_v51, 4  ;;  %v1388_v62 = vsel %vm7812_vm8, %v1372_v60, %v1387_v20  ;;  %v9301_v51 = vpop.f32.mrf.mxu1 }
 0x155   : > { %7434 = vmatprep.mubr.msk.bf16.mxu0 %vm1880_vm12, %v7585_v1  ;;  %v4848_v14 = vshll.u32 %v9256_v23, 16  ;;  %1389 = vst [vmem:[#allocation2 + $0xcc] sm:$0xf] %v1388_v62  ;;  %v4812_v1 = vrot.slane %v4811_v9, 4  ;;  %v4846_v54 = vrot.slane %v4845_v30, 4  ;;  %10849 = vst [vmem:[#allocation3_spill] sm:$0xff] %v9301_v51 }
 0x156   : > { %v9269_v6 = vsel %vm8243_vm2, %v10846_v8, %v4091_v2  ;;  %v9284_v2 = vld [vmem:[#allocation2 + $0x34] sm:$0xf]  ;;  %v1381_v19 = vsel %vm7818_vm9, %v1373_v18, %v1380_v0  ;;  %v1392_v27 = vsel %vm7727_vm3, %v1382_v41, %v1391_v46  ;;  %v5548_v9 = vrot.slane %v9191_v22, 5  ;;  %v9311_v46 = vpop.f32.mrf.mxu0 }
 0x157   : > { %1390 = vst.msk [vmem:[#allocation2 + $0xd0] sm:$0xf] %vm1152_vm6, %v1381_v19  ;;  %1393 = vst [vmem:[#allocation2 + $0xd4] sm:$0x1] %v1392_v27  ;;  %v4862_v17 = vshll.u32 %v9284_v2, 16  ;;  %v4866_v36 = vshrl.u32 %v9284_v2, 16  ;;  %v10850_v18 = vcombine.low %v9116_v59, %v9120_v35  ;;  %v4817_v24 = vsel %vm7864_vm13, %v4812_v1, %v9231_v32 }
 0x158   : > { %v4850_v20 = vrot.slane %v4848_v14, 5  ;;  %v4880_v60 = vshll.u32 %v4765_v13, 16  ;;  %v5555_v22 = vrot.slane %v9206_v33, 5  ;;  %v4858_v30 = vrot.slane %v4856_v29, 5  ;;  %v9320_v59 = vld [vmem:[#allocation2 + $0x38] sm:$0x1] }
 0x159   : > { %v4827_v8 = vsel %vm7864_vm13, %v4822_v7, %v4826_v63  ;;  %v6829_v0 = vrot.slane %v5482_v38, 9  ;;  %v9322_v35 = vrot.slane %v4862_v17, 5  ;;  %v4868_v41 = vrot.slane %v4866_v36, 4  ;;  %v9328_v33 = vld [vmem:[#allocation2 + $0x44] sm:$0x1]  ;;  %v9336_v7 = vpop.f32.mrf.mxu0 }
 0x15a   : > { %v4841_v32 = vsel %vm7864_vm13, %v4836_v47, %v9235_v25  ;;  %v5551_v62 = vrot.slane %v9233_v42, 5  ;;  %v4886_v14 = vshll.u32 %v9304_v12, 16  ;;  %v4890_v56 = vshrl.u32 %v9304_v12, 16  ;;  %v7589_v38 = vld [vmem:[#allocation2 + $0x60] sm:$0xff]  }
 0x15b   : > { %7409 = vmatmul.mubr.msk.bf16.gmra.mxu1 %vm1880_vm12, %v10848_v3  ;;  %7435 = vmatmul.mubr.msk.bf16.gmra.mxu0 %vm1880_vm12, %v7586_v61  ;;  %v9332_v61 = vpop.f32.mrf.mxu1  ;;  %v4851_v19 = vsel %vm7864_vm13, %v4846_v54, %v4850_v20  ;;  %v5550_v27 = vrot.slane %v5548_v9, 4  ;;  %v4879_v1 = vrot.slane %v4877_v11, 4  ;;  %v4882_v13 = vrot.slane %v4880_v60, 5  ;;  %v4768_v11 = vld [vmem:[#allocation2 + $0x48] sm:$0xf] }
 0x15c   : > { %7412 = vmatprep.mubr.msk.bf16.mxu1 %vm1880_vm12, %v10850_v18  ;;  %7438 = vmatprep.mubr.msk.bf16.mxu0 %vm1880_vm12, %v7587_v45  ;;  %10851 = vst [vmem:[#allocation8_spill] sm:$0xff] %v9332_v61  ;;  %v7588_v45 = vld [vmem:[#allocation2 + $0x54] sm:$0xff]   ;;  %v6830_v25 = vrot.slane %v5483_v53, 9  ;;  %v5557_v63 = vrot.slane %v5555_v22, 4  ;;  %v5558_v42 = vrot.slane %v9256_v23, 5  ;;  %v4859_v47 = vor.u32 %v4858_v30, %v4855_v43 }
 0x15d   : > { %v4869_v50 = vor.u32 %v4868_v41, %v9322_v35  ;;  %v4872_v29 = vshll.u32 %v9320_v59, 16  ;;  %v9341_v17 = vrot.slane %v4886_v14, 5  ;;  %v4892_v36 = vrot.slane %v4890_v56, 4  ;;  %v9357_v18 = vpop.f32.mrf.mxu1 }
 0x15e   : > { %v9347_v20 = vcombine.low %v4817_v24, %v4827_v8  ;;  %v9351_v23 = vsel %vm8243_vm2, %v6829_v0, %v5548_v9  ;;  %v10852_v60 = vcombine.low %v9135_v58, %v9139_v4  ;;  %10853 = vst [vmem:[#allocation9_spill] sm:$0xff] %v9357_v18  ;;  %v9359_v53 = vcombine.low %v4841_v32, %v4851_v19  ;;  %v9366_v8 = vld [vmem:[#allocation2 + $0x4c] sm:$0xf]  ;;  %v9369_v9 = vpop.f32.mrf.mxu0  ;;  %v5484_v32 = vld [vmem:[#allocation2 + $0x30] sm:$0xe]  ;;  %v7591_v19 = vld [vmem:[#allocation2 + $0x78] sm:$0xff]  }
 0x15f   : > { %v9363_v43 = vsel %vm8243_vm2, %v5550_v27, %v5551_v62  ;;  %v4883_v24 = vor.u32 %v4882_v13, %v4879_v1  ;;  %v4896_v30 = vshll.u32 %v9328_v33, 16  ;;  %v10854_v58 = vcombine.low %v9154_v55, %v9158_v26 }
 0x160   : > { %v9377_v4 = vsel %vm8243_vm2, %v6830_v25, %v5555_v22  ;;  %v9381_v0 = vsel %vm8243_vm2, %v5557_v63, %v5558_v42  ;;  %v4860_v41 = vrot.slane %v4859_v47, 4  ;;  %v5562_v62 = vrot.slane %v9284_v2, 5  ;;  %v9388_v22 = vld [vmem:[#allocation2 + $0x3c] sm:$0xe]  ;;  %v4771_v47 = vld [vmem:[#allocation2 + $0x54] sm:$0xf] }
 0x161   : > { %v4870_v14 = vrot.slane %v4869_v50, 4  ;;  %v4874_v56 = vrot.slane %v4872_v29, 5  ;;  %v4893_v55 = vor.u32 %v4892_v36, %v9341_v17  ;;  %v4901_v26 = vshrl.u32 %v4768_v11, 16  ;;  %v9396_v50 = vpop.f32.mrf.mxu0 }
 0x162   : > { %v4904_v27 = vshll.u32 %v4768_v11, 16  ;;  %v4910_v1 = vshll.u32 %v9366_v8, 16  ;;  %v4914_v13 = vshrl.u32 %v9366_v8, 16  ;;  %v4884_v25 = vrot.slane %v4883_v24, 4 }
 0x163   : > { %7413 = vmatmul.mubr.msk.bf16.gmra.mxu1 %vm1880_vm12, %v10852_v60  ;;  %7439 = vmatmul.mubr.msk.bf16.gmra.mxu0 %vm1880_vm12, %v7588_v45  ;;  %v9392_v45 = vpop.f32.mrf.mxu1  ;;  %v4898_v63 = vrot.slane %v4896_v30, 5  ;;  %v6831_v42 = vrot.slane %v5484_v32, 9  ;;  %v4865_v29 = vsel %vm7864_vm13, %v4860_v41, %v9322_v35  ;;  %v5564_v36 = vrot.slane %v5562_v62, 4  ;;  %v9407_v32 = vld [vmem:[#allocation2 + $0x50] sm:$0x1] }
 0x164   : > { %7416 = vmatprep.mubr.msk.bf16.mxu1 %vm1880_vm12, %v10854_v58  ;;  %7442 = vmatprep.mubr.msk.bf16.mxu0 %vm1880_vm12, %v7589_v38  ;;  %10855 = vst [vmem:[#allocation10_spill] sm:$0xff] %v9392_v45  ;;  %v7590_v38 = vld [vmem:[#allocation2 + $0x6c] sm:$0xff]   ;;  %v5565_v11 = vrot.slane %v9320_v59, 5  ;;  %v5569_v60 = vrot.slane %v9304_v12, 5  ;;  %v9403_v58 = vld [vmem:[#allocation2 + $0x58] sm:$0xf]  ;;  %v4875_v24 = vsel %vm7864_vm13, %v4870_v14, %v4874_v56  ;;  %v10856_v59 = vcombine.low %v9174_v57, %v9178_v28 }
 0x165   : > { %v4894_v30 = vrot.slane %v4893_v55, 4  ;;  %v4903_v2 = vrot.slane %v4901_v26, 4  ;;  %v4906_v3 = vrot.slane %v4904_v27, 5  ;;  %v9409_v54 = vrot.slane %v4910_v1, 5  ;;  %v9415_v12 = vpop.f32.mrf.mxu1  ;;  %v9422_v55 = vld [vmem:[#allocation2 + $0x5c] sm:$0x1]  ;;  %v9427_v1 = vpop.f32.mrf.mxu0 }
 0x166   : > { %v4916_v31 = vrot.slane %v4914_v13, 4  ;;  %v4925_v35 = vshrl.u32 %v4771_v47, 16  ;;  %v4928_v41 = vshll.u32 %v4771_v47, 16  ;;  %10857 = vst [vmem:[#allocation11_spill] sm:$0xff] %v9415_v12  ;;  %v9419_v14 = vsel %vm8243_vm2, %v6831_v42, %v5562_v62  ;;  %v7592_v12 = vld [vmem:[#allocation2 + $0x84] sm:$0xff]  }
 0x167   : > { %v6832_v56 = vrot.slane %v9388_v22, 9  ;;  %v4934_v26 = vshll.u32 %v9403_v58, 16  ;;  %v4938_v27 = vshrl.u32 %v9403_v58, 16  ;;  %v10858_v57 = vcombine.low %v9186_v15, %v9200_v49  ;;  %v4777_v45 = vld [vmem:[#allocation2 + $0x6c] sm:$0xf] }
 0x168   : > { %v9435_v28 = vsel %vm8243_vm2, %v5564_v36, %v5565_v11  ;;  %v5571_v62 = vrot.slane %v5569_v60, 4  ;;  %v5572_v22 = vrot.slane %v9328_v33, 5  ;;  %v4920_v13 = vshll.u32 %v9407_v32, 16 }
 0x169   : > { %v9440_v42 = vcombine.low %v4865_v29, %v4875_v24  ;;  %v4889_v47 = vsel %vm7864_vm13, %v4884_v25, %v9341_v17  ;;  %v4899_v15 = vsel %vm7864_vm13, %v4894_v30, %v4898_v63  ;;  %v4907_v49 = vor.u32 %v4906_v3, %v4903_v2  ;;  %v7593_v3 = vld [vmem:[#allocation2 + $0x90] sm:$0xff]   ;;  %v9456_v2 = vpop.f32.mrf.mxu0 }
 0x16a   : > { %v4917_v36 = vor.u32 %v4916_v31, %v9409_v54  ;;  %v4927_v11 = vrot.slane %v4925_v35, 4  ;;  %v4944_v33 = vshll.u32 %v9422_v55, 16  ;;  %v9453_v24 = vrot.slane %v4934_v26, 5  ;;  %v9468_v26 = vld [vmem:[#allocation2 + $0x64] sm:$0xf] }
 0x16b   : > { %7417 = vmatmul.mubr.msk.bf16.gmra.mxu1 %vm1880_vm12, %v10856_v59  ;;  %7443 = vmatmul.mubr.msk.bf16.gmra.mxu0 %vm1880_vm12, %v7590_v38  ;;  %v5486_v38 = vld [vmem:[#allocation2 + $0x48] sm:$0xe]  ;;  %v4930_v59 = vrot.slane %v4928_v41, 5  ;;  %v4940_v17 = vrot.slane %v4938_v27, 4  ;;  %v5576_v25 = vrot.slane %v9366_v8, 5  ;;  %v9458_v31 = vcombine.low %v4889_v47, %v4899_v15 }
 0x16c   : > { %7420 = vmatprep.mubr.msk.bf16.mxu1 %vm1880_vm12, %v10858_v57  ;;  %7446 = vmatprep.mubr.msk.bf16.mxu0 %vm1880_vm12, %v7591_v19  ;;  %v4774_v57 = vld [vmem:[#allocation2 + $0x60] sm:$0xf]  ;;  %v9449_v19 = vpop.f32.mrf.mxu1  ;;  %v9462_v63 = vsel %vm8243_vm2, %v6832_v56, %v5569_v60  ;;  %v9466_v30 = vsel %vm8243_vm2, %v5571_v62, %v5572_v22  ;;  %v4922_v35 = vrot.slane %v4920_v13, 5  ;;  %v5487_v41 = vld [vmem:[#allocation2 + $0x54] sm:$0xe]  ;;  %v4908_v27 = vrot.slane %v4907_v49, 4 }
 0x16d   : > { %10859 = vst [vmem:[#allocation13_spill] sm:$0xff] %v9449_v19  ;;  %10860 = vst [vmem:[#allocation12_spill] sm:$0xff] %v9466_v30  ;;  %v6833_v29 = vrot.slane %v5486_v38, 9  ;;  %v4949_v8 = vshrl.u32 %v4774_v57, 16  ;;  %v4952_v19 = vshll.u32 %v4774_v57, 16  ;;  %v4918_v18 = vrot.slane %v4917_v36, 4 }
 0x16e   : > { %v4931_v47 = vor.u32 %v4930_v59, %v4927_v11  ;;  %v9470_v15 = vrot.slane %v4944_v33, 5  ;;  %v5579_v60 = vrot.slane %v9407_v32, 5  ;;  %v9473_v56 = vld [vmem:[#allocation2 + $0x70] sm:$0xf]  ;;  %v10861_v62 = vcombine.low %v9204_v5, %v9239_v48  ;;  %v9479_v22 = vpop.f32.mrf.mxu1  ;;  %v9484_v11 = vpop.f32.mrf.mxu0  ;;  %v9493_v57 = vld [vmem:[#allocation2 + $0x68] sm:$0x1] }
 0x16f   : > { %10862 = vst [vmem:[#allocation16_spill] sm:$0xff] %v9479_v22  ;;  %v4941_v13 = vor.u32 %v4940_v17, %v9453_v24  ;;  %v5578_v49 = vrot.slane %v5576_v25, 4  ;;  %v6834_v38 = vrot.slane %v5487_v41, 9  ;;  %v5583_v36 = vrot.slane %v9403_v58, 5 }
 0x170   : > { %v10863_v32 = vcombine.low %v9269_v6, %v9275_v10  ;;  %v4951_v5 = vrot.slane %v4949_v8, 4  ;;  %v4954_v48 = vrot.slane %v4952_v19, 5  ;;  %v4958_v59 = vshll.u32 %v9468_v26, 16  ;;  %v9508_v8 = vpop.f32.mrf.mxu1 }
 0x171   : > { %v4962_v33 = vshrl.u32 %v9468_v26, 16  ;;  %v4973_v58 = vshrl.u32 %v4777_v45, 16  ;;  %v4976_v17 = vshll.u32 %v4777_v45, 16  ;;  %v4986_v41 = vshrl.u32 %v9473_v56, 16  ;;  %10865 = vst [vmem:[#allocation15_spill] sm:$0xff] %v9508_v8 }
 0x172   : > { %v4913_v6 = vsel %vm7864_vm13, %v4908_v27, %v9409_v54  ;;  %v4923_v10 = vsel %vm7864_vm13, %v4918_v18, %v4922_v35  ;;  %v9502_v19 = vrot.slane %v4931_v47, 4  ;;  %v9510_v45 = vrot.slane %v4941_v13, 4  ;;  %v9517_v27 = vld [vmem:[#allocation2 + $0x74] sm:$0x1]  ;;  %v7594_v18 = vld [vmem:[#allocation2 + $0x9c] sm:$0xff]   ;;  %v9519_v35 = vpop.f32.mrf.mxu0  ;;  %v7595_v47 = vld [vmem:[#allocation2 + $0xa8] sm:$0xff]  }
 0x173   : > { %7421 = vmatmul.mubr.msk.bf16.gmra.mxu1 %vm1880_vm12, %v10861_v62  ;;  %7447 = vmatmul.mubr.msk.bf16.gmra.mxu0 %vm1880_vm12, %v7592_v12  ;;  %v4982_v12 = vshll.u32 %v9473_v56, 16  ;;  %v9514_v62 = vsel %vm8243_vm2, %v5578_v49, %v5579_v60  ;;  %v5586_v54 = vrot.slane %v9422_v55, 5  ;;  %v4955_v22 = vor.u32 %v4954_v48, %v4951_v5  ;;  %v4780_v49 = vld [vmem:[#allocation2 + $0x78] sm:$0xf] }
 0x174   : > { %7424 = vmatprep.mubr.msk.bf16.mxu1 %vm1880_vm12, %v10863_v32  ;;  %7450 = vmatprep.mubr.msk.bf16.mxu0 %vm1880_vm12, %v7593_v3  ;;  %v9506_v3 = vsel %vm8243_vm2, %v6833_v29, %v5576_v25  ;;  %10866 = vst [vmem:[#allocation18_spill] sm:$0xff] %v9514_v62  ;;  %v5585_v32 = vrot.slane %v5583_v36, 4  ;;  %v9521_v29 = vrot.slane %v4958_v59, 5  ;;  %v4964_v25 = vrot.slane %v4962_v33, 4 }
 0x175   : > { %10864 = vst [vmem:[#allocation14_spill] sm:$0xff] %v9506_v3  ;;  %v4968_v13 = vshll.u32 %v9493_v57, 16  ;;  %v4975_v61 = vrot.slane %v4973_v58, 4  ;;  %v4978_v8 = vrot.slane %v4976_v17, 5  ;;  %v9524_v51 = vrot.slane %v4982_v12, 5 }
 0x176   : > { %v4988_v60 = vrot.slane %v4986_v41, 4  ;;  %v9528_v37 = vcombine.low %v4913_v6, %v4923_v10  ;;  %v9532_v21 = vsel %vm8243_vm2, %v6834_v38, %v5583_v36  ;;  %v4992_v5 = vshll.u32 %v9517_v27, 16  ;;  %v7596_v36 = vld [vmem:[#allocation2 + $0xb4] sm:$0xff]  }
 0x177   : > { %v10868_v59 = vcombine.low %v9279_v40, %v9288_v52  ;;  %v4937_v33 = vsel %vm7864_vm13, %v9502_v19, %v9453_v24  ;;  %v4947_v38 = vsel %vm7864_vm13, %v9510_v45, %v9470_v15  ;;  %v9553_v58 = vsel %vm8243_vm2, %v5585_v32, %v5586_v54  ;;  %v5488_v40 = vld [vmem:[#allocation2 + $0x60] sm:$0xe]  ;;  %v9556_v52 = vpop.f32.mrf.mxu0  ;;  %v9562_v15 = vld [vmem:[#allocation2 + $0x7c] sm:$0xf]  ;;  %v4783_v54 = vld [vmem:[#allocation2 + $0x84] sm:$0xf] }
 0x178   : > { %v4965_v24 = vor.u32 %v4964_v25, %v9521_v29  ;;  %v5590_v17 = vrot.slane %v9468_v26, 5  ;;  %v4997_v12 = vshrl.u32 %v4780_v49, 16  ;;  %v5000_v41 = vshll.u32 %v4780_v49, 16 }
 0x179   : > { %v4956_v10 = vrot.slane %v4955_v22, 4  ;;  %v4970_v19 = vrot.slane %v4968_v13, 5  ;;  %v4979_v45 = vor.u32 %v4978_v8, %v4975_v61  ;;  %v4989_v32 = vor.u32 %v4988_v60, %v9524_v51  ;;  %v9574_v61 = vpop.f32.mrf.mxu0  ;;  %v9576_v60 = vld [vmem:[#allocation2 + $0x88] sm:$0xf] }
 0x17a   : > { %v5597_v25 = vrot.slane %v9473_v56, 5  ;;  %v4999_v26 = vrot.slane %v4997_v12, 4  ;;  %v5593_v49 = vrot.slane %v9493_v57, 5  ;;  %v5010_v22 = vshrl.u32 %v9562_v15, 16  ;;  %v7597_v56 = vld [vmem:[#allocation2 + $0xc0] sm:$0xff]  }
 0x17b   : > { %v9535_v48 = vpop.f32.mrf.mxu1  ;;  %7425 = vmatmul.mubr.msk.bf16.gmra.mxu1 %vm1880_vm12, %v10868_v59  ;;  %7451 = vmatmul.mubr.msk.bf16.gmra.mxu0 %vm1880_vm12, %v7594_v18  ;;  %v4994_v18 = vrot.slane %v4992_v5, 5  ;;  %v5489_v59 = vld [vmem:[#allocation2 + $0x6c] sm:$0xe]  ;;  %v4966_v8 = vrot.slane %v4965_v24, 4  ;;  %v5592_v13 = vrot.slane %v5590_v17, 4  ;;  %v5021_v5 = vshrl.u32 %v4783_v54, 16 }
 0x17c   : > { %10867 = vst [vmem:[#allocation17_spill] sm:$0xff] %v9535_v48  ;;  %7464 = vmatprep.mubr.msk.bf16.mxu1 %vm1880_vm12, %v9347_v20  ;;  %7454 = vmatprep.mubr.msk.bf16.mxu0 %vm1880_vm12, %v7595_v47  ;;  %v6835_v20 = vrot.slane %v5488_v40, 9  ;;  %v5002_v47 = vrot.slane %v5000_v41, 5  ;;  %v5024_v40 = vshll.u32 %v4783_v54, 16  ;;  %v4980_v48 = vrot.slane %v4979_v45, 4 }
 0x17d   : > { %v9565_v6 = vpop.f32.mrf.mxu1  ;;  %v6836_v34 = vrot.slane %v5489_v59, 9  ;;  %v5600_v57 = vrot.slane %v9517_v27, 5  ;;  %v5599_v41 = vrot.slane %v5597_v25, 4  ;;  %v5012_v3 = vrot.slane %v5010_v22, 4  ;;  %v9590_v45 = vld [vmem:[#allocation2 + $0x80] sm:$0x1] }
 0x17e   : > { %10869 = vst [vmem:[#allocation21_spill] sm:$0xff] %v9565_v6  ;;  %v5006_v6 = vshll.u32 %v9562_v15, 16  ;;  %v5003_v39 = vor.u32 %v5002_v47, %v4999_v26  ;;  %v9585_v24 = vcombine.low %v4937_v33, %v4947_v38  ;;  %v4961_v54 = vsel %vm7864_vm13, %v4956_v10, %v9521_v29 }
 0x17f   : > { %v9569_v55 = vpop.f32.mrf.mxu1  ;;  %v5034_v27 = vshrl.u32 %v9576_v60, 16  ;;  %v9603_v33 = vsel %vm8243_vm2, %v6835_v20, %v5590_v17  ;;  %v5023_v29 = vrot.slane %v5021_v5, 4  ;;  %v5026_v38 = vrot.slane %v5024_v40, 5 }
 0x180   : > { %10870 = vst [vmem:[#allocation19_spill] sm:$0xff] %v9569_v55  ;;  %v4990_v55 = vrot.slane %v4989_v32, 4  ;;  %v9581_v62 = vrot.slane %v5006_v6, 5  ;;  %v5030_v32 = vshll.u32 %v9576_v60, 16  ;;  %v9595_v6 = vpop.f32.mrf.mxu0  ;;  %10872 = vst [vmem:[#allocation20_spill] sm:$0xff] %v9603_v33  ;;  %v9617_v17 = vsel %vm8243_vm2, %v6836_v34, %v5597_v25 }
 0x181   : > { %v9578_v12 = vpop.f32.mrf.mxu1  ;;  %10874 = vst [vmem:[#allocation24_spill] sm:$0xff] %v9617_v17  ;;  %v9623_v20 = vsel %vm8243_vm2, %v5599_v41, %v5600_v57  ;;  %v9625_v26 = vrot.slane %v5003_v39, 4  ;;  %v5036_v22 = vrot.slane %v5034_v27, 4  ;;  %v5027_v5 = vor.u32 %v5026_v38, %v5023_v29  ;;  %v9659_v41 = vld [vmem:[#allocation2 + $0x84] sm:$0xe] }
 0x182   : > { %10871 = vst [vmem:[#allocation22_spill] sm:$0xff] %v9578_v12  ;;  %v4995_v59 = vsel %vm7864_vm13, %v4990_v55, %v4994_v18  ;;  %10875 = vst [vmem:[#allocation25_spill] sm:$0xff] %v9623_v20  ;;  %v5016_v55 = vshll.u32 %v9590_v45, 16  ;;  %v4786_v18 = vld [vmem:[#allocation2 + $0x90] sm:$0xf]  ;;  %v9633_v25 = vrot.slane %v5030_v32, 5 }
 0x183   : > { %v7262_v30 = vpop.f32.mrf.mxu1  ;;  %7465 = vmatmul.mubr.msk.bf16.vlgmr.msra.gmra.mxu1 %vm1880_vm12, %v9359_v53  ;;  %7455 = vmatmul.mubr.msk.bf16.gmra.mxu0 %vm1880_vm12, %v7596_v36  ;;  %v4971_v53 = vsel %vm7864_vm13, %v4966_v8, %v4970_v19  ;;  %v4985_v36 = vsel %vm7864_vm13, %v4980_v48, %v9524_v51  ;;  %v9619_v19 = vld [vmem:[#allocation2 + $0x8c] sm:$0x1]  ;;  %v5013_v51 = vor.u32 %v5012_v3, %v9581_v62  ;;  %v5490_v48 = vld [vmem:[#allocation2 + $0x78] sm:$0xe]  ;;  %v9635_v8 = vpop.f32.mrf.mxu0  ;;  %v5604_v32 = vrot.slane %v9562_v15, 5 }
 0x184   : > { %7468 = vmatprep.mubr.msk.bf16.mxu1 %vm1880_vm12, %v9440_v42  ;;  %7458 = vmatprep.mubr.msk.bf16.mxu0 %vm1880_vm12, %v7597_v56  ;;  %v9613_v42 = vsel %vm8243_vm2, %v5592_v13, %v5593_v49  ;;  %v9631_v34 = vcombine.low %v4961_v54, %v4971_v53  ;;  %v7598_v13 = vld [vmem:[#allocation2 + $0xcc] sm:$0xff]   ;;  %v9637_v39 = vcombine.low %v4985_v36, %v4995_v59  ;;  %v5040_v40 = vshll.u32 %v9619_v19, 16  ;;  %v9642_v56 = vld [vmem:[#allocation2 + $0x94] sm:$0xf] }
 0x185   : > { %v2259_v10 = vpop.f32.mrf.mxu1  ;;  %10873 = vst [vmem:[#allocation23_spill] sm:$0xff] %v9613_v42  ;;  %v6837_v54 = vrot.slane %v5490_v48, 9  ;;  %v5045_v27 = vshrl.u32 %v4786_v18, 16  ;;  %v9648_v53 = vadd.f32 %v7262_v30, %v9311_v46  ;;  %v5009_v29 = vsel %vm7864_vm13, %v9625_v26, %v9581_v62  ;;  %v4789_v30 = vld [vmem:[#allocation2 + $0x9c] sm:$0xf] }
 0x186   : > { %v5014_v38 = vrot.slane %v5013_v51, 4  ;;  %v5018_v36 = vrot.slane %v5016_v55, 5  ;;  %v5037_v48 = vor.u32 %v5036_v22, %v9633_v25  ;;  %v5048_v3 = vshll.u32 %v4786_v18, 16  ;;  %v9672_v51 = vld [vmem:[#allocation2 + $0x98] sm:$0x1] }
 0x187   : > { %v7263_v49 = vpop.f32.mrf.mxu1  ;;  %v5047_v15 = vrot.slane %v5045_v27, 4  ;;  %v5054_v46 = vshll.u32 %v9642_v56, 16  ;;  %v9666_v62 = vadd.f32 %v2259_v10, %v9336_v7  ;;  %v5042_v26 = vrot.slane %v5040_v40, 5 }
 0x188   : > { %v5058_v55 = vshrl.u32 %v9642_v56, 16  ;;  %v10876_v18 = vcombine.low %v9351_v23, %v9363_v43  ;;  %v9681_v7 = vsel %vm8243_vm2, %v6837_v54, %v5604_v32  ;;  %v9683_v10 = vrot.slane %v5604_v32, 4 }
 0x189   : > { %v2262_v57 = vpop.f32.mrf.mxu1  ;;  %10877 = vst [vmem:[#allocation26_spill] sm:$0xff] %v9681_v7  ;;  %v5019_v27 = vsel %vm7864_vm13, %v5014_v38, %v5018_v36  ;;  %v5069_v43 = vshrl.u32 %v4789_v30, 16  ;;  %v5038_v20 = vrot.slane %v5037_v48, 4  ;;  %v5064_v32 = vshll.u32 %v9672_v51, 16 }
 0x18a   : > { %v5060_v23 = vrot.slane %v5058_v55, 4  ;;  %v2271_v36 = vadd.f32 %v7263_v49, %v9369_v9  ;;  %v10768_v48 = vrot.slane %v9576_v60, 5  ;;  %v9708_v33 = vcombine.low %v5009_v29, %v5019_v27  ;;  %v9715_v9 = vld [vmem:[#allocation2 + $0xa4] sm:$0x1] }
 0x18b   : > { %v9654_v59 = vpop.f32.mrf.mxu1  ;;  %7469 = vmatmul.mubr.msk.bf16.gmra.mxu1 %vm1880_vm12, %v9458_v31  ;;  %v9662_v47 = vpop.f32.mrf.mxu0  ;;  %7459 = vmatmul.mubr.msk.bf16.gmra.mxu0 %vm1880_vm12, %v7598_v13  ;;  %v9670_v31 = vrot.slane %v5027_v5, 4  ;;  %v9685_v13 = vrot.slane %v5054_v46, 5  ;;  %v9687_v5 = vld [vmem:[#allocation2 + $0xa0] sm:$0xf]  ;;  %v5071_v55 = vrot.slane %v5069_v43, 4  ;;  %v2263_v49 = vadd.f32 %v2262_v57, %v9396_v50 }
 0x18c   : > { %7472 = vmatprep.mubr.msk.bf16.mxu1 %vm1880_vm12, %v9528_v37  ;;  %7498 = vmatprep.mubr.msk.bf16.mxu0 %vm1880_vm12, %v10876_v18  ;;  %v5050_v37 = vrot.slane %v5048_v3, 5  ;;  %v5072_v18 = vshll.u32 %v4789_v30, 16  ;;  %v5078_v42 = vshll.u32 %v9687_v5, 16  ;;  %v5082_v38 = vshrl.u32 %v9687_v5, 16 }
 0x18d   : > { %v2275_v22 = vpop.f32.mrf.mxu1  ;;  %v9689_v40 = vpop.f32.mrf.mxu0  ;;  %v5061_v7 = vor.u32 %v5060_v23, %v9685_v13  ;;  %v5033_v23 = vsel %vm7864_vm13, %v9670_v31, %v9633_v25  ;;  %v5066_v27 = vrot.slane %v5064_v32, 5  ;;  %v9733_v31 = vld [vmem:[#allocation2 + $0x90] sm:$0xe] }
 0x18e   : > { %v5051_v17 = vor.u32 %v5050_v37, %v5047_v15  ;;  %v5074_v54 = vrot.slane %v5072_v18, 5  ;;  %v9731_v57 = vrot.slane %v5078_v42, 5  ;;  %v5088_v42 = vshll.u32 %v9715_v9, 16 }
 0x18f   : > { %v7267_v12 = vpop.f32.mrf.mxu1  ;;  %v9695_v3 = vpop.f32.mrf.mxu0  ;;  %v5062_v50 = vrot.slane %v5061_v7, 4  ;;  %v2284_v7 = vadd.f32 %v9654_v59, %v9427_v1  ;;  %v9763_v1 = vld [vmem:[#allocation2 + $0xac] sm:$0xf] }
 0x190   : > { %v5052_v29 = vrot.slane %v5051_v17, 4 }
 0x191   : > { %v2278_v30 = vpop.f32.mrf.mxu1  ;;  %v9703_v15 = vpop.f32.mrf.mxu0  ;;  %v5067_v59 = vsel %vm7864_vm13, %v5062_v50, %v5066_v27  ;;  %v5102_v50 = vshll.u32 %v9763_v1, 16 }
 0x192   : > { %v9706_v37 = vadd.f32 %v2278_v30, %v9519_v35  ;;  %v5043_v35 = vsel %vm7864_vm13, %v5038_v20, %v5042_v26  ;;  %v10878_v30 = vcombine.low %v9377_v4, %v9381_v0  ;;  %v10879_v4 = vcombine.low %v9419_v14, %v9435_v28 }
 0x193   : > { %v7270_v43 = vpop.f32.mrf.mxu1  ;;  %7473 = vmatmul.mubr.msk.bf16.gmra.mxu1 %vm1880_vm12, %v9585_v24  ;;  %v7296_v18 = vpop.f32.mrf.mxu0  ;;  %v5084_v24 = vrot.slane %v5082_v38, 4  ;;  %v5075_v20 = vor.u32 %v5074_v54, %v5071_v55  ;;  %v9753_v14 = vcombine.low %v5033_v23, %v5043_v35  ;;  %v2287_v38 = vadd.f32 %v7267_v12, %v9484_v11 }
 0x194   : > { %7499 = vmatmul.mubr.msk.bf16.vlgmr.msra.gmra.mxu0 %vm1880_vm12, %v10878_v30  ;;  %v9727_v25 = vadd.f32 %v7270_v43, %v9556_v52  ;;  %7476 = vmatprep.mubr.msk.bf16.mxu1 %vm1880_vm12, %v9631_v34  ;;  %v9736_v17 = vadd.f32 %v7296_v18, %v9648_v53  ;;  %v9744_v52 = vrot.slane %v10768_v48, 4  ;;  %v4792_v34 = vld [vmem:[#allocation2 + $0xa8] sm:$0xf]  ;;  %v2276_v53 = vadd.f32 %v2275_v22, %v9456_v2 }
 0x195   : > { %7502 = vmatprep.mubr.msk.bf16.mxu0 %vm1880_vm12, %v10879_v4  ;;  %v2291_v0 = vpop.f32.mrf.mxu1  ;;  %v2684_v26 = vpop.f32.mrf.mxu0  ;;  %v5057_v55 = vsel %vm7864_vm13, %v5052_v29, %v9685_v13  ;;  %v5093_v22 = vshrl.u32 %v4792_v34, 16  ;;  %v9773_v23 = vrot.slane %v5075_v20, 4  ;;  %v9775_v13 = vrot.slane %v5088_v42, 5  ;;  %v9778_v29 = vld [vmem:[#allocation2 + $0xb0] sm:$0x1] }
 0x196   : > { %v9751_v32 = vadd.f32 %v2291_v0, %v9574_v61  ;;  %v9756_v28 = vadd.f32 %v2684_v26, %v9666_v62  ;;  %v5085_v62 = vor.u32 %v5084_v24, %v9731_v57  ;;  %v5618_v35 = vrot.slane %v9642_v56, 5  ;;  %v4795_v24 = vld [vmem:[#allocation2 + $0xb4] sm:$0xf]  ;;  %v9790_v26 = vld [vmem:[#allocation2 + $0xb8] sm:$0xf] }
 0x197   : > { %v7271_v54 = vpop.f32.mrf.mxu1  ;;  %v7297_v2 = vpop.f32.mrf.mxu0  ;;  %v5095_v30 = vrot.slane %v5093_v22, 4  ;;  %v5096_v27 = vshll.u32 %v4792_v34, 16  ;;  %v6807_v0 = vcombine.low %v5057_v55, %v5067_v59  ;;  %v5106_v42 = vshrl.u32 %v9763_v1, 16  ;;  %v10882_v22 = vld [vmem:[#allocation14_spill] sm:$0xff] }
 0x198   : > { %v9766_v61 = vadd.f32 %v7271_v54, %v9595_v6  ;;  %v9771_v11 = vadd.f32 %v7297_v2, %v2271_v36  ;;  %v10880_v54 = vld [vmem:[#allocation12_spill] sm:$0xff]  ;;  %v9801_v55 = vrot.slane %v5102_v50, 5  ;;  %v5112_v2 = vshll.u32 %v9778_v29, 16 }
 0x199   : > { %v2294_v12 = vpop.f32.mrf.mxu1  ;;  %v2687_v18 = vpop.f32.mrf.mxu0  ;;  %v10881_v34 = vcombine.low %v9462_v63, %v10880_v54  ;;  %v5086_v54 = vrot.slane %v5085_v62, 4  ;;  %v5126_v50 = vshll.u32 %v9790_v26, 16  ;;  %v5130_v62 = vshrl.u32 %v9790_v26, 16 }
 0x19a   : > { %v9781_v6 = vadd.f32 %v2294_v12, %v9635_v8  ;;  %v9784_v36 = vadd.f32 %v2687_v18, %v2263_v49  ;;  %v10883_v12 = vld [vmem:[#allocation18_spill] sm:$0xff] }
 0x19b   : > { %v7274_v4 = vpop.f32.mrf.mxu1  ;;  %7477 = vmatmul.mubr.msk.bf16.gmra.mxu1 %vm1880_vm12, %v9637_v39  ;;  %v7300_v8 = vpop.f32.mrf.mxu0  ;;  %v5098_v39 = vrot.slane %v5096_v27, 5  ;;  %v10884_v18 = vcombine.low %v10882_v22, %v10883_v12  ;;  %v5120_v27 = vshll.u32 %v4795_v24, 16  ;;  %v9817_v22 = vld [vmem:[#allocation2 + $0xbc] sm:$0x1]  ;;  %v5132_v46 = vrot.slane %v5130_v62, 4 }
 0x19c   : > { %7503 = vmatmul.mubr.msk.bf16.gmra.mxu0 %vm1880_vm12, %v10881_v34  ;;  %v9797_v49 = vadd.f32 %v7274_v4, %v9662_v47  ;;  %7480 = vmatprep.mubr.msk.bf16.mxu1 %vm1880_vm12, %v9708_v33  ;;  %v9804_v59 = vadd.f32 %v7300_v8, %v2284_v7  ;;  %v5108_v34 = vrot.slane %v5106_v42, 4  ;;  %v5117_v47 = vshrl.u32 %v4795_v24, 16 }
 0x19d   : > { %7506 = vmatprep.mubr.msk.bf16.mxu0 %vm1880_vm12, %v10884_v18  ;;  %v2307_v63 = vpop.f32.mrf.mxu1  ;;  %v2700_v4 = vpop.f32.mrf.mxu0  ;;  %v5099_v33 = vor.u32 %v5098_v39, %v5095_v30  ;;  %v9823_v30 = vrot.slane %v5126_v50, 5  ;;  %v10888_v50 = vrot.slane %v9659_v41, 9  ;;  %v5081_v41 = vsel %vm7864_vm13, %v9773_v23, %v9731_v57 }
 0x19e   : > { %v9811_v20 = vadd.f32 %v2307_v63, %v9689_v40  ;;  %v9814_v43 = vadd.f32 %v2700_v4, %v2276_v53  ;;  %v5109_v8 = vor.u32 %v5108_v34, %v9801_v55  ;;  %v5119_v12 = vrot.slane %v5117_v47, 4 }
 0x19f   : > { %v7275_v7 = vpop.f32.mrf.mxu1  ;;  %v7301_v42 = vpop.f32.mrf.mxu0  ;;  %v5114_v40 = vrot.slane %v5112_v2, 5  ;;  %v5122_v63 = vrot.slane %v5120_v27, 5  ;;  %v5100_v39 = vrot.slane %v5099_v33, 4  ;;  %v5620_v47 = vrot.slane %v5618_v35, 4 }
 0x1a0   : > { %10885 = vst [vmem:[#allocation12_spill] sm:$0xff] %v9814_v43  ;;  %v9821_v18 = vadd.f32 %v7275_v7, %v9695_v3  ;;  %v9825_v24 = vadd.f32 %v7301_v42, %v2287_v38  ;;  %v5110_v4 = vrot.slane %v5109_v8, 4  ;;  %v5136_v3 = vshll.u32 %v9817_v22, 16 }
 0x1a1   : > { %v2310_v53 = vpop.f32.mrf.mxu1  ;;  %v2703_v34 = vpop.f32.mrf.mxu0  ;;  %v5123_v43 = vor.u32 %v5122_v63, %v5119_v12  ;;  %v10886_v38 = vrot.slane %v9590_v45, 5  ;;  %v10887_v33 = vrot.slane %v9576_v60, 5  ;;  %v10890_v45 = vrot.slane %v9619_v19, 5  ;;  %v9883_v12 = vld [vmem:[#allocation2 + $0x9c] sm:$0xe] }
 0x1a2   : > { %v9828_v48 = vadd.f32 %v2310_v53, %v9703_v15  ;;  %v9834_v2 = vadd.f32 %v2703_v34, %v9706_v37  ;;  %v5133_v37 = vor.u32 %v5132_v46, %v9823_v30  ;;  %v10892_v46 = vld [vmem:[#allocation23_spill] sm:$0xff]  ;;  %v5105_v57 = vsel %vm7864_vm13, %v5100_v39, %v9801_v55  ;;  %v9913_v34 = vld [vmem:[#allocation2 + $0xa8] sm:$0xe] }
 0x1a3   : > { %v7278_v27 = vpop.f32.mrf.mxu1  ;;  %7481 = vmatmul.mubr.msk.bf16.gmra.mxu1 %vm1880_vm12, %v9753_v14  ;;  %v9843_v15 = vsel %vm8243_vm2, %v9683_v10, %v10886_v38  ;;  %v9851_v7 = vsel %vm8243_vm2, %v10888_v50, %v10887_v33  ;;  %v7304_v8 = vpop.f32.mrf.mxu0  ;;  %v10889_v14 = vcombine.low %v9532_v21, %v9553_v58  ;;  %v9863_v60 = vsel %vm8243_vm2, %v9744_v52, %v10890_v45  ;;  %v10891_v10 = vld [vmem:[#allocation20_spill] sm:$0xff]  ;;  %v9919_v33 = vld [vmem:[#allocation2 + $0xc8] sm:$0x1] }
 0x1a4   : > { %7484 = vmatprep.mubr.msk.bf16.mxu1 %vm1880_vm12, %v6807_v0  ;;  %v5091_v21 = vsel %vm7864_vm13, %v5086_v54, %v9775_v13  ;;  %v10769_v58 = vrot.slane %v9687_v5, 5  ;;  %v9875_v19 = vadd.f32 %v7304_v8, %v9727_v25  ;;  %v10893_v52 = vcombine.low %v10891_v10, %v10892_v46  ;;  %v4798_v54 = vld [vmem:[#allocation2 + $0xc0] sm:$0xf] }
 0x1a5   : > { %7507 = vmatmul.mubr.msk.bf16.gmra.mxu0 %vm1880_vm12, %v10889_v14  ;;  %v9881_v0 = vpop.f32.mrf.mxu1  ;;  %v5115_v23 = vsel %vm7864_vm13, %v5110_v4, %v5114_v40  ;;  %v5124_v13 = vrot.slane %v5123_v43, 4  ;;  %v2716_v25 = vpop.f32.mrf.mxu0  ;;  %v10894_v62 = vrot.slane %v9733_v31, 9  ;;  %v10895_v63 = vrot.slane %v9672_v51, 5  ;;  %v10896_v40 = vld [vmem:[#allocation26_spill] sm:$0xff]  ;;  %v9915_v51 = vld [vmem:[#allocation2 + $0xc4] sm:$0xf] }
 0x1a6   : > { %7510 = vmatprep.mubr.msk.bf16.mxu0 %vm1880_vm12, %v10893_v52  ;;  %v5134_v55 = vrot.slane %v5133_v37, 4  ;;  %v5138_v39 = vrot.slane %v5136_v3, 5  ;;  %v9905_v43 = vadd.f32 %v2716_v25, %v9751_v32  ;;  %v6854_v56 = vcombine.low %v10896_v40, %v9843_v15  ;;  %v4801_v52 = vld [vmem:[#allocation2 + $0xcc] sm:$0xf] }
 0x1a7   : > { %v9896_v42 = vsel %vm8243_vm2, %v10894_v62, %v5618_v35  ;;  %v9902_v53 = vsel %vm8243_vm2, %v5620_v47, %v10895_v63  ;;  %v9911_v4 = vpop.f32.mrf.mxu1  ;;  %v6808_v35 = vcombine.low %v5081_v41, %v5091_v21  ;;  %v7305_v47 = vpop.f32.mrf.mxu0  ;;  %v6809_v32 = vcombine.low %v5105_v57, %v5115_v23  ;;  %v9947_v62 = vld [vmem:[#allocation2 + $0xd0] sm:$0xf] }
 0x1a8   : > { %v5141_v50 = vshrl.u32 %v4798_v54, 16  ;;  %v9922_v15 = vadd.f32 %v7305_v47, %v9766_v61  ;;  %v9930_v14 = vrot.slane %v10769_v58, 4  ;;  %v5129_v45 = vsel %vm7864_vm13, %v5124_v13, %v9823_v30 }
 0x1a9   : > { %v9924_v37 = vpop.f32.mrf.mxu1  ;;  %v2719_v41 = vpop.f32.mrf.mxu0  ;;  %v5139_v21 = vsel %vm7864_vm13, %v5134_v55, %v5138_v39  ;;  %v5144_v61 = vshll.u32 %v4798_v54, 16  ;;  %v5150_v46 = vshll.u32 %v9915_v51, 16  ;;  %v5154_v30 = vshrl.u32 %v9915_v51, 16  ;;  %v10897_v54 = vld [vmem:[#allocation24_spill] sm:$0xff]  ;;  %v10898_v55 = vld [vmem:[#allocation25_spill] sm:$0xff] }
 0x1aa   : > { %v5143_v10 = vrot.slane %v5141_v50, 4  ;;  %v9939_v57 = vadd.f32 %v2719_v41, %v9781_v6  ;;  %v5160_v13 = vshll.u32 %v9919_v33, 16  ;;  %v10899_v39 = vcombine.low %v10897_v54, %v10898_v55  ;;  %v10900_v6 = vld [vmem:[#allocation5_spill] sm:$0xff] }
 0x1ab   : > { %v9941_v23 = vpop.f32.mrf.mxu1  ;;  %7485 = vmatmul.mubr.msk.bf16.gmra.mxu1 %vm1880_vm12, %v6808_v35  ;;  %v7308_v63 = vpop.f32.mrf.mxu0  ;;  %v2332_v40 = vadd.f32 %v7278_v27, %v10900_v6  ;;  %v5632_v35 = vrot.slane %v9763_v1, 5  ;;  %v5146_v47 = vrot.slane %v5144_v61, 5  ;;  %v5152_v50 = vrot.slane %v5150_v46, 5  ;;  %v9962_v27 = vld [vmem:[#allocation2 + $0xd4] sm:$0x1] }
 0x1ac   : > { %7488 = vmatprep.mubr.msk.bf16.mxu1 %vm1880_vm12, %v6809_v32  ;;  %v9957_v41 = vadd.f32 %v7308_v63, %v9797_v49  ;;  %v6810_v8 = vcombine.low %v5129_v45, %v5139_v21  ;;  %v5156_v3 = vrot.slane %v5154_v30, 4  ;;  %v5165_v54 = vshrl.u32 %v4801_v52, 16 }
 0x1ad   : > { %7511 = vmatmul.mubr.msk.bf16.gmra.mxu0 %vm1880_vm12, %v10899_v39  ;;  %v9960_v25 = vpop.f32.mrf.mxu1  ;;  %v2732_v55 = vpop.f32.mrf.mxu0  ;;  %v5147_v39 = vor.u32 %v5146_v47, %v5143_v10  ;;  %v5162_v38 = vrot.slane %v5160_v13, 5  ;;  %v5168_v32 = vshll.u32 %v4801_v52, 16  ;;  %v5174_v1 = vshll.u32 %v9947_v62, 16 }
 0x1ae   : > { %7514 = vmatprep.mubr.msk.bf16.mxu0 %vm1880_vm12, %v6854_v56  ;;  %v9966_v61 = vadd.f32 %v2732_v55, %v9811_v20  ;;  %v5157_v46 = vor.u32 %v5156_v3, %v5152_v50  ;;  %v5167_v56 = vrot.slane %v5165_v54, 4  ;;  %v5178_v63 = vshrl.u32 %v9947_v62, 16  ;;  %v10901_v3 = vld [vmem:[#allocation4_spill] sm:$0xff] }
 0x1af   : > { %v9968_v49 = vpop.f32.mrf.mxu1  ;;  %v7309_v45 = vpop.f32.mrf.mxu0  ;;  %v5635_v21 = vrot.slane %v9778_v29, 5  ;;  %v5148_v30 = vrot.slane %v5147_v39, 4  ;;  %v5170_v10 = vrot.slane %v5168_v32, 5  ;;  %v5176_v13 = vrot.slane %v5174_v1, 5 }
 0x1b0   : > { %v9973_v6 = vadd.f32 %v7309_v45, %v9821_v18  ;;  %v5158_v47 = vrot.slane %v5157_v46, 4  ;;  %v5180_v20 = vrot.slane %v5178_v63, 4  ;;  %v5184_v55 = vshll.u32 %v9962_v27, 16 }
 0x1b1   : > { %v9975_v52 = vpop.f32.mrf.mxu1  ;;  %v2735_v58 = vpop.f32.mrf.mxu0  ;;  %v2324_v54 = vadd.f32 %v9881_v0, %v10901_v3  ;;  %v5634_v31 = vrot.slane %v5632_v35, 4  ;;  %v5153_v29 = vsel %vm7864_vm13, %v5148_v30, %v5152_v50  ;;  %v5171_v39 = vor.u32 %v5170_v10, %v5167_v56 }
 0x1b2   : > { %v9983_v32 = vadd.f32 %v2735_v58, %v9828_v48  ;;  %v5163_v1 = vsel %vm7864_vm13, %v5158_v47, %v5162_v38  ;;  %v5181_v46 = vor.u32 %v5180_v20, %v5176_v13  ;;  %v5186_v63 = vrot.slane %v5184_v55, 5  ;;  %v5495_v47 = vld [vmem:[#allocation2 + $0xb4] sm:$0xe] }
 0x1b3   : > { %v9985_v18 = vpop.f32.mrf.mxu1  ;;  %7489 = vmatmul.mubr.msk.bf16.gmra.mxu1 %vm1880_vm12, %v6810_v8  ;;  %v7312_v45 = vpop.f32.mrf.mxu0  ;;  %v10902_v0 = vcombine.low %v9851_v7, %v9863_v60  ;;  %v10903_v50 = vrot.slane %v9687_v5, 5  ;;  %v10904_v48 = vrot.slane %v9883_v12, 9  ;;  %v10905_v8 = vrot.slane %v9715_v9, 5  ;;  %v10906_v7 = vld [vmem:[#allocation6_spill] sm:$0xff] }
 0x1b4   : > { %v6811_v56 = vcombine.low %v5153_v29, %v5163_v1  ;;  %v5172_v30 = vrot.slane %v5171_v39, 4  ;;  %v10005_v10 = vadd.f32 %v7312_v45, %v2332_v40  ;;  %v2335_v60 = vadd.f32 %v9911_v4, %v10906_v7 }
 0x1b5   : > { %7515 = vmatmul.mubr.msk.bf16.gmra.mxu0 %vm1880_vm12, %v10902_v0  ;;  %v5626_v58 = vsel %vm8243_vm2, %v10904_v48, %v10903_v50  ;;  %v5629_v38 = vsel %vm8243_vm2, %v9930_v14, %v10905_v8  ;;  %v10907_v5 = vcombine.low %v9896_v42, %v9902_v53  ;;  %v10013_v12 = vpop.f32.mrf.mxu1  ;;  %v5639_v9 = vrot.slane %v9790_v26, 5  ;;  %v2748_v55 = vpop.f32.mrf.mxu0  ;;  %v10909_v26 = vld [vmem:[#allocation7_spill] sm:$0xff] }
 0x1b6   : > { %v5182_v20 = vrot.slane %v5181_v46, 4  ;;  %v10908_v14 = vrot.slane %v9913_v34, 9  ;;  %v5636_v4 = vsel %vm8243_vm2, %v5634_v31, %v5635_v21  ;;  %7492 = vmatprep.mubr.msk.bf16.mxu1 %vm1880_vm12, %v6811_v56  ;;  %v5177_v42 = vsel %vm7864_vm13, %v5172_v30, %v5176_v13  ;;  %v10910_v13 = vld [vmem:[#allocation3_spill] sm:$0xff] }
 0x1b7   : > { %7518 = vmatprep.mubr.msk.bf16.mxu0 %vm1880_vm12, %v10907_v5  ;;  %v5646_v53 = vrot.slane %v9915_v51, 5  ;;  %v10026_v3 = vadd.f32 %v2748_v55, %v2324_v54  ;;  %v2327_v29 = vadd.f32 %v9924_v37, %v10909_v26  ;;  %v7287_v39 = vpop.f32.mrf.mxu1  ;;  %v7313_v1 = vpop.f32.mrf.mxu0  ;;  %v6857_v46 = vcombine.low %v5626_v58, %v5629_v38  ;;  %v10911_v8 = vld [vmem:[#allocation15_spill] sm:$0xff]  ;;  %v10912_v38 = vld [vmem:[#allocation8_spill] sm:$0xff]  ;;  %v10913_v5 = vld [vmem:[#allocation17_spill] sm:$0xff] }
 0x1b8   : > { %v5633_v40 = vsel %vm8243_vm2, %v10908_v14, %v5632_v35  ;;  %v5187_v34 = vsel %vm7864_vm13, %v5182_v20, %v5186_v63  ;;  %v5496_v35 = vld [vmem:[#allocation2 + $0xc0] sm:$0xe]  ;;  %v6842_v31 = vrot.slane %v5495_v47, 9  ;;  %v5642_v21 = vrot.slane %v9817_v22, 5  ;;  %v10914_v55 = vld [vmem:[#allocation9_spill] sm:$0xff] }
 0x1b9   : > { %v6812_v45 = vcombine.low %v5177_v42, %v5187_v34  ;;  %v10033_v0 = vadd.f32 %v7313_v1, %v2335_v60  ;;  %v2348_v51 = vadd.f32 %v9941_v23, %v10910_v13  ;;  %v6858_v54 = vcombine.low %v5633_v40, %v5636_v4  ;;  %v2358_v48 = vpop.f32.mrf.mxu1  ;;  %v2751_v37 = vpop.f32.mrf.mxu0  ;;  %v5497_v40 = vld [vmem:[#allocation2 + $0xcc] sm:$0xe] }
 0x1ba   : > { %v5641_v50 = vrot.slane %v5639_v9, 4  ;;  %v2359_v56 = vadd.f32 %v2358_v48, %v10911_v8  ;;  %v6843_v44 = vrot.slane %v5496_v35, 9  ;;  %v5648_v63 = vrot.slane %v5646_v53, 4 }
 0x1bb   : > { %v5649_v30 = vrot.slane %v9919_v33, 5  ;;  %v10039_v58 = vadd.f32 %v2751_v37, %v2327_v29  ;;  %v2340_v22 = vadd.f32 %v9960_v25, %v10912_v38  ;;  %v7290_v7 = vpop.f32.mrf.mxu1  ;;  %7493 = vmatmul.mubr.msk.bf16.gmra.mxu1 %vm1880_vm12, %v6812_v45  ;;  %v7316_v60 = vpop.f32.mrf.mxu0  ;;  %v5640_v23 = vsel %vm8243_vm2, %v6842_v31, %v5639_v9  ;;  %v10915_v29 = vld [vmem:[#allocation21_spill] sm:$0xff] }
 0x1bc   : > { %v2380_v47 = vadd.f32 %v7290_v7, %v10913_v5  ;;  %v10048_v20 = vadd.f32 %v7316_v60, %v2348_v51  ;;  %v2351_v33 = vadd.f32 %v9968_v49, %v10914_v55  ;;  %v5643_v25 = vsel %vm8243_vm2, %v5641_v50, %v5642_v21  ;;  %v10916_v49 = vld [vmem:[#allocation10_spill] sm:$0xff]  ;;  %v10917_v21 = vld [vmem:[#allocation11_spill] sm:$0xff]  ;;  %v10920_v38 = vld [vmem:[#allocation13_spill] sm:$0xff] }
 0x1bd   : > { %7519 = vmatmul.mubr.msk.bf16.gmra.mxu0 %vm1880_vm12, %v6857_v46  ;;  %v2371_v14 = vpop.f32.mrf.mxu1  ;;  %v5653_v4 = vrot.slane %v9947_v62, 5  ;;  %v2764_v42 = vpop.f32.mrf.mxu0  ;;  %v5647_v9 = vsel %vm8243_vm2, %v6843_v44, %v5646_v53  ;;  %v5650_v26 = vsel %vm8243_vm2, %v5648_v63, %v5649_v30  ;;  %v2343_v1 = vadd.f32 %v9975_v52, %v10916_v49  ;;  %v10918_v51 = vld [vmem:[#allocation19_spill] sm:$0xff]  ;;  %v10919_v63 = vld [vmem:[#allocation22_spill] sm:$0xff]  ;;  %v10921_v5 = vld [vmem:[#allocation16_spill] sm:$0xff] }
 0x1be   : > { %7522 = vmatprep.mubr.msk.bf16.mxu0 %vm1880_vm12, %v6858_v54  ;;  %v2372_v34 = vadd.f32 %v2371_v14, %v10915_v29  ;;  %v10061_v35 = vadd.f32 %v2764_v42, %v2340_v22  ;;  %v2364_v45 = vadd.f32 %v9985_v18, %v10917_v21  ;;  %v6859_v62 = vcombine.low %v5640_v23, %v5643_v25 }
 0x1bf   : > { %v7291_v46 = vpop.f32.mrf.mxu1  ;;  %v7317_v31 = vpop.f32.mrf.mxu0  ;;  %v6844_v13 = vrot.slane %v5497_v40, 9  ;;  %v6860_v50 = vcombine.low %v5647_v9, %v5650_v26  ;;  %v5655_v48 = vrot.slane %v5653_v4, 4  ;;  %v5656_v37 = vrot.slane %v9962_v27, 5 }
 0x1c0   : > { %v2383_v54 = vadd.f32 %v7291_v46, %v10918_v51  ;;  %v10068_v53 = vadd.f32 %v7317_v31, %v2351_v33  ;;  %v2356_v22 = vadd.f32 %v10013_v12, %v10920_v38  ;;  %v2367_v55 = vadd.f32 %v7287_v39, %v10921_v5 }
 0x1c1   : > { %v2374_v8 = vpop.f32.mrf.mxu1  ;;  %v2767_v44 = vpop.f32.mrf.mxu0  ;;  %v5654_v27 = vsel %vm8243_vm2, %v6844_v13, %v5653_v4  ;;  %v5657_v33 = vsel %vm8243_vm2, %v5655_v48, %v5656_v37 }
 0x1c2   : > { %v2375_v30 = vadd.f32 %v2374_v8, %v10919_v63  ;;  %v10072_v52 = vadd.f32 %v2767_v44, %v2343_v1  ;;  %v6861_v9 = vcombine.low %v5654_v27, %v5657_v33 }
 0x1c3   : > { %v7330_v18 = vpop.f32.mrf.mxu1  ;;  %v7320_v7 = vpop.f32.mrf.mxu0 }
 0x1c4   : > { %v3171_v60 = vadd.f32 %v7330_v18, %v9736_v17  ;;  %v10078_v23 = vadd.f32 %v7320_v7, %v2364_v45 }
 0x1c5   : > { %7523 = vmatmul.mubr.msk.bf16.gmra.mxu0 %vm1880_vm12, %v6859_v62  ;;  %v3042_v25 = vpop.f32.mrf.mxu1  ;;  %v2780_v12 = vpop.f32.mrf.mxu0  ;;  %v10922_v62 = vld [vmem:[#allocation12_spill] sm:$0xff] }
 0x1c6   : > { %7526 = vmatprep.mubr.msk.bf16.mxu0 %vm1880_vm12, %v6860_v50  ;;  %v3169_v14 = vadd.f32 %v3042_v25, %v9756_v28  ;;  %v10087_v40 = vadd.f32 %v2780_v12, %v2356_v22 }
 0x1c7   : > { %v7331_v42 = vpop.f32.mrf.mxu1  ;;  %v7321_v17 = vpop.f32.mrf.mxu0 }
 0x1c8   : > { %v3172_v26 = vadd.f32 %v7331_v42, %v9771_v11  ;;  %v10090_v39 = vadd.f32 %v7321_v17, %v2367_v55 }
 0x1c9   : > { %v3045_v29 = vpop.f32.mrf.mxu1  ;;  %v2783_v49 = vpop.f32.mrf.mxu0 }
 0x1ca   : > { %v3170_v4 = vadd.f32 %v3045_v29, %v9784_v36  ;;  %v10093_v1 = vadd.f32 %v2783_v49, %v2359_v56 }
 0x1cb   : > { %v7334_v16 = vpop.f32.mrf.mxu1  ;;  %v7324_v46 = vpop.f32.mrf.mxu0 }
 0x1cc   : > { %v3175_v28 = vadd.f32 %v7334_v16, %v9804_v59  ;;  %v10097_v31 = vadd.f32 %v7324_v46, %v2380_v47 }
 0x1cd   : > { %7527 = vmatmul.mubr.msk.bf16.gmra.mxu0 %vm1880_vm12, %v6861_v9  ;;  %v3058_v21 = vpop.f32.mrf.mxu1  ;;  %v2796_v45 = vpop.f32.mrf.mxu0 }
 0x1ce   : > { %v3173_v11 = vadd.f32 %v3058_v21, %v10922_v62  ;;  %v10100_v13 = vadd.f32 %v2796_v45, %v2372_v34 }
 0x1cf   : > { %v7335_v51 = vpop.f32.mrf.mxu1  ;;  %v7325_v50 = vpop.f32.mrf.mxu0 }
 0x1d0   : > { %v3176_v36 = vadd.f32 %v7335_v51, %v9825_v24  ;;  %v10103_v56 = vadd.f32 %v7325_v50, %v2383_v54 }
 0x1d1   : > { %v3061_v48 = vpop.f32.mrf.mxu1  ;;  %v2799_v37 = vpop.f32.mrf.mxu0 }
 0x1d2   : > { %v3174_v8 = vadd.f32 %v3061_v48, %v9834_v2  ;;  %v10106_v44 = vadd.f32 %v2799_v37, %v2375_v30 }
 0x1d3   : > { %v7338_v59 = vpop.f32.mrf.mxu1  ;;  %v7364_v47 = vpop.f32.mrf.mxu0 }
 0x1d4   : > { %v3179_v63 = vadd.f32 %v7338_v59, %v9875_v19  ;;  %v10109_v38 = vadd.f32 %v7364_v47, %v3171_v60 }
 0x1d5   : > { %v3074_v34 = vpop.f32.mrf.mxu1  ;;  %v3768_v22 = vpop.f32.mrf.mxu0 }
 0x1d6   : > { %v3177_v18 = vadd.f32 %v3074_v34, %v9905_v43  ;;  %v10112_v7 = vadd.f32 %v3768_v22, %v3169_v14 }
 0x1d7   : > { %v7339_v24 = vpop.f32.mrf.mxu1  ;;  %v7365_v54 = vpop.f32.mrf.mxu0 }
 0x1d8   : > { %v3180_v5 = vadd.f32 %v7339_v24, %v9922_v15  ;;  %v10115_v55 = vadd.f32 %v7365_v54, %v3172_v26 }
 0x1d9   : > { %v3077_v2 = vpop.f32.mrf.mxu1  ;;  %v3771_v30 = vpop.f32.mrf.mxu0 }
 0x1da   : > { %v3178_v27 = vadd.f32 %v3077_v2, %v9939_v57  ;;  %v10118_v33 = vadd.f32 %v3771_v30, %v3170_v4 }
 0x1db   : > { %v7342_v19 = vpop.f32.mrf.mxu1  ;;  %v7368_v60 = vpop.f32.mrf.mxu0 }
 0x1dc   : > { %v3183_v25 = vadd.f32 %v7342_v19, %v9957_v41  ;;  %v10121_v12 = vadd.f32 %v7368_v60, %v3175_v28 }
 0x1dd   : > { %v3090_v43 = vpop.f32.mrf.mxu1  ;;  %v3784_v14 = vpop.f32.mrf.mxu0 }
 0x1de   : > { %v3181_v42 = vadd.f32 %v3090_v43, %v9966_v61  ;;  %v10124_v17 = vadd.f32 %v3784_v14, %v3173_v11 }
 0x1df   : > { %v7343_v15 = vpop.f32.mrf.mxu1  ;;  %v7369_v9 = vpop.f32.mrf.mxu0 }
 0x1e0   : > { %v3184_v26 = vadd.f32 %v7343_v15, %v9973_v6  ;;  %v10127_v29 = vadd.f32 %v7369_v9, %v3176_v36 }
 0x1e1   : > { %v3093_v57 = vpop.f32.mrf.mxu1  ;;  %v3787_v49 = vpop.f32.mrf.mxu0 }
 0x1e2   : > { %v3182_v4 = vadd.f32 %v3093_v57, %v9983_v32  ;;  %v10130_v16 = vadd.f32 %v3787_v49, %v3174_v8 }
 0x1e3   : > { %v7346_v41 = vpop.f32.mrf.mxu1  ;;  %v7372_v46 = vpop.f32.mrf.mxu0 }
 0x1e4   : > { %v3187_v28 = vadd.f32 %v7346_v41, %v10005_v10  ;;  %v10133_v21 = vadd.f32 %v7372_v46, %v3179_v63 }
 0x1e5   : > { %v3106_v61 = vpop.f32.mrf.mxu1  ;;  %v3800_v45 = vpop.f32.mrf.mxu0 }
 0x1e6   : > { %v3185_v62 = vadd.f32 %v3106_v61, %v10026_v3  ;;  %v10136_v11 = vadd.f32 %v3800_v45, %v3177_v18 }
 0x1e7   : > { %v7347_v6 = vpop.f32.mrf.mxu1  ;;  %v7373_v51 = vpop.f32.mrf.mxu0 }
 0x1e8   : > { %v3188_v50 = vadd.f32 %v7347_v6, %v10033_v0  ;;  %v10139_v36 = vadd.f32 %v7373_v51, %v3180_v5 }
 0x1e9   : > { %v3109_v32 = vpop.f32.mrf.mxu1  ;;  %v3803_v48 = vpop.f32.mrf.mxu0 }
 0x1ea   : > { %v3186_v37 = vadd.f32 %v3109_v32, %v10039_v58  ;;  %v10142_v8 = vadd.f32 %v3803_v48, %v3178_v27 }
 0x1eb   : > { %v7350_v10 = vpop.f32.mrf.mxu1  ;;  %v7376_v59 = vpop.f32.mrf.mxu0 }
 0x1ec   : > { %v3191_v47 = vadd.f32 %v7350_v10, %v10048_v20  ;;  %v10145_v63 = vadd.f32 %v7376_v59, %v3183_v25 }
 0x1ed   : > { %v3122_v3 = vpop.f32.mrf.mxu1  ;;  %v3816_v34 = vpop.f32.mrf.mxu0 }
 0x1ee   : > { %v3189_v22 = vadd.f32 %v3122_v3, %v10061_v35  ;;  %v10148_v18 = vadd.f32 %v3816_v34, %v3181_v42 }
 0x1ef   : > { %v7351_v0 = vpop.f32.mrf.mxu1  ;;  %v7377_v24 = vpop.f32.mrf.mxu0 }
 0x1f0   : > { %v3192_v54 = vadd.f32 %v7351_v0, %v10068_v53  ;;  %v10151_v5 = vadd.f32 %v7377_v24, %v3184_v26 }
 0x1f1   : > { %v3125_v58 = vpop.f32.mrf.mxu1  ;;  %v3819_v2 = vpop.f32.mrf.mxu0 }
 0x1f2   : > { %v3190_v30 = vadd.f32 %v3125_v58, %v10072_v52  ;;  %v10154_v27 = vadd.f32 %v3819_v2, %v3182_v4 }
 0x1f3   : > { %v7354_v20 = vpop.f32.mrf.mxu1  ;;  %v7380_v19 = vpop.f32.mrf.mxu0 }
 0x1f4   : > { %v3195_v60 = vadd.f32 %v7354_v20, %v10078_v23  ;;  %v10157_v25 = vadd.f32 %v7380_v19, %v3187_v28 }
 0x1f5   : > { %v3138_v35 = vpop.f32.mrf.mxu1  ;;  %v3832_v43 = vpop.f32.mrf.mxu0 }
 0x1f6   : > { %v3193_v14 = vadd.f32 %v3138_v35, %v10087_v40  ;;  %v10160_v42 = vadd.f32 %v3832_v43, %v3185_v62 }
 0x1f7   : > { %v7355_v53 = vpop.f32.mrf.mxu1  ;;  %v7381_v15 = vpop.f32.mrf.mxu0 }
 0x1f8   : > { %v3196_v9 = vadd.f32 %v7355_v53, %v10090_v39  ;;  %v10163_v26 = vadd.f32 %v7381_v15, %v3188_v50 }
 0x1f9   : > { %v3141_v52 = vpop.f32.mrf.mxu1  ;;  %v3835_v57 = vpop.f32.mrf.mxu0 }
 0x1fa   : > { %v3194_v49 = vadd.f32 %v3141_v52, %v10093_v1  ;;  %v10166_v4 = vadd.f32 %v3835_v57, %v3186_v37 }
 0x1fb   : > { %v7358_v23 = vpop.f32.mrf.mxu1  ;;  %v7384_v41 = vpop.f32.mrf.mxu0 }
 0x1fc   : > { %v3199_v46 = vadd.f32 %v7358_v23, %v10097_v31  ;;  %v10169_v28 = vadd.f32 %v7384_v41, %v3191_v47 }
 0x1fd   : > { %v3154_v40 = vpop.f32.mrf.mxu1  ;;  %v3848_v61 = vpop.f32.mrf.mxu0 }
 0x1fe   : > { %10923 = vst [vmem:[#allocation14_spill] sm:$0xff] %v10169_v28  ;;  %v3197_v45 = vadd.f32 %v3154_v40, %v10100_v13  ;;  %v10172_v62 = vadd.f32 %v3848_v61, %v3189_v22 }
 0x1ff   : > { %v7359_v39 = vpop.f32.mrf.mxu1  ;;  %v7385_v6 = vpop.f32.mrf.mxu0 }
 0x200   : > { %10924 = vst [vmem:[#allocation18_spill] sm:$0xff] %v10172_v62  ;;  %v3200_v51 = vadd.f32 %v7359_v39, %v10103_v56  ;;  %v10175_v50 = vadd.f32 %v7385_v6, %v3192_v54 }
 0x201   : > { %v3157_v1 = vpop.f32.mrf.mxu1  ;;  %v3851_v32 = vpop.f32.mrf.mxu0 }
 0x202   : > { %10925 = vst [vmem:[#allocation20_spill] sm:$0xff] %v10175_v50  ;;  %v3198_v48 = vadd.f32 %v3157_v1, %v10106_v44  ;;  %v10178_v37 = vadd.f32 %v3851_v32, %v3190_v30 }
 0x203   : > { %v10180_v31 = vpop.f32.mrf.mxu1  ;;  %v7388_v10 = vpop.f32.mrf.mxu0 }
 0x204   : > { %10926 = vst [vmem:[#allocation23_spill] sm:$0xff] %v10178_v37  ;;  %v10182_v59 = vadd.f32 %v7388_v10, %v3195_v60 }
 0x205   : > { %v10184_v13 = vpop.f32.mrf.mxu1  ;;  %v3864_v47 = vpop.f32.mrf.mxu0 }
 0x206   : > { %10927 = vst [vmem:[#allocation26_spill] sm:$0xff] %v10182_v59  ;;  %v10186_v3 = vadd.f32 %v3864_v47, %v3193_v14 }
 0x207   : > { %v10188_v34 = vpop.f32.mrf.mxu1  ;;  %v7389_v56 = vpop.f32.mrf.mxu0 }
 0x208   : > { %10928 = vst [vmem:[#allocation24_spill] sm:$0xff] %v10186_v3  ;;  %v10190_v22 = vadd.f32 %v7389_v56, %v3196_v9 }
 0x209   : > { %v10192_v0 = vpop.f32.mrf.mxu1  ;;  %v3867_v44 = vpop.f32.mrf.mxu0 }
 0x20a   : > { %10929 = vst [vmem:[#allocation25_spill] sm:$0xff] %v10190_v22  ;;  %v10194_v24 = vadd.f32 %v3867_v44, %v3194_v49 }
 0x20b   : > { %v10196_v54 = vpop.f32.mrf.mxu1  ;;  %v7392_v58 = vpop.f32.mrf.mxu0 }
 0x20c   : > { %10930 = vst [vmem:[#allocation5_spill] sm:$0xff] %v10194_v24  ;;  %v10198_v2 = vadd.f32 %v7392_v58, %v3199_v46 }
 0x20d   : > { %v10200_v30 = vpop.f32.mrf.mxu1  ;;  %v3880_v20 = vpop.f32.mrf.mxu0 }
 0x20e   : > { %10931 = vst [vmem:[#allocation4_spill] sm:$0xff] %v10198_v2  ;;  %v10202_v19 = vadd.f32 %v3880_v20, %v3197_v45 }
 0x20f   : > { %v10204_v60 = vpop.f32.mrf.mxu1  ;;  %v7393_v35 = vpop.f32.mrf.mxu0 }
 0x210   : > { %10932 = vst [vmem:[#allocation6_spill] sm:$0xff] %v10202_v19  ;;  %v10206_v43 = vadd.f32 %v7393_v35, %v3200_v51 }
 0x211   : > { %v10208_v14 = vpop.f32.mrf.mxu1  ;;  %v3883_v53 = vpop.f32.mrf.mxu0 }
 0x212   : > { %10933 = vst [vmem:[#allocation7_spill] sm:$0xff] %v10206_v43  ;;  %v10210_v15 = vadd.f32 %v3883_v53, %v3198_v48 }
 0x213   : > { %v10212_v9 = vpop.f32.mrf.mxu1  ;;  %v10214_v52 = vpop.f32.mrf.mxu0 }
 0x214   : > { %10934 = vst [vmem:[#allocation3_spill] sm:$0xff] %v10210_v15 }
 0x215   : > { %v10216_v57 = vpop.f32.mrf.mxu1  ;;  %v10218_v49 = vpop.f32.mrf.mxu0 }
 0x217   : > { %v10220_v23 = vpop.f32.mrf.mxu1  ;;  %v10222_v41 = vpop.f32.mrf.mxu0 }
 0x219   : > { %v10224_v46 = vpop.f32.mrf.mxu1  ;;  %v10226_v40 = vpop.f32.mrf.mxu0 }
 0x21b   : > { %v10228_v61 = vpop.f32.mrf.mxu1  ;;  %v10230_v45 = vpop.f32.mrf.mxu0 }
 0x21d   : > { %v10232_v39 = vpop.f32.mrf.mxu1  ;;  %v10234_v6 = vpop.f32.mrf.mxu0 }
 0x21f   : > { %v10236_v51 = vpop.f32.mrf.mxu1  ;;  %v10238_v1 = vpop.f32.mrf.mxu0 }
 0x221   : > { %v10240_v32 = vpop.f32.mrf.mxu1  ;;  %v10242_v48 = vpop.f32.mrf.mxu0 }
 0x223   : > { %v10244_v10 = vpop.f32.mrf.mxu1  ;;  %v10246_v47 = vpop.f32.mrf.mxu0 }
 0x225   : > { %v10248_v56 = vpop.f32.mrf.mxu1  ;;  %v10250_v44 = vpop.f32.mrf.mxu0 }
 0x227   : > { %v10252_v58 = vpop.f32.mrf.mxu1  ;;  %v10254_v20 = vpop.f32.mrf.mxu0 }
 0x229   : > { %v10256_v35 = vpop.f32.mrf.mxu1  ;;  %v10258_v53 = vpop.f32.mrf.mxu0 }
 0x22b   : > { %v10260_v15 = vpop.f32.mrf.mxu1  ;;  %v10262_v43 = vpop.f32.mrf.mxu0 }
 0x22c   : > { %10935 = vst [vmem:[#allocation15_spill] sm:$0xff] %v10260_v15  ;;  %10936 = vst [vmem:[#allocation8_spill] sm:$0xff] %v10262_v43 }
 0x22d   : > { %v10264_v19 = vpop.f32.mrf.mxu1  ;;  %v10266_v2 = vpop.f32.mrf.mxu0 }
 0x22e   : > { %10937 = vst [vmem:[#allocation17_spill] sm:$0xff] %v10264_v19  ;;  %10938 = vst [vmem:[#allocation9_spill] sm:$0xff] %v10266_v2 }
 0x22f   : > { %v10268_v24 = vpop.f32.mrf.mxu1  ;;  %v10270_v22 = vpop.f32.mrf.mxu0 }
 0x230   : > { %10939 = vst [vmem:[#allocation21_spill] sm:$0xff] %v10268_v24  ;;  %10940 = vst [vmem:[#allocation10_spill] sm:$0xff] %v10270_v22 }
 0x231   : > { %v10272_v3 = vpop.f32.mrf.mxu1  ;;  %v10274_v59 = vpop.f32.mrf.mxu0 }
 0x232   : > { %10941 = vst [vmem:[#allocation11_spill] sm:$0xff] %v10272_v3  ;;  %10942 = vst [vmem:[#allocation19_spill] sm:$0xff] %v10274_v59 }
 0x233   : > { %v10276_v37 = vpop.f32.mrf.mxu1  ;;  %v10278_v50 = vpop.f32.mrf.mxu0 }
 0x234   : > { %10943 = vst [vmem:[#allocation22_spill] sm:$0xff] %v10276_v37  ;;  %10944 = vst [vmem:[#allocation13_spill] sm:$0xff] %v10278_v50 }
 0x235   : > { %v10280_v62 = vpop.f32.mrf.mxu1  ;;  %v10282_v15 = vpop.f32.mrf.mxu0 }
 0x236   : > { %10945 = vst [vmem:[#allocation16_spill] sm:$0xff] %v10280_v62  ;;  %10946 = vst [vmem:[#allocation12_spill] sm:$0xff] %v10282_v15 }
 0x237   : > { %v10284_v28 = vpop.f32.mrf.mxu1  ;;  %v10286_v19 = vpop.f32.mrf.mxu0 }
 0x238   : > { %10947 = vst [vmem:[#allocation27_spill] sm:$0xff] %v10284_v28  ;;  %10948 = vst [vmem:[#allocation28_spill] sm:$0xff] %v10286_v19 }
 0x239   : > { %v10288_v2 = vpop.f32.mrf.mxu1  ;;  %v10290_v24 = vpop.f32.mrf.mxu0 }
 0x23a   : > { %10949 = vst [vmem:[#allocation29_spill] sm:$0xff] %v10288_v2  ;;  %10950 = vst [vmem:[#allocation30_spill] sm:$0xff] %v10290_v24 }
 0x23b   : > { %v10292_v22 = vpop.f32.mrf.mxu1  ;;  %v10294_v3 = vpop.f32.mrf.mxu0 }
 0x23c   : > { %10951 = vst [vmem:[#allocation31_spill] sm:$0xff] %v10292_v22 }
 0x23d   : > { %v10296_v59 = vpop.f32.mrf.mxu1  ;;  %v10298_v37 = vpop.f32.mrf.mxu0 }
 0x23e   : > { %10952 = vst [vmem:[#allocation32_spill] sm:$0xff] %v10296_v59  ;;  %10953 = vst [vmem:[#allocation33_spill] sm:$0xff] %v10298_v37  ;;  %v4367_v59 = vadd.f32 %v10180_v31, %v10109_v38  ;;  %v4370_v31 = vadd.f32 %v10208_v14, %v10130_v16  ;;  %v4381_v14 = vadd.f32 %v10248_v56, %v10160_v42  ;;  %v10961_v42 = vld [vmem:[#allocation9_spill] sm:$0xff] }
 0x23f   : > { %v10300_v50 = vpop.f32.mrf.mxu1  ;;  %v10302_v62 = vpop.f32.mrf.mxu0 }
 0x240   : > { %10954 = vst [vmem:[#allocation34_spill] sm:$0xff] %v10300_v50  ;;  %10955 = vst [vmem:[#allocation35_spill] sm:$0xff] %v10302_v62  ;;  %v4365_v50 = vadd.f32 %v10184_v13, %v10112_v7  ;;  %v4369_v62 = vadd.f32 %v10200_v30, %v10124_v17  ;;  %v4372_v7 = vadd.f32 %v10204_v60, %v10127_v29 }
 0x241   : > { %v10304_v15 = vpop.f32.mrf.mxu1  ;;  %v10306_v28 = vpop.f32.mrf.mxu0  ;;  %v4726_v13 = vadd.f32 %v10214_v52, %v4367_v59  ;;  %v4373_v17 = vadd.f32 %v10216_v57, %v10136_v11  ;;  %v4379_v59 = vadd.f32 %v10228_v61, %v10145_v63  ;;  %v4380_v30 = vadd.f32 %v10236_v51, %v10151_v5 }
 0x242   : > { %10956 = vst [vmem:[#allocation36_spill] sm:$0xff] %v10304_v15  ;;  %10957 = vst [vmem:[#allocation37_spill] sm:$0xff] %v10306_v28  ;;  %v4368_v15 = vadd.f32 %v10188_v34, %v10115_v55  ;;  %v4366_v28 = vadd.f32 %v10192_v0, %v10118_v33  ;;  %v4375_v55 = vadd.f32 %v10212_v9, %v10133_v21 }
 0x243   : > { %v7466_v19 = vpop.f32.mrf.mxu1  ;;  %v10308_v2 = vpop.f32.mrf.mxu0  ;;  %v4376_v34 = vadd.f32 %v10220_v23, %v10139_v36  ;;  %v4374_v21 = vadd.f32 %v10224_v46, %v10142_v8  ;;  %v10358_v11 = vadd.f32 %v10234_v6, %v4369_v62  ;;  %v4377_v36 = vadd.f32 %v10232_v39, %v10148_v18  ;;  %v10960_v23 = vld [vmem:[#allocation8_spill] sm:$0xff]  ;;  %v10965_v39 = vld [vmem:[#allocation17_spill] sm:$0xff] }
 0x244   : > { %10958 = vst [vmem:[#allocation38_spill] sm:$0xff] %v10308_v2  ;;  %v4727_v29 = vadd.f32 %v10222_v41, %v4368_v15  ;;  %v4725_v16 = vadd.f32 %v10226_v40, %v4366_v28  ;;  %v10367_v8 = vadd.f32 %v10238_v1, %v4372_v7  ;;  %v10370_v63 = vadd.f32 %v10242_v48, %v4370_v31  ;;  %v10963_v40 = vld [vmem:[#allocation15_spill] sm:$0xff]  ;;  %v10966_v1 = vld [vmem:[#allocation10_spill] sm:$0xff] }
 0x245   : > { %v5323_v24 = vpop.f32.mrf.mxu1  ;;  %v10310_v43 = vpop.f32.mrf.mxu0  ;;  %v4378_v60 = vadd.f32 %v10240_v32, %v10154_v27  ;;  %v4383_v62 = vadd.f32 %v10244_v10, %v10157_v25  ;;  %v10379_v18 = vadd.f32 %v10246_v47, %v4375_v55  ;;  %v10382_v5 = vadd.f32 %v10250_v44, %v4373_v17  ;;  %v10968_v32 = vld [vmem:[#allocation21_spill] sm:$0xff]  ;;  %v10969_v10 = vld [vmem:[#allocation23_spill] sm:$0xff]  ;;  %v10973_v31 = vld [vmem:[#allocation26_spill] sm:$0xff] }
 0x246   : > { %10959 = vst [vmem:[#allocation39_spill] sm:$0xff] %v10310_v43  ;;  %v4371_v43 = vadd.f32 %v10196_v54, %v10121_v12  ;;  %v4724_v12 = vadd.f32 %v10218_v49, %v4365_v50  ;;  %v4384_v15 = vadd.f32 %v10252_v58, %v10163_v26  ;;  %v10391_v27 = vadd.f32 %v10254_v20, %v4376_v34  ;;  %v10962_v26 = vld [vmem:[#allocation14_spill] sm:$0xff]  ;;  %v10970_v47 = vld [vmem:[#allocation11_spill] sm:$0xff]  ;;  %v10975_v17 = vld [vmem:[#allocation24_spill] sm:$0xff] }
 0x247   : > { %v10312_v22 = vpop.f32.mrf.mxu1  ;;  %v10318_v37 = vpop.f32.mrf.mxu0  ;;  %v10394_v25 = vadd.f32 %v10258_v53, %v4374_v21  ;;  %v4382_v52 = vadd.f32 %v10256_v35, %v10166_v4  ;;  %v5452_v57 = vadd.f32 %v7466_v19, %v4726_v13  ;;  %v10401_v41 = vadd.f32 %v10960_v23, %v4379_v59  ;;  %v10967_v19 = vld [vmem:[#allocation20_spill] sm:$0xff]  ;;  %v10971_v20 = vld [vmem:[#allocation19_spill] sm:$0xff]  ;;  %v10972_v53 = vld [vmem:[#allocation13_spill] sm:$0xff] }
 0x248   : > { %v4730_v50 = vadd.f32 %v10230_v45, %v4371_v43  ;;  %v10404_v46 = vadd.f32 %v10961_v42, %v4377_v36  ;;  %v4387_v61 = vadd.f32 %v10963_v40, %v10962_v26  ;;  %v10964_v45 = vld [vmem:[#allocation18_spill] sm:$0xff]  ;;  %v10413_v4 = vadd.f32 %v10966_v1, %v4380_v30  ;;  %v10976_v34 = vld [vmem:[#allocation16_spill] sm:$0xff]  ;;  %v10980_v42 = vld [vmem:[#allocation27_spill] sm:$0xff] }
 0x249   : > { %v10324_v2 = vpop.f32.mrf.mxu1  ;;  %v10330_v38 = vpop.f32.mrf.mxu0  ;;  %v4385_v6 = vadd.f32 %v10965_v39, %v10964_v45  ;;  %v4388_v48 = vadd.f32 %v10968_v32, %v10967_v19  ;;  %v4386_v56 = vadd.f32 %v10970_v47, %v10969_v10  ;;  %v5450_v44 = vadd.f32 %v5323_v24, %v4724_v12  ;;  %v10974_v55 = vld [vmem:[#allocation22_spill] sm:$0xff]  ;;  %v10977_v36 = vld [vmem:[#allocation12_spill] sm:$0xff]  ;;  %v10979_v12 = vld [vmem:[#allocation25_spill] sm:$0xff] }
 0x24a   : > { %v10422_v35 = vadd.f32 %v10971_v20, %v4378_v60  ;;  %v10425_v7 = vadd.f32 %v10972_v53, %v4383_v62  ;;  %v4391_v13 = vadd.f32 %v10974_v55, %v10973_v31  ;;  %v4389_v21 = vadd.f32 %v10976_v34, %v10975_v17  ;;  %v10978_v23 = vld [vmem:[#allocation28_spill] sm:$0xff]  ;;  %v10981_v62 = vld [vmem:[#allocation30_spill] sm:$0xff]  ;;  %v10983_v39 = vld [vmem:[#allocation29_spill] sm:$0xff] }
 0x24b   : > { %v10338_v33 = vpop.f32.mrf.mxu1  ;;  %v10346_v0 = vpop.f32.mrf.mxu0  ;;  %v10432_v30 = vadd.f32 %v10977_v36, %v4381_v14  ;;  %v10435_v24 = vadd.f32 %v10978_v23, %v4384_v15  ;;  %v4392_v60 = vadd.f32 %v10980_v42, %v10979_v12  ;;  %v10449_v45 = vadd.f32 %v10981_v62, %v4382_v52  ;;  %v10982_v14 = vld [vmem:[#allocation5_spill] sm:$0xff]  ;;  %v10984_v15 = vld [vmem:[#allocation4_spill] sm:$0xff]  ;;  %v10985_v19 = vld [vmem:[#allocation31_spill] sm:$0xff] }
 0x24c   : > { %v4390_v1 = vadd.f32 %v10983_v39, %v10982_v14  ;;  %v4395_v32 = vadd.f32 %v10985_v19, %v10984_v15  ;;  %v10457_v47 = vadd.f32 %v10294_v3, %v4387_v61  ;;  %v5451_v31 = vadd.f32 %v10324_v2, %v4725_v16  ;;  %v10986_v52 = vld [vmem:[#allocation33_spill] sm:$0xff]  ;;  %v10987_v34 = vld [vmem:[#allocation35_spill] sm:$0xff]  ;;  %v10988_v36 = vld [vmem:[#allocation6_spill] sm:$0xff] }
 0x24d   : > { %v10354_v54 = vpop.f32.mrf.mxu1  ;;  %v10364_v28 = vpop.f32.mrf.mxu0  ;;  %v10463_v17 = vadd.f32 %v10986_v52, %v4385_v6  ;;  %v10989_v23 = vld [vmem:[#allocation32_spill] sm:$0xff]  ;;  %v10991_v12 = vld [vmem:[#allocation34_spill] sm:$0xff]  ;;  %v10992_v42 = vld [vmem:[#allocation37_spill] sm:$0xff] }
 0x24e   : > { %v10993_v2 = vld [vmem:[#allocation3_spill] sm:$0xff]  ;;  %v10994_v16 = vld [vmem:[#allocation36_spill] sm:$0xff]  ;;  %v10995_v39 = vld [vmem:[#allocation38_spill] sm:$0xff] }
 0x24f   : > { %v10376_v43 = vpop.f32.mrf.mxu1  ;;  %v10388_v9 = vpop.f32.mrf.mxu0  ;;  %v10477_v62 = vadd.f32 %v10994_v16, %v10993_v2  ;;  %v10485_v15 = vadd.f32 %v10995_v39, %v4391_v13  ;;  %v10996_v19 = vld [vmem:[#allocation39_spill] sm:$0xff] }
 0x251   : > { %v10398_v49 = vpop.f32.mrf.mxu1  ;;  %v10410_v51 = vpop.f32.mrf.mxu0 }
 0x253   : > { %v10419_v58 = vpop.f32.mrf.mxu1 }
 0x254   : > { %v7500_v59 = vpop.f32.mrf.mxu0 }
 0x255   : > { %v5922_v26 = vadd.f32 %v7500_v59, %v5452_v57  ;;  %v10439_v40 = vpop.f32.mrf.mxu1  ;;  %v5453_v57 = vadd.f32 %v10312_v22, %v4727_v29  ;;  %v10466_v59 = vadd.f32 %v10987_v34, %v4388_v48  ;;  %v4393_v22 = vadd.f32 %v10989_v23, %v10988_v36  ;;  %v10990_v29 = vld [vmem:[#allocation7_spill] sm:$0xff] }
 0x256   : > { %v5793_v10 = vpop.f32.mrf.mxu0  ;;  %v4396_v3 = vadd.f32 %v10991_v12, %v10990_v29  ;;  %v5456_v48 = vadd.f32 %v10338_v33, %v4730_v50  ;;  %v10494_v36 = vadd.f32 %v10330_v38, %v4390_v1  ;;  %v5454_v50 = vadd.f32 %v10354_v54, %v10358_v11 }
 0x257   : > { %v6954_v20 = vpack.c.bf16 %v5922_v26, %v5922_v26  ;;  %v5920_v53 = vadd.f32 %v5793_v10, %v5450_v44  ;;  %v10460_v55 = vpop.f32.mrf.mxu1  ;;  %v10473_v44 = vadd.f32 %v10992_v42, %v4386_v56  ;;  %v10488_v10 = vadd.f32 %v10996_v19, %v4389_v21 }
 0x258   : > { %v7501_v61 = vpop.f32.mrf.mxu0  ;;  %v10491_v56 = vadd.f32 %v10318_v37, %v4392_v60  ;;  %v6185_v21 = vmul.f32 %v5922_v26, %v5922_v26  ;;  %v5457_v38 = vadd.f32 %v10376_v43, %v10367_v8  ;;  %v10509_v54 = vadd.f32 %v10346_v0, %v4395_v32 }
 0x259   : > { %6082 = vst.msk [vmem:[%s10446_s10 + $0x8] sm:$0xf] %vm1152_vm6, %v6954_v20  ;;  %v6952_v6 = vpack.c.bf16 %v5920_v53, %v5920_v53  ;;  %v10482_v14 = vpop.f32.mrf.mxu1  ;;  %v5923_v52 = vadd.f32 %v7501_v61, %v5453_v57  ;;  %v6183_v20 = vmul.f32 %v5920_v53, %v5920_v53  ;;  %v6112_v23 = vsel %vm1880_vm12, %v5920_v53, 0.0 }
 0x25a   : > { %v5796_v34 = vpop.f32.mrf.mxu0  ;;  %v10512_v11 = vadd.f32 %v10364_v28, %v4393_v22  ;;  %v6115_v53 = vsel %vm1880_vm12, %v5922_v26, 0.0  ;;  %v5455_v26 = vadd.f32 %v10398_v49, %v10370_v63 }
 0x25b   : > { %6080 = vst.msk [vmem:[%s10446_s10] sm:$0xf] %vm1152_vm6, %v6952_v6  ;;  %v5921_v33 = vadd.f32 %v5796_v34, %v5451_v31  ;;  %v10500_v13 = vpop.f32.mrf.mxu1  ;;  %v6955_v37 = vpack.c.bf16 %v5923_v52, %v5923_v52  ;;  %v6215_v43 = vsel %vm1880_vm12, %v6183_v20, 0.0  ;;  %v6186_v42 = vmul.f32 %v5923_v52, %v5923_v52 }
 0x25c   : > { %v7504_v60 = vpop.f32.mrf.mxu0  ;;  %v6117_v39 = vsel %vm1880_vm12, %v5923_v52, 0.0  ;;  %v5460_v34 = vadd.f32 %v10419_v58, %v10379_v18 }
 0x25d   : > { %v6953_v1 = vpack.c.bf16 %v5921_v33, %v5921_v33  ;;  %v6113_v57 = vsel %vm1880_vm12, %v5921_v33, 0.0  ;;  %v6184_v29 = vmul.f32 %v5921_v33, %v5921_v33  ;;  %v5926_v31 = vadd.f32 %v7504_v60, %v5456_v48  ;;  %v10506_v12 = vpop.f32.mrf.mxu1  ;;  %6083 = vst.msk [vmem:[%s10446_s10 + $0xc] sm:$0xf] %vm1152_vm6, %v6955_v37 }
 0x25e   : > { %v6114_v61 = vadd.f32 %v6113_v57, %v6112_v23  ;;  %v5809_v8 = vpop.f32.mrf.mxu0  ;;  %v6218_v48 = vsel %vm1880_vm12, %v6185_v21, 0.0  ;;  %v10534_v33 = vadd.f32 %v10388_v9, %v4396_v3  ;;  %v6220_v21 = vsel %vm1880_vm12, %v6186_v42, 0.0 }
 0x25f   : > { %6081 = vst.msk [vmem:[%s10446_s10 + $0x4] sm:$0xf] %vm1152_vm6, %v6953_v1  ;;  %v6216_v2 = vsel %vm1880_vm12, %v6184_v29, 0.0  ;;  %v6958_v16 = vpack.c.bf16 %v5926_v31, %v5926_v31  ;;  %v10521_v0 = vpop.f32.mrf.mxu1  ;;  %v5924_v22 = vadd.f32 %v5809_v8, %v5454_v50  ;;  %v5458_v9 = vadd.f32 %v10439_v40, %v10382_v5 }
 0x260   : > { %v6116_v32 = vadd.f32 %v6115_v53, %v6114_v61  ;;  %v6217_v28 = vadd.f32 %v6216_v2, %v6215_v43  ;;  %v7505_v6 = vpop.f32.mrf.mxu0  ;;  %v6189_v57 = vmul.f32 %v5926_v31, %v5926_v31  ;;  %v5461_v61 = vadd.f32 %v10460_v55, %v10391_v27 }
 0x261   : > { %6086 = vst.msk [vmem:[%s10446_s10 + $0x18] sm:$0xf] %vm1152_vm6, %v6958_v16  ;;  %v5927_v19 = vadd.f32 %v7505_v6, %v5457_v38  ;;  %v10531_v20 = vpop.f32.mrf.mxu1  ;;  %v6956_v23 = vpack.c.bf16 %v5924_v22, %v5924_v22  ;;  %v6119_v52 = vsel %vm1880_vm12, %v5924_v22, 0.0  ;;  %v6187_v37 = vmul.f32 %v5924_v22, %v5924_v22 }
 0x262   : > { %v6219_v50 = vadd.f32 %v6218_v48, %v6217_v28  ;;  %v6118_v63 = vadd.f32 %v6117_v39, %v6116_v32  ;;  %v5812_v49 = vpop.f32.mrf.mxu0  ;;  %v10554_v40 = vadd.f32 %v10410_v51, %v10477_v62  ;;  %v5459_v22 = vadd.f32 %v10482_v14, %v10394_v25 }
 0x263   : > { %v6959_v60 = vpack.c.bf16 %v5927_v19, %v5927_v19  ;;  %v10538_v38 = vpop.f32.mrf.mxu1  ;;  %6084 = vst.msk [vmem:[%s10446_s10 + $0x10] sm:$0xf] %vm1152_vm6, %v6956_v23  ;;  %v5925_v1 = vadd.f32 %v5812_v49, %v5455_v26  ;;  %v6222_v29 = vsel %vm1880_vm12, %v6187_v37, 0.0  ;;  %v6123_v27 = vsel %vm1880_vm12, %v5926_v31, 0.0 }
 0x264   : > { %v6120_v18 = vadd.f32 %v6119_v52, %v6118_v63  ;;  %v6221_v58 = vadd.f32 %v6220_v21, %v6219_v50  ;;  %v6190_v55 = vmul.f32 %v5927_v19, %v5927_v19  ;;  %v5464_v25 = vadd.f32 %v10500_v13, %v10401_v41 }
 0x265   : > { %v7508_v3 = vpop.f32.mrf.mxu0  ;;  %6087 = vst.msk [vmem:[%s10446_s10 + $0x1c] sm:$0xf] %vm1152_vm6, %v6959_v60  ;;  %v10549_v8 = vpop.f32.mrf.mxu1  ;;  %v6957_v42 = vpack.c.bf16 %v5925_v1, %v5925_v1  ;;  %v6121_v2 = vsel %vm1880_vm12, %v5925_v1, 0.0  ;;  %v6188_v16 = vmul.f32 %v5925_v1, %v5925_v1  ;;  %v6226_v14 = vsel %vm1880_vm12, %v6189_v57, 0.0 }
 0x266   : > { %v5930_v53 = vadd.f32 %v7508_v3, %v5460_v34  ;;  %v6223_v43 = vadd.f32 %v6222_v29, %v6221_v58  ;;  %v6122_v32 = vadd.f32 %v6121_v2, %v6120_v18  ;;  %v6125_v31 = vsel %vm1880_vm12, %v5927_v19, 0.0 }
 0x267   : > { %v5825_v5 = vpop.f32.mrf.mxu0  ;;  %v10558_v26 = vpop.f32.mrf.mxu1  ;;  %6085 = vst.msk [vmem:[%s10446_s10 + $0x14] sm:$0xf] %vm1152_vm6, %v6957_v42  ;;  %v6224_v6 = vsel %vm1880_vm12, %v6188_v16, 0.0  ;;  %v5462_v60 = vadd.f32 %v10506_v12, %v10404_v46  ;;  %v6228_v41 = vsel %vm1880_vm12, %v6190_v55, 0.0  ;;  %v5465_v1 = vadd.f32 %v10521_v0, %v10413_v4 }
 0x268   : > { %v6962_v28 = vpack.c.bf16 %v5930_v53, %v5930_v53  ;;  %v5928_v48 = vadd.f32 %v5825_v5, %v5458_v9  ;;  %v6124_v34 = vadd.f32 %v6123_v27, %v6122_v32  ;;  %v6225_v50 = vadd.f32 %v6224_v6, %v6223_v43 }
 0x269   : > { %v7509_v39 = vpop.f32.mrf.mxu0  ;;  %v10568_v62 = vpop.f32.mrf.mxu1  ;;  %v6193_v9 = vmul.f32 %v5930_v53, %v5930_v53  ;;  %v5463_v0 = vadd.f32 %v10531_v20, %v10422_v35  ;;  %v5468_v35 = vadd.f32 %v10538_v38, %v10425_v7 }
 0x26a   : > { %6090 = vst.msk [vmem:[%s10446_s10 + $0x28] sm:$0xf] %vm1152_vm6, %v6962_v28  ;;  %v5931_v51 = vadd.f32 %v7509_v39, %v5461_v61  ;;  %v6960_v23 = vpack.c.bf16 %v5928_v48, %v5928_v48  ;;  %v6191_v63 = vmul.f32 %v5928_v48, %v5928_v48  ;;  %v6227_v21 = vadd.f32 %v6226_v14, %v6225_v50 }
 0x26b   : > { %v5828_v49 = vpop.f32.mrf.mxu0  ;;  %v6126_v52 = vadd.f32 %v6125_v31, %v6124_v34  ;;  %v10574_v18 = vpop.f32.mrf.mxu1  ;;  %v6127_v13 = vsel %vm1880_vm12, %v5928_v48, 0.0  ;;  %v6131_v28 = vsel %vm1880_vm12, %v5930_v53, 0.0  ;;  %v6234_v53 = vsel %vm1880_vm12, %v6193_v9, 0.0 }
 0x26c   : > { %v6963_v37 = vpack.c.bf16 %v5931_v51, %v5931_v51  ;;  %6088 = vst.msk [vmem:[%s10446_s10 + $0x20] sm:$0xf] %vm1152_vm6, %v6960_v23  ;;  %v5929_v58 = vadd.f32 %v5828_v49, %v5459_v22  ;;  %v6229_v57 = vadd.f32 %v6228_v41, %v6227_v21  ;;  %v6230_v29 = vsel %vm1880_vm12, %v6191_v63, 0.0 }
 0x26d   : > { %v7512_v19 = vpop.f32.mrf.mxu0  ;;  %v6128_v3 = vadd.f32 %v6127_v13, %v6126_v52  ;;  %v10584_v12 = vpop.f32.mrf.mxu1  ;;  %v6194_v22 = vmul.f32 %v5931_v51, %v5931_v51  ;;  %v6133_v50 = vsel %vm1880_vm12, %v5931_v51, 0.0  ;;  %v5466_v21 = vadd.f32 %v10549_v8, %v10432_v30 }
 0x26e   : > { %6091 = vst.msk [vmem:[%s10446_s10 + $0x2c] sm:$0xf] %vm1152_vm6, %v6963_v37  ;;  %v5934_v46 = vadd.f32 %v7512_v19, %v5464_v25  ;;  %v6961_v61 = vpack.c.bf16 %v5929_v58, %v5929_v58  ;;  %v6129_v43 = vsel %vm1880_vm12, %v5929_v58, 0.0  ;;  %v6192_v42 = vmul.f32 %v5929_v58, %v5929_v58 }
 0x26f   : > { %v5841_v2 = vpop.f32.mrf.mxu0  ;;  %v6231_v16 = vadd.f32 %v6230_v29, %v6229_v57  ;;  %v6130_v5 = vadd.f32 %v6129_v43, %v6128_v3  ;;  %v10590_v32 = vpop.f32.mrf.mxu1  ;;  %v6236_v7 = vsel %vm1880_vm12, %v6194_v22, 0.0 }
 0x270   : > { %v6966_v4 = vpack.c.bf16 %v5934_v46, %v5934_v46  ;;  %6089 = vst.msk [vmem:[%s10446_s10 + $0x24] sm:$0xf] %vm1152_vm6, %v6961_v61  ;;  %v6232_v27 = vsel %vm1880_vm12, %v6192_v42, 0.0  ;;  %v5932_v55 = vadd.f32 %v5841_v2, %v5462_v60  ;;  %v5469_v60 = vadd.f32 %v10558_v26, %v10435_v24 }
 0x271   : > { %v7513_v6 = vpop.f32.mrf.mxu0  ;;  %v6132_v48 = vadd.f32 %v6131_v28, %v6130_v5  ;;  %v6233_v39 = vadd.f32 %v6232_v27, %v6231_v16  ;;  %v10600_v20 = vpop.f32.mrf.mxu1  ;;  %v6197_v41 = vmul.f32 %v5934_v46, %v5934_v46  ;;  %v5467_v26 = vadd.f32 %v10568_v62, %v10449_v45 }
 0x272   : > { %6094 = vst.msk [vmem:[%s10446_s10 + $0x38] sm:$0xf] %vm1152_vm6, %v6966_v4  ;;  %v5935_v34 = vadd.f32 %v7513_v6, %v5465_v1  ;;  %v6964_v25 = vpack.c.bf16 %v5932_v55, %v5932_v55  ;;  %v6195_v14 = vmul.f32 %v5932_v55, %v5932_v55  ;;  %v6135_v38 = vsel %vm1880_vm12, %v5932_v55, 0.0 }
 0x273   : > { %v5844_v31 = vpop.f32.mrf.mxu0  ;;  %v6235_v23 = vadd.f32 %v6234_v53, %v6233_v39  ;;  %v6134_v63 = vadd.f32 %v6133_v50, %v6132_v48  ;;  %v10606_v52 = vpop.f32.mrf.mxu1  ;;  %v6139_v43 = vsel %vm1880_vm12, %v5934_v46, 0.0  ;;  %v5472_v27 = vadd.f32 %v10574_v18, %v10457_v47 }
 0x274   : > { %v6967_v49 = vpack.c.bf16 %v5935_v34, %v5935_v34  ;;  %6092 = vst.msk [vmem:[%s10446_s10 + $0x30] sm:$0xf] %vm1152_vm6, %v6964_v25  ;;  %v5933_v37 = vadd.f32 %v5844_v31, %v5463_v0  ;;  %v6238_v19 = vsel %vm1880_vm12, %v6195_v14, 0.0  ;;  %v6198_v42 = vmul.f32 %v5935_v34, %v5935_v34 }
 0x275   : > { %v7516_v51 = vpop.f32.mrf.mxu0  ;;  %v6136_v13 = vadd.f32 %v6135_v38, %v6134_v63  ;;  %v6237_v58 = vadd.f32 %v6236_v7, %v6235_v23  ;;  %v10616_v8 = vpop.f32.mrf.mxu1  ;;  %v6242_v45 = vsel %vm1880_vm12, %v6197_v41, 0.0  ;;  %v6141_v62 = vsel %vm1880_vm12, %v5935_v34, 0.0 }
 0x276   : > { %6095 = vst.msk [vmem:[%s10446_s10 + $0x3c] sm:$0xf] %vm1152_vm6, %v6967_v49  ;;  %v5938_v30 = vadd.f32 %v7516_v51, %v5468_v35  ;;  %v6965_v1 = vpack.c.bf16 %v5933_v37, %v5933_v37  ;;  %v6137_v9 = vsel %vm1880_vm12, %v5933_v37, 0.0  ;;  %v6196_v3 = vmul.f32 %v5933_v37, %v5933_v37 }
 0x277   : > { %v5857_v57 = vpop.f32.mrf.mxu0  ;;  %v6239_v29 = vadd.f32 %v6238_v19, %v6237_v58  ;;  %v6138_v61 = vadd.f32 %v6137_v9, %v6136_v13  ;;  %v7491_v4 = vpop.f32.mrf.mxu1  ;;  %v5470_v53 = vadd.f32 %v10584_v12, %v10463_v17  ;;  %v6244_v50 = vsel %vm1880_vm12, %v6198_v42, 0.0 }
 0x278   : > { %v6970_v24 = vpack.c.bf16 %v5938_v30, %v5938_v30  ;;  %6093 = vst.msk [vmem:[%s10446_s10 + $0x34] sm:$0xf] %vm1152_vm6, %v6965_v1  ;;  %v6240_v2 = vsel %vm1880_vm12, %v6196_v3, 0.0  ;;  %v5936_v16 = vadd.f32 %v5857_v57, %v5466_v21  ;;  %v5473_v34 = vadd.f32 %v10590_v32, %v10466_v59 }
 0x279   : > { %v7517_v5 = vpop.f32.mrf.mxu0  ;;  %v6140_v0 = vadd.f32 %v6139_v43, %v6138_v61  ;;  %v6241_v28 = vadd.f32 %v6240_v2, %v6239_v29  ;;  %v5422_v14 = vpop.f32.mrf.mxu1  ;;  %v6201_v31 = vmul.f32 %v5938_v30, %v5938_v30  ;;  %v5471_v59 = vadd.f32 %v10600_v20, %v10473_v44 }
 0x27a   : > { %6098 = vst.msk [vmem:[%s10446_s10 + $0x48] sm:$0xf] %vm1152_vm6, %v6970_v24  ;;  %v5939_v22 = vadd.f32 %v7517_v5, %v5469_v60  ;;  %v6968_v46 = vpack.c.bf16 %v5936_v16, %v5936_v16  ;;  %v6199_v55 = vmul.f32 %v5936_v16, %v5936_v16  ;;  %v6143_v47 = vsel %vm1880_vm12, %v5936_v16, 0.0 }
 0x27b   : > { %v5860_v6 = vpop.f32.mrf.mxu0  ;;  %v6243_v48 = vadd.f32 %v6242_v45, %v6241_v28  ;;  %v6142_v39 = vadd.f32 %v6141_v62, %v6140_v0  ;;  %v6147_v32 = vsel %vm1880_vm12, %v5938_v30, 0.0  ;;  %v7494_v1 = vpop.f32.mrf.mxu1  ;;  %v5476_v29 = vadd.f32 %v10606_v52, %v10485_v15 }
 0x27c   : > { %v6971_v35 = vpack.c.bf16 %v5939_v22, %v5939_v22  ;;  %6096 = vst.msk [vmem:[%s10446_s10 + $0x40] sm:$0xf] %vm1152_vm6, %v6968_v46  ;;  %v5937_v18 = vadd.f32 %v5860_v6, %v5467_v26  ;;  %v6246_v17 = vsel %vm1880_vm12, %v6199_v55, 0.0  ;;  %v6202_v41 = vmul.f32 %v5939_v22, %v5939_v22 }
 0x27d   : > { %v7520_v25 = vpop.f32.mrf.mxu0  ;;  %v6144_v23 = vadd.f32 %v6143_v47, %v6142_v39  ;;  %v6245_v63 = vadd.f32 %v6244_v50, %v6243_v48  ;;  %v6250_v44 = vsel %vm1880_vm12, %v6201_v31, 0.0  ;;  %v6149_v20 = vsel %vm1880_vm12, %v5939_v22, 0.0  ;;  %v5435_v28 = vpop.f32.mrf.mxu1 }
 0x27e   : > { %6099 = vst.msk [vmem:[%s10446_s10 + $0x4c] sm:$0xf] %vm1152_vm6, %v6971_v35  ;;  %v5942_v49 = vadd.f32 %v7520_v25, %v5472_v27  ;;  %v6969_v12 = vpack.c.bf16 %v5937_v18, %v5937_v18  ;;  %v6145_v21 = vsel %vm1880_vm12, %v5937_v18, 0.0  ;;  %v6200_v7 = vmul.f32 %v5937_v18, %v5937_v18 }
 0x27f   : > { %v5873_v38 = vpop.f32.mrf.mxu0  ;;  %v6247_v37 = vadd.f32 %v6246_v17, %v6245_v63  ;;  %v6146_v51 = vadd.f32 %v6145_v21, %v6144_v23  ;;  %v5474_v2 = vadd.f32 %v10616_v8, %v10488_v10  ;;  %v6252_v16 = vsel %vm1880_vm12, %v6202_v41, 0.0  ;;  %v7495_v25 = vpop.f32.mrf.mxu1 }
 0x280   : > { %v6974_v60 = vpack.c.bf16 %v5942_v49, %v5942_v49  ;;  %6097 = vst.msk [vmem:[%s10446_s10 + $0x44] sm:$0xf] %vm1152_vm6, %v6969_v12  ;;  %v6248_v13 = vsel %vm1880_vm12, %v6200_v7, 0.0  ;;  %v5940_v58 = vadd.f32 %v5873_v38, %v5470_v53  ;;  %v5477_v0 = vadd.f32 %v7491_v4, %v10491_v56 }
 0x281   : > { %v7521_v19 = vpop.f32.mrf.mxu0  ;;  %v6148_v9 = vadd.f32 %v6147_v32, %v6146_v51  ;;  %v6249_v3 = vadd.f32 %v6248_v13, %v6247_v37  ;;  %v6205_v22 = vmul.f32 %v5942_v49, %v5942_v49  ;;  %v5475_v56 = vadd.f32 %v5422_v14, %v10494_v36  ;;  %v5438_v41 = vpop.f32.mrf.mxu1 }
 0x282   : > { %6102 = vst.msk [vmem:[%s10446_s10 + $0x58] sm:$0xf] %vm1152_vm6, %v6974_v60  ;;  %v5943_v57 = vadd.f32 %v7521_v19, %v5473_v34  ;;  %v6972_v30 = vpack.c.bf16 %v5940_v58, %v5940_v58  ;;  %v6203_v61 = vmul.f32 %v5940_v58, %v5940_v58  ;;  %v6151_v15 = vsel %vm1880_vm12, %v5940_v58, 0.0 }
 0x283   : > { %v5876_v24 = vpop.f32.mrf.mxu0  ;;  %v6251_v26 = vadd.f32 %v6250_v44, %v6249_v3  ;;  %v6150_v43 = vadd.f32 %v6149_v20, %v6148_v9  ;;  %v6155_v4 = vsel %vm1880_vm12, %v5942_v49, 0.0  ;;  %v5480_v63 = vadd.f32 %v7494_v1, %v10509_v54 }
 0x284   : > { %v6975_v42 = vpack.c.bf16 %v5943_v57, %v5943_v57  ;;  %6100 = vst.msk [vmem:[%s10446_s10 + $0x50] sm:$0xf] %vm1152_vm6, %v6972_v30  ;;  %v5941_v52 = vadd.f32 %v5876_v24, %v5471_v59  ;;  %v6254_v10 = vsel %vm1880_vm12, %v6203_v61, 0.0  ;;  %v6206_v53 = vmul.f32 %v5943_v57, %v5943_v57 }
 0x285   : > { %v7524_v5 = vpop.f32.mrf.mxu0  ;;  %v6152_v27 = vadd.f32 %v6151_v15, %v6150_v43  ;;  %v6253_v45 = vadd.f32 %v6252_v16, %v6251_v26  ;;  %v6258_v36 = vsel %vm1880_vm12, %v6205_v22, 0.0  ;;  %v6157_v14 = vsel %vm1880_vm12, %v5943_v57, 0.0 }
 0x286   : > { %6103 = vst.msk [vmem:[%s10446_s10 + $0x5c] sm:$0xf] %vm1152_vm6, %v6975_v42  ;;  %v5946_v62 = vadd.f32 %v7524_v5, %v5476_v29  ;;  %v6973_v8 = vpack.c.bf16 %v5941_v52, %v5941_v52  ;;  %v6153_v46 = vsel %vm1880_vm12, %v5941_v52, 0.0  ;;  %v6204_v55 = vmul.f32 %v5941_v52, %v5941_v52 }
 0x287   : > { %v5889_v6 = vpop.f32.mrf.mxu0  ;;  %v6255_v48 = vadd.f32 %v6254_v10, %v6253_v45  ;;  %v6154_v39 = vadd.f32 %v6153_v46, %v6152_v27  ;;  %v5478_v37 = vadd.f32 %v5435_v28, %v10512_v11  ;;  %v6260_v51 = vsel %vm1880_vm12, %v6206_v53, 0.0 }
 0x288   : > { %v6978_v35 = vpack.c.bf16 %v5946_v62, %v5946_v62  ;;  %6101 = vst.msk [vmem:[%s10446_s10 + $0x54] sm:$0xf] %vm1152_vm6, %v6973_v8  ;;  %v6256_v50 = vsel %vm1880_vm12, %v6204_v55, 0.0  ;;  %v5944_v47 = vadd.f32 %v5889_v6, %v5474_v2  ;;  %v5481_v32 = vadd.f32 %v7495_v25, %v10534_v33 }
 0x289   : > { %v7525_v18 = vpop.f32.mrf.mxu0  ;;  %v6156_v34 = vadd.f32 %v6155_v4, %v6154_v39  ;;  %v6257_v31 = vadd.f32 %v6256_v50, %v6255_v48  ;;  %v6209_v13 = vmul.f32 %v5946_v62, %v5946_v62  ;;  %v5479_v33 = vadd.f32 %v5438_v41, %v10554_v40 }
 0x28a   : > { %6106 = vst.msk [vmem:[%s10446_s10 + $0x68] sm:$0xf] %vm1152_vm6, %v6978_v35  ;;  %v5947_v23 = vadd.f32 %v7525_v18, %v5477_v0  ;;  %v6976_v49 = vpack.c.bf16 %v5944_v47, %v5944_v47  ;;  %v6207_v17 = vmul.f32 %v5944_v47, %v5944_v47  ;;  %v6159_v60 = vsel %vm1880_vm12, %v5944_v47, 0.0 }
 0x28b   : > { %v5892_v12 = vpop.f32.mrf.mxu0  ;;  %v6259_v21 = vadd.f32 %v6258_v36, %v6257_v31  ;;  %v6158_v7 = vadd.f32 %v6157_v14, %v6156_v34  ;;  %v6163_v61 = vsel %vm1880_vm12, %v5946_v62, 0.0  ;;  %v6266_v52 = vsel %vm1880_vm12, %v6209_v13, 0.0 }
 0x28c   : > { %v6979_v38 = vpack.c.bf16 %v5947_v23, %v5947_v23  ;;  %6104 = vst.msk [vmem:[%s10446_s10 + $0x60] sm:$0xf] %vm1152_vm6, %v6976_v49  ;;  %v5945_v54 = vadd.f32 %v5892_v12, %v5475_v56  ;;  %v6262_v11 = vsel %vm1880_vm12, %v6207_v17, 0.0  ;;  %v6210_v24 = vmul.f32 %v5947_v23, %v5947_v23 }
 0x28d   : > { %v7528_v59 = vpop.f32.mrf.mxu0  ;;  %v6160_v58 = vadd.f32 %v6159_v60, %v6158_v7  ;;  %v6261_v19 = vadd.f32 %v6260_v51, %v6259_v21  ;;  %v6165_v40 = vsel %vm1880_vm12, %v5947_v23, 0.0 }
 0x28e   : > { %6107 = vst.msk [vmem:[%s10446_s10 + $0x6c] sm:$0xf] %vm1152_vm6, %v6979_v38  ;;  %v5950_v1 = vadd.f32 %v7528_v59, %v5480_v63  ;;  %v6977_v9 = vpack.c.bf16 %v5945_v54, %v5945_v54  ;;  %v6161_v3 = vsel %vm1880_vm12, %v5945_v54, 0.0  ;;  %v6208_v57 = vmul.f32 %v5945_v54, %v5945_v54 }
 0x28f   : > { %v5905_v29 = vpop.f32.mrf.mxu0  ;;  %v6263_v44 = vadd.f32 %v6262_v11, %v6261_v19  ;;  %v6162_v20 = vadd.f32 %v6161_v3, %v6160_v58  ;;  %v6268_v62 = vsel %vm1880_vm12, %v6210_v24, 0.0 }
 0x290   : > { %v6982_v30 = vpack.c.bf16 %v5950_v1, %v5950_v1  ;;  %6105 = vst.msk [vmem:[%s10446_s10 + $0x64] sm:$0xf] %vm1152_vm6, %v6977_v9  ;;  %v6264_v26 = vsel %vm1880_vm12, %v6208_v57, 0.0  ;;  %v5948_v43 = vadd.f32 %v5905_v29, %v5478_v37  ;;  %v6213_v46 = vmul.f32 %v5950_v1, %v5950_v1 }
 0x291   : > { %v7529_v42 = vpop.f32.mrf.mxu0  ;;  %v6164_v2 = vadd.f32 %v6163_v61, %v6162_v20  ;;  %v6265_v16 = vadd.f32 %v6264_v26, %v6263_v44  ;;  %v6171_v50 = vsel %vm1880_vm12, %v5950_v1, 0.0 }
 0x292   : > { %6110 = vst.msk [vmem:[%s10446_s10 + $0x78] sm:$0xf] %vm1152_vm6, %v6982_v30  ;;  %v5951_v15 = vadd.f32 %v7529_v42, %v5481_v32  ;;  %v6980_v5 = vpack.c.bf16 %v5948_v43, %v5948_v43  ;;  %v6211_v0 = vmul.f32 %v5948_v43, %v5948_v43  ;;  %v6167_v10 = vsel %vm1880_vm12, %v5948_v43, 0.0 }
 0x293   : > { %v5908_v28 = vpop.f32.mrf.mxu0  ;;  %v6267_v22 = vadd.f32 %v6266_v52, %v6265_v16  ;;  %v6166_v27 = vadd.f32 %v6165_v40, %v6164_v2  ;;  %v6274_v31 = vsel %vm1880_vm12, %v6213_v46, 0.0 }
 0x294   : > { %v6983_v45 = vpack.c.bf16 %v5951_v15, %v5951_v15  ;;  %6108 = vst.msk [vmem:[%s10446_s10 + $0x70] sm:$0xf] %vm1152_vm6, %v6980_v5  ;;  %v5949_v8 = vadd.f32 %v5908_v28, %v5479_v33  ;;  %v6270_v48 = vsel %vm1880_vm12, %v6211_v0, 0.0  ;;  %v6214_v47 = vmul.f32 %v5951_v15, %v5951_v15 }
 0x295   : > { %v6168_v55 = vadd.f32 %v6167_v10, %v6166_v27  ;;  %v6269_v6 = vadd.f32 %v6268_v62, %v6267_v22  ;;  %v6173_v23 = vsel %vm1880_vm12, %v5951_v15, 0.0 }
 0x296   : > { %6111 = vst.msk [vmem:[%s10446_s10 + $0x7c] sm:$0xf] %vm1152_vm6, %v6983_v45  ;;  %v6981_v39 = vpack.c.bf16 %v5949_v8, %v5949_v8  ;;  %v6169_v35 = vsel %vm1880_vm12, %v5949_v8, 0.0  ;;  %v6212_v56 = vmul.f32 %v5949_v8, %v5949_v8  ;;  %v6276_v14 = vsel %vm1880_vm12, %v6214_v47, 0.0 }
 0x297   : > { %v6271_v4 = vadd.f32 %v6270_v48, %v6269_v6  ;;  %v6170_v53 = vadd.f32 %v6169_v35, %v6168_v55 }
 0x298   : > { %6109 = vst.msk [vmem:[%s10446_s10 + $0x74] sm:$0xf] %vm1152_vm6, %v6981_v39  ;;  %v6272_v18 = vsel %vm1880_vm12, %v6212_v56, 0.0 }
 0x299   : > { %v6172_v25 = vadd.f32 %v6171_v50, %v6170_v53  ;;  %v6273_v34 = vadd.f32 %v6272_v18, %v6271_v4 }
 0x29b   : > { %v6174_v63 = vadd.f32 %v6173_v23, %v6172_v25  ;;  %v6275_v36 = vadd.f32 %v6274_v31, %v6273_v34 }
 0x29d   : > { %v6175_v49 = vrot.slane %v6174_v63, 4  ;;  %v6277_v17 = vadd.f32 %v6276_v14, %v6275_v36 }
 0x29f   : > { %v6176_v12 = vadd.f32 %v6175_v49, %v6174_v63  ;;  %v6278_v21 = vrot.slane %v6277_v17, 4 }
 0x2a1   : > { %v6177_v7 = vrot.slane %v6176_v12, 2  ;;  %v6279_v38 = vadd.f32 %v6278_v21, %v6277_v17 }
 0x2a3   : > { %v6178_v37 = vadd.f32 %v6177_v7, %v6176_v12  ;;  %v6280_v51 = vrot.slane %v6279_v38, 2 }
 0x2a5   : > { %v6179_v60 = vrot.slane %v6178_v37, 1  ;;  %v6281_v54 = vadd.f32 %v6280_v51, %v6279_v38 }
 0x2a7   : > { %v6180_v59 = vadd.f32 %v6179_v60, %v6178_v37  ;;  %v6282_v32 = vrot.slane %v6281_v54, 1 }
 0x2a9   : > { %6182 = vst.msk [vmem:[%s438_s13] sm:$0x1] %vm446_vm1, %v6180_v59  ;;  %v6283_v41 = vadd.f32 %v6282_v32, %v6281_v54 }
 0x2ab   : > { %6284 = vst.msk [vmem:[%s443_s16] sm:$0x1] %vm446_vm1, %v6283_v41 }
 0x2ac PF: > { %s19_s29 = sadd.s32 1, %s7652_s29   ;;  %s10997_s27 = smov %s7648_s28 }
 0x2ad   : > { %p16_p5 = scmp.ge.s32.totalorder %s19_s29, 4   ;;  %s10998_s28 = smov %s11000_s30 }
 0x2af   :  { %18 = sbr.rel (!%p16_p5) target bundleno = 2 (0x2), region = 115 }

</bundles_post_ra>
